<compile_context>
chip_gen: v5e
topology: v5e:2x2
jax: 0.10.0
libtpu: 0.0.40
codegen_flags: <defaults>
</compile_context>

<pallas_src>
import functools

import jax
import jax.numpy as jnp
from jax.experimental import pallas as pl
from jax.experimental.pallas import tpu as pltpu


_VMEM = pltpu.MemorySpace.VMEM


def _vmem_spec():
    return pl.BlockSpec(memory_space=_VMEM)


def _vmem_call(kernel, out_shape, *args):
    # Single-invocation kernels (no grid): every operand fits comfortably in
    # VMEM, so per-grid-step overhead is avoided entirely.
    return pl.pallas_call(
        kernel,
        in_specs=[_vmem_spec() for _ in args],
        out_specs=_vmem_spec(),
        out_shape=out_shape,
    )(*args)


# ---------------------------------------------------------------------------
# Pallas kernels
# ---------------------------------------------------------------------------
def _conv_pool_kernel(xe_ref, xo_ref, w_ref, b_ref, o_ref):
    """Fused conv(+folded BN)+ReLU+MaxPool2d((1,2),(1,2)).

    xe_ref / xo_ref hold the im2col rows of the even / odd conv output
    positions; the pool is max over the two halves.  Two matmuls share the
    same RHS (no concat copy needed)."""
    f32 = jnp.float32
    w = w_ref[...]
    b = b_ref[...]
    ze = jnp.maximum(jnp.dot(xe_ref[...], w, preferred_element_type=f32) + b, 0.0)
    zo = jnp.maximum(jnp.dot(xo_ref[...], w, preferred_element_type=f32) + b, 0.0)
    o_ref[...] = jnp.maximum(ze, zo)


def _fused_mid_kernel(cols_ref, x1_ref, ares_ref, bres_ref, w2b_ref, b2b_ref,
                      wr1_ref, br1_ref, w3_ref, b3_ref, o_ref, *, nl):
    """CNN2b conv+BN  +  res_connect_01  +  relu(y1+y2)  +  CNN3, one launch.

    Row layout of the 6-wide stage is (position j)-major / (batch b)-minor so
    every CNN3 tap is a contiguous row block and all matmul outputs stay 64
    lanes wide.
      cols_ref : (6*NL, 96)    im2col of the CNN2a output, j-major rows
      x1_ref   : (NL*50, 16)   CNN1 output (rows b*50+w)
      ares_ref : (6*NL, NL*50) block matrix encoding Linear(50, 6) per batch
      w3_ref   : (3*64, 64)    CNN3 taps stacked row-wise
    """
    f32 = jnp.float32
    # y1 = CNN2 tail conv (+ folded BN, no ReLU), rows (j, b)
    y1 = jnp.dot(cols_ref[...], w2b_ref[...], preferred_element_type=f32) + b2b_ref[...]
    # y2 = res_connect_01: 1x1 conv + ReLU, then Linear(50->6) contracted over
    # the width axis via the block matrix (keeps the 64 channels on lanes; no
    # transposes, no narrow (.,6) stores).
    r = jnp.maximum(
        jnp.dot(x1_ref[...], wr1_ref[...], preferred_element_type=f32) + br1_ref[...],
        0.0)                                                         # (NL*50, 64)
    y2 = jnp.dot(ares_ref[...], r, preferred_element_type=f32) + bres_ref[...]
    y = jnp.maximum(y1 + y2, 0.0)                                    # (6*NL, 64)
    # CNN3: conv(64->64, k=3, s=3, p=1)+BN+ReLU, MaxPool(1,2): width 6 -> 2 -> 1
    w3 = w3_ref[...]
    t0, t1, t2 = w3[0:64, :], w3[64:128, :], w3[128:192, :]
    yj = lambda j: y[j * nl:(j + 1) * nl, :]
    p0 = (jnp.dot(yj(0), t1, preferred_element_type=f32)             # tap0 hits pad
          + jnp.dot(yj(1), t2, preferred_element_type=f32) + b3_ref[...])
    p1 = (jnp.dot(yj(2), t0, preferred_element_type=f32)
          + jnp.dot(yj(3), t1, preferred_element_type=f32)
          + jnp.dot(yj(4), t2, preferred_element_type=f32) + b3_ref[...])
    o_ref[...] = jnp.maximum(jnp.maximum(p0, 0.0), jnp.maximum(p1, 0.0))


def _bilstm_kernel(x_ref, wih_ref, whhf_ref, whhb_ref, bf_ref, bb_ref, o_ref,
                   *, n, l, h):
    """Bidirectional LSTM, both directions in one kernel.

    x_ref: (L*N, D) time-major.  wih_ref: (D, 8H) = [fwd i|f|g|o, bwd i|f|g|o].
    whh*: (H, 4H); b*: (1, 4H) (= b_ih + b_hh).  o_ref: (L*N, 2H) time-major,
    lanes [:H] = forward h_t, [H:] = backward h_t (torch nn.LSTM convention)."""
    f32 = jnp.float32

    def sigmoid(z):
        # exp + approximate reciprocal both ride the EUP slot -> keeps the
        # serialized recurrence off the VALU critical path.
        return pl.reciprocal(1.0 + jnp.exp(-z), approx=True)

    # Hoisted input projection: all timesteps, both directions, one matmul.
    xg = jnp.dot(x_ref[...], wih_ref[...], preferred_element_type=f32)   # (L*N, 8H)
    whf = whhf_ref[...]
    whb = whhb_ref[...]
    bf = bf_ref[...]
    bb = bb_ref[...]

    hf = jnp.zeros((n, h), f32)
    cf = jnp.zeros((n, h), f32)
    hb = jnp.zeros((n, h), f32)
    cb = jnp.zeros((n, h), f32)
    fwd_out = [None] * l
    bwd_out = [None] * l
    # Fully unrolled recurrence (L is static & small); the independent forward
    # and backward chains live in one basic block and interleave.
    for t in range(l):
        s = l - 1 - t
        gf = (xg[t * n:(t + 1) * n, 0:4 * h]
              + jnp.dot(hf, whf, preferred_element_type=f32) + bf)       # (N, 4H)
        gb = (xg[s * n:(s + 1) * n, 4 * h:8 * h]
              + jnp.dot(hb, whb, preferred_element_type=f32) + bb)
        i_f, f_f = sigmoid(gf[:, 0:h]), sigmoid(gf[:, h:2 * h])
        g_f, o_f = jnp.tanh(gf[:, 2 * h:3 * h]), sigmoid(gf[:, 3 * h:4 * h])
        i_b, f_b = sigmoid(gb[:, 0:h]), sigmoid(gb[:, h:2 * h])
        g_b, o_b = jnp.tanh(gb[:, 2 * h:3 * h]), sigmoid(gb[:, 3 * h:4 * h])
        cf = f_f * cf + i_f * g_f
        hf = o_f * jnp.tanh(cf)
        cb = f_b * cb + i_b * g_b
        hb = o_b * jnp.tanh(cb)
        fwd_out[t] = hf
        bwd_out[s] = hb
    # Single full-tile store (avoids 2*L small masked sub-tile stores).
    fwd = jnp.concatenate(fwd_out, axis=0)                               # (L*N, H)
    bwd = jnp.concatenate(bwd_out, axis=0)                               # (L*N, H)
    o_ref[...] = jnp.concatenate([fwd, bwd], axis=1)                     # (L*N, 2H)


def _heads_kernel(ylstm_ref, seq_ref, wlr_ref, blr_ref, wsoh_ref, bsoh_ref,
                  wrul_ref, brul_ref, o_ref, *, n, l):
    """relu(LR(lstm_out) + seq), then the SOH (64->1) and RUL (L->1) heads.

    Emitted transposed as (L+1, N) so no in-kernel reshape of the (N*L, 1)
    SOH column is needed; the wrapper does one tiny XLA transpose."""
    f32 = jnp.float32
    y = jnp.maximum(
        jnp.dot(ylstm_ref[...], wlr_ref[...], preferred_element_type=f32)
        + blr_ref[...] + seq_ref[...], 0.0)                              # (N*L, F)
    # TODO(synk): nn.Dropout train-mode RNG masking not modeled (eval identity).
    wsoh = wsoh_ref[...]
    cols = [jnp.dot(y[i * l:(i + 1) * l, :], wsoh, preferred_element_type=f32)
            for i in range(n)]
    soh_t = jnp.concatenate(cols, axis=1) + bsoh_ref[...]                # (L, N)
    rul_t = jnp.dot(wrul_ref[...], soh_t, preferred_element_type=f32) + brul_ref[...]
    o_ref[...] = jnp.concatenate([soh_t, rul_t], axis=0)                 # (L+1, N)


# ---------------------------------------------------------------------------
# pallas_call wrappers
# ---------------------------------------------------------------------------
def conv_pool(xe, xo, w, b):
    rows, cout = xe.shape[0], w.shape[1]
    return _vmem_call(_conv_pool_kernel,
                      jax.ShapeDtypeStruct((rows, cout), jnp.float32),
                      xe, xo, w, b)


def fused_mid(cols_j, x1, a_res, b_res, p, nl):
    cout = p["c3_w"].shape[1]
    return _vmem_call(functools.partial(_fused_mid_kernel, nl=nl),
                      jax.ShapeDtypeStruct((nl, cout), jnp.float32),
                      cols_j, x1, a_res, b_res, p["c2b_w"], p["c2b_b"],
                      p["r1c_w"], p["r1c_b"], p["c3_w"], p["c3_b"])


def bilstm(x_tm, p, n, l, h):
    return _vmem_call(functools.partial(_bilstm_kernel, n=n, l=l, h=h),
                      jax.ShapeDtypeStruct((l * n, 2 * h), jnp.float32),
                      x_tm, p["lstm_wih"], p["lstm_whh_f"], p["lstm_whh_b"],
                      p["lstm_b_f"], p["lstm_b_b"])


def heads(y_lstm, seq, p, n, l):
    return _vmem_call(functools.partial(_heads_kernel, n=n, l=l),
                      jax.ShapeDtypeStruct((l + 1, n), jnp.float32),
                      y_lstm, seq, p["lr_w"], p["lr_b"], p["soh_w"], p["soh_b"],
                      p["rul_w"], p["rul_b"])


# ---------------------------------------------------------------------------
# conv-as-matmul glue (im2col window extraction only; compute stays in Pallas)
# ---------------------------------------------------------------------------
def _im2col_1d(x, K, S, pad):
    """x: (B, W, C) -> (B, W_out, K*C); feature order is tap-major,
    channel-minor, matching the (K*Cin, Cout) weight layout."""
    B, W, C = x.shape
    w_out = (W + 2 * pad - K) // S + 1
    xp = jnp.pad(x, ((0, 0), (pad, pad), (0, 0)))
    taps = [xp[:, k: k + S * (w_out - 1) + 1: S, :] for k in range(K)]
    return jnp.concatenate(taps, axis=-1)


def _im2col_pooled(x, K, S, pad):
    """im2col + even/odd position split for a following MaxPool2d((1,2),(1,2))
    (PyTorch floor mode).  Returns two (B*W_pool, K*C) row blocks."""
    B, _, C = x.shape
    cols = _im2col_1d(x, K, S, pad)
    wp = cols.shape[1] // 2
    xe = cols[:, 0:2 * wp:2, :].reshape(B * wp, K * C)
    xo = cols[:, 1:2 * wp:2, :].reshape(B * wp, K * C)
    return xe, xo, wp


# ---------------------------------------------------------------------------
# parameters (deterministic, synthetic)
# ---------------------------------------------------------------------------
def _fold_bn(w, b, c, eps=1e-5):
    # TODO(synk): BatchNorm2d is applied with eval-mode running statistics
    # (fresh init: mean=0, var=1, gamma=1, beta=0) folded into the matmul.
    gamma = jnp.ones((c,), jnp.float32)
    beta = jnp.zeros((c,), jnp.float32)
    mean = jnp.zeros((c,), jnp.float32)
    var = jnp.ones((c,), jnp.float32)
    s = gamma / jnp.sqrt(var + eps)
    return w * s[None, :], (b - mean[None, :]) * s[None, :] + beta[None, :]


def init_params(key, L, feature_size=64, in_ch=6):
    keys = iter(jax.random.split(key, 32))

    def nrm(shape, scale=0.05):
        return (scale * jax.random.normal(next(keys), shape)).astype(jnp.float32)

    H = feature_size // 2
    p = {}
    # CNN1: Conv2d(6,16,(1,5),(1,2),(0,2)) + BN + ReLU + MaxPool(1,2)
    p["c1_w"], p["c1_b"] = _fold_bn(nrm((5 * in_ch, 16)), nrm((1, 16)), 16)
    # CNN2: Conv2d(16,32,(1,3),(1,2),(0,1))+BN+ReLU+MaxPool, Conv2d(32,64,...)+BN
    p["c2a_w"], p["c2a_b"] = _fold_bn(nrm((3 * 16, 32)), nrm((1, 32)), 32)
    p["c2b_w"], p["c2b_b"] = _fold_bn(nrm((3 * 32, 64)), nrm((1, 64)), 64)
    # res_connect_01: Conv2d(16,64,1) + ReLU + Linear(50,6)
    p["r1c_w"], p["r1c_b"] = nrm((16, 64)), nrm((1, 64))
    p["r1l_w"], p["r1l_b"] = nrm((50, 6)), nrm((6,))
    # CNN3: Conv2d(64,64,(1,3),(1,3),(0,1)) + BN + ReLU + MaxPool (taps stacked)
    p["c3_w"], p["c3_b"] = _fold_bn(nrm((3 * 64, feature_size)),
                                    nrm((1, feature_size)), feature_size)
    # bidirectional LSTM(64 -> 32), fused-gate layout; gate order (i, f, g, o),
    # b = b_ih + b_hh; wih columns = [forward 4H | backward 4H]
    p["lstm_wih"] = nrm((feature_size, 8 * H))
    p["lstm_whh_f"] = nrm((H, 4 * H))
    p["lstm_whh_b"] = nrm((H, 4 * H))
    p["lstm_b_f"] = nrm((1, 4 * H))
    p["lstm_b_b"] = nrm((1, 4 * H))
    # linear heads
    p["lr_w"], p["lr_b"] = nrm((feature_size, feature_size)), nrm((1, feature_size))
    p["soh_w"], p["soh_b"] = nrm((feature_size, 1)), nrm((1, 1))
    p["rul_w"], p["rul_b"] = nrm((1, L)), nrm((1, 1))
    return p


# ---------------------------------------------------------------------------
# forward pass (mirrors CNN_LSTM.forward; attention / res_connect_02 are
# defined in the torch module but unused in its forward, so omitted here)
# ---------------------------------------------------------------------------
def cnn_lstm_forward(x, p):
    N, _, L, W = x.shape                                   # NCHW; conv height is 1
    F = p["c3_w"].shape[1]                                 # feature_size = 64
    H = F // 2
    NL = N * L
    xb = jnp.transpose(x, (0, 2, 3, 1)).reshape(NL, W, x.shape[1])   # (N*L, W, 6)

    # x = CNN1(x)                               -> rows (b*50+w), 16 channels
    xe, xo, W1 = _im2col_pooled(xb, 5, 2, 2)
    x1 = conv_pool(xe, xo, p["c1_w"], p["c1_b"])           # (NL*50, 16)

    # first half of CNN2                        -> rows (b*12+w), 32 channels
    he, ho, W2 = _im2col_pooled(x1.reshape(NL, W1, 16), 3, 2, 1)
    h = conv_pool(he, ho, p["c2a_w"], p["c2a_b"])          # (NL*12, 32)

    # fused: CNN2 tail + res_connect_01 + relu(y1+y2) + CNN3  -> (N*L, 64)
    cols2b = _im2col_1d(h.reshape(NL, W2, 32), 3, 2, 1)    # (NL, 6, 96)
    WJ = cols2b.shape[1]                                   # 6
    cols2b_j = jnp.transpose(cols2b, (1, 0, 2)).reshape(WJ * NL, 3 * 32)
    # Block matrix for Linear(50, 6) applied per batch to the (NL*50, 64)
    # residual activation:  A[(j,b), (b',w)] = W_l[w, j] * (b == b')
    a_res = jnp.einsum("jw,bB->jbBw", p["r1l_w"].T,
                       jnp.eye(NL, dtype=jnp.float32)).reshape(WJ * NL, NL * W1)
    b_res = jnp.repeat(p["r1l_b"], NL).reshape(WJ * NL, 1)
    seq = fused_mid(cols2b_j, x1, a_res, b_res, p, NL)     # (N*L, 64), rows (n, l)

    # y2, _ = LSTM(y)  (bidirectional, batch_first)  -- time-major inside
    x_tm = seq.reshape(N, L, F).transpose(1, 0, 2).reshape(L * N, F)
    y_tm = bilstm(x_tm, p, N, L, H)                        # (L*N, 64)
    y_bm = y_tm.reshape(L, N, F).transpose(1, 0, 2).reshape(NL, F)

    # y = relu(LR(lstm_out) + seq); soh = SOH(y); rul = RUL(soh)
    out_t = heads(y_bm, seq, p, N, L)                      # (L+1, N)
    return out_t.T                                         # (N, L+1) = [soh | rul]


if __name__ == "__main__":
    # W=200 so CNN1's output width is 50, as hardwired by Linear(50, 6) in
    # res_connect_01; L=8 is the sequence length consumed by Linear(L, 1).
    N, C, L, W = 2, 6, 8, 200
    root = jax.random.PRNGKey(0)
    kx, kp = jax.random.split(root)
    x = jax.random.normal(kx, (N, C, L, W), dtype=jnp.float32)
    params = init_params(kp, L)

    out = jax.block_until_ready(jax.jit(cnn_lstm_forward)(x, params))
    assert out.shape == (N, L + 1) and out.dtype == jnp.float32
    assert bool(jnp.all(jnp.isfinite(out)))
    print("KERNEL_OK")
</pallas_src>

<mosaic_0001>
module attributes {stable_mosaic.version = 11 : i64} {
  func.func @_conv_pool_kernel(%arg0: memref<800x30xf32, #tpu.memory_space<vmem>>, %arg1: memref<800x30xf32, #tpu.memory_space<vmem>>, %arg2: memref<30x16xf32, #tpu.memory_space<vmem>>, %arg3: memref<1x16xf32, #tpu.memory_space<vmem>>, %arg4: memref<800x16xf32, #tpu.memory_space<vmem>>) attributes {dimension_semantics = [], scalar_prefetch = 0 : i64, scratch_operands = 0 : i64, tpu.core_type = #tpu.core_type<tc>} {
    %c0 = arith.constant 0 : index
    %c0_0 = arith.constant 0 : index
    %0 = vector.load %arg2[%c0, %c0_0] : memref<30x16xf32, #tpu.memory_space<vmem>>, vector<30x16xf32>
    %c0_1 = arith.constant 0 : index
    %c0_2 = arith.constant 0 : index
    %1 = vector.load %arg3[%c0_1, %c0_2] : memref<1x16xf32, #tpu.memory_space<vmem>>, vector<1x16xf32>
    %c0_3 = arith.constant 0 : index
    %c0_4 = arith.constant 0 : index
    %2 = vector.load %arg0[%c0_3, %c0_4] : memref<800x30xf32, #tpu.memory_space<vmem>>, vector<800x30xf32>
    %cst = arith.constant dense<0.000000e+00> : vector<800x16xf32>
    %3 = tpu.matmul %2, %0, %cst {dimension_numbers = #tpu.dot_dimension_numbers<[1], [0], [0], [1], [0, 0, 1, 1], [], []>} : vector<800x30xf32>, vector<30x16xf32>, vector<800x16xf32> -> vector<800x16xf32>
    %4 = vector.broadcast %1 : vector<1x16xf32> to vector<800x16xf32>
    %5 = arith.addf %3, %4 : vector<800x16xf32>
    %cst_5 = arith.constant 0.000000e+00 : f32
    %6 = vector.broadcast %cst_5 : f32 to vector<800x16xf32>
    %7 = arith.maximumf %5, %6 : vector<800x16xf32>
    %c0_6 = arith.constant 0 : index
    %c0_7 = arith.constant 0 : index
    %8 = vector.load %arg1[%c0_6, %c0_7] : memref<800x30xf32, #tpu.memory_space<vmem>>, vector<800x30xf32>
    %cst_8 = arith.constant dense<0.000000e+00> : vector<800x16xf32>
    %9 = tpu.matmul %8, %0, %cst_8 {dimension_numbers = #tpu.dot_dimension_numbers<[1], [0], [0], [1], [0, 0, 1, 1], [], []>} : vector<800x30xf32>, vector<30x16xf32>, vector<800x16xf32> -> vector<800x16xf32>
    %10 = vector.broadcast %1 : vector<1x16xf32> to vector<800x16xf32>
    %11 = arith.addf %9, %10 : vector<800x16xf32>
    %cst_9 = arith.constant 0.000000e+00 : f32
    %12 = vector.broadcast %cst_9 : f32 to vector<800x16xf32>
    %13 = arith.maximumf %11, %12 : vector<800x16xf32>
    %14 = arith.maximumf %7, %13 : vector<800x16xf32>
    %c0_10 = arith.constant 0 : index
    %c0_11 = arith.constant 0 : index
    %15 = vector.load %arg4[%c0_10, %c0_11] : memref<800x16xf32, #tpu.memory_space<vmem>>, vector<800x16xf32>
    tpu.vector_store %arg4[%c0_10, %c0_11], %14 {strides = array<i32>} : memref<800x16xf32, #tpu.memory_space<vmem>>, vector<800x16xf32>,
    return
  }
}

module attributes {stable_mosaic.version = 11 : i64} {
  func.func @_conv_pool_kernel(%arg0: memref<192x48xf32, #tpu.memory_space<vmem>>, %arg1: memref<192x48xf32, #tpu.memory_space<vmem>>, %arg2: memref<48x32xf32, #tpu.memory_space<vmem>>, %arg3: memref<1x32xf32, #tpu.memory_space<vmem>>, %arg4: memref<192x32xf32, #tpu.memory_space<vmem>>) attributes {dimension_semantics = [], scalar_prefetch = 0 : i64, scratch_operands = 0 : i64, tpu.core_type = #tpu.core_type<tc>} {
    %c0 = arith.constant 0 : index
    %c0_0 = arith.constant 0 : index
    %0 = vector.load %arg2[%c0, %c0_0] : memref<48x32xf32, #tpu.memory_space<vmem>>, vector<48x32xf32>
    %c0_1 = arith.constant 0 : index
    %c0_2 = arith.constant 0 : index
    %1 = vector.load %arg3[%c0_1, %c0_2] : memref<1x32xf32, #tpu.memory_space<vmem>>, vector<1x32xf32>
    %c0_3 = arith.constant 0 : index
    %c0_4 = arith.constant 0 : index
    %2 = vector.load %arg0[%c0_3, %c0_4] : memref<192x48xf32, #tpu.memory_space<vmem>>, vector<192x48xf32>
    %cst = arith.constant dense<0.000000e+00> : vector<192x32xf32>
    %3 = tpu.matmul %2, %0, %cst {dimension_numbers = #tpu.dot_dimension_numbers<[1], [0], [0], [1], [0, 0, 1, 1], [], []>} : vector<192x48xf32>, vector<48x32xf32>, vector<192x32xf32> -> vector<192x32xf32>
    %4 = vector.broadcast %1 : vector<1x32xf32> to vector<192x32xf32>
    %5 = arith.addf %3, %4 : vector<192x32xf32>
    %cst_5 = arith.constant 0.000000e+00 : f32
    %6 = vector.broadcast %cst_5 : f32 to vector<192x32xf32>
    %7 = arith.maximumf %5, %6 : vector<192x32xf32>
    %c0_6 = arith.constant 0 : index
    %c0_7 = arith.constant 0 : index
    %8 = vector.load %arg1[%c0_6, %c0_7] : memref<192x48xf32, #tpu.memory_space<vmem>>, vector<192x48xf32>
    %cst_8 = arith.constant dense<0.000000e+00> : vector<192x32xf32>
    %9 = tpu.matmul %8, %0, %cst_8 {dimension_numbers = #tpu.dot_dimension_numbers<[1], [0], [0], [1], [0, 0, 1, 1], [], []>} : vector<192x48xf32>, vector<48x32xf32>, vector<192x32xf32> -> vector<192x32xf32>
    %10 = vector.broadcast %1 : vector<1x32xf32> to vector<192x32xf32>
    %11 = arith.addf %9, %10 : vector<192x32xf32>
    %cst_9 = arith.constant 0.000000e+00 : f32
    %12 = vector.broadcast %cst_9 : f32 to vector<192x32xf32>
    %13 = arith.maximumf %11, %12 : vector<192x32xf32>
    %14 = arith.maximumf %7, %13 : vector<192x32xf32>
    %c0_10 = arith.constant 0 : index
    %c0_11 = arith.constant 0 : index
    %15 = vector.load %arg4[%c0_10, %c0_11] : memref<192x32xf32, #tpu.memory_space<vmem>>, vector<192x32xf32>
    tpu.vector_store %arg4[%c0_10, %c0_11], %14 {strides = array<i32>} : memref<192x32xf32, #tpu.memory_space<vmem>>, vector<192x32xf32>,
    return
  }
}

module attributes {stable_mosaic.version = 11 : i64} {
  func.func @_fused_mid_kernel(%arg0: memref<96x96xf32, #tpu.memory_space<vmem>>, %arg1: memref<800x16xf32, #tpu.memory_space<vmem>>, %arg2: memref<96x800xf32, #tpu.memory_space<vmem>>, %arg3: memref<96x1xf32, #tpu.memory_space<vmem>>, %arg4: memref<96x64xf32, #tpu.memory_space<vmem>>, %arg5: memref<1x64xf32, #tpu.memory_space<vmem>>, %arg6: memref<16x64xf32, #tpu.memory_space<vmem>>, %arg7: memref<1x64xf32, #tpu.memory_space<vmem>>, %arg8: memref<192x64xf32, #tpu.memory_space<vmem>>, %arg9: memref<1x64xf32, #tpu.memory_space<vmem>>, %arg10: memref<16x64xf32, #tpu.memory_space<vmem>>) attributes {dimension_semantics = [], scalar_prefetch = 0 : i64, scratch_operands = 0 : i64, tpu.core_type = #tpu.core_type<tc>} {
    %c0 = arith.constant 0 : index
    %c0_0 = arith.constant 0 : index
    %0 = vector.load %arg0[%c0, %c0_0] : memref<96x96xf32, #tpu.memory_space<vmem>>, vector<96x96xf32>
    %c0_1 = arith.constant 0 : index
    %c0_2 = arith.constant 0 : index
    %1 = vector.load %arg4[%c0_1, %c0_2] : memref<96x64xf32, #tpu.memory_space<vmem>>, vector<96x64xf32>
    %cst = arith.constant dense<0.000000e+00> : vector<96x64xf32>
    %2 = tpu.matmul %0, %1, %cst {dimension_numbers = #tpu.dot_dimension_numbers<[1], [0], [0], [1], [0, 0, 1, 1], [], []>} : vector<96x96xf32>, vector<96x64xf32>, vector<96x64xf32> -> vector<96x64xf32>
    %c0_3 = arith.constant 0 : index
    %c0_4 = arith.constant 0 : index
    %3 = vector.load %arg5[%c0_3, %c0_4] : memref<1x64xf32, #tpu.memory_space<vmem>>, vector<1x64xf32>
    %4 = vector.broadcast %3 : vector<1x64xf32> to vector<96x64xf32>
    %5 = arith.addf %2, %4 : vector<96x64xf32>
    %c0_5 = arith.constant 0 : index
    %c0_6 = arith.constant 0 : index
    %6 = vector.load %arg1[%c0_5, %c0_6] : memref<800x16xf32, #tpu.memory_space<vmem>>, vector<800x16xf32>
    %c0_7 = arith.constant 0 : index
    %c0_8 = arith.constant 0 : index
    %7 = vector.load %arg6[%c0_7, %c0_8] : memref<16x64xf32, #tpu.memory_space<vmem>>, vector<16x64xf32>
    %cst_9 = arith.constant dense<0.000000e+00> : vector<800x64xf32>
    %8 = tpu.matmul %6, %7, %cst_9 {dimension_numbers = #tpu.dot_dimension_numbers<[1], [0], [0], [1], [0, 0, 1, 1], [], []>} : vector<800x16xf32>, vector<16x64xf32>, vector<800x64xf32> -> vector<800x64xf32>
    %c0_10 = arith.constant 0 : index
    %c0_11 = arith.constant 0 : index
    %9 = vector.load %arg7[%c0_10, %c0_11] : memref<1x64xf32, #tpu.memory_space<vmem>>, vector<1x64xf32>
    %10 = vector.broadcast %9 : vector<1x64xf32> to vector<800x64xf32>
    %11 = arith.addf %8, %10 : vector<800x64xf32>
    %cst_12 = arith.constant 0.000000e+00 : f32
    %12 = vector.broadcast %cst_12 : f32 to vector<800x64xf32>
    %13 = arith.maximumf %11, %12 : vector<800x64xf32>
    %c0_13 = arith.constant 0 : index
    %c0_14 = arith.constant 0 : index
    %14 = vector.load %arg2[%c0_13, %c0_14] : memref<96x800xf32, #tpu.memory_space<vmem>>, vector<96x800xf32>
    %cst_15 = arith.constant dense<0.000000e+00> : vector<96x64xf32>
    %15 = tpu.matmul %14, %13, %cst_15 {dimension_numbers = #tpu.dot_dimension_numbers<[1], [0], [0], [1], [0, 0, 1, 1], [], []>} : vector<96x800xf32>, vector<800x64xf32>, vector<96x64xf32> -> vector<96x64xf32>
    %c0_16 = arith.constant 0 : index
    %c0_17 = arith.constant 0 : index
    %16 = vector.load %arg3[%c0_16, %c0_17] : memref<96x1xf32, #tpu.memory_space<vmem>>, vector<96x1xf32>
    %17 = vector.broadcast %16 : vector<96x1xf32> to vector<96x64xf32>
    %18 = arith.addf %15, %17 : vector<96x64xf32>
    %19 = arith.addf %5, %18 : vector<96x64xf32>
    %cst_18 = arith.constant 0.000000e+00 : f32
    %20 = vector.broadcast %cst_18 : f32 to vector<96x64xf32>
    %21 = arith.maximumf %19, %20 : vector<96x64xf32>
    %c0_19 = arith.constant 0 : index
    %c0_20 = arith.constant 0 : index
    %22 = vector.load %arg8[%c0_19, %c0_20] : memref<192x64xf32, #tpu.memory_space<vmem>>, vector<192x64xf32>
    %23 = vector.extract_strided_slice %22 {offsets = [0, 0], sizes = [64, 64], strides = [1, 1]} : vector<192x64xf32> to vector<64x64xf32>
    %24 = vector.extract_strided_slice %22 {offsets = [64, 0], sizes = [64, 64], strides = [1, 1]} : vector<192x64xf32> to vector<64x64xf32>
    %25 = vector.extract_strided_slice %22 {offsets = [128, 0], sizes = [64, 64], strides = [1, 1]} : vector<192x64xf32> to vector<64x64xf32>
    %26 = vector.extract_strided_slice %21 {offsets = [0, 0], sizes = [16, 64], strides = [1, 1]} : vector<96x64xf32> to vector<16x64xf32>
    %cst_21 = arith.constant dense<0.000000e+00> : vector<16x64xf32>
    %27 = tpu.matmul %26, %24, %cst_21 {dimension_numbers = #tpu.dot_dimension_numbers<[1], [0], [0], [1], [0, 0, 1, 1], [], []>} : vector<16x64xf32>, vector<64x64xf32>, vector<16x64xf32> -> vector<16x64xf32>
    %28 = vector.extract_strided_slice %21 {offsets = [16, 0], sizes = [16, 64], strides = [1, 1]} : vector<96x64xf32> to vector<16x64xf32>
    %cst_22 = arith.constant dense<0.000000e+00> : vector<16x64xf32>
    %29 = tpu.matmul %28, %25, %cst_22 {dimension_numbers = #tpu.dot_dimension_numbers<[1], [0], [0], [1], [0, 0, 1, 1], [], []>} : vector<16x64xf32>, vector<64x64xf32>, vector<16x64xf32> -> vector<16x64xf32>
    %30 = arith.addf %27, %29 : vector<16x64xf32>
    %c0_23 = arith.constant 0 : index
    %c0_24 = arith.constant 0 : index
    %31 = vector.load %arg9[%c0_23, %c0_24] : memref<1x64xf32, #tpu.memory_space<vmem>>, vector<1x64xf32>
    %32 = vector.broadcast %31 : vector<1x64xf32> to vector<16x64xf32>
    %33 = arith.addf %30, %32 : vector<16x64xf32>
    %34 = vector.extract_strided_slice %21 {offsets = [32, 0], sizes = [16, 64], strides = [1, 1]} : vector<96x64xf32> to vector<16x64xf32>
    %cst_25 = arith.constant dense<0.000000e+00> : vector<16x64xf32>
    %35 = tpu.matmul %34, %23, %cst_25 {dimension_numbers = #tpu.dot_dimension_numbers<[1], [0], [0], [1], [0, 0, 1, 1], [], []>} : vector<16x64xf32>, vector<64x64xf32>, vector<16x64xf32> -> vector<16x64xf32>
    %36 = vector.extract_strided_slice %21 {offsets = [48, 0], sizes = [16, 64], strides = [1, 1]} : vector<96x64xf32> to vector<16x64xf32>
    %cst_26 = arith.constant dense<0.000000e+00> : vector<16x64xf32>
    %37 = tpu.matmul %36, %24, %cst_26 {dimension_numbers = #tpu.dot_dimension_numbers<[1], [0], [0], [1], [0, 0, 1, 1], [], []>} : vector<16x64xf32>, vector<64x64xf32>, vector<16x64xf32> -> vector<16x64xf32>
    %38 = arith.addf %35, %37 : vector<16x64xf32>
    %39 = vector.extract_strided_slice %21 {offsets = [64, 0], sizes = [16, 64], strides = [1, 1]} : vector<96x64xf32> to vector<16x64xf32>
    %cst_27 = arith.constant dense<0.000000e+00> : vector<16x64xf32>
    %40 = tpu.matmul %39, %25, %cst_27 {dimension_numbers = #tpu.dot_dimension_numbers<[1], [0], [0], [1], [0, 0, 1, 1], [], []>} : vector<16x64xf32>, vector<64x64xf32>, vector<16x64xf32> -> vector<16x64xf32>
    %41 = arith.addf %38, %40 : vector<16x64xf32>
    %c0_28 = arith.constant 0 : index
    %c0_29 = arith.constant 0 : index
    %42 = vector.load %arg9[%c0_28, %c0_29] : memref<1x64xf32, #tpu.memory_space<vmem>>, vector<1x64xf32>
    %43 = vector.broadcast %42 : vector<1x64xf32> to vector<16x64xf32>
    %44 = arith.addf %41, %43 : vector<16x64xf32>
    %cst_30 = arith.constant 0.000000e+00 : f32
    %45 = vector.broadcast %cst_30 : f32 to vector<16x64xf32>
    %46 = arith.maximumf %33, %45 : vector<16x64xf32>
    %cst_31 = arith.constant 0.000000e+00 : f32
    %47 = vector.broadcast %cst_31 : f32 to vector<16x64xf32>
    %48 = arith.maximumf %44, %47 : vector<16x64xf32>
    %49 = arith.maximumf %46, %48 : vector<16x64xf32>
    %c0_32 = arith.constant 0 : index
    %c0_33 = arith.constant 0 : index
    %50 = vector.load %arg10[%c0_32, %c0_33] : memref<16x64xf32, #tpu.memory_space<vmem>>, vector<16x64xf32>
    tpu.vector_store %arg10[%c0_32, %c0_33], %49 {strides = array<i32>} : memref<16x64xf32, #tpu.memory_space<vmem>>, vector<16x64xf32>,
    return
  }
}

module attributes {stable_mosaic.version = 11 : i64} {
  func.func @_bilstm_kernel(%arg0: memref<16x64xf32, #tpu.memory_space<vmem>>, %arg1: memref<64x256xf32, #tpu.memory_space<vmem>>, %arg2: memref<32x128xf32, #tpu.memory_space<vmem>>, %arg3: memref<32x128xf32, #tpu.memory_space<vmem>>, %arg4: memref<1x128xf32, #tpu.memory_space<vmem>>, %arg5: memref<1x128xf32, #tpu.memory_space<vmem>>, %arg6: memref<16x64xf32, #tpu.memory_space<vmem>>) attributes {dimension_semantics = [], scalar_prefetch = 0 : i64, scratch_operands = 0 : i64, tpu.core_type = #tpu.core_type<tc>} {
    %c0 = arith.constant 0 : index
    %c0_0 = arith.constant 0 : index
    %0 = vector.load %arg0[%c0, %c0_0] : memref<16x64xf32, #tpu.memory_space<vmem>>, vector<16x64xf32>
    %c0_1 = arith.constant 0 : index
    %c0_2 = arith.constant 0 : index
    %1 = vector.load %arg1[%c0_1, %c0_2] : memref<64x256xf32, #tpu.memory_space<vmem>>, vector<64x256xf32>
    %cst = arith.constant dense<0.000000e+00> : vector<16x256xf32>
    %2 = tpu.matmul %0, %1, %cst {dimension_numbers = #tpu.dot_dimension_numbers<[1], [0], [0], [1], [0, 0, 1, 1], [], []>} : vector<16x64xf32>, vector<64x256xf32>, vector<16x256xf32> -> vector<16x256xf32>
    %c0_3 = arith.constant 0 : index
    %c0_4 = arith.constant 0 : index
    %3 = vector.load %arg2[%c0_3, %c0_4] : memref<32x128xf32, #tpu.memory_space<vmem>>, vector<32x128xf32>
    %c0_5 = arith.constant 0 : index
    %c0_6 = arith.constant 0 : index
    %4 = vector.load %arg3[%c0_5, %c0_6] : memref<32x128xf32, #tpu.memory_space<vmem>>, vector<32x128xf32>
    %c0_7 = arith.constant 0 : index
    %c0_8 = arith.constant 0 : index
    %5 = vector.load %arg4[%c0_7, %c0_8] : memref<1x128xf32, #tpu.memory_space<vmem>>, vector<1x128xf32>
    %c0_9 = arith.constant 0 : index
    %c0_10 = arith.constant 0 : index
    %6 = vector.load %arg5[%c0_9, %c0_10] : memref<1x128xf32, #tpu.memory_space<vmem>>, vector<1x128xf32>
    %cst_11 = arith.constant 0.000000e+00 : f32
    %7 = vector.broadcast %cst_11 : f32 to vector<2x32xf32>
    %cst_12 = arith.constant 0.000000e+00 : f32
    %8 = vector.broadcast %cst_12 : f32 to vector<2x32xf32>
    %cst_13 = arith.constant 0.000000e+00 : f32
    %9 = vector.broadcast %cst_13 : f32 to vector<2x32xf32>
    %cst_14 = arith.constant 0.000000e+00 : f32
    %10 = vector.broadcast %cst_14 : f32 to vector<2x32xf32>
    %11 = vector.extract_strided_slice %2 {offsets = [0, 0], sizes = [2, 128], strides = [1, 1]} : vector<16x256xf32> to vector<2x128xf32>
    %cst_15 = arith.constant dense<0.000000e+00> : vector<2x128xf32>
    %12 = tpu.matmul %7, %3, %cst_15 {dimension_numbers = #tpu.dot_dimension_numbers<[1], [0], [0], [1], [0, 0, 1, 1], [], []>} : vector<2x32xf32>, vector<32x128xf32>, vector<2x128xf32> -> vector<2x128xf32>
    %13 = arith.addf %11, %12 : vector<2x128xf32>
    %14 = vector.broadcast %5 : vector<1x128xf32> to vector<2x128xf32>
    %15 = arith.addf %13, %14 : vector<2x128xf32>
    %16 = vector.extract_strided_slice %2 {offsets = [14, 128], sizes = [2, 128], strides = [1, 1]} : vector<16x256xf32> to vector<2x128xf32>
    %cst_16 = arith.constant dense<0.000000e+00> : vector<2x128xf32>
    %17 = tpu.matmul %9, %4, %cst_16 {dimension_numbers = #tpu.dot_dimension_numbers<[1], [0], [0], [1], [0, 0, 1, 1], [], []>} : vector<2x32xf32>, vector<32x128xf32>, vector<2x128xf32> -> vector<2x128xf32>
    %18 = arith.addf %16, %17 : vector<2x128xf32>
    %19 = vector.broadcast %6 : vector<1x128xf32> to vector<2x128xf32>
    %20 = arith.addf %18, %19 : vector<2x128xf32>
    %21 = vector.extract_strided_slice %15 {offsets = [0, 0], sizes = [2, 32], strides = [1, 1]} : vector<2x128xf32> to vector<2x32xf32>
    %cst_17 = arith.constant 0.000000e+00 : f32
    %22 = vector.broadcast %cst_17 : f32 to vector<2x32xf32>
    %23 = arith.subf %22, %21 : vector<2x32xf32>
    %24 = math.exp %23 : vector<2x32xf32>
    %cst_18 = arith.constant 1.000000e+00 : f32
    %25 = vector.broadcast %cst_18 : f32 to vector<2x32xf32>
    %26 = arith.addf %25, %24 : vector<2x32xf32>
    %27 = tpu.reciprocal %26 {approx = true} : vector<2x32xf32> -> vector<2x32xf32>
    %28 = vector.extract_strided_slice %15 {offsets = [0, 32], sizes = [2, 32], strides = [1, 1]} : vector<2x128xf32> to vector<2x32xf32>
    %cst_19 = arith.constant 0.000000e+00 : f32
    %29 = vector.broadcast %cst_19 : f32 to vector<2x32xf32>
    %30 = arith.subf %29, %28 : vector<2x32xf32>
    %31 = math.exp %30 : vector<2x32xf32>
    %cst_20 = arith.constant 1.000000e+00 : f32
    %32 = vector.broadcast %cst_20 : f32 to vector<2x32xf32>
    %33 = arith.addf %32, %31 : vector<2x32xf32>
    %34 = tpu.reciprocal %33 {approx = true} : vector<2x32xf32> -> vector<2x32xf32>
    %35 = vector.extract_strided_slice %15 {offsets = [0, 64], sizes = [2, 32], strides = [1, 1]} : vector<2x128xf32> to vector<2x32xf32>
    %36 = math.tanh %35 : vector<2x32xf32>
    %37 = vector.extract_strided_slice %15 {offsets = [0, 96], sizes = [2, 32], strides = [1, 1]} : vector<2x128xf32> to vector<2x32xf32>
    %cst_21 = arith.constant 0.000000e+00 : f32
    %38 = vector.broadcast %cst_21 : f32 to vector<2x32xf32>
    %39 = arith.subf %38, %37 : vector<2x32xf32>
    %40 = math.exp %39 : vector<2x32xf32>
    %cst_22 = arith.constant 1.000000e+00 : f32
    %41 = vector.broadcast %cst_22 : f32 to vector<2x32xf32>
    %42 = arith.addf %41, %40 : vector<2x32xf32>
    %43 = tpu.reciprocal %42 {approx = true} : vector<2x32xf32> -> vector<2x32xf32>
    %44 = vector.extract_strided_slice %20 {offsets = [0, 0], sizes = [2, 32], strides = [1, 1]} : vector<2x128xf32> to vector<2x32xf32>
    %cst_23 = arith.constant 0.000000e+00 : f32
    %45 = vector.broadcast %cst_23 : f32 to vector<2x32xf32>
    %46 = arith.subf %45, %44 : vector<2x32xf32>
    %47 = math.exp %46 : vector<2x32xf32>
    %cst_24 = arith.constant 1.000000e+00 : f32
    %48 = vector.broadcast %cst_24 : f32 to vector<2x32xf32>
    %49 = arith.addf %48, %47 : vector<2x32xf32>
    %50 = tpu.reciprocal %49 {approx = true} : vector<2x32xf32> -> vector<2x32xf32>
    %51 = vector.extract_strided_slice %20 {offsets = [0, 32], sizes = [2, 32], strides = [1, 1]} : vector<2x128xf32> to vector<2x32xf32>
    %cst_25 = arith.constant 0.000000e+00 : f32
    %52 = vector.broadcast %cst_25 : f32 to vector<2x32xf32>
    %53 = arith.subf %52, %51 : vector<2x32xf32>
    %54 = math.exp %53 : vector<2x32xf32>
    %cst_26 = arith.constant 1.000000e+00 : f32
    %55 = vector.broadcast %cst_26 : f32 to vector<2x32xf32>
    %56 = arith.addf %55, %54 : vector<2x32xf32>
    %57 = tpu.reciprocal %56 {approx = true} : vector<2x32xf32> -> vector<2x32xf32>
    %58 = vector.extract_strided_slice %20 {offsets = [0, 64], sizes = [2, 32], strides = [1, 1]} : vector<2x128xf32> to vector<2x32xf32>
    %59 = math.tanh %58 : vector<2x32xf32>
    %60 = vector.extract_strided_slice %20 {offsets = [0, 96], sizes = [2, 32], strides = [1, 1]} : vector<2x128xf32> to vector<2x32xf32>
    %cst_27 = arith.constant 0.000000e+00 : f32
    %61 = vector.broadcast %cst_27 : f32 to vector<2x32xf32>
    %62 = arith.subf %61, %60 : vector<2x32xf32>
    %63 = math.exp %62 : vector<2x32xf32>
    %cst_28 = arith.constant 1.000000e+00 : f32
    %64 = vector.broadcast %cst_28 : f32 to vector<2x32xf32>
    %65 = arith.addf %64, %63 : vector<2x32xf32>
    %66 = tpu.reciprocal %65 {approx = true} : vector<2x32xf32> -> vector<2x32xf32>
    %67 = arith.mulf %34, %8 : vector<2x32xf32>
    %68 = arith.mulf %27, %36 : vector<2x32xf32>
    %69 = arith.addf %67, %68 : vector<2x32xf32>
    %70 = math.tanh %69 : vector<2x32xf32>
    %71 = arith.mulf %43, %70 : vector<2x32xf32>
    %72 = arith.mulf %57, %10 : vector<2x32xf32>
    %73 = arith.mulf %50, %59 : vector<2x32xf32>
    %74 = arith.addf %72, %73 : vector<2x32xf32>
    %75 = math.tanh %74 : vector<2x32xf32>
    %76 = arith.mulf %66, %75 : vector<2x32xf32>
    %77 = vector.extract_strided_slice %2 {offsets = [2, 0], sizes = [2, 128], strides = [1, 1]} : vector<16x256xf32> to vector<2x128xf32>
    %cst_29 = arith.constant dense<0.000000e+00> : vector<2x128xf32>
    %78 = tpu.matmul %71, %3, %cst_29 {dimension_numbers = #tpu.dot_dimension_numbers<[1], [0], [0], [1], [0, 0, 1, 1], [], []>} : vector<2x32xf32>, vector<32x128xf32>, vector<2x128xf32> -> vector<2x128xf32>
    %79 = arith.addf %77, %78 : vector<2x128xf32>
    %80 = vector.broadcast %5 : vector<1x128xf32> to vector<2x128xf32>
    %81 = arith.addf %79, %80 : vector<2x128xf32>
    %82 = vector.extract_strided_slice %2 {offsets = [12, 128], sizes = [2, 128], strides = [1, 1]} : vector<16x256xf32> to vector<2x128xf32>
    %cst_30 = arith.constant dense<0.000000e+00> : vector<2x128xf32>
    %83 = tpu.matmul %76, %4, %cst_30 {dimension_numbers = #tpu.dot_dimension_numbers<[1], [0], [0], [1], [0, 0, 1, 1], [], []>} : vector<2x32xf32>, vector<32x128xf32>, vector<2x128xf32> -> vector<2x128xf32>
    %84 = arith.addf %82, %83 : vector<2x128xf32>
    %85 = vector.broadcast %6 : vector<1x128xf32> to vector<2x128xf32>
    %86 = arith.addf %84, %85 : vector<2x128xf32>
    %87 = vector.extract_strided_slice %81 {offsets = [0, 0], sizes = [2, 32], strides = [1, 1]} : vector<2x128xf32> to vector<2x32xf32>
    %cst_31 = arith.constant 0.000000e+00 : f32
    %88 = vector.broadcast %cst_31 : f32 to vector<2x32xf32>
    %89 = arith.subf %88, %87 : vector<2x32xf32>
    %90 = math.exp %89 : vector<2x32xf32>
    %cst_32 = arith.constant 1.000000e+00 : f32
    %91 = vector.broadcast %cst_32 : f32 to vector<2x32xf32>
    %92 = arith.addf %91, %90 : vector<2x32xf32>
    %93 = tpu.reciprocal %92 {approx = true} : vector<2x32xf32> -> vector<2x32xf32>
    %94 = vector.extract_strided_slice %81 {offsets = [0, 32], sizes = [2, 32], strides = [1, 1]} : vector<2x128xf32> to vector<2x32xf32>
    %cst_33 = arith.constant 0.000000e+00 : f32
    %95 = vector.broadcast %cst_33 : f32 to vector<2x32xf32>
    %96 = arith.subf %95, %94 : vector<2x32xf32>
    %97 = math.exp %96 : vector<2x32xf32>
    %cst_34 = arith.constant 1.000000e+00 : f32
    %98 = vector.broadcast %cst_34 : f32 to vector<2x32xf32>
    %99 = arith.addf %98, %97 : vector<2x32xf32>
    %100 = tpu.reciprocal %99 {approx = true} : vector<2x32xf32> -> vector<2x32xf32>
    %101 = vector.extract_strided_slice %81 {offsets = [0, 64], sizes = [2, 32], strides = [1, 1]} : vector<2x128xf32> to vector<2x32xf32>
    %102 = math.tanh %101 : vector<2x32xf32>
    %103 = vector.extract_strided_slice %81 {offsets = [0, 96], sizes = [2, 32], strides = [1, 1]} : vector<2x128xf32> to vector<2x32xf32>
    %cst_35 = arith.constant 0.000000e+00 : f32
    %104 = vector.broadcast %cst_35 : f32 to vector<2x32xf32>
    %105 = arith.subf %104, %103 : vector<2x32xf32>
    %106 = math.exp %105 : vector<2x32xf32>
    %cst_36 = arith.constant 1.000000e+00 : f32
    %107 = vector.broadcast %cst_36 : f32 to vector<2x32xf32>
    %108 = arith.addf %107, %106 : vector<2x32xf32>
    %109 = tpu.reciprocal %108 {approx = true} : vector<2x32xf32> -> vector<2x32xf32>
    %110 = vector.extract_strided_slice %86 {offsets = [0, 0], sizes = [2, 32], strides = [1, 1]} : vector<2x128xf32> to vector<2x32xf32>
    %cst_37 = arith.constant 0.000000e+00 : f32
    %111 = vector.broadcast %cst_37 : f32 to vector<2x32xf32>
    %112 = arith.subf %111, %110 : vector<2x32xf32>
    %113 = math.exp %112 : vector<2x32xf32>
    %cst_38 = arith.constant 1.000000e+00 : f32
    %114 = vector.broadcast %cst_38 : f32 to vector<2x32xf32>
    %115 = arith.addf %114, %113 : vector<2x32xf32>
    %116 = tpu.reciprocal %115 {approx = true} : vector<2x32xf32> -> vector<2x32xf32>
    %117 = vector.extract_strided_slice %86 {offsets = [0, 32], sizes = [2, 32], strides = [1, 1]} : vector<2x128xf32> to vector<2x32xf32>
    %cst_39 = arith.constant 0.000000e+00 : f32
    %118 = vector.broadcast %cst_39 : f32 to vector<2x32xf32>
    %119 = arith.subf %118, %117 : vector<2x32xf32>
    %120 = math.exp %119 : vector<2x32xf32>
    %cst_40 = arith.constant 1.000000e+00 : f32
    %121 = vector.broadcast %cst_40 : f32 to vector<2x32xf32>
    %122 = arith.addf %121, %120 : vector<2x32xf32>
    %123 = tpu.reciprocal %122 {approx = true} : vector<2x32xf32> -> vector<2x32xf32>
    %124 = vector.extract_strided_slice %86 {offsets = [0, 64], sizes = [2, 32], strides = [1, 1]} : vector<2x128xf32> to vector<2x32xf32>
    %125 = math.tanh %124 : vector<2x32xf32>
    %126 = vector.extract_strided_slice %86 {offsets = [0, 96], sizes = [2, 32], strides = [1, 1]} : vector<2x128xf32> to vector<2x32xf32>
    %cst_41 = arith.constant 0.000000e+00 : f32
    %127 = vector.broadcast %cst_41 : f32 to vector<2x32xf32>
    %128 = arith.subf %127, %126 : vector<2x32xf32>
    %129 = math.exp %128 : vector<2x32xf32>
    %cst_42 = arith.constant 1.000000e+00 : f32
    %130 = vector.broadcast %cst_42 : f32 to vector<2x32xf32>
    %131 = arith.addf %130, %129 : vector<2x32xf32>
    %132 = tpu.reciprocal %131 {approx = true} : vector<2x32xf32> -> vector<2x32xf32>
    %133 = arith.mulf %100, %69 : vector<2x32xf32>
    %134 = arith.mulf %93, %102 : vector<2x32xf32>
    %135 = arith.addf %133, %134 : vector<2x32xf32>
    %136 = math.tanh %135 : vector<2x32xf32>
    %137 = arith.mulf %109, %136 : vector<2x32xf32>
    %138 = arith.mulf %123, %74 : vector<2x32xf32>
    %139 = arith.mulf %116, %125 : vector<2x32xf32>
    %140 = arith.addf %138, %139 : vector<2x32xf32>
    %141 = math.tanh %140 : vector<2x32xf32>
    %142 = arith.mulf %132, %141 : vector<2x32xf32>
    %143 = vector.extract_strided_slice %2 {offsets = [4, 0], sizes = [2, 128], strides = [1, 1]} : vector<16x256xf32> to vector<2x128xf32>
    %cst_43 = arith.constant dense<0.000000e+00> : vector<2x128xf32>
    %144 = tpu.matmul %137, %3, %cst_43 {dimension_numbers = #tpu.dot_dimension_numbers<[1], [0], [0], [1], [0, 0, 1, 1], [], []>} : vector<2x32xf32>, vector<32x128xf32>, vector<2x128xf32> -> vector<2x128xf32>
    %145 = arith.addf %143, %144 : vector<2x128xf32>
    %146 = vector.broadcast %5 : vector<1x128xf32> to vector<2x128xf32>
    %147 = arith.addf %145, %146 : vector<2x128xf32>
    %148 = vector.extract_strided_slice %2 {offsets = [10, 128], sizes = [2, 128], strides = [1, 1]} : vector<16x256xf32> to vector<2x128xf32>
    %cst_44 = arith.constant dense<0.000000e+00> : vector<2x128xf32>
    %149 = tpu.matmul %142, %4, %cst_44 {dimension_numbers = #tpu.dot_dimension_numbers<[1], [0], [0], [1], [0, 0, 1, 1], [], []>} : vector<2x32xf32>, vector<32x128xf32>, vector<2x128xf32> -> vector<2x128xf32>
    %150 = arith.addf %148, %149 : vector<2x128xf32>
    %151 = vector.broadcast %6 : vector<1x128xf32> to vector<2x128xf32>
    %152 = arith.addf %150, %151 : vector<2x128xf32>
    %153 = vector.extract_strided_slice %147 {offsets = [0, 0], sizes = [2, 32], strides = [1, 1]} : vector<2x128xf32> to vector<2x32xf32>
    %cst_45 = arith.constant 0.000000e+00 : f32
    %154 = vector.broadcast %cst_45 : f32 to vector<2x32xf32>
    %155 = arith.subf %154, %153 : vector<2x32xf32>
    %156 = math.exp %155 : vector<2x32xf32>
    %cst_46 = arith.constant 1.000000e+00 : f32
    %157 = vector.broadcast %cst_46 : f32 to vector<2x32xf32>
    %158 = arith.addf %157, %156 : vector<2x32xf32>
    %159 = tpu.reciprocal %158 {approx = true} : vector<2x32xf32> -> vector<2x32xf32>
    %160 = vector.extract_strided_slice %147 {offsets = [0, 32], sizes = [2, 32], strides = [1, 1]} : vector<2x128xf32> to vector<2x32xf32>
    %cst_47 = arith.constant 0.000000e+00 : f32
    %161 = vector.broadcast %cst_47 : f32 to vector<2x32xf32>
    %162 = arith.subf %161, %160 : vector<2x32xf32>
    %163 = math.exp %162 : vector<2x32xf32>
    %cst_48 = arith.constant 1.000000e+00 : f32
    %164 = vector.broadcast %cst_48 : f32 to vector<2x32xf32>
    %165 = arith.addf %164, %163 : vector<2x32xf32>
    %166 = tpu.reciprocal %165 {approx = true} : vector<2x32xf32> -> vector<2x32xf32>
    %167 = vector.extract_strided_slice %147 {offsets = [0, 64], sizes = [2, 32], strides = [1, 1]} : vector<2x128xf32> to vector<2x32xf32>
    %168 = math.tanh %167 : vector<2x32xf32>
    %169 = vector.extract_strided_slice %147 {offsets = [0, 96], sizes = [2, 32], strides = [1, 1]} : vector<2x128xf32> to vector<2x32xf32>
    %cst_49 = arith.constant 0.000000e+00 : f32
    %170 = vector.broadcast %cst_49 : f32 to vector<2x32xf32>
    %171 = arith.subf %170, %169 : vector<2x32xf32>
    %172 = math.exp %171 : vector<2x32xf32>
    %cst_50 = arith.constant 1.000000e+00 : f32
    %173 = vector.broadcast %cst_50 : f32 to vector<2x32xf32>
    %174 = arith.addf %173, %172 : vector<2x32xf32>
    %175 = tpu.reciprocal %174 {approx = true} : vector<2x32xf32> -> vector<2x32xf32>
    %176 = vector.extract_strided_slice %152 {offsets = [0, 0], sizes = [2, 32], strides = [1, 1]} : vector<2x128xf32> to vector<2x32xf32>
    %cst_51 = arith.constant 0.000000e+00 : f32
    %177 = vector.broadcast %cst_51 : f32 to vector<2x32xf32>
    %178 = arith.subf %177, %176 : vector<2x32xf32>
    %179 = math.exp %178 : vector<2x32xf32>
    %cst_52 = arith.constant 1.000000e+00 : f32
    %180 = vector.broadcast %cst_52 : f32 to vector<2x32xf32>
    %181 = arith.addf %180, %179 : vector<2x32xf32>
    %182 = tpu.reciprocal %181 {approx = true} : vector<2x32xf32> -> vector<2x32xf32>
    %183 = vector.extract_strided_slice %152 {offsets = [0, 32], sizes = [2, 32], strides = [1, 1]} : vector<2x128xf32> to vector<2x32xf32>
    %cst_53 = arith.constant 0.000000e+00 : f32
    %184 = vector.broadcast %cst_53 : f32 to vector<2x32xf32>
    %185 = arith.subf %184, %183 : vector<2x32xf32>
    %186 = math.exp %185 : vector<2x32xf32>
    %cst_54 = arith.constant 1.000000e+00 : f32
    %187 = vector.broadcast %cst_54 : f32 to vector<2x32xf32>
    %188 = arith.addf %187, %186 : vector<2x32xf32>
    %189 = tpu.reciprocal %188 {approx = true} : vector<2x32xf32> -> vector<2x32xf32>
    %190 = vector.extract_strided_slice %152 {offsets = [0, 64], sizes = [2, 32], strides = [1, 1]} : vector<2x128xf32> to vector<2x32xf32>
    %191 = math.tanh %190 : vector<2x32xf32>
    %192 = vector.extract_strided_slice %152 {offsets = [0, 96], sizes = [2, 32], strides = [1, 1]} : vector<2x128xf32> to vector<2x32xf32>
    %cst_55 = arith.constant 0.000000e+00 : f32
    %193 = vector.broadcast %cst_55 : f32 to vector<2x32xf32>
    %194 = arith.subf %193, %192 : vector<2x32xf32>
    %195 = math.exp %194 : vector<2x32xf32>
    %cst_56 = arith.constant 1.000000e+00 : f32
    %196 = vector.broadcast %cst_56 : f32 to vector<2x32xf32>
    %197 = arith.addf %196, %195 : vector<2x32xf32>
    %198 = tpu.reciprocal %197 {approx = true} : vector<2x32xf32> -> vector<2x32xf32>
    %199 = arith.mulf %166, %135 : vector<2x32xf32>
    %200 = arith.mulf %159, %168 : vector<2x32xf32>
    %201 = arith.addf %199, %200 : vector<2x32xf32>
    %202 = math.tanh %201 : vector<2x32xf32>
    %203 = arith.mulf %175, %202 : vector<2x32xf32>
    %204 = arith.mulf %189, %140 : vector<2x32xf32>
    %205 = arith.mulf %182, %191 : vector<2x32xf32>
    %206 = arith.addf %204, %205 : vector<2x32xf32>
    %207 = math.tanh %206 : vector<2x32xf32>
    %208 = arith.mulf %198, %207 : vector<2x32xf32>
    %209 = vector.extract_strided_slice %2 {offsets = [6, 0], sizes = [2, 128], strides = [1, 1]} : vector<16x256xf32> to vector<2x128xf32>
    %cst_57 = arith.constant dense<0.000000e+00> : vector<2x128xf32>
    %210 = tpu.matmul %203, %3, %cst_57 {dimension_numbers = #tpu.dot_dimension_numbers<[1], [0], [0], [1], [0, 0, 1, 1], [], []>} : vector<2x32xf32>, vector<32x128xf32>, vector<2x128xf32> -> vector<2x128xf32>
    %211 = arith.addf %209, %210 : vector<2x128xf32>
    %212 = vector.broadcast %5 : vector<1x128xf32> to vector<2x128xf32>
    %213 = arith.addf %211, %212 : vector<2x128xf32>
    %214 = vector.extract_strided_slice %2 {offsets = [8, 128], sizes = [2, 128], strides = [1, 1]} : vector<16x256xf32> to vector<2x128xf32>
    %cst_58 = arith.constant dense<0.000000e+00> : vector<2x128xf32>
    %215 = tpu.matmul %208, %4, %cst_58 {dimension_numbers = #tpu.dot_dimension_numbers<[1], [0], [0], [1], [0, 0, 1, 1], [], []>} : vector<2x32xf32>, vector<32x128xf32>, vector<2x128xf32> -> vector<2x128xf32>
    %216 = arith.addf %214, %215 : vector<2x128xf32>
    %217 = vector.broadcast %6 : vector<1x128xf32> to vector<2x128xf32>
    %218 = arith.addf %216, %217 : vector<2x128xf32>
    %219 = vector.extract_strided_slice %213 {offsets = [0, 0], sizes = [2, 32], strides = [1, 1]} : vector<2x128xf32> to vector<2x32xf32>
    %cst_59 = arith.constant 0.000000e+00 : f32
    %220 = vector.broadcast %cst_59 : f32 to vector<2x32xf32>
    %221 = arith.subf %220, %219 : vector<2x32xf32>
    %222 = math.exp %221 : vector<2x32xf32>
    %cst_60 = arith.constant 1.000000e+00 : f32
    %223 = vector.broadcast %cst_60 : f32 to vector<2x32xf32>
    %224 = arith.addf %223, %222 : vector<2x32xf32>
    %225 = tpu.reciprocal %224 {approx = true} : vector<2x32xf32> -> vector<2x32xf32>
    %226 = vector.extract_strided_slice %213 {offsets = [0, 32], sizes = [2, 32], strides = [1, 1]} : vector<2x128xf32> to vector<2x32xf32>
    %cst_61 = arith.constant 0.000000e+00 : f32
    %227 = vector.broadcast %cst_61 : f32 to vector<2x32xf32>
    %228 = arith.subf %227, %226 : vector<2x32xf32>
    %229 = math.exp %228 : vector<2x32xf32>
    %cst_62 = arith.constant 1.000000e+00 : f32
    %230 = vector.broadcast %cst_62 : f32 to vector<2x32xf32>
    %231 = arith.addf %230, %229 : vector<2x32xf32>
    %232 = tpu.reciprocal %231 {approx = true} : vector<2x32xf32> -> vector<2x32xf32>
    %233 = vector.extract_strided_slice %213 {offsets = [0, 64], sizes = [2, 32], strides = [1, 1]} : vector<2x128xf32> to vector<2x32xf32>
    %234 = math.tanh %233 : vector<2x32xf32>
    %235 = vector.extract_strided_slice %213 {offsets = [0, 96], sizes = [2, 32], strides = [1, 1]} : vector<2x128xf32> to vector<2x32xf32>
    %cst_63 = arith.constant 0.000000e+00 : f32
    %236 = vector.broadcast %cst_63 : f32 to vector<2x32xf32>
    %237 = arith.subf %236, %235 : vector<2x32xf32>
    %238 = math.exp %237 : vector<2x32xf32>
    %cst_64 = arith.constant 1.000000e+00 : f32
    %239 = vector.broadcast %cst_64 : f32 to vector<2x32xf32>
    %240 = arith.addf %239, %238 : vector<2x32xf32>
    %241 = tpu.reciprocal %240 {approx = true} : vector<2x32xf32> -> vector<2x32xf32>
    %242 = vector.extract_strided_slice %218 {offsets = [0, 0], sizes = [2, 32], strides = [1, 1]} : vector<2x128xf32> to vector<2x32xf32>
    %cst_65 = arith.constant 0.000000e+00 : f32
    %243 = vector.broadcast %cst_65 : f32 to vector<2x32xf32>
    %244 = arith.subf %243, %242 : vector<2x32xf32>
    %245 = math.exp %244 : vector<2x32xf32>
    %cst_66 = arith.constant 1.000000e+00 : f32
    %246 = vector.broadcast %cst_66 : f32 to vector<2x32xf32>
    %247 = arith.addf %246, %245 : vector<2x32xf32>
    %248 = tpu.reciprocal %247 {approx = true} : vector<2x32xf32> -> vector<2x32xf32>
    %249 = vector.extract_strided_slice %218 {offsets = [0, 32], sizes = [2, 32], strides = [1, 1]} : vector<2x128xf32> to vector<2x32xf32>
    %cst_67 = arith.constant 0.000000e+00 : f32
    %250 = vector.broadcast %cst_67 : f32 to vector<2x32xf32>
    %251 = arith.subf %250, %249 : vector<2x32xf32>
    %252 = math.exp %251 : vector<2x32xf32>
    %cst_68 = arith.constant 1.000000e+00 : f32
    %253 = vector.broadcast %cst_68 : f32 to vector<2x32xf32>
    %254 = arith.addf %253, %252 : vector<2x32xf32>
    %255 = tpu.reciprocal %254 {approx = true} : vector<2x32xf32> -> vector<2x32xf32>
    %256 = vector.extract_strided_slice %218 {offsets = [0, 64], sizes = [2, 32], strides = [1, 1]} : vector<2x128xf32> to vector<2x32xf32>
    %257 = math.tanh %256 : vector<2x32xf32>
    %258 = vector.extract_strided_slice %218 {offsets = [0, 96], sizes = [2, 32], strides = [1, 1]} : vector<2x128xf32> to vector<2x32xf32>
    %cst_69 = arith.constant 0.000000e+00 : f32
    %259 = vector.broadcast %cst_69 : f32 to vector<2x32xf32>
    %260 = arith.subf %259, %258 : vector<2x32xf32>
    %261 = math.exp %260 : vector<2x32xf32>
    %cst_70 = arith.constant 1.000000e+00 : f32
    %262 = vector.broadcast %cst_70 : f32 to vector<2x32xf32>
    %263 = arith.addf %262, %261 : vector<2x32xf32>
    %264 = tpu.reciprocal %263 {approx = true} : vector<2x32xf32> -> vector<2x32xf32>
    %265 = arith.mulf %232, %201 : vector<2x32xf32>
    %266 = arith.mulf %225, %234 : vector<2x32xf32>
    %267 = arith.addf %265, %266 : vector<2x32xf32>
    %268 = math.tanh %267 : vector<2x32xf32>
    %269 = arith.mulf %241, %268 : vector<2x32xf32>
    %270 = arith.mulf %255, %206 : vector<2x32xf32>
    %271 = arith.mulf %248, %257 : vector<2x32xf32>
    %272 = arith.addf %270, %271 : vector<2x32xf32>
    %273 = math.tanh %272 : vector<2x32xf32>
    %274 = arith.mulf %264, %273 : vector<2x32xf32>
    %275 = vector.extract_strided_slice %2 {offsets = [8, 0], sizes = [2, 128], strides = [1, 1]} : vector<16x256xf32> to vector<2x128xf32>
    %cst_71 = arith.constant dense<0.000000e+00> : vector<2x128xf32>
    %276 = tpu.matmul %269, %3, %cst_71 {dimension_numbers = #tpu.dot_dimension_numbers<[1], [0], [0], [1], [0, 0, 1, 1], [], []>} : vector<2x32xf32>, vector<32x128xf32>, vector<2x128xf32> -> vector<2x128xf32>
    %277 = arith.addf %275, %276 : vector<2x128xf32>
    %278 = vector.broadcast %5 : vector<1x128xf32> to vector<2x128xf32>
    %279 = arith.addf %277, %278 : vector<2x128xf32>
    %280 = vector.extract_strided_slice %2 {offsets = [6, 128], sizes = [2, 128], strides = [1, 1]} : vector<16x256xf32> to vector<2x128xf32>
    %cst_72 = arith.constant dense<0.000000e+00> : vector<2x128xf32>
    %281 = tpu.matmul %274, %4, %cst_72 {dimension_numbers = #tpu.dot_dimension_numbers<[1], [0], [0], [1], [0, 0, 1, 1], [], []>} : vector<2x32xf32>, vector<32x128xf32>, vector<2x128xf32> -> vector<2x128xf32>
    %282 = arith.addf %280, %281 : vector<2x128xf32>
    %283 = vector.broadcast %6 : vector<1x128xf32> to vector<2x128xf32>
    %284 = arith.addf %282, %283 : vector<2x128xf32>
    %285 = vector.extract_strided_slice %279 {offsets = [0, 0], sizes = [2, 32], strides = [1, 1]} : vector<2x128xf32> to vector<2x32xf32>
    %cst_73 = arith.constant 0.000000e+00 : f32
    %286 = vector.broadcast %cst_73 : f32 to vector<2x32xf32>
    %287 = arith.subf %286, %285 : vector<2x32xf32>
    %288 = math.exp %287 : vector<2x32xf32>
    %cst_74 = arith.constant 1.000000e+00 : f32
    %289 = vector.broadcast %cst_74 : f32 to vector<2x32xf32>
    %290 = arith.addf %289, %288 : vector<2x32xf32>
    %291 = tpu.reciprocal %290 {approx = true} : vector<2x32xf32> -> vector<2x32xf32>
    %292 = vector.extract_strided_slice %279 {offsets = [0, 32], sizes = [2, 32], strides = [1, 1]} : vector<2x128xf32> to vector<2x32xf32>
    %cst_75 = arith.constant 0.000000e+00 : f32
    %293 = vector.broadcast %cst_75 : f32 to vector<2x32xf32>
    %294 = arith.subf %293, %292 : vector<2x32xf32>
    %295 = math.exp %294 : vector<2x32xf32>
    %cst_76 = arith.constant 1.000000e+00 : f32
    %296 = vector.broadcast %cst_76 : f32 to vector<2x32xf32>
    %297 = arith.addf %296, %295 : vector<2x32xf32>
    %298 = tpu.reciprocal %297 {approx = true} : vector<2x32xf32> -> vector<2x32xf32>
    %299 = vector.extract_strided_slice %279 {offsets = [0, 64], sizes = [2, 32], strides = [1, 1]} : vector<2x128xf32> to vector<2x32xf32>
    %300 = math.tanh %299 : vector<2x32xf32>
    %301 = vector.extract_strided_slice %279 {offsets = [0, 96], sizes = [2, 32], strides = [1, 1]} : vector<2x128xf32> to vector<2x32xf32>
    %cst_77 = arith.constant 0.000000e+00 : f32
    %302 = vector.broadcast %cst_77 : f32 to vector<2x32xf32>
    %303 = arith.subf %302, %301 : vector<2x32xf32>
    %304 = math.exp %303 : vector<2x32xf32>
    %cst_78 = arith.constant 1.000000e+00 : f32
    %305 = vector.broadcast %cst_78 : f32 to vector<2x32xf32>
    %306 = arith.addf %305, %304 : vector<2x32xf32>
    %307 = tpu.reciprocal %306 {approx = true} : vector<2x32xf32> -> vector<2x32xf32>
    %308 = vector.extract_strided_slice %284 {offsets = [0, 0], sizes = [2, 32], strides = [1, 1]} : vector<2x128xf32> to vector<2x32xf32>
    %cst_79 = arith.constant 0.000000e+00 : f32
    %309 = vector.broadcast %cst_79 : f32 to vector<2x32xf32>
    %310 = arith.subf %309, %308 : vector<2x32xf32>
    %311 = math.exp %310 : vector<2x32xf32>
    %cst_80 = arith.constant 1.000000e+00 : f32
    %312 = vector.broadcast %cst_80 : f32 to vector<2x32xf32>
    %313 = arith.addf %312, %311 : vector<2x32xf32>
    %314 = tpu.reciprocal %313 {approx = true} : vector<2x32xf32> -> vector<2x32xf32>
    %315 = vector.extract_strided_slice %284 {offsets = [0, 32], sizes = [2, 32], strides = [1, 1]} : vector<2x128xf32> to vector<2x32xf32>
    %cst_81 = arith.constant 0.000000e+00 : f32
    %316 = vector.broadcast %cst_81 : f32 to vector<2x32xf32>
    %317 = arith.subf %316, %315 : vector<2x32xf32>
    %318 = math.exp %317 : vector<2x32xf32>
    %cst_82 = arith.constant 1.000000e+00 : f32
    %319 = vector.broadcast %cst_82 : f32 to vector<2x32xf32>
    %320 = arith.addf %319, %318 : vector<2x32xf32>
    %321 = tpu.reciprocal %320 {approx = true} : vector<2x32xf32> -> vector<2x32xf32>
    %322 = vector.extract_strided_slice %284 {offsets = [0, 64], sizes = [2, 32], strides = [1, 1]} : vector<2x128xf32> to vector<2x32xf32>
    %323 = math.tanh %322 : vector<2x32xf32>
    %324 = vector.extract_strided_slice %284 {offsets = [0, 96], sizes = [2, 32], strides = [1, 1]} : vector<2x128xf32> to vector<2x32xf32>
    %cst_83 = arith.constant 0.000000e+00 : f32
    %325 = vector.broadcast %cst_83 : f32 to vector<2x32xf32>
    %326 = arith.subf %325, %324 : vector<2x32xf32>
    %327 = math.exp %326 : vector<2x32xf32>
    %cst_84 = arith.constant 1.000000e+00 : f32
    %328 = vector.broadcast %cst_84 : f32 to vector<2x32xf32>
    %329 = arith.addf %328, %327 : vector<2x32xf32>
    %330 = tpu.reciprocal %329 {approx = true} : vector<2x32xf32> -> vector<2x32xf32>
    %331 = arith.mulf %298, %267 : vector<2x32xf32>
    %332 = arith.mulf %291, %300 : vector<2x32xf32>
    %333 = arith.addf %331, %332 : vector<2x32xf32>
    %334 = math.tanh %333 : vector<2x32xf32>
    %335 = arith.mulf %307, %334 : vector<2x32xf32>
    %336 = arith.mulf %321, %272 : vector<2x32xf32>
    %337 = arith.mulf %314, %323 : vector<2x32xf32>
    %338 = arith.addf %336, %337 : vector<2x32xf32>
    %339 = math.tanh %338 : vector<2x32xf32>
    %340 = arith.mulf %330, %339 : vector<2x32xf32>
    %341 = vector.extract_strided_slice %2 {offsets = [10, 0], sizes = [2, 128], strides = [1, 1]} : vector<16x256xf32> to vector<2x128xf32>
    %cst_85 = arith.constant dense<0.000000e+00> : vector<2x128xf32>
    %342 = tpu.matmul %335, %3, %cst_85 {dimension_numbers = #tpu.dot_dimension_numbers<[1], [0], [0], [1], [0, 0, 1, 1], [], []>} : vector<2x32xf32>, vector<32x128xf32>, vector<2x128xf32> -> vector<2x128xf32>
    %343 = arith.addf %341, %342 : vector<2x128xf32>
    %344 = vector.broadcast %5 : vector<1x128xf32> to vector<2x128xf32>
    %345 = arith.addf %343, %344 : vector<2x128xf32>
    %346 = vector.extract_strided_slice %2 {offsets = [4, 128], sizes = [2, 128], strides = [1, 1]} : vector<16x256xf32> to vector<2x128xf32>
    %cst_86 = arith.constant dense<0.000000e+00> : vector<2x128xf32>
    %347 = tpu.matmul %340, %4, %cst_86 {dimension_numbers = #tpu.dot_dimension_numbers<[1], [0], [0], [1], [0, 0, 1, 1], [], []>} : vector<2x32xf32>, vector<32x128xf32>, vector<2x128xf32> -> vector<2x128xf32>
    %348 = arith.addf %346, %347 : vector<2x128xf32>
    %349 = vector.broadcast %6 : vector<1x128xf32> to vector<2x128xf32>
    %350 = arith.addf %348, %349 : vector<2x128xf32>
    %351 = vector.extract_strided_slice %345 {offsets = [0, 0], sizes = [2, 32], strides = [1, 1]} : vector<2x128xf32> to vector<2x32xf32>
    %cst_87 = arith.constant 0.000000e+00 : f32
    %352 = vector.broadcast %cst_87 : f32 to vector<2x32xf32>
    %353 = arith.subf %352, %351 : vector<2x32xf32>
    %354 = math.exp %353 : vector<2x32xf32>
    %cst_88 = arith.constant 1.000000e+00 : f32
    %355 = vector.broadcast %cst_88 : f32 to vector<2x32xf32>
    %356 = arith.addf %355, %354 : vector<2x32xf32>
    %357 = tpu.reciprocal %356 {approx = true} : vector<2x32xf32> -> vector<2x32xf32>
    %358 = vector.extract_strided_slice %345 {offsets = [0, 32], sizes = [2, 32], strides = [1, 1]} : vector<2x128xf32> to vector<2x32xf32>
    %cst_89 = arith.constant 0.000000e+00 : f32
    %359 = vector.broadcast %cst_89 : f32 to vector<2x32xf32>
    %360 = arith.subf %359, %358 : vector<2x32xf32>
    %361 = math.exp %360 : vector<2x32xf32>
    %cst_90 = arith.constant 1.000000e+00 : f32
    %362 = vector.broadcast %cst_90 : f32 to vector<2x32xf32>
    %363 = arith.addf %362, %361 : vector<2x32xf32>
    %364 = tpu.reciprocal %363 {approx = true} : vector<2x32xf32> -> vector<2x32xf32>
    %365 = vector.extract_strided_slice %345 {offsets = [0, 64], sizes = [2, 32], strides = [1, 1]} : vector<2x128xf32> to vector<2x32xf32>
    %366 = math.tanh %365 : vector<2x32xf32>
    %367 = vector.extract_strided_slice %345 {offsets = [0, 96], sizes = [2, 32], strides = [1, 1]} : vector<2x128xf32> to vector<2x32xf32>
    %cst_91 = arith.constant 0.000000e+00 : f32
    %368 = vector.broadcast %cst_91 : f32 to vector<2x32xf32>
    %369 = arith.subf %368, %367 : vector<2x32xf32>
    %370 = math.exp %369 : vector<2x32xf32>
    %cst_92 = arith.constant 1.000000e+00 : f32
    %371 = vector.broadcast %cst_92 : f32 to vector<2x32xf32>
    %372 = arith.addf %371, %370 : vector<2x32xf32>
    %373 = tpu.reciprocal %372 {approx = true} : vector<2x32xf32> -> vector<2x32xf32>
    %374 = vector.extract_strided_slice %350 {offsets = [0, 0], sizes = [2, 32], strides = [1, 1]} : vector<2x128xf32> to vector<2x32xf32>
    %cst_93 = arith.constant 0.000000e+00 : f32
    %375 = vector.broadcast %cst_93 : f32 to vector<2x32xf32>
    %376 = arith.subf %375, %374 : vector<2x32xf32>
    %377 = math.exp %376 : vector<2x32xf32>
    %cst_94 = arith.constant 1.000000e+00 : f32
    %378 = vector.broadcast %cst_94 : f32 to vector<2x32xf32>
    %379 = arith.addf %378, %377 : vector<2x32xf32>
    %380 = tpu.reciprocal %379 {approx = true} : vector<2x32xf32> -> vector<2x32xf32>
    %381 = vector.extract_strided_slice %350 {offsets = [0, 32], sizes = [2, 32], strides = [1, 1]} : vector<2x128xf32> to vector<2x32xf32>
    %cst_95 = arith.constant 0.000000e+00 : f32
    %382 = vector.broadcast %cst_95 : f32 to vector<2x32xf32>
    %383 = arith.subf %382, %381 : vector<2x32xf32>
    %384 = math.exp %383 : vector<2x32xf32>
    %cst_96 = arith.constant 1.000000e+00 : f32
    %385 = vector.broadcast %cst_96 : f32 to vector<2x32xf32>
    %386 = arith.addf %385, %384 : vector<2x32xf32>
    %387 = tpu.reciprocal %386 {approx = true} : vector<2x32xf32> -> vector<2x32xf32>
    %388 = vector.extract_strided_slice %350 {offsets = [0, 64], sizes = [2, 32], strides = [1, 1]} : vector<2x128xf32> to vector<2x32xf32>
    %389 = math.tanh %388 : vector<2x32xf32>
    %390 = vector.extract_strided_slice %350 {offsets = [0, 96], sizes = [2, 32], strides = [1, 1]} : vector<2x128xf32> to vector<2x32xf32>
    %cst_97 = arith.constant 0.000000e+00 : f32
    %391 = vector.broadcast %cst_97 : f32 to vector<2x32xf32>
    %392 = arith.subf %391, %390 : vector<2x32xf32>
    %393 = math.exp %392 : vector<2x32xf32>
    %cst_98 = arith.constant 1.000000e+00 : f32
    %394 = vector.broadcast %cst_98 : f32 to vector<2x32xf32>
    %395 = arith.addf %394, %393 : vector<2x32xf32>
    %396 = tpu.reciprocal %395 {approx = true} : vector<2x32xf32> -> vector<2x32xf32>
    %397 = arith.mulf %364, %333 : vector<2x32xf32>
    %398 = arith.mulf %357, %366 : vector<2x32xf32>
    %399 = arith.addf %397, %398 : vector<2x32xf32>
    %400 = math.tanh %399 : vector<2x32xf32>
    %401 = arith.mulf %373, %400 : vector<2x32xf32>
    %402 = arith.mulf %387, %338 : vector<2x32xf32>
    %403 = arith.mulf %380, %389 : vector<2x32xf32>
    %404 = arith.addf %402, %403 : vector<2x32xf32>
    %405 = math.tanh %404 : vector<2x32xf32>
    %406 = arith.mulf %396, %405 : vector<2x32xf32>
    %407 = vector.extract_strided_slice %2 {offsets = [12, 0], sizes = [2, 128], strides = [1, 1]} : vector<16x256xf32> to vector<2x128xf32>
    %cst_99 = arith.constant dense<0.000000e+00> : vector<2x128xf32>
    %408 = tpu.matmul %401, %3, %cst_99 {dimension_numbers = #tpu.dot_dimension_numbers<[1], [0], [0], [1], [0, 0, 1, 1], [], []>} : vector<2x32xf32>, vector<32x128xf32>, vector<2x128xf32> -> vector<2x128xf32>
    %409 = arith.addf %407, %408 : vector<2x128xf32>
    %410 = vector.broadcast %5 : vector<1x128xf32> to vector<2x128xf32>
    %411 = arith.addf %409, %410 : vector<2x128xf32>
    %412 = vector.extract_strided_slice %2 {offsets = [2, 128], sizes = [2, 128], strides = [1, 1]} : vector<16x256xf32> to vector<2x128xf32>
    %cst_100 = arith.constant dense<0.000000e+00> : vector<2x128xf32>
    %413 = tpu.matmul %406, %4, %cst_100 {dimension_numbers = #tpu.dot_dimension_numbers<[1], [0], [0], [1], [0, 0, 1, 1], [], []>} : vector<2x32xf32>, vector<32x128xf32>, vector<2x128xf32> -> vector<2x128xf32>
    %414 = arith.addf %412, %413 : vector<2x128xf32>
    %415 = vector.broadcast %6 : vector<1x128xf32> to vector<2x128xf32>
    %416 = arith.addf %414, %415 : vector<2x128xf32>
    %417 = vector.extract_strided_slice %411 {offsets = [0, 0], sizes = [2, 32], strides = [1, 1]} : vector<2x128xf32> to vector<2x32xf32>
    %cst_101 = arith.constant 0.000000e+00 : f32
    %418 = vector.broadcast %cst_101 : f32 to vector<2x32xf32>
    %419 = arith.subf %418, %417 : vector<2x32xf32>
    %420 = math.exp %419 : vector<2x32xf32>
    %cst_102 = arith.constant 1.000000e+00 : f32
    %421 = vector.broadcast %cst_102 : f32 to vector<2x32xf32>
    %422 = arith.addf %421, %420 : vector<2x32xf32>
    %423 = tpu.reciprocal %422 {approx = true} : vector<2x32xf32> -> vector<2x32xf32>
    %424 = vector.extract_strided_slice %411 {offsets = [0, 32], sizes = [2, 32], strides = [1, 1]} : vector<2x128xf32> to vector<2x32xf32>
    %cst_103 = arith.constant 0.000000e+00 : f32
    %425 = vector.broadcast %cst_103 : f32 to vector<2x32xf32>
    %426 = arith.subf %425, %424 : vector<2x32xf32>
    %427 = math.exp %426 : vector<2x32xf32>
    %cst_104 = arith.constant 1.000000e+00 : f32
    %428 = vector.broadcast %cst_104 : f32 to vector<2x32xf32>
    %429 = arith.addf %428, %427 : vector<2x32xf32>
    %430 = tpu.reciprocal %429 {approx = true} : vector<2x32xf32> -> vector<2x32xf32>
    %431 = vector.extract_strided_slice %411 {offsets = [0, 64], sizes = [2, 32], strides = [1, 1]} : vector<2x128xf32> to vector<2x32xf32>
    %432 = math.tanh %431 : vector<2x32xf32>
    %433 = vector.extract_strided_slice %411 {offsets = [0, 96], sizes = [2, 32], strides = [1, 1]} : vector<2x128xf32> to vector<2x32xf32>
    %cst_105 = arith.constant 0.000000e+00 : f32
    %434 = vector.broadcast %cst_105 : f32 to vector<2x32xf32>
    %435 = arith.subf %434, %433 : vector<2x32xf32>
    %436 = math.exp %435 : vector<2x32xf32>
    %cst_106 = arith.constant 1.000000e+00 : f32
    %437 = vector.broadcast %cst_106 : f32 to vector<2x32xf32>
    %438 = arith.addf %437, %436 : vector<2x32xf32>
    %439 = tpu.reciprocal %438 {approx = true} : vector<2x32xf32> -> vector<2x32xf32>
    %440 = vector.extract_strided_slice %416 {offsets = [0, 0], sizes = [2, 32], strides = [1, 1]} : vector<2x128xf32> to vector<2x32xf32>
    %cst_107 = arith.constant 0.000000e+00 : f32
    %441 = vector.broadcast %cst_107 : f32 to vector<2x32xf32>
    %442 = arith.subf %441, %440 : vector<2x32xf32>
    %443 = math.exp %442 : vector<2x32xf32>
    %cst_108 = arith.constant 1.000000e+00 : f32
    %444 = vector.broadcast %cst_108 : f32 to vector<2x32xf32>
    %445 = arith.addf %444, %443 : vector<2x32xf32>
    %446 = tpu.reciprocal %445 {approx = true} : vector<2x32xf32> -> vector<2x32xf32>
    %447 = vector.extract_strided_slice %416 {offsets = [0, 32], sizes = [2, 32], strides = [1, 1]} : vector<2x128xf32> to vector<2x32xf32>
    %cst_109 = arith.constant 0.000000e+00 : f32
    %448 = vector.broadcast %cst_109 : f32 to vector<2x32xf32>
    %449 = arith.subf %448, %447 : vector<2x32xf32>
    %450 = math.exp %449 : vector<2x32xf32>
    %cst_110 = arith.constant 1.000000e+00 : f32
    %451 = vector.broadcast %cst_110 : f32 to vector<2x32xf32>
    %452 = arith.addf %451, %450 : vector<2x32xf32>
    %453 = tpu.reciprocal %452 {approx = true} : vector<2x32xf32> -> vector<2x32xf32>
    %454 = vector.extract_strided_slice %416 {offsets = [0, 64], sizes = [2, 32], strides = [1, 1]} : vector<2x128xf32> to vector<2x32xf32>
    %455 = math.tanh %454 : vector<2x32xf32>
    %456 = vector.extract_strided_slice %416 {offsets = [0, 96], sizes = [2, 32], strides = [1, 1]} : vector<2x128xf32> to vector<2x32xf32>
    %cst_111 = arith.constant 0.000000e+00 : f32
    %457 = vector.broadcast %cst_111 : f32 to vector<2x32xf32>
    %458 = arith.subf %457, %456 : vector<2x32xf32>
    %459 = math.exp %458 : vector<2x32xf32>
    %cst_112 = arith.constant 1.000000e+00 : f32
    %460 = vector.broadcast %cst_112 : f32 to vector<2x32xf32>
    %461 = arith.addf %460, %459 : vector<2x32xf32>
    %462 = tpu.reciprocal %461 {approx = true} : vector<2x32xf32> -> vector<2x32xf32>
    %463 = arith.mulf %430, %399 : vector<2x32xf32>
    %464 = arith.mulf %423, %432 : vector<2x32xf32>
    %465 = arith.addf %463, %464 : vector<2x32xf32>
    %466 = math.tanh %465 : vector<2x32xf32>
    %467 = arith.mulf %439, %466 : vector<2x32xf32>
    %468 = arith.mulf %453, %404 : vector<2x32xf32>
    %469 = arith.mulf %446, %455 : vector<2x32xf32>
    %470 = arith.addf %468, %469 : vector<2x32xf32>
    %471 = math.tanh %470 : vector<2x32xf32>
    %472 = arith.mulf %462, %471 : vector<2x32xf32>
    %473 = vector.extract_strided_slice %2 {offsets = [14, 0], sizes = [2, 128], strides = [1, 1]} : vector<16x256xf32> to vector<2x128xf32>
    %cst_113 = arith.constant dense<0.000000e+00> : vector<2x128xf32>
    %474 = tpu.matmul %467, %3, %cst_113 {dimension_numbers = #tpu.dot_dimension_numbers<[1], [0], [0], [1], [0, 0, 1, 1], [], []>} : vector<2x32xf32>, vector<32x128xf32>, vector<2x128xf32> -> vector<2x128xf32>
    %475 = arith.addf %473, %474 : vector<2x128xf32>
    %476 = vector.broadcast %5 : vector<1x128xf32> to vector<2x128xf32>
    %477 = arith.addf %475, %476 : vector<2x128xf32>
    %478 = vector.extract_strided_slice %2 {offsets = [0, 128], sizes = [2, 128], strides = [1, 1]} : vector<16x256xf32> to vector<2x128xf32>
    %cst_114 = arith.constant dense<0.000000e+00> : vector<2x128xf32>
    %479 = tpu.matmul %472, %4, %cst_114 {dimension_numbers = #tpu.dot_dimension_numbers<[1], [0], [0], [1], [0, 0, 1, 1], [], []>} : vector<2x32xf32>, vector<32x128xf32>, vector<2x128xf32> -> vector<2x128xf32>
    %480 = arith.addf %478, %479 : vector<2x128xf32>
    %481 = vector.broadcast %6 : vector<1x128xf32> to vector<2x128xf32>
    %482 = arith.addf %480, %481 : vector<2x128xf32>
    %483 = vector.extract_strided_slice %477 {offsets = [0, 0], sizes = [2, 32], strides = [1, 1]} : vector<2x128xf32> to vector<2x32xf32>
    %cst_115 = arith.constant 0.000000e+00 : f32
    %484 = vector.broadcast %cst_115 : f32 to vector<2x32xf32>
    %485 = arith.subf %484, %483 : vector<2x32xf32>
    %486 = math.exp %485 : vector<2x32xf32>
    %cst_116 = arith.constant 1.000000e+00 : f32
    %487 = vector.broadcast %cst_116 : f32 to vector<2x32xf32>
    %488 = arith.addf %487, %486 : vector<2x32xf32>
    %489 = tpu.reciprocal %488 {approx = true} : vector<2x32xf32> -> vector<2x32xf32>
    %490 = vector.extract_strided_slice %477 {offsets = [0, 32], sizes = [2, 32], strides = [1, 1]} : vector<2x128xf32> to vector<2x32xf32>
    %cst_117 = arith.constant 0.000000e+00 : f32
    %491 = vector.broadcast %cst_117 : f32 to vector<2x32xf32>
    %492 = arith.subf %491, %490 : vector<2x32xf32>
    %493 = math.exp %492 : vector<2x32xf32>
    %cst_118 = arith.constant 1.000000e+00 : f32
    %494 = vector.broadcast %cst_118 : f32 to vector<2x32xf32>
    %495 = arith.addf %494, %493 : vector<2x32xf32>
    %496 = tpu.reciprocal %495 {approx = true} : vector<2x32xf32> -> vector<2x32xf32>
    %497 = vector.extract_strided_slice %477 {offsets = [0, 64], sizes = [2, 32], strides = [1, 1]} : vector<2x128xf32> to vector<2x32xf32>
    %498 = math.tanh %497 : vector<2x32xf32>
    %499 = vector.extract_strided_slice %477 {offsets = [0, 96], sizes = [2, 32], strides = [1, 1]} : vector<2x128xf32> to vector<2x32xf32>
    %cst_119 = arith.constant 0.000000e+00 : f32
    %500 = vector.broadcast %cst_119 : f32 to vector<2x32xf32>
    %501 = arith.subf %500, %499 : vector<2x32xf32>
    %502 = math.exp %501 : vector<2x32xf32>
    %cst_120 = arith.constant 1.000000e+00 : f32
    %503 = vector.broadcast %cst_120 : f32 to vector<2x32xf32>
    %504 = arith.addf %503, %502 : vector<2x32xf32>
    %505 = tpu.reciprocal %504 {approx = true} : vector<2x32xf32> -> vector<2x32xf32>
    %506 = vector.extract_strided_slice %482 {offsets = [0, 0], sizes = [2, 32], strides = [1, 1]} : vector<2x128xf32> to vector<2x32xf32>
    %cst_121 = arith.constant 0.000000e+00 : f32
    %507 = vector.broadcast %cst_121 : f32 to vector<2x32xf32>
    %508 = arith.subf %507, %506 : vector<2x32xf32>
    %509 = math.exp %508 : vector<2x32xf32>
    %cst_122 = arith.constant 1.000000e+00 : f32
    %510 = vector.broadcast %cst_122 : f32 to vector<2x32xf32>
    %511 = arith.addf %510, %509 : vector<2x32xf32>
    %512 = tpu.reciprocal %511 {approx = true} : vector<2x32xf32> -> vector<2x32xf32>
    %513 = vector.extract_strided_slice %482 {offsets = [0, 32], sizes = [2, 32], strides = [1, 1]} : vector<2x128xf32> to vector<2x32xf32>
    %cst_123 = arith.constant 0.000000e+00 : f32
    %514 = vector.broadcast %cst_123 : f32 to vector<2x32xf32>
    %515 = arith.subf %514, %513 : vector<2x32xf32>
    %516 = math.exp %515 : vector<2x32xf32>
    %cst_124 = arith.constant 1.000000e+00 : f32
    %517 = vector.broadcast %cst_124 : f32 to vector<2x32xf32>
    %518 = arith.addf %517, %516 : vector<2x32xf32>
    %519 = tpu.reciprocal %518 {approx = true} : vector<2x32xf32> -> vector<2x32xf32>
    %520 = vector.extract_strided_slice %482 {offsets = [0, 64], sizes = [2, 32], strides = [1, 1]} : vector<2x128xf32> to vector<2x32xf32>
    %521 = math.tanh %520 : vector<2x32xf32>
    %522 = vector.extract_strided_slice %482 {offsets = [0, 96], sizes = [2, 32], strides = [1, 1]} : vector<2x128xf32> to vector<2x32xf32>
    %cst_125 = arith.constant 0.000000e+00 : f32
    %523 = vector.broadcast %cst_125 : f32 to vector<2x32xf32>
    %524 = arith.subf %523, %522 : vector<2x32xf32>
    %525 = math.exp %524 : vector<2x32xf32>
    %cst_126 = arith.constant 1.000000e+00 : f32
    %526 = vector.broadcast %cst_126 : f32 to vector<2x32xf32>
    %527 = arith.addf %526, %525 : vector<2x32xf32>
    %528 = tpu.reciprocal %527 {approx = true} : vector<2x32xf32> -> vector<2x32xf32>
    %529 = arith.mulf %496, %465 : vector<2x32xf32>
    %530 = arith.mulf %489, %498 : vector<2x32xf32>
    %531 = arith.addf %529, %530 : vector<2x32xf32>
    %532 = math.tanh %531 : vector<2x32xf32>
    %533 = arith.mulf %505, %532 : vector<2x32xf32>
    %534 = arith.mulf %519, %470 : vector<2x32xf32>
    %535 = arith.mulf %512, %521 : vector<2x32xf32>
    %536 = arith.addf %534, %535 : vector<2x32xf32>
    %537 = math.tanh %536 : vector<2x32xf32>
    %538 = arith.mulf %528, %537 : vector<2x32xf32>
    %539 = tpu.concatenate %71, %137, %203, %269, %335, %401, %467, %533 in 0 : vector<2x32xf32>, vector<2x32xf32>, vector<2x32xf32>, vector<2x32xf32>, vector<2x32xf32>, vector<2x32xf32>, vector<2x32xf32>, vector<2x32xf32> -> vector<16x32xf32>
    %540 = tpu.concatenate %538, %472, %406, %340, %274, %208, %142, %76 in 0 : vector<2x32xf32>, vector<2x32xf32>, vector<2x32xf32>, vector<2x32xf32>, vector<2x32xf32>, vector<2x32xf32>, vector<2x32xf32>, vector<2x32xf32> -> vector<16x32xf32>
    %541 = tpu.concatenate %539, %540 in 1 : vector<16x32xf32>, vector<16x32xf32> -> vector<16x64xf32>
    %c0_127 = arith.constant 0 : index
    %c0_128 = arith.constant 0 : index
    %542 = vector.load %arg6[%c0_127, %c0_128] : memref<16x64xf32, #tpu.memory_space<vmem>>, vector<16x64xf32>
    tpu.vector_store %arg6[%c0_127, %c0_128], %541 {strides = array<i32>} : memref<16x64xf32, #tpu.memory_space<vmem>>, vector<16x64xf32>,
    return
  }
}

module attributes {stable_mosaic.version = 11 : i64} {
  func.func @_heads_kernel(%arg0: memref<16x64xf32, #tpu.memory_space<vmem>>, %arg1: memref<16x64xf32, #tpu.memory_space<vmem>>, %arg2: memref<64x64xf32, #tpu.memory_space<vmem>>, %arg3: memref<1x64xf32, #tpu.memory_space<vmem>>, %arg4: memref<64x1xf32, #tpu.memory_space<vmem>>, %arg5: memref<1x1xf32, #tpu.memory_space<vmem>>, %arg6: memref<1x8xf32, #tpu.memory_space<vmem>>, %arg7: memref<1x1xf32, #tpu.memory_space<vmem>>, %arg8: memref<9x2xf32, #tpu.memory_space<vmem>>) attributes {dimension_semantics = [], scalar_prefetch = 0 : i64, scratch_operands = 0 : i64, tpu.core_type = #tpu.core_type<tc>} {
    %c0 = arith.constant 0 : index
    %c0_0 = arith.constant 0 : index
    %0 = vector.load %arg0[%c0, %c0_0] : memref<16x64xf32, #tpu.memory_space<vmem>>, vector<16x64xf32>
    %c0_1 = arith.constant 0 : index
    %c0_2 = arith.constant 0 : index
    %1 = vector.load %arg2[%c0_1, %c0_2] : memref<64x64xf32, #tpu.memory_space<vmem>>, vector<64x64xf32>
    %cst = arith.constant dense<0.000000e+00> : vector<16x64xf32>
    %2 = tpu.matmul %0, %1, %cst {dimension_numbers = #tpu.dot_dimension_numbers<[1], [0], [0], [1], [0, 0, 1, 1], [], []>} : vector<16x64xf32>, vector<64x64xf32>, vector<16x64xf32> -> vector<16x64xf32>
    %c0_3 = arith.constant 0 : index
    %c0_4 = arith.constant 0 : index
    %3 = vector.load %arg3[%c0_3, %c0_4] : memref<1x64xf32, #tpu.memory_space<vmem>>, vector<1x64xf32>
    %4 = vector.broadcast %3 : vector<1x64xf32> to vector<16x64xf32>
    %5 = arith.addf %2, %4 : vector<16x64xf32>
    %c0_5 = arith.constant 0 : index
    %c0_6 = arith.constant 0 : index
    %6 = vector.load %arg1[%c0_5, %c0_6] : memref<16x64xf32, #tpu.memory_space<vmem>>, vector<16x64xf32>
    %7 = arith.addf %5, %6 : vector<16x64xf32>
    %cst_7 = arith.constant 0.000000e+00 : f32
    %8 = vector.broadcast %cst_7 : f32 to vector<16x64xf32>
    %9 = arith.maximumf %7, %8 : vector<16x64xf32>
    %c0_8 = arith.constant 0 : index
    %c0_9 = arith.constant 0 : index
    %10 = vector.load %arg4[%c0_8, %c0_9] : memref<64x1xf32, #tpu.memory_space<vmem>>, vector<64x1xf32>
    %11 = vector.extract_strided_slice %9 {offsets = [0, 0], sizes = [8, 64], strides = [1, 1]} : vector<16x64xf32> to vector<8x64xf32>
    %cst_10 = arith.constant dense<0.000000e+00> : vector<8x1xf32>
    %12 = tpu.matmul %11, %10, %cst_10 {dimension_numbers = #tpu.dot_dimension_numbers<[1], [0], [0], [1], [0, 0, 1, 1], [], []>} : vector<8x64xf32>, vector<64x1xf32>, vector<8x1xf32> -> vector<8x1xf32>
    %13 = vector.extract_strided_slice %9 {offsets = [8, 0], sizes = [8, 64], strides = [1, 1]} : vector<16x64xf32> to vector<8x64xf32>
    %cst_11 = arith.constant dense<0.000000e+00> : vector<8x1xf32>
    %14 = tpu.matmul %13, %10, %cst_11 {dimension_numbers = #tpu.dot_dimension_numbers<[1], [0], [0], [1], [0, 0, 1, 1], [], []>} : vector<8x64xf32>, vector<64x1xf32>, vector<8x1xf32> -> vector<8x1xf32>
    %15 = tpu.concatenate %12, %14 in 1 : vector<8x1xf32>, vector<8x1xf32> -> vector<8x2xf32>
    %c0_12 = arith.constant 0 : index
    %c0_13 = arith.constant 0 : index
    %16 = vector.load %arg5[%c0_12, %c0_13] : memref<1x1xf32, #tpu.memory_space<vmem>>, vector<1x1xf32>
    %17 = vector.broadcast %16 : vector<1x1xf32> to vector<8x2xf32>
    %18 = arith.addf %15, %17 : vector<8x2xf32>
    %c0_14 = arith.constant 0 : index
    %c0_15 = arith.constant 0 : index
    %19 = vector.load %arg6[%c0_14, %c0_15] : memref<1x8xf32, #tpu.memory_space<vmem>>, vector<1x8xf32>
    %cst_16 = arith.constant dense<0.000000e+00> : vector<1x2xf32>
    %20 = tpu.matmul %19, %18, %cst_16 {dimension_numbers = #tpu.dot_dimension_numbers<[1], [0], [0], [1], [0, 0, 1, 1], [], []>} : vector<1x8xf32>, vector<8x2xf32>, vector<1x2xf32> -> vector<1x2xf32>
    %c0_17 = arith.constant 0 : index
    %c0_18 = arith.constant 0 : index
    %21 = vector.load %arg7[%c0_17, %c0_18] : memref<1x1xf32, #tpu.memory_space<vmem>>, vector<1x1xf32>
    %22 = vector.broadcast %21 : vector<1x1xf32> to vector<1x2xf32>
    %23 = arith.addf %20, %22 : vector<1x2xf32>
    %24 = tpu.concatenate %18, %23 in 0 : vector<8x2xf32>, vector<1x2xf32> -> vector<9x2xf32>
    %c0_19 = arith.constant 0 : index
    %c0_20 = arith.constant 0 : index
    %25 = vector.load %arg8[%c0_19, %c0_20] : memref<9x2xf32, #tpu.memory_space<vmem>>, vector<9x2xf32>
    tpu.vector_store %arg8[%c0_19, %c0_20], %24 {strides = array<i32>} : memref<9x2xf32, #tpu.memory_space<vmem>>, vector<9x2xf32>,
    return
  }
}

</mosaic_0001>

<bundles_post_ra>
// kernel: cnn_lstm_forward.5
= control target key start
LH: loop header
LB: loop body
LE: loop exit
PB: predicated region body
PF: predicated region fallthrough
CT: control target
= control target key end

     0   :  { %vm426_vm0 = vcmask 1045504   ;;  %vm125_vm1 = vcmask 244736   ;;  %vm1764_vm2 = vcmask 130048   ;;  %s3520_s2 = inlined_call_operand.vmem [shape: f32[30,16], index: 2, kind: input, shape index: {}]   ;;  %s3521_s0 = inlined_call_operand.vmem [shape: f32[800,30], index: 0, kind: input, shape index: {}]   ;;  %s3522_s1 = inlined_call_operand.vmem [shape: f32[800,30], index: 1, kind: input, shape index: {}]   ;;  %s3523_s3 = inlined_call_operand.vmem [shape: f32[1,16], index: 3, kind: input, shape index: {}]   ;;  %s3524_s4 = inlined_call_operand.vmem [shape: f32[800,16], index: 4, kind: output, shape index: {}]  }
   0x1   :  { %v20_v0 = vld [vmem:[%s3520_s2 + $0x18] sm:$0x3f]  ;;  %v19_v1 = vld [vmem:[%s3520_s2 + $0x10] sm:$0xff]  ;;  %v18_v2 = vld [vmem:[%s3520_s2 + $0x8] sm:$0xff] }
   0x2   :  { %2071 = vmatpush.msk.msra.mxu2 %vm426_vm0, %v20_v0  ;;  %2075 = vmatpush.msk.msra.mxu3 %vm426_vm0, %v20_v0  ;;  %v17_v3 = vld [vmem:[%s3520_s2] sm:$0xff]  ;;  %v72_v4 = vld [vmem:[%s3521_s0 + $0x190] sm:$0xff]  ;;  %v73_v8 = vld [vmem:[%s3521_s0 + $0x198] sm:$0xff] }
   0x3   :  { %1869 = vmatpush.msk.msra.mxu0 %vm426_vm0, %v20_v0  ;;  %1970 = vmatpush.msk.msra.mxu1 %vm426_vm0, %v20_v0  ;;  %v897_v5 = vld [vmem:[%s3522_s1 + $0x190] sm:$0xff]  ;;  %v22_v6 = vld [vmem:[%s3521_s0] sm:$0xff]  ;;  %v898_v9 = vld [vmem:[%s3522_s1 + $0x198] sm:$0xff] }
   0x4   :  { %2072 = vmatpush.msra.mxu2 %v19_v1  ;;  %2076 = vmatpush.msra.mxu3 %v19_v1  ;;  %v847_v7 = vld [vmem:[%s3522_s1] sm:$0xff]  ;;  %v23_v10 = vld [vmem:[%s3521_s0 + $0x8] sm:$0xff]  ;;  %v24_v14 = vld [vmem:[%s3521_s0 + $0x10] sm:$0xff] }
   0x5   :  { %443 = vmatpush.msra.mxu0 %v19_v1  ;;  %1260 = vmatpush.msra.mxu1 %v19_v1  ;;  %v848_v11 = vld [vmem:[%s3522_s1 + $0x8] sm:$0xff]  ;;  %v74_v12 = vld [vmem:[%s3521_s0 + $0x1a0] sm:$0xff]  ;;  %v849_v15 = vld [vmem:[%s3522_s1 + $0x10] sm:$0xff] }
   0x6   :  { %2073 = vmatpush.msra.mxu2 %v18_v2  ;;  %2077 = vmatpush.msra.mxu3 %v18_v2  ;;  %v899_v13 = vld [vmem:[%s3522_s1 + $0x1a0] sm:$0xff]  ;;  %v75_v16 = vld [vmem:[%s3521_s0 + $0x1a8] sm:$0xff]  ;;  %v25_v18 = vld [vmem:[%s3521_s0 + $0x18] sm:$0xff] }
   0x7   :  { %444 = vmatpush.msra.mxu0 %v18_v2  ;;  %1261 = vmatpush.msra.mxu1 %v18_v2  ;;  %v900_v17 = vld [vmem:[%s3522_s1 + $0x1a8] sm:$0xff]  ;;  %v850_v19 = vld [vmem:[%s3522_s1 + $0x18] sm:$0xff]  ;;  %v76_v20 = vld [vmem:[%s3521_s0 + $0x1b0] sm:$0xff] }
   0x8   :  { %2074 = vmatpush.msra.mxu2 %v17_v3  ;;  %2078 = vmatpush.msra.mxu3 %v17_v3  ;;  %v901_v21 = vld [vmem:[%s3522_s1 + $0x1b0] sm:$0xff]  ;;  %v26_v22 = vld [vmem:[%s3521_s0 + $0x20] sm:$0xff]  ;;  %v77_v24 = vld [vmem:[%s3521_s0 + $0x1b8] sm:$0xff] }
   0x9   :  { %1920 = vmatmul.msk.f32.vlgmr.msra.gmra.mxu2 %vm125_vm1, %v72_v4  ;;  %2021 = vmatmul.msk.f32.vlgmr.msra.gmra.mxu3 %vm125_vm1, %v897_v5  ;;  %v851_v23 = vld [vmem:[%s3522_s1 + $0x20] sm:$0xff]  ;;  %v902_v25 = vld [vmem:[%s3522_s1 + $0x1b8] sm:$0xff]  ;;  %v27_v26 = vld [vmem:[%s3521_s0 + $0x28] sm:$0xff] }
   0xa   :  { %445 = vmatpush.msra.mxu0 %v17_v3  ;;  %1262 = vmatpush.msra.mxu1 %v17_v3  ;;  %v852_v27 = vld [vmem:[%s3522_s1 + $0x28] sm:$0xff]  ;;  %v78_v28 = vld [vmem:[%s3521_s0 + $0x1c0] sm:$0xff]  ;;  %v28_v30 = vld [vmem:[%s3521_s0 + $0x30] sm:$0xff] }
   0xb   :  { %1870 = vmatmul.msk.f32.vlgmr.msra.gmra.mxu0 %vm125_vm1, %v22_v6  ;;  %1971 = vmatmul.msk.f32.vlgmr.msra.gmra.mxu1 %vm125_vm1, %v847_v7  ;;  %v903_v29 = vld [vmem:[%s3522_s1 + $0x1c0] sm:$0xff]  ;;  %v853_v31 = vld [vmem:[%s3522_s1 + $0x30] sm:$0xff]  ;;  %v79_v32 = vld [vmem:[%s3521_s0 + $0x1c8] sm:$0xff] }
   0xc   :  { %v904_v33 = vld [vmem:[%s3522_s1 + $0x1c8] sm:$0xff]  ;;  %v29_v34 = vld [vmem:[%s3521_s0 + $0x38] sm:$0xff]  ;;  %v80_v36 = vld [vmem:[%s3521_s0 + $0x1d0] sm:$0xff] }
   0xd   :  { %v854_v35 = vld [vmem:[%s3522_s1 + $0x38] sm:$0xff]  ;;  %v905_v37 = vld [vmem:[%s3522_s1 + $0x1d0] sm:$0xff]  ;;  %v30_v38 = vld [vmem:[%s3521_s0 + $0x40] sm:$0xff] }
   0xe   :  { %v855_v39 = vld [vmem:[%s3522_s1 + $0x40] sm:$0xff]  ;;  %v81_v40 = vld [vmem:[%s3521_s0 + $0x1d8] sm:$0xff]  ;;  %v31_v42 = vld [vmem:[%s3521_s0 + $0x48] sm:$0xff] }
   0xf   :  { %v906_v41 = vld [vmem:[%s3522_s1 + $0x1d8] sm:$0xff]  ;;  %v856_v43 = vld [vmem:[%s3522_s1 + $0x48] sm:$0xff]  ;;  %v82_v44 = vld [vmem:[%s3521_s0 + $0x1e0] sm:$0xff] }
  0x10   :  { %v907_v45 = vld [vmem:[%s3522_s1 + $0x1e0] sm:$0xff]  ;;  %v32_v46 = vld [vmem:[%s3521_s0 + $0x50] sm:$0xff]  ;;  %v83_v48 = vld [vmem:[%s3521_s0 + $0x1e8] sm:$0xff] }
  0x11   :  { %1921 = vmatmul.msk.f32.gmra.mxu2 %vm125_vm1, %v73_v8  ;;  %2022 = vmatmul.msk.f32.gmra.mxu3 %vm125_vm1, %v898_v9  ;;  %v857_v47 = vld [vmem:[%s3522_s1 + $0x50] sm:$0xff]  ;;  %v908_v49 = vld [vmem:[%s3522_s1 + $0x1e8] sm:$0xff]  ;;  %v33_v50 = vld [vmem:[%s3521_s0 + $0x58] sm:$0xff] }
  0x12   :  { %v858_v51 = vld [vmem:[%s3522_s1 + $0x58] sm:$0xff]  ;;  %v84_v52 = vld [vmem:[%s3521_s0 + $0x1f0] sm:$0xff]  ;;  %v34_v54 = vld [vmem:[%s3521_s0 + $0x60] sm:$0xff] }
  0x13   :  { %1871 = vmatmul.msk.f32.gmra.mxu0 %vm125_vm1, %v23_v10  ;;  %1972 = vmatmul.msk.f32.gmra.mxu1 %vm125_vm1, %v848_v11  ;;  %v909_v53 = vld [vmem:[%s3522_s1 + $0x1f0] sm:$0xff]  ;;  %v859_v55 = vld [vmem:[%s3522_s1 + $0x60] sm:$0xff]  ;;  %v85_v56 = vld [vmem:[%s3521_s0 + $0x1f8] sm:$0xff] }
  0x14   :  { %v910_v57 = vld [vmem:[%s3522_s1 + $0x1f8] sm:$0xff]  ;;  %v35_v58 = vld [vmem:[%s3521_s0 + $0x68] sm:$0xff]  ;;  %v86_v60 = vld [vmem:[%s3521_s0 + $0x200] sm:$0xff] }
  0x15   :  { %v860_v59 = vld [vmem:[%s3522_s1 + $0x68] sm:$0xff]  ;;  %v911_v61 = vld [vmem:[%s3522_s1 + $0x200] sm:$0xff]  ;;  %v36_v62 = vld [vmem:[%s3521_s0 + $0x70] sm:$0xff] }
  0x16   :  { %v861_v63 = vld [vmem:[%s3522_s1 + $0x70] sm:$0xff]  ;;  %v87_v0 = vld [vmem:[%s3521_s0 + $0x208] sm:$0xff]  ;;  %v37_v2 = vld [vmem:[%s3521_s0 + $0x78] sm:$0xff] }
  0x17   :  { %v912_v1 = vld [vmem:[%s3522_s1 + $0x208] sm:$0xff]  ;;  %v862_v3 = vld [vmem:[%s3522_s1 + $0x78] sm:$0xff]  ;;  %v2378_v4 = vld [vmem:[%s3523_s3] ss:$0 sm:$0xff] }
  0x18   :  { %v88_v5 = vld [vmem:[%s3521_s0 + $0x210] sm:$0xff]  ;;  %v38_v9 = vld [vmem:[%s3521_s0 + $0x80] sm:$0xff] }
  0x19   :  { %1922 = vmatmul.msk.f32.gmra.mxu2 %vm125_vm1, %v74_v12  ;;  %2023 = vmatmul.msk.f32.gmra.mxu3 %vm125_vm1, %v899_v13  ;;  %v913_v6 = vld [vmem:[%s3522_s1 + $0x210] sm:$0xff]  ;;  %v863_v10 = vld [vmem:[%s3522_s1 + $0x80] sm:$0xff] }
  0x1b   :  { %1872 = vmatmul.msk.f32.gmra.mxu0 %vm125_vm1, %v24_v14  ;;  %1973 = vmatmul.msk.f32.gmra.mxu1 %vm125_vm1, %v849_v15 }
  0x21   :  { %1923 = vmatmul.msk.f32.gmra.mxu2 %vm125_vm1, %v75_v16  ;;  %2024 = vmatmul.msk.f32.gmra.mxu3 %vm125_vm1, %v900_v17 }
  0x23   :  { %1873 = vmatmul.msk.f32.gmra.mxu0 %vm125_vm1, %v25_v18  ;;  %1974 = vmatmul.msk.f32.gmra.mxu1 %vm125_vm1, %v850_v19 }
  0x29   :  { %1924 = vmatmul.msk.f32.gmra.mxu2 %vm125_vm1, %v76_v20  ;;  %2025 = vmatmul.msk.f32.gmra.mxu3 %vm125_vm1, %v901_v21  ;;  %v89_v20 = vld [vmem:[%s3521_s0 + $0x218] sm:$0xff] }
  0x2a   :  { %v914_v21 = vld [vmem:[%s3522_s1 + $0x218] sm:$0xff] }
  0x2b   :  { %1874 = vmatmul.msk.f32.gmra.mxu0 %vm125_vm1, %v26_v22  ;;  %1975 = vmatmul.msk.f32.gmra.mxu1 %vm125_vm1, %v851_v23 }
  0x31   :  { %1925 = vmatmul.msk.f32.gmra.mxu2 %vm125_vm1, %v77_v24  ;;  %2026 = vmatmul.msk.f32.gmra.mxu3 %vm125_vm1, %v902_v25 }
  0x33   :  { %1875 = vmatmul.msk.f32.gmra.mxu0 %vm125_vm1, %v27_v26  ;;  %1976 = vmatmul.msk.f32.gmra.mxu1 %vm125_vm1, %v852_v27  ;;  %v39_v26 = vld [vmem:[%s3521_s0 + $0x88] sm:$0xff] }
  0x34   :  { %v864_v27 = vld [vmem:[%s3522_s1 + $0x88] sm:$0xff] }
  0x39   :  { %1926 = vmatmul.msk.f32.gmra.mxu2 %vm125_vm1, %v78_v28  ;;  %2027 = vmatmul.msk.f32.gmra.mxu3 %vm125_vm1, %v903_v29 }
  0x3b   :  { %1876 = vmatmul.msk.f32.gmra.mxu0 %vm125_vm1, %v28_v30  ;;  %1977 = vmatmul.msk.f32.gmra.mxu1 %vm125_vm1, %v853_v31 }
  0x41   :  { %1927 = vmatmul.msk.f32.gmra.mxu2 %vm125_vm1, %v79_v32  ;;  %2028 = vmatmul.msk.f32.gmra.mxu3 %vm125_vm1, %v904_v33 }
  0x43   :  { %1877 = vmatmul.msk.f32.gmra.mxu0 %vm125_vm1, %v29_v34  ;;  %1978 = vmatmul.msk.f32.gmra.mxu1 %vm125_vm1, %v854_v35 }
  0x49   :  { %1928 = vmatmul.msk.f32.gmra.mxu2 %vm125_vm1, %v80_v36  ;;  %2029 = vmatmul.msk.f32.gmra.mxu3 %vm125_vm1, %v905_v37 }
  0x4b   :  { %1878 = vmatmul.msk.f32.gmra.mxu0 %vm125_vm1, %v30_v38  ;;  %1979 = vmatmul.msk.f32.gmra.mxu1 %vm125_vm1, %v855_v39  ;;  %v90_v38 = vld [vmem:[%s3521_s0 + $0x220] sm:$0xff] }
  0x4c   :  { %v915_v39 = vld [vmem:[%s3522_s1 + $0x220] sm:$0xff] }
  0x51   :  { %1929 = vmatmul.msk.f32.gmra.mxu2 %vm125_vm1, %v81_v40  ;;  %2030 = vmatmul.msk.f32.gmra.mxu3 %vm125_vm1, %v906_v41 }
  0x53   :  { %1879 = vmatmul.msk.f32.gmra.mxu0 %vm125_vm1, %v31_v42  ;;  %1980 = vmatmul.msk.f32.gmra.mxu1 %vm125_vm1, %v856_v43 }
  0x59   :  { %1930 = vmatmul.msk.f32.gmra.mxu2 %vm125_vm1, %v82_v44  ;;  %2031 = vmatmul.msk.f32.gmra.mxu3 %vm125_vm1, %v907_v45  ;;  %v40_v44 = vld [vmem:[%s3521_s0 + $0x90] sm:$0xff] }
  0x5a   :  { %v865_v45 = vld [vmem:[%s3522_s1 + $0x90] sm:$0xff] }
  0x5b   :  { %1880 = vmatmul.msk.f32.gmra.mxu0 %vm125_vm1, %v32_v46  ;;  %1981 = vmatmul.msk.f32.gmra.mxu1 %vm125_vm1, %v857_v47 }
  0x61   :  { %1931 = vmatmul.msk.f32.gmra.mxu2 %vm125_vm1, %v83_v48  ;;  %2032 = vmatmul.msk.f32.gmra.mxu3 %vm125_vm1, %v908_v49 }
  0x63   :  { %1881 = vmatmul.msk.f32.gmra.mxu0 %vm125_vm1, %v33_v50  ;;  %1982 = vmatmul.msk.f32.gmra.mxu1 %vm125_vm1, %v858_v51 }
  0x69   :  { %1932 = vmatmul.msk.f32.gmra.mxu2 %vm125_vm1, %v84_v52  ;;  %2033 = vmatmul.msk.f32.gmra.mxu3 %vm125_vm1, %v909_v53 }
  0x6b   :  { %1882 = vmatmul.msk.f32.gmra.mxu0 %vm125_vm1, %v34_v54  ;;  %1983 = vmatmul.msk.f32.gmra.mxu1 %vm125_vm1, %v859_v55 }
  0x71   :  { %1933 = vmatmul.msk.f32.gmra.mxu2 %vm125_vm1, %v85_v56  ;;  %2034 = vmatmul.msk.f32.gmra.mxu3 %vm125_vm1, %v910_v57  ;;  %v91_v56 = vld [vmem:[%s3521_s0 + $0x228] sm:$0xff] }
  0x72   :  { %v916_v57 = vld [vmem:[%s3522_s1 + $0x228] sm:$0xff] }
  0x73   :  { %1883 = vmatmul.msk.f32.gmra.mxu0 %vm125_vm1, %v35_v58  ;;  %1984 = vmatmul.msk.f32.gmra.mxu1 %vm125_vm1, %v860_v59 }
  0x79   :  { %1934 = vmatmul.msk.f32.gmra.mxu2 %vm125_vm1, %v86_v60  ;;  %2035 = vmatmul.msk.f32.gmra.mxu3 %vm125_vm1, %v911_v61 }
  0x7b   :  { %1884 = vmatmul.msk.f32.gmra.mxu0 %vm125_vm1, %v36_v62  ;;  %1985 = vmatmul.msk.f32.gmra.mxu1 %vm125_vm1, %v861_v63  ;;  %v41_v62 = vld [vmem:[%s3521_s0 + $0x98] sm:$0xff] }
  0x7c   :  { %v866_v63 = vld [vmem:[%s3522_s1 + $0x98] sm:$0xff] }
  0x81   :  { %1935 = vmatmul.msk.f32.gmra.mxu2 %vm125_vm1, %v87_v0  ;;  %2036 = vmatmul.msk.f32.gmra.mxu3 %vm125_vm1, %v912_v1 }
  0x83   :  { %1885 = vmatmul.msk.f32.gmra.mxu0 %vm125_vm1, %v37_v2  ;;  %1986 = vmatmul.msk.f32.gmra.mxu1 %vm125_vm1, %v862_v3 }
  0x88   :  { %v447_v7 = vpop.f32.mrf.mxu0  ;;  %v1264_v8 = vpop.f32.mrf.mxu1 }
  0x89   :  { %1936 = vmatmul.msk.f32.gmra.mxu2 %vm125_vm1, %v88_v5  ;;  %2037 = vmatmul.msk.f32.gmra.mxu3 %vm125_vm1, %v913_v6  ;;  %v448_v11 = vadd.f32 %v2378_v4, %v447_v7  ;;  %v1265_v12 = vadd.f32 %v2378_v4, %v1264_v8 }
  0x8b   :  { %v747_v13 = vmax.f32 %v448_v11, 0.0  ;;  %v1564_v14 = vmax.f32 %v1265_v12, 0.0  ;;  %1886 = vmatmul.msk.f32.gmra.mxu0 %vm125_vm1, %v38_v9  ;;  %1987 = vmatmul.msk.f32.gmra.mxu1 %vm125_vm1, %v863_v10  ;;  %v92_v11 = vld [vmem:[%s3521_s0 + $0x230] sm:$0xff] }
  0x8c   :  { %v597_v15 = vpop.f32.mrf.mxu2  ;;  %v1414_v16 = vpop.f32.mrf.mxu3  ;;  %v917_v12 = vld [vmem:[%s3522_s1 + $0x230] sm:$0xff] }
  0x8d   :  { %v598_v17 = vadd.f32 %v2378_v4, %v597_v15  ;;  %v1664_v18 = vmax.f32 %v747_v13, %v1564_v14  ;;  %v1415_v19 = vadd.f32 %v2378_v4, %v1414_v16 }
  0x8f   :  { %v797_v22 = vmax.f32 %v598_v17, 0.0  ;;  %1765 = vst.msk [vmem:[%s3524_s4] sm:$0xff] %vm1764_vm2, %v1664_v18  ;;  %v1614_v23 = vmax.f32 %v1415_v19, 0.0  ;;  %v42_v17 = vld [vmem:[%s3521_s0 + $0xa0] sm:$0xff] }
  0x90   :  { %v450_v24 = vpop.f32.mrf.mxu0  ;;  %v1267_v25 = vpop.f32.mrf.mxu1  ;;  %v867_v18 = vld [vmem:[%s3522_s1 + $0xa0] sm:$0xff] }
  0x91   :  { %v1714_v28 = vmax.f32 %v797_v22, %v1614_v23  ;;  %1937 = vmatmul.msk.f32.gmra.mxu2 %vm125_vm1, %v89_v20  ;;  %2038 = vmatmul.msk.f32.gmra.mxu3 %vm125_vm1, %v914_v21  ;;  %v451_v29 = vadd.f32 %v2378_v4, %v450_v24  ;;  %v1268_v30 = vadd.f32 %v2378_v4, %v1267_v25 }
  0x93   :  { %1815 = vst.msk [vmem:[%s3524_s4 + $0x190] sm:$0xff] %vm1764_vm2, %v1714_v28  ;;  %v748_v31 = vmax.f32 %v451_v29, 0.0  ;;  %v1565_v32 = vmax.f32 %v1268_v30, 0.0  ;;  %1887 = vmatmul.msk.f32.gmra.mxu0 %vm125_vm1, %v39_v26  ;;  %1988 = vmatmul.msk.f32.gmra.mxu1 %vm125_vm1, %v864_v27  ;;  %v93_v29 = vld [vmem:[%s3521_s0 + $0x238] sm:$0xff] }
  0x94   :  { %v600_v33 = vpop.f32.mrf.mxu2  ;;  %v1417_v34 = vpop.f32.mrf.mxu3  ;;  %v918_v30 = vld [vmem:[%s3522_s1 + $0x238] sm:$0xff] }
  0x95   :  { %v601_v35 = vadd.f32 %v2378_v4, %v600_v33  ;;  %v1665_v36 = vmax.f32 %v748_v31, %v1565_v32  ;;  %v1418_v37 = vadd.f32 %v2378_v4, %v1417_v34 }
  0x97   :  { %v798_v40 = vmax.f32 %v601_v35, 0.0  ;;  %1766 = vst.msk [vmem:[%s3524_s4 + $0x8] sm:$0xff] %vm1764_vm2, %v1665_v36  ;;  %v1615_v41 = vmax.f32 %v1418_v37, 0.0  ;;  %v43_v35 = vld [vmem:[%s3521_s0 + $0xa8] sm:$0xff] }
  0x98   :  { %v453_v42 = vpop.f32.mrf.mxu0  ;;  %v1270_v43 = vpop.f32.mrf.mxu1  ;;  %v868_v36 = vld [vmem:[%s3522_s1 + $0xa8] sm:$0xff] }
  0x99   :  { %v1715_v46 = vmax.f32 %v798_v40, %v1615_v41  ;;  %1938 = vmatmul.msk.f32.gmra.mxu2 %vm125_vm1, %v90_v38  ;;  %2039 = vmatmul.msk.f32.gmra.mxu3 %vm125_vm1, %v915_v39  ;;  %v454_v47 = vadd.f32 %v2378_v4, %v453_v42  ;;  %v1271_v48 = vadd.f32 %v2378_v4, %v1270_v43 }
  0x9b   :  { %1816 = vst.msk [vmem:[%s3524_s4 + $0x198] sm:$0xff] %vm1764_vm2, %v1715_v46  ;;  %v749_v49 = vmax.f32 %v454_v47, 0.0  ;;  %v1566_v50 = vmax.f32 %v1271_v48, 0.0  ;;  %1888 = vmatmul.msk.f32.gmra.mxu0 %vm125_vm1, %v40_v44  ;;  %1989 = vmatmul.msk.f32.gmra.mxu1 %vm125_vm1, %v865_v45  ;;  %v94_v47 = vld [vmem:[%s3521_s0 + $0x240] sm:$0xff] }
  0x9c   :  { %v603_v51 = vpop.f32.mrf.mxu2  ;;  %v1420_v52 = vpop.f32.mrf.mxu3  ;;  %v919_v48 = vld [vmem:[%s3522_s1 + $0x240] sm:$0xff] }
  0x9d   :  { %v604_v53 = vadd.f32 %v2378_v4, %v603_v51  ;;  %v1666_v54 = vmax.f32 %v749_v49, %v1566_v50  ;;  %v1421_v55 = vadd.f32 %v2378_v4, %v1420_v52 }
  0x9f   :  { %v799_v58 = vmax.f32 %v604_v53, 0.0  ;;  %1767 = vst.msk [vmem:[%s3524_s4 + $0x10] sm:$0xff] %vm1764_vm2, %v1666_v54  ;;  %v1616_v59 = vmax.f32 %v1421_v55, 0.0  ;;  %v44_v53 = vld [vmem:[%s3521_s0 + $0xb0] sm:$0xff] }
  0xa0   :  { %v456_v60 = vpop.f32.mrf.mxu0  ;;  %v1273_v61 = vpop.f32.mrf.mxu1  ;;  %v869_v54 = vld [vmem:[%s3522_s1 + $0xb0] sm:$0xff] }
  0xa1   :  { %v1716_v0 = vmax.f32 %v799_v58, %v1616_v59  ;;  %1939 = vmatmul.msk.f32.gmra.mxu2 %vm125_vm1, %v91_v56  ;;  %2040 = vmatmul.msk.f32.gmra.mxu3 %vm125_vm1, %v916_v57  ;;  %v457_v1 = vadd.f32 %v2378_v4, %v456_v60  ;;  %v1274_v2 = vadd.f32 %v2378_v4, %v1273_v61 }
  0xa3   :  { %1817 = vst.msk [vmem:[%s3524_s4 + $0x1a0] sm:$0xff] %vm1764_vm2, %v1716_v0  ;;  %v750_v3 = vmax.f32 %v457_v1, 0.0  ;;  %v1567_v5 = vmax.f32 %v1274_v2, 0.0  ;;  %1889 = vmatmul.msk.f32.gmra.mxu0 %vm125_vm1, %v41_v62  ;;  %1990 = vmatmul.msk.f32.gmra.mxu1 %vm125_vm1, %v866_v63  ;;  %v95_v1 = vld [vmem:[%s3521_s0 + $0x248] sm:$0xff] }
  0xa4   :  { %v606_v6 = vpop.f32.mrf.mxu2  ;;  %v1423_v7 = vpop.f32.mrf.mxu3  ;;  %v920_v2 = vld [vmem:[%s3522_s1 + $0x248] sm:$0xff] }
  0xa5   :  { %v607_v8 = vadd.f32 %v2378_v4, %v606_v6  ;;  %v1667_v9 = vmax.f32 %v750_v3, %v1567_v5  ;;  %v1424_v10 = vadd.f32 %v2378_v4, %v1423_v7 }
  0xa7   :  { %v800_v13 = vmax.f32 %v607_v8, 0.0  ;;  %1768 = vst.msk [vmem:[%s3524_s4 + $0x18] sm:$0xff] %vm1764_vm2, %v1667_v9  ;;  %v1617_v14 = vmax.f32 %v1424_v10, 0.0  ;;  %v45_v8 = vld [vmem:[%s3521_s0 + $0xb8] sm:$0xff] }
  0xa8   :  { %v459_v15 = vpop.f32.mrf.mxu0  ;;  %v1276_v16 = vpop.f32.mrf.mxu1  ;;  %v870_v9 = vld [vmem:[%s3522_s1 + $0xb8] sm:$0xff] }
  0xa9   :  { %v1717_v19 = vmax.f32 %v800_v13, %v1617_v14  ;;  %1940 = vmatmul.msk.f32.gmra.mxu2 %vm125_vm1, %v92_v11  ;;  %2041 = vmatmul.msk.f32.gmra.mxu3 %vm125_vm1, %v917_v12  ;;  %v460_v20 = vadd.f32 %v2378_v4, %v459_v15  ;;  %v1277_v21 = vadd.f32 %v2378_v4, %v1276_v16 }
  0xab   :  { %1818 = vst.msk [vmem:[%s3524_s4 + $0x1a8] sm:$0xff] %vm1764_vm2, %v1717_v19  ;;  %v751_v22 = vmax.f32 %v460_v20, 0.0  ;;  %v1568_v23 = vmax.f32 %v1277_v21, 0.0  ;;  %1890 = vmatmul.msk.f32.gmra.mxu0 %vm125_vm1, %v42_v17  ;;  %1991 = vmatmul.msk.f32.gmra.mxu1 %vm125_vm1, %v867_v18  ;;  %v96_v20 = vld [vmem:[%s3521_s0 + $0x250] sm:$0xff] }
  0xac   :  { %v609_v24 = vpop.f32.mrf.mxu2  ;;  %v1426_v25 = vpop.f32.mrf.mxu3  ;;  %v921_v21 = vld [vmem:[%s3522_s1 + $0x250] sm:$0xff] }
  0xad   :  { %v610_v26 = vadd.f32 %v2378_v4, %v609_v24  ;;  %v1668_v27 = vmax.f32 %v751_v22, %v1568_v23  ;;  %v1427_v28 = vadd.f32 %v2378_v4, %v1426_v25 }
  0xaf   :  { %v801_v31 = vmax.f32 %v610_v26, 0.0  ;;  %1769 = vst.msk [vmem:[%s3524_s4 + $0x20] sm:$0xff] %vm1764_vm2, %v1668_v27  ;;  %v1618_v32 = vmax.f32 %v1427_v28, 0.0  ;;  %v46_v26 = vld [vmem:[%s3521_s0 + $0xc0] sm:$0xff] }
  0xb0   :  { %v462_v33 = vpop.f32.mrf.mxu0  ;;  %v1279_v34 = vpop.f32.mrf.mxu1  ;;  %v871_v27 = vld [vmem:[%s3522_s1 + $0xc0] sm:$0xff] }
  0xb1   :  { %v1718_v37 = vmax.f32 %v801_v31, %v1618_v32  ;;  %1941 = vmatmul.msk.f32.gmra.mxu2 %vm125_vm1, %v93_v29  ;;  %2042 = vmatmul.msk.f32.gmra.mxu3 %vm125_vm1, %v918_v30  ;;  %v463_v38 = vadd.f32 %v2378_v4, %v462_v33  ;;  %v1280_v39 = vadd.f32 %v2378_v4, %v1279_v34 }
  0xb3   :  { %1819 = vst.msk [vmem:[%s3524_s4 + $0x1b0] sm:$0xff] %vm1764_vm2, %v1718_v37  ;;  %v752_v40 = vmax.f32 %v463_v38, 0.0  ;;  %v1569_v41 = vmax.f32 %v1280_v39, 0.0  ;;  %1891 = vmatmul.msk.f32.gmra.mxu0 %vm125_vm1, %v43_v35  ;;  %1992 = vmatmul.msk.f32.gmra.mxu1 %vm125_vm1, %v868_v36  ;;  %v97_v38 = vld [vmem:[%s3521_s0 + $0x258] sm:$0xff] }
  0xb4   :  { %v612_v42 = vpop.f32.mrf.mxu2  ;;  %v1429_v43 = vpop.f32.mrf.mxu3  ;;  %v922_v39 = vld [vmem:[%s3522_s1 + $0x258] sm:$0xff] }
  0xb5   :  { %v613_v44 = vadd.f32 %v2378_v4, %v612_v42  ;;  %v1669_v45 = vmax.f32 %v752_v40, %v1569_v41  ;;  %v1430_v46 = vadd.f32 %v2378_v4, %v1429_v43 }
  0xb7   :  { %v802_v49 = vmax.f32 %v613_v44, 0.0  ;;  %1770 = vst.msk [vmem:[%s3524_s4 + $0x28] sm:$0xff] %vm1764_vm2, %v1669_v45  ;;  %v1619_v50 = vmax.f32 %v1430_v46, 0.0  ;;  %v47_v44 = vld [vmem:[%s3521_s0 + $0xc8] sm:$0xff] }
  0xb8   :  { %v465_v51 = vpop.f32.mrf.mxu0  ;;  %v1282_v52 = vpop.f32.mrf.mxu1  ;;  %v872_v45 = vld [vmem:[%s3522_s1 + $0xc8] sm:$0xff] }
  0xb9   :  { %v1719_v55 = vmax.f32 %v802_v49, %v1619_v50  ;;  %1942 = vmatmul.msk.f32.gmra.mxu2 %vm125_vm1, %v94_v47  ;;  %2043 = vmatmul.msk.f32.gmra.mxu3 %vm125_vm1, %v919_v48  ;;  %v466_v56 = vadd.f32 %v2378_v4, %v465_v51  ;;  %v1283_v57 = vadd.f32 %v2378_v4, %v1282_v52 }
  0xbb   :  { %1820 = vst.msk [vmem:[%s3524_s4 + $0x1b8] sm:$0xff] %vm1764_vm2, %v1719_v55  ;;  %v753_v58 = vmax.f32 %v466_v56, 0.0  ;;  %v1570_v59 = vmax.f32 %v1283_v57, 0.0  ;;  %1892 = vmatmul.msk.f32.gmra.mxu0 %vm125_vm1, %v44_v53  ;;  %1993 = vmatmul.msk.f32.gmra.mxu1 %vm125_vm1, %v869_v54  ;;  %v98_v56 = vld [vmem:[%s3521_s0 + $0x260] sm:$0xff] }
  0xbc   :  { %v615_v60 = vpop.f32.mrf.mxu2  ;;  %v1432_v61 = vpop.f32.mrf.mxu3  ;;  %v923_v57 = vld [vmem:[%s3522_s1 + $0x260] sm:$0xff] }
  0xbd   :  { %v616_v62 = vadd.f32 %v2378_v4, %v615_v60  ;;  %v1670_v63 = vmax.f32 %v753_v58, %v1570_v59  ;;  %v1433_v0 = vadd.f32 %v2378_v4, %v1432_v61 }
  0xbf   :  { %v803_v3 = vmax.f32 %v616_v62, 0.0  ;;  %1771 = vst.msk [vmem:[%s3524_s4 + $0x30] sm:$0xff] %vm1764_vm2, %v1670_v63  ;;  %v1620_v5 = vmax.f32 %v1433_v0, 0.0  ;;  %v48_v62 = vld [vmem:[%s3521_s0 + $0xd0] sm:$0xff] }
  0xc0   :  { %v468_v6 = vpop.f32.mrf.mxu0  ;;  %v1285_v7 = vpop.f32.mrf.mxu1  ;;  %v873_v63 = vld [vmem:[%s3522_s1 + $0xd0] sm:$0xff] }
  0xc1   :  { %v1720_v10 = vmax.f32 %v803_v3, %v1620_v5  ;;  %1943 = vmatmul.msk.f32.gmra.mxu2 %vm125_vm1, %v95_v1  ;;  %2044 = vmatmul.msk.f32.gmra.mxu3 %vm125_vm1, %v920_v2  ;;  %v469_v11 = vadd.f32 %v2378_v4, %v468_v6  ;;  %v1286_v12 = vadd.f32 %v2378_v4, %v1285_v7 }
  0xc3   :  { %1821 = vst.msk [vmem:[%s3524_s4 + $0x1c0] sm:$0xff] %vm1764_vm2, %v1720_v10  ;;  %v754_v13 = vmax.f32 %v469_v11, 0.0  ;;  %v1571_v14 = vmax.f32 %v1286_v12, 0.0  ;;  %1893 = vmatmul.msk.f32.gmra.mxu0 %vm125_vm1, %v45_v8  ;;  %1994 = vmatmul.msk.f32.gmra.mxu1 %vm125_vm1, %v870_v9  ;;  %v99_v11 = vld [vmem:[%s3521_s0 + $0x268] sm:$0xff] }
  0xc4   :  { %v618_v15 = vpop.f32.mrf.mxu2  ;;  %v1435_v16 = vpop.f32.mrf.mxu3  ;;  %v924_v12 = vld [vmem:[%s3522_s1 + $0x268] sm:$0xff] }
  0xc5   :  { %v619_v17 = vadd.f32 %v2378_v4, %v618_v15  ;;  %v1671_v18 = vmax.f32 %v754_v13, %v1571_v14  ;;  %v1436_v19 = vadd.f32 %v2378_v4, %v1435_v16 }
  0xc7   :  { %v804_v22 = vmax.f32 %v619_v17, 0.0  ;;  %1772 = vst.msk [vmem:[%s3524_s4 + $0x38] sm:$0xff] %vm1764_vm2, %v1671_v18  ;;  %v1621_v23 = vmax.f32 %v1436_v19, 0.0  ;;  %v49_v17 = vld [vmem:[%s3521_s0 + $0xd8] sm:$0xff] }
  0xc8   :  { %v471_v24 = vpop.f32.mrf.mxu0  ;;  %v1288_v25 = vpop.f32.mrf.mxu1  ;;  %v874_v18 = vld [vmem:[%s3522_s1 + $0xd8] sm:$0xff] }
  0xc9   :  { %v1721_v28 = vmax.f32 %v804_v22, %v1621_v23  ;;  %1944 = vmatmul.msk.f32.gmra.mxu2 %vm125_vm1, %v96_v20  ;;  %2045 = vmatmul.msk.f32.gmra.mxu3 %vm125_vm1, %v921_v21  ;;  %v472_v29 = vadd.f32 %v2378_v4, %v471_v24  ;;  %v1289_v30 = vadd.f32 %v2378_v4, %v1288_v25 }
  0xcb   :  { %1822 = vst.msk [vmem:[%s3524_s4 + $0x1c8] sm:$0xff] %vm1764_vm2, %v1721_v28  ;;  %v755_v31 = vmax.f32 %v472_v29, 0.0  ;;  %v1572_v32 = vmax.f32 %v1289_v30, 0.0  ;;  %1894 = vmatmul.msk.f32.gmra.mxu0 %vm125_vm1, %v46_v26  ;;  %1995 = vmatmul.msk.f32.gmra.mxu1 %vm125_vm1, %v871_v27  ;;  %v100_v29 = vld [vmem:[%s3521_s0 + $0x270] sm:$0xff] }
  0xcc   :  { %v621_v33 = vpop.f32.mrf.mxu2  ;;  %v1438_v34 = vpop.f32.mrf.mxu3  ;;  %v925_v30 = vld [vmem:[%s3522_s1 + $0x270] sm:$0xff] }
  0xcd   :  { %v622_v35 = vadd.f32 %v2378_v4, %v621_v33  ;;  %v1672_v36 = vmax.f32 %v755_v31, %v1572_v32  ;;  %v1439_v37 = vadd.f32 %v2378_v4, %v1438_v34 }
  0xcf   :  { %v805_v40 = vmax.f32 %v622_v35, 0.0  ;;  %1773 = vst.msk [vmem:[%s3524_s4 + $0x40] sm:$0xff] %vm1764_vm2, %v1672_v36  ;;  %v1622_v41 = vmax.f32 %v1439_v37, 0.0  ;;  %v50_v35 = vld [vmem:[%s3521_s0 + $0xe0] sm:$0xff] }
  0xd0   :  { %v474_v42 = vpop.f32.mrf.mxu0  ;;  %v1291_v43 = vpop.f32.mrf.mxu1  ;;  %v875_v36 = vld [vmem:[%s3522_s1 + $0xe0] sm:$0xff] }
  0xd1   :  { %v1722_v46 = vmax.f32 %v805_v40, %v1622_v41  ;;  %1945 = vmatmul.msk.f32.gmra.mxu2 %vm125_vm1, %v97_v38  ;;  %2046 = vmatmul.msk.f32.gmra.mxu3 %vm125_vm1, %v922_v39  ;;  %v475_v47 = vadd.f32 %v2378_v4, %v474_v42  ;;  %v1292_v48 = vadd.f32 %v2378_v4, %v1291_v43 }
  0xd3   :  { %1823 = vst.msk [vmem:[%s3524_s4 + $0x1d0] sm:$0xff] %vm1764_vm2, %v1722_v46  ;;  %v756_v49 = vmax.f32 %v475_v47, 0.0  ;;  %v1573_v50 = vmax.f32 %v1292_v48, 0.0  ;;  %1895 = vmatmul.msk.f32.gmra.mxu0 %vm125_vm1, %v47_v44  ;;  %1996 = vmatmul.msk.f32.gmra.mxu1 %vm125_vm1, %v872_v45  ;;  %v101_v47 = vld [vmem:[%s3521_s0 + $0x278] sm:$0xff] }
  0xd4   :  { %v624_v51 = vpop.f32.mrf.mxu2  ;;  %v1441_v52 = vpop.f32.mrf.mxu3  ;;  %v926_v48 = vld [vmem:[%s3522_s1 + $0x278] sm:$0xff] }
  0xd5   :  { %v625_v53 = vadd.f32 %v2378_v4, %v624_v51  ;;  %v1673_v54 = vmax.f32 %v756_v49, %v1573_v50  ;;  %v1442_v55 = vadd.f32 %v2378_v4, %v1441_v52 }
  0xd7   :  { %v806_v58 = vmax.f32 %v625_v53, 0.0  ;;  %1774 = vst.msk [vmem:[%s3524_s4 + $0x48] sm:$0xff] %vm1764_vm2, %v1673_v54  ;;  %v1623_v59 = vmax.f32 %v1442_v55, 0.0  ;;  %v51_v53 = vld [vmem:[%s3521_s0 + $0xe8] sm:$0xff] }
  0xd8   :  { %v477_v60 = vpop.f32.mrf.mxu0  ;;  %v1294_v61 = vpop.f32.mrf.mxu1  ;;  %v876_v54 = vld [vmem:[%s3522_s1 + $0xe8] sm:$0xff] }
  0xd9   :  { %v1723_v0 = vmax.f32 %v806_v58, %v1623_v59  ;;  %1946 = vmatmul.msk.f32.gmra.mxu2 %vm125_vm1, %v98_v56  ;;  %2047 = vmatmul.msk.f32.gmra.mxu3 %vm125_vm1, %v923_v57  ;;  %v478_v1 = vadd.f32 %v2378_v4, %v477_v60  ;;  %v1295_v2 = vadd.f32 %v2378_v4, %v1294_v61 }
  0xdb   :  { %1824 = vst.msk [vmem:[%s3524_s4 + $0x1d8] sm:$0xff] %vm1764_vm2, %v1723_v0  ;;  %v757_v3 = vmax.f32 %v478_v1, 0.0  ;;  %v1574_v5 = vmax.f32 %v1295_v2, 0.0  ;;  %1896 = vmatmul.msk.f32.gmra.mxu0 %vm125_vm1, %v48_v62  ;;  %1997 = vmatmul.msk.f32.gmra.mxu1 %vm125_vm1, %v873_v63  ;;  %v102_v1 = vld [vmem:[%s3521_s0 + $0x280] sm:$0xff] }
  0xdc   :  { %v627_v6 = vpop.f32.mrf.mxu2  ;;  %v1444_v7 = vpop.f32.mrf.mxu3  ;;  %v927_v2 = vld [vmem:[%s3522_s1 + $0x280] sm:$0xff] }
  0xdd   :  { %v628_v8 = vadd.f32 %v2378_v4, %v627_v6  ;;  %v1674_v9 = vmax.f32 %v757_v3, %v1574_v5  ;;  %v1445_v10 = vadd.f32 %v2378_v4, %v1444_v7 }
  0xdf   :  { %v807_v13 = vmax.f32 %v628_v8, 0.0  ;;  %1775 = vst.msk [vmem:[%s3524_s4 + $0x50] sm:$0xff] %vm1764_vm2, %v1674_v9  ;;  %v1624_v14 = vmax.f32 %v1445_v10, 0.0  ;;  %v52_v8 = vld [vmem:[%s3521_s0 + $0xf0] sm:$0xff] }
  0xe0   :  { %v480_v15 = vpop.f32.mrf.mxu0  ;;  %v1297_v16 = vpop.f32.mrf.mxu1  ;;  %v877_v9 = vld [vmem:[%s3522_s1 + $0xf0] sm:$0xff] }
  0xe1   :  { %v1724_v19 = vmax.f32 %v807_v13, %v1624_v14  ;;  %1947 = vmatmul.msk.f32.gmra.mxu2 %vm125_vm1, %v99_v11  ;;  %2048 = vmatmul.msk.f32.gmra.mxu3 %vm125_vm1, %v924_v12  ;;  %v481_v20 = vadd.f32 %v2378_v4, %v480_v15  ;;  %v1298_v21 = vadd.f32 %v2378_v4, %v1297_v16 }
  0xe3   :  { %1825 = vst.msk [vmem:[%s3524_s4 + $0x1e0] sm:$0xff] %vm1764_vm2, %v1724_v19  ;;  %v758_v22 = vmax.f32 %v481_v20, 0.0  ;;  %v1575_v23 = vmax.f32 %v1298_v21, 0.0  ;;  %1897 = vmatmul.msk.f32.gmra.mxu0 %vm125_vm1, %v49_v17  ;;  %1998 = vmatmul.msk.f32.gmra.mxu1 %vm125_vm1, %v874_v18  ;;  %v103_v20 = vld [vmem:[%s3521_s0 + $0x288] sm:$0xff] }
  0xe4   :  { %v630_v24 = vpop.f32.mrf.mxu2  ;;  %v1447_v25 = vpop.f32.mrf.mxu3  ;;  %v928_v21 = vld [vmem:[%s3522_s1 + $0x288] sm:$0xff] }
  0xe5   :  { %v631_v26 = vadd.f32 %v2378_v4, %v630_v24  ;;  %v1675_v27 = vmax.f32 %v758_v22, %v1575_v23  ;;  %v1448_v28 = vadd.f32 %v2378_v4, %v1447_v25 }
  0xe7   :  { %v808_v31 = vmax.f32 %v631_v26, 0.0  ;;  %1776 = vst.msk [vmem:[%s3524_s4 + $0x58] sm:$0xff] %vm1764_vm2, %v1675_v27  ;;  %v1625_v32 = vmax.f32 %v1448_v28, 0.0  ;;  %v53_v26 = vld [vmem:[%s3521_s0 + $0xf8] sm:$0xff] }
  0xe8   :  { %v483_v33 = vpop.f32.mrf.mxu0  ;;  %v1300_v34 = vpop.f32.mrf.mxu1  ;;  %v878_v27 = vld [vmem:[%s3522_s1 + $0xf8] sm:$0xff] }
  0xe9   :  { %v1725_v37 = vmax.f32 %v808_v31, %v1625_v32  ;;  %1948 = vmatmul.msk.f32.gmra.mxu2 %vm125_vm1, %v100_v29  ;;  %2049 = vmatmul.msk.f32.gmra.mxu3 %vm125_vm1, %v925_v30  ;;  %v484_v38 = vadd.f32 %v2378_v4, %v483_v33  ;;  %v1301_v39 = vadd.f32 %v2378_v4, %v1300_v34 }
  0xeb   :  { %1826 = vst.msk [vmem:[%s3524_s4 + $0x1e8] sm:$0xff] %vm1764_vm2, %v1725_v37  ;;  %v759_v40 = vmax.f32 %v484_v38, 0.0  ;;  %v1576_v41 = vmax.f32 %v1301_v39, 0.0  ;;  %1898 = vmatmul.msk.f32.gmra.mxu0 %vm125_vm1, %v50_v35  ;;  %1999 = vmatmul.msk.f32.gmra.mxu1 %vm125_vm1, %v875_v36  ;;  %v104_v38 = vld [vmem:[%s3521_s0 + $0x290] sm:$0xff] }
  0xec   :  { %v633_v42 = vpop.f32.mrf.mxu2  ;;  %v1450_v43 = vpop.f32.mrf.mxu3  ;;  %v929_v39 = vld [vmem:[%s3522_s1 + $0x290] sm:$0xff] }
  0xed   :  { %v634_v44 = vadd.f32 %v2378_v4, %v633_v42  ;;  %v1676_v45 = vmax.f32 %v759_v40, %v1576_v41  ;;  %v1451_v46 = vadd.f32 %v2378_v4, %v1450_v43 }
  0xef   :  { %v809_v49 = vmax.f32 %v634_v44, 0.0  ;;  %1777 = vst.msk [vmem:[%s3524_s4 + $0x60] sm:$0xff] %vm1764_vm2, %v1676_v45  ;;  %v1626_v50 = vmax.f32 %v1451_v46, 0.0  ;;  %v54_v44 = vld [vmem:[%s3521_s0 + $0x100] sm:$0xff] }
  0xf0   :  { %v486_v51 = vpop.f32.mrf.mxu0  ;;  %v1303_v52 = vpop.f32.mrf.mxu1  ;;  %v879_v45 = vld [vmem:[%s3522_s1 + $0x100] sm:$0xff] }
  0xf1   :  { %v1726_v55 = vmax.f32 %v809_v49, %v1626_v50  ;;  %1949 = vmatmul.msk.f32.gmra.mxu2 %vm125_vm1, %v101_v47  ;;  %2050 = vmatmul.msk.f32.gmra.mxu3 %vm125_vm1, %v926_v48  ;;  %v487_v56 = vadd.f32 %v2378_v4, %v486_v51  ;;  %v1304_v57 = vadd.f32 %v2378_v4, %v1303_v52 }
  0xf3   :  { %1827 = vst.msk [vmem:[%s3524_s4 + $0x1f0] sm:$0xff] %vm1764_vm2, %v1726_v55  ;;  %v760_v58 = vmax.f32 %v487_v56, 0.0  ;;  %v1577_v59 = vmax.f32 %v1304_v57, 0.0  ;;  %1899 = vmatmul.msk.f32.gmra.mxu0 %vm125_vm1, %v51_v53  ;;  %2000 = vmatmul.msk.f32.gmra.mxu1 %vm125_vm1, %v876_v54  ;;  %v105_v56 = vld [vmem:[%s3521_s0 + $0x298] sm:$0xff] }
  0xf4   :  { %v636_v60 = vpop.f32.mrf.mxu2  ;;  %v1453_v61 = vpop.f32.mrf.mxu3  ;;  %v930_v57 = vld [vmem:[%s3522_s1 + $0x298] sm:$0xff] }
  0xf5   :  { %v637_v62 = vadd.f32 %v2378_v4, %v636_v60  ;;  %v1677_v63 = vmax.f32 %v760_v58, %v1577_v59  ;;  %v1454_v0 = vadd.f32 %v2378_v4, %v1453_v61 }
  0xf7   :  { %v810_v3 = vmax.f32 %v637_v62, 0.0  ;;  %1778 = vst.msk [vmem:[%s3524_s4 + $0x68] sm:$0xff] %vm1764_vm2, %v1677_v63  ;;  %v1627_v5 = vmax.f32 %v1454_v0, 0.0  ;;  %v55_v62 = vld [vmem:[%s3521_s0 + $0x108] sm:$0xff] }
  0xf8   :  { %v489_v6 = vpop.f32.mrf.mxu0  ;;  %v1306_v7 = vpop.f32.mrf.mxu1  ;;  %v880_v63 = vld [vmem:[%s3522_s1 + $0x108] sm:$0xff] }
  0xf9   :  { %v1727_v10 = vmax.f32 %v810_v3, %v1627_v5  ;;  %1950 = vmatmul.msk.f32.gmra.mxu2 %vm125_vm1, %v102_v1  ;;  %2051 = vmatmul.msk.f32.gmra.mxu3 %vm125_vm1, %v927_v2  ;;  %v490_v11 = vadd.f32 %v2378_v4, %v489_v6  ;;  %v1307_v12 = vadd.f32 %v2378_v4, %v1306_v7 }
  0xfb   :  { %1828 = vst.msk [vmem:[%s3524_s4 + $0x1f8] sm:$0xff] %vm1764_vm2, %v1727_v10  ;;  %v761_v13 = vmax.f32 %v490_v11, 0.0  ;;  %v1578_v14 = vmax.f32 %v1307_v12, 0.0  ;;  %1900 = vmatmul.msk.f32.gmra.mxu0 %vm125_vm1, %v52_v8  ;;  %2001 = vmatmul.msk.f32.gmra.mxu1 %vm125_vm1, %v877_v9  ;;  %v106_v11 = vld [vmem:[%s3521_s0 + $0x2a0] sm:$0xff] }
  0xfc   :  { %v639_v15 = vpop.f32.mrf.mxu2  ;;  %v1456_v16 = vpop.f32.mrf.mxu3  ;;  %v931_v12 = vld [vmem:[%s3522_s1 + $0x2a0] sm:$0xff] }
  0xfd   :  { %v640_v17 = vadd.f32 %v2378_v4, %v639_v15  ;;  %v1678_v18 = vmax.f32 %v761_v13, %v1578_v14  ;;  %v1457_v19 = vadd.f32 %v2378_v4, %v1456_v16 }
  0xff   :  { %v811_v22 = vmax.f32 %v640_v17, 0.0  ;;  %1779 = vst.msk [vmem:[%s3524_s4 + $0x70] sm:$0xff] %vm1764_vm2, %v1678_v18  ;;  %v1628_v23 = vmax.f32 %v1457_v19, 0.0  ;;  %v56_v17 = vld [vmem:[%s3521_s0 + $0x110] sm:$0xff] }
 0x100   :  { %v492_v24 = vpop.f32.mrf.mxu0  ;;  %v1309_v25 = vpop.f32.mrf.mxu1  ;;  %v881_v18 = vld [vmem:[%s3522_s1 + $0x110] sm:$0xff] }
 0x101   :  { %v1728_v28 = vmax.f32 %v811_v22, %v1628_v23  ;;  %1951 = vmatmul.msk.f32.gmra.mxu2 %vm125_vm1, %v103_v20  ;;  %2052 = vmatmul.msk.f32.gmra.mxu3 %vm125_vm1, %v928_v21  ;;  %v493_v29 = vadd.f32 %v2378_v4, %v492_v24  ;;  %v1310_v30 = vadd.f32 %v2378_v4, %v1309_v25 }
 0x103   :  { %1829 = vst.msk [vmem:[%s3524_s4 + $0x200] sm:$0xff] %vm1764_vm2, %v1728_v28  ;;  %v762_v31 = vmax.f32 %v493_v29, 0.0  ;;  %v1579_v32 = vmax.f32 %v1310_v30, 0.0  ;;  %1901 = vmatmul.msk.f32.gmra.mxu0 %vm125_vm1, %v53_v26  ;;  %2002 = vmatmul.msk.f32.gmra.mxu1 %vm125_vm1, %v878_v27  ;;  %v107_v29 = vld [vmem:[%s3521_s0 + $0x2a8] sm:$0xff] }
 0x104   :  { %v642_v33 = vpop.f32.mrf.mxu2  ;;  %v1459_v34 = vpop.f32.mrf.mxu3  ;;  %v932_v30 = vld [vmem:[%s3522_s1 + $0x2a8] sm:$0xff] }
 0x105   :  { %v643_v35 = vadd.f32 %v2378_v4, %v642_v33  ;;  %v1679_v36 = vmax.f32 %v762_v31, %v1579_v32  ;;  %v1460_v37 = vadd.f32 %v2378_v4, %v1459_v34 }
 0x107   :  { %v812_v40 = vmax.f32 %v643_v35, 0.0  ;;  %1780 = vst.msk [vmem:[%s3524_s4 + $0x78] sm:$0xff] %vm1764_vm2, %v1679_v36  ;;  %v1629_v41 = vmax.f32 %v1460_v37, 0.0  ;;  %v57_v35 = vld [vmem:[%s3521_s0 + $0x118] sm:$0xff] }
 0x108   :  { %v495_v42 = vpop.f32.mrf.mxu0  ;;  %v1312_v43 = vpop.f32.mrf.mxu1  ;;  %v882_v36 = vld [vmem:[%s3522_s1 + $0x118] sm:$0xff] }
 0x109   :  { %v1729_v46 = vmax.f32 %v812_v40, %v1629_v41  ;;  %1952 = vmatmul.msk.f32.gmra.mxu2 %vm125_vm1, %v104_v38  ;;  %2053 = vmatmul.msk.f32.gmra.mxu3 %vm125_vm1, %v929_v39  ;;  %v496_v47 = vadd.f32 %v2378_v4, %v495_v42  ;;  %v1313_v48 = vadd.f32 %v2378_v4, %v1312_v43 }
 0x10b   :  { %1830 = vst.msk [vmem:[%s3524_s4 + $0x208] sm:$0xff] %vm1764_vm2, %v1729_v46  ;;  %v763_v49 = vmax.f32 %v496_v47, 0.0  ;;  %v1580_v50 = vmax.f32 %v1313_v48, 0.0  ;;  %1902 = vmatmul.msk.f32.gmra.mxu0 %vm125_vm1, %v54_v44  ;;  %2003 = vmatmul.msk.f32.gmra.mxu1 %vm125_vm1, %v879_v45  ;;  %v108_v47 = vld [vmem:[%s3521_s0 + $0x2b0] sm:$0xff] }
 0x10c   :  { %v645_v51 = vpop.f32.mrf.mxu2  ;;  %v1462_v52 = vpop.f32.mrf.mxu3  ;;  %v933_v48 = vld [vmem:[%s3522_s1 + $0x2b0] sm:$0xff] }
 0x10d   :  { %v646_v53 = vadd.f32 %v2378_v4, %v645_v51  ;;  %v1680_v54 = vmax.f32 %v763_v49, %v1580_v50  ;;  %v1463_v55 = vadd.f32 %v2378_v4, %v1462_v52 }
 0x10f   :  { %v813_v58 = vmax.f32 %v646_v53, 0.0  ;;  %1781 = vst.msk [vmem:[%s3524_s4 + $0x80] sm:$0xff] %vm1764_vm2, %v1680_v54  ;;  %v1630_v59 = vmax.f32 %v1463_v55, 0.0  ;;  %v58_v53 = vld [vmem:[%s3521_s0 + $0x120] sm:$0xff] }
 0x110   :  { %v498_v60 = vpop.f32.mrf.mxu0  ;;  %v1315_v61 = vpop.f32.mrf.mxu1  ;;  %v883_v54 = vld [vmem:[%s3522_s1 + $0x120] sm:$0xff] }
 0x111   :  { %v1730_v0 = vmax.f32 %v813_v58, %v1630_v59  ;;  %1953 = vmatmul.msk.f32.gmra.mxu2 %vm125_vm1, %v105_v56  ;;  %2054 = vmatmul.msk.f32.gmra.mxu3 %vm125_vm1, %v930_v57  ;;  %v499_v1 = vadd.f32 %v2378_v4, %v498_v60  ;;  %v1316_v2 = vadd.f32 %v2378_v4, %v1315_v61 }
 0x113   :  { %1831 = vst.msk [vmem:[%s3524_s4 + $0x210] sm:$0xff] %vm1764_vm2, %v1730_v0  ;;  %v764_v3 = vmax.f32 %v499_v1, 0.0  ;;  %v1581_v5 = vmax.f32 %v1316_v2, 0.0  ;;  %1903 = vmatmul.msk.f32.gmra.mxu0 %vm125_vm1, %v55_v62  ;;  %2004 = vmatmul.msk.f32.gmra.mxu1 %vm125_vm1, %v880_v63  ;;  %v109_v1 = vld [vmem:[%s3521_s0 + $0x2b8] sm:$0xff] }
 0x114   :  { %v648_v6 = vpop.f32.mrf.mxu2  ;;  %v1465_v7 = vpop.f32.mrf.mxu3  ;;  %v934_v2 = vld [vmem:[%s3522_s1 + $0x2b8] sm:$0xff] }
 0x115   :  { %v649_v8 = vadd.f32 %v2378_v4, %v648_v6  ;;  %v1681_v9 = vmax.f32 %v764_v3, %v1581_v5  ;;  %v1466_v10 = vadd.f32 %v2378_v4, %v1465_v7 }
 0x117   :  { %v814_v13 = vmax.f32 %v649_v8, 0.0  ;;  %1782 = vst.msk [vmem:[%s3524_s4 + $0x88] sm:$0xff] %vm1764_vm2, %v1681_v9  ;;  %v1631_v14 = vmax.f32 %v1466_v10, 0.0  ;;  %v884_v8 = vld [vmem:[%s3522_s1 + $0x128] sm:$0xff]  ;;  %v2981_v10 = vld [vmem:[%s3523_s3] ss:$0 sm:$0xff] }
 0x118   :  { %v501_v15 = vpop.f32.mrf.mxu0  ;;  %v1318_v16 = vpop.f32.mrf.mxu1 }
 0x119   :  { %v1731_v19 = vmax.f32 %v814_v13, %v1631_v14  ;;  %1954 = vmatmul.msk.f32.gmra.mxu2 %vm125_vm1, %v106_v11  ;;  %2055 = vmatmul.msk.f32.gmra.mxu3 %vm125_vm1, %v931_v12  ;;  %v502_v20 = vadd.f32 %v2378_v4, %v501_v15  ;;  %v1319_v21 = vadd.f32 %v2378_v4, %v1318_v16 }
 0x11b   :  { %1832 = vst.msk [vmem:[%s3524_s4 + $0x218] sm:$0xff] %vm1764_vm2, %v1731_v19  ;;  %v765_v22 = vmax.f32 %v502_v20, 0.0  ;;  %v1582_v23 = vmax.f32 %v1319_v21, 0.0  ;;  %1904 = vmatmul.msk.f32.gmra.mxu0 %vm125_vm1, %v56_v17  ;;  %2005 = vmatmul.msk.f32.gmra.mxu1 %vm125_vm1, %v881_v18  ;;  %v110_v20 = vld [vmem:[%s3521_s0 + $0x2c0] sm:$0xff] }
 0x11c   :  { %v651_v24 = vpop.f32.mrf.mxu2  ;;  %v1468_v25 = vpop.f32.mrf.mxu3  ;;  %v935_v21 = vld [vmem:[%s3522_s1 + $0x2c0] sm:$0xff] }
 0x11d   :  { %v652_v26 = vadd.f32 %v2378_v4, %v651_v24  ;;  %v1682_v27 = vmax.f32 %v765_v22, %v1582_v23  ;;  %v1469_v28 = vadd.f32 %v2378_v4, %v1468_v25 }
 0x11f   :  { %v815_v31 = vmax.f32 %v652_v26, 0.0  ;;  %1783 = vst.msk [vmem:[%s3524_s4 + $0x90] sm:$0xff] %vm1764_vm2, %v1682_v27  ;;  %v1632_v32 = vmax.f32 %v1469_v28, 0.0  ;;  %v60_v26 = vld [vmem:[%s3521_s0 + $0x130] sm:$0xff] }
 0x120   :  { %v504_v33 = vpop.f32.mrf.mxu0  ;;  %v1321_v34 = vpop.f32.mrf.mxu1  ;;  %v885_v27 = vld [vmem:[%s3522_s1 + $0x130] sm:$0xff] }
 0x121   :  { %v1732_v37 = vmax.f32 %v815_v31, %v1632_v32  ;;  %1955 = vmatmul.msk.f32.gmra.mxu2 %vm125_vm1, %v107_v29  ;;  %2056 = vmatmul.msk.f32.gmra.mxu3 %vm125_vm1, %v932_v30  ;;  %v505_v38 = vadd.f32 %v2378_v4, %v504_v33  ;;  %v1322_v39 = vadd.f32 %v2378_v4, %v1321_v34 }
 0x123   :  { %1833 = vst.msk [vmem:[%s3524_s4 + $0x220] sm:$0xff] %vm1764_vm2, %v1732_v37  ;;  %v766_v40 = vmax.f32 %v505_v38, 0.0  ;;  %v1583_v41 = vmax.f32 %v1322_v39, 0.0  ;;  %1905 = vmatmul.msk.f32.gmra.mxu0 %vm125_vm1, %v57_v35  ;;  %2006 = vmatmul.msk.f32.gmra.mxu1 %vm125_vm1, %v882_v36  ;;  %v111_v38 = vld [vmem:[%s3521_s0 + $0x2c8] sm:$0xff] }
 0x124   :  { %v654_v42 = vpop.f32.mrf.mxu2  ;;  %v1471_v43 = vpop.f32.mrf.mxu3  ;;  %v936_v39 = vld [vmem:[%s3522_s1 + $0x2c8] sm:$0xff] }
 0x125   :  { %v655_v44 = vadd.f32 %v2378_v4, %v654_v42  ;;  %v1683_v45 = vmax.f32 %v766_v40, %v1583_v41  ;;  %v1472_v46 = vadd.f32 %v2378_v4, %v1471_v43 }
 0x127   :  { %v816_v49 = vmax.f32 %v655_v44, 0.0  ;;  %1784 = vst.msk [vmem:[%s3524_s4 + $0x98] sm:$0xff] %vm1764_vm2, %v1683_v45  ;;  %v1633_v50 = vmax.f32 %v1472_v46, 0.0  ;;  %v61_v44 = vld [vmem:[%s3521_s0 + $0x138] sm:$0xff] }
 0x128   :  { %v507_v51 = vpop.f32.mrf.mxu0  ;;  %v1324_v52 = vpop.f32.mrf.mxu1  ;;  %v886_v45 = vld [vmem:[%s3522_s1 + $0x138] sm:$0xff] }
 0x129   :  { %v1733_v55 = vmax.f32 %v816_v49, %v1633_v50  ;;  %1956 = vmatmul.msk.f32.gmra.mxu2 %vm125_vm1, %v108_v47  ;;  %2057 = vmatmul.msk.f32.gmra.mxu3 %vm125_vm1, %v933_v48  ;;  %v508_v56 = vadd.f32 %v2378_v4, %v507_v51  ;;  %v1325_v57 = vadd.f32 %v2378_v4, %v1324_v52 }
 0x12b   :  { %1834 = vst.msk [vmem:[%s3524_s4 + $0x228] sm:$0xff] %vm1764_vm2, %v1733_v55  ;;  %v767_v58 = vmax.f32 %v508_v56, 0.0  ;;  %v1584_v59 = vmax.f32 %v1325_v57, 0.0  ;;  %1906 = vmatmul.msk.f32.gmra.mxu0 %vm125_vm1, %v58_v53  ;;  %2007 = vmatmul.msk.f32.gmra.mxu1 %vm125_vm1, %v883_v54  ;;  %v112_v56 = vld [vmem:[%s3521_s0 + $0x2d0] sm:$0xff] }
 0x12c   :  { %v657_v60 = vpop.f32.mrf.mxu2  ;;  %v1474_v61 = vpop.f32.mrf.mxu3  ;;  %v937_v57 = vld [vmem:[%s3522_s1 + $0x2d0] sm:$0xff] }
 0x12d   :  { %v658_v62 = vadd.f32 %v2378_v4, %v657_v60  ;;  %v1684_v63 = vmax.f32 %v767_v58, %v1584_v59  ;;  %v1475_v0 = vadd.f32 %v2378_v4, %v1474_v61  ;;  %v59_v4 = vld [vmem:[%s3521_s0 + $0x128] sm:$0xff] }
 0x12f   :  { %v817_v3 = vmax.f32 %v658_v62, 0.0  ;;  %1785 = vst.msk [vmem:[%s3524_s4 + $0xa0] sm:$0xff] %vm1764_vm2, %v1684_v63  ;;  %v1634_v5 = vmax.f32 %v1475_v0, 0.0  ;;  %v62_v62 = vld [vmem:[%s3521_s0 + $0x140] sm:$0xff] }
 0x130   :  { %v510_v6 = vpop.f32.mrf.mxu0  ;;  %v1327_v7 = vpop.f32.mrf.mxu1  ;;  %v887_v63 = vld [vmem:[%s3522_s1 + $0x140] sm:$0xff] }
 0x131   :  { %v1734_v9 = vmax.f32 %v817_v3, %v1634_v5  ;;  %1957 = vmatmul.msk.f32.gmra.mxu2 %vm125_vm1, %v109_v1  ;;  %2058 = vmatmul.msk.f32.gmra.mxu3 %vm125_vm1, %v934_v2  ;;  %v511_v11 = vadd.f32 %v2981_v10, %v510_v6  ;;  %v1328_v12 = vadd.f32 %v2981_v10, %v1327_v7 }
 0x133   :  { %1835 = vst.msk [vmem:[%s3524_s4 + $0x230] sm:$0xff] %vm1764_vm2, %v1734_v9  ;;  %v768_v13 = vmax.f32 %v511_v11, 0.0  ;;  %v1585_v14 = vmax.f32 %v1328_v12, 0.0  ;;  %1907 = vmatmul.msk.f32.gmra.mxu0 %vm125_vm1, %v59_v4  ;;  %2008 = vmatmul.msk.f32.gmra.mxu1 %vm125_vm1, %v884_v8  ;;  %v113_v11 = vld [vmem:[%s3521_s0 + $0x2d8] sm:$0xff] }
 0x134   :  { %v660_v15 = vpop.f32.mrf.mxu2  ;;  %v1477_v16 = vpop.f32.mrf.mxu3  ;;  %v938_v12 = vld [vmem:[%s3522_s1 + $0x2d8] sm:$0xff] }
 0x135   :  { %v661_v17 = vadd.f32 %v2981_v10, %v660_v15  ;;  %v1685_v18 = vmax.f32 %v768_v13, %v1585_v14  ;;  %v1478_v19 = vadd.f32 %v2981_v10, %v1477_v16 }
 0x137   :  { %v818_v22 = vmax.f32 %v661_v17, 0.0  ;;  %1786 = vst.msk [vmem:[%s3524_s4 + $0xa8] sm:$0xff] %vm1764_vm2, %v1685_v18  ;;  %v1635_v23 = vmax.f32 %v1478_v19, 0.0  ;;  %v63_v17 = vld [vmem:[%s3521_s0 + $0x148] sm:$0xff] }
 0x138   :  { %v513_v24 = vpop.f32.mrf.mxu0  ;;  %v1330_v25 = vpop.f32.mrf.mxu1  ;;  %v888_v18 = vld [vmem:[%s3522_s1 + $0x148] sm:$0xff] }
 0x139   :  { %v1735_v28 = vmax.f32 %v818_v22, %v1635_v23  ;;  %1958 = vmatmul.msk.f32.gmra.mxu2 %vm125_vm1, %v110_v20  ;;  %2059 = vmatmul.msk.f32.gmra.mxu3 %vm125_vm1, %v935_v21  ;;  %v514_v29 = vadd.f32 %v2981_v10, %v513_v24  ;;  %v1331_v30 = vadd.f32 %v2981_v10, %v1330_v25 }
 0x13b   :  { %1836 = vst.msk [vmem:[%s3524_s4 + $0x238] sm:$0xff] %vm1764_vm2, %v1735_v28  ;;  %v769_v31 = vmax.f32 %v514_v29, 0.0  ;;  %v1586_v32 = vmax.f32 %v1331_v30, 0.0  ;;  %1908 = vmatmul.msk.f32.gmra.mxu0 %vm125_vm1, %v60_v26  ;;  %2009 = vmatmul.msk.f32.gmra.mxu1 %vm125_vm1, %v885_v27  ;;  %v114_v29 = vld [vmem:[%s3521_s0 + $0x2e0] sm:$0xff] }
 0x13c   :  { %v663_v33 = vpop.f32.mrf.mxu2  ;;  %v1480_v34 = vpop.f32.mrf.mxu3  ;;  %v939_v30 = vld [vmem:[%s3522_s1 + $0x2e0] sm:$0xff] }
 0x13d   :  { %v664_v35 = vadd.f32 %v2981_v10, %v663_v33  ;;  %v1686_v36 = vmax.f32 %v769_v31, %v1586_v32  ;;  %v1481_v37 = vadd.f32 %v2981_v10, %v1480_v34 }
 0x13f   :  { %v819_v40 = vmax.f32 %v664_v35, 0.0  ;;  %1787 = vst.msk [vmem:[%s3524_s4 + $0xb0] sm:$0xff] %vm1764_vm2, %v1686_v36  ;;  %v1636_v41 = vmax.f32 %v1481_v37, 0.0  ;;  %v64_v35 = vld [vmem:[%s3521_s0 + $0x150] sm:$0xff] }
 0x140   :  { %v516_v42 = vpop.f32.mrf.mxu0  ;;  %v1333_v43 = vpop.f32.mrf.mxu1  ;;  %v889_v36 = vld [vmem:[%s3522_s1 + $0x150] sm:$0xff] }
 0x141   :  { %v1736_v46 = vmax.f32 %v819_v40, %v1636_v41  ;;  %1959 = vmatmul.msk.f32.gmra.mxu2 %vm125_vm1, %v111_v38  ;;  %2060 = vmatmul.msk.f32.gmra.mxu3 %vm125_vm1, %v936_v39  ;;  %v517_v47 = vadd.f32 %v2981_v10, %v516_v42  ;;  %v1334_v48 = vadd.f32 %v2981_v10, %v1333_v43 }
 0x143   :  { %1837 = vst.msk [vmem:[%s3524_s4 + $0x240] sm:$0xff] %vm1764_vm2, %v1736_v46  ;;  %v770_v49 = vmax.f32 %v517_v47, 0.0  ;;  %v1587_v50 = vmax.f32 %v1334_v48, 0.0  ;;  %1909 = vmatmul.msk.f32.gmra.mxu0 %vm125_vm1, %v61_v44  ;;  %2010 = vmatmul.msk.f32.gmra.mxu1 %vm125_vm1, %v886_v45  ;;  %v115_v47 = vld [vmem:[%s3521_s0 + $0x2e8] sm:$0xff] }
 0x144   :  { %v666_v51 = vpop.f32.mrf.mxu2  ;;  %v1483_v52 = vpop.f32.mrf.mxu3  ;;  %v940_v48 = vld [vmem:[%s3522_s1 + $0x2e8] sm:$0xff] }
 0x145   :  { %v667_v53 = vadd.f32 %v2981_v10, %v666_v51  ;;  %v1687_v54 = vmax.f32 %v770_v49, %v1587_v50  ;;  %v1484_v55 = vadd.f32 %v2981_v10, %v1483_v52 }
 0x147   :  { %v820_v58 = vmax.f32 %v667_v53, 0.0  ;;  %1788 = vst.msk [vmem:[%s3524_s4 + $0xb8] sm:$0xff] %vm1764_vm2, %v1687_v54  ;;  %v1637_v59 = vmax.f32 %v1484_v55, 0.0  ;;  %v65_v53 = vld [vmem:[%s3521_s0 + $0x158] sm:$0xff] }
 0x148   :  { %v519_v60 = vpop.f32.mrf.mxu0  ;;  %v1336_v61 = vpop.f32.mrf.mxu1  ;;  %v890_v54 = vld [vmem:[%s3522_s1 + $0x158] sm:$0xff] }
 0x149   :  { %v1737_v0 = vmax.f32 %v820_v58, %v1637_v59  ;;  %1960 = vmatmul.msk.f32.gmra.mxu2 %vm125_vm1, %v112_v56  ;;  %2061 = vmatmul.msk.f32.gmra.mxu3 %vm125_vm1, %v937_v57  ;;  %v520_v1 = vadd.f32 %v2981_v10, %v519_v60  ;;  %v1337_v2 = vadd.f32 %v2981_v10, %v1336_v61 }
 0x14b   :  { %1838 = vst.msk [vmem:[%s3524_s4 + $0x248] sm:$0xff] %vm1764_vm2, %v1737_v0  ;;  %v771_v3 = vmax.f32 %v520_v1, 0.0  ;;  %v1588_v5 = vmax.f32 %v1337_v2, 0.0  ;;  %1910 = vmatmul.msk.f32.gmra.mxu0 %vm125_vm1, %v62_v62  ;;  %2011 = vmatmul.msk.f32.gmra.mxu1 %vm125_vm1, %v887_v63  ;;  %v116_v1 = vld [vmem:[%s3521_s0 + $0x2f0] sm:$0xff] }
 0x14c   :  { %v669_v6 = vpop.f32.mrf.mxu2  ;;  %v1486_v7 = vpop.f32.mrf.mxu3  ;;  %v941_v2 = vld [vmem:[%s3522_s1 + $0x2f0] sm:$0xff] }
 0x14d   :  { %v670_v4 = vadd.f32 %v2981_v10, %v669_v6  ;;  %v1688_v8 = vmax.f32 %v771_v3, %v1588_v5  ;;  %v1487_v9 = vadd.f32 %v2981_v10, %v1486_v7 }
 0x14f   :  { %v821_v13 = vmax.f32 %v670_v4, 0.0  ;;  %1789 = vst.msk [vmem:[%s3524_s4 + $0xc0] sm:$0xff] %vm1764_vm2, %v1688_v8  ;;  %v1638_v14 = vmax.f32 %v1487_v9, 0.0  ;;  %v66_v4 = vld [vmem:[%s3521_s0 + $0x160] sm:$0xff] }
 0x150   :  { %v522_v15 = vpop.f32.mrf.mxu0  ;;  %v1339_v16 = vpop.f32.mrf.mxu1  ;;  %v891_v8 = vld [vmem:[%s3522_s1 + $0x160] sm:$0xff] }
 0x151   :  { %v1738_v19 = vmax.f32 %v821_v13, %v1638_v14  ;;  %1961 = vmatmul.msk.f32.gmra.mxu2 %vm125_vm1, %v113_v11  ;;  %2062 = vmatmul.msk.f32.gmra.mxu3 %vm125_vm1, %v938_v12  ;;  %v523_v20 = vadd.f32 %v2981_v10, %v522_v15  ;;  %v1340_v21 = vadd.f32 %v2981_v10, %v1339_v16 }
 0x153   :  { %1839 = vst.msk [vmem:[%s3524_s4 + $0x250] sm:$0xff] %vm1764_vm2, %v1738_v19  ;;  %v772_v22 = vmax.f32 %v523_v20, 0.0  ;;  %v1589_v23 = vmax.f32 %v1340_v21, 0.0  ;;  %1911 = vmatmul.msk.f32.gmra.mxu0 %vm125_vm1, %v63_v17  ;;  %2012 = vmatmul.msk.f32.gmra.mxu1 %vm125_vm1, %v888_v18  ;;  %v117_v20 = vld [vmem:[%s3521_s0 + $0x2f8] sm:$0xff] }
 0x154   :  { %v672_v24 = vpop.f32.mrf.mxu2  ;;  %v1489_v25 = vpop.f32.mrf.mxu3  ;;  %v942_v21 = vld [vmem:[%s3522_s1 + $0x2f8] sm:$0xff] }
 0x155   :  { %v673_v26 = vadd.f32 %v2981_v10, %v672_v24  ;;  %v1689_v27 = vmax.f32 %v772_v22, %v1589_v23  ;;  %v1490_v28 = vadd.f32 %v2981_v10, %v1489_v25 }
 0x157   :  { %v822_v31 = vmax.f32 %v673_v26, 0.0  ;;  %1790 = vst.msk [vmem:[%s3524_s4 + $0xc8] sm:$0xff] %vm1764_vm2, %v1689_v27  ;;  %v1639_v32 = vmax.f32 %v1490_v28, 0.0  ;;  %v67_v26 = vld [vmem:[%s3521_s0 + $0x168] sm:$0xff] }
 0x158   :  { %v525_v33 = vpop.f32.mrf.mxu0  ;;  %v1342_v34 = vpop.f32.mrf.mxu1  ;;  %v892_v27 = vld [vmem:[%s3522_s1 + $0x168] sm:$0xff] }
 0x159   :  { %v1739_v37 = vmax.f32 %v822_v31, %v1639_v32  ;;  %1962 = vmatmul.msk.f32.gmra.mxu2 %vm125_vm1, %v114_v29  ;;  %2063 = vmatmul.msk.f32.gmra.mxu3 %vm125_vm1, %v939_v30  ;;  %v526_v38 = vadd.f32 %v2981_v10, %v525_v33  ;;  %v1343_v39 = vadd.f32 %v2981_v10, %v1342_v34 }
 0x15b   :  { %1840 = vst.msk [vmem:[%s3524_s4 + $0x258] sm:$0xff] %vm1764_vm2, %v1739_v37  ;;  %v773_v40 = vmax.f32 %v526_v38, 0.0  ;;  %v1590_v41 = vmax.f32 %v1343_v39, 0.0  ;;  %1912 = vmatmul.msk.f32.gmra.mxu0 %vm125_vm1, %v64_v35  ;;  %2013 = vmatmul.msk.f32.gmra.mxu1 %vm125_vm1, %v889_v36  ;;  %v118_v38 = vld [vmem:[%s3521_s0 + $0x300] sm:$0xff] }
 0x15c   :  { %v675_v42 = vpop.f32.mrf.mxu2  ;;  %v1492_v43 = vpop.f32.mrf.mxu3  ;;  %v943_v39 = vld [vmem:[%s3522_s1 + $0x300] sm:$0xff] }
 0x15d   :  { %v676_v44 = vadd.f32 %v2981_v10, %v675_v42  ;;  %v1690_v45 = vmax.f32 %v773_v40, %v1590_v41  ;;  %v1493_v46 = vadd.f32 %v2981_v10, %v1492_v43 }
 0x15f   :  { %v823_v49 = vmax.f32 %v676_v44, 0.0  ;;  %1791 = vst.msk [vmem:[%s3524_s4 + $0xd0] sm:$0xff] %vm1764_vm2, %v1690_v45  ;;  %v1640_v50 = vmax.f32 %v1493_v46, 0.0  ;;  %v68_v44 = vld [vmem:[%s3521_s0 + $0x170] sm:$0xff] }
 0x160   :  { %v528_v51 = vpop.f32.mrf.mxu0  ;;  %v1345_v52 = vpop.f32.mrf.mxu1  ;;  %v893_v45 = vld [vmem:[%s3522_s1 + $0x170] sm:$0xff] }
 0x161   :  { %v1740_v55 = vmax.f32 %v823_v49, %v1640_v50  ;;  %1963 = vmatmul.msk.f32.gmra.mxu2 %vm125_vm1, %v115_v47  ;;  %2064 = vmatmul.msk.f32.gmra.mxu3 %vm125_vm1, %v940_v48  ;;  %v529_v56 = vadd.f32 %v2981_v10, %v528_v51  ;;  %v1346_v57 = vadd.f32 %v2981_v10, %v1345_v52 }
 0x163   :  { %1841 = vst.msk [vmem:[%s3524_s4 + $0x260] sm:$0xff] %vm1764_vm2, %v1740_v55  ;;  %v774_v58 = vmax.f32 %v529_v56, 0.0  ;;  %v1591_v59 = vmax.f32 %v1346_v57, 0.0  ;;  %1913 = vmatmul.msk.f32.gmra.mxu0 %vm125_vm1, %v65_v53  ;;  %2014 = vmatmul.msk.f32.gmra.mxu1 %vm125_vm1, %v890_v54  ;;  %v119_v56 = vld [vmem:[%s3521_s0 + $0x308] sm:$0xff] }
 0x164   :  { %v678_v60 = vpop.f32.mrf.mxu2  ;;  %v1495_v61 = vpop.f32.mrf.mxu3  ;;  %v944_v57 = vld [vmem:[%s3522_s1 + $0x308] sm:$0xff] }
 0x165   :  { %v679_v62 = vadd.f32 %v2981_v10, %v678_v60  ;;  %v1691_v63 = vmax.f32 %v774_v58, %v1591_v59  ;;  %v1496_v0 = vadd.f32 %v2981_v10, %v1495_v61 }
 0x167   :  { %v824_v3 = vmax.f32 %v679_v62, 0.0  ;;  %1792 = vst.msk [vmem:[%s3524_s4 + $0xd8] sm:$0xff] %vm1764_vm2, %v1691_v63  ;;  %v1641_v5 = vmax.f32 %v1496_v0, 0.0  ;;  %v69_v62 = vld [vmem:[%s3521_s0 + $0x178] sm:$0xff] }
 0x168   :  { %v531_v6 = vpop.f32.mrf.mxu0  ;;  %v1348_v7 = vpop.f32.mrf.mxu1  ;;  %v894_v63 = vld [vmem:[%s3522_s1 + $0x178] sm:$0xff] }
 0x169   :  { %v1741_v9 = vmax.f32 %v824_v3, %v1641_v5  ;;  %1964 = vmatmul.msk.f32.gmra.mxu2 %vm125_vm1, %v116_v1  ;;  %2065 = vmatmul.msk.f32.gmra.mxu3 %vm125_vm1, %v941_v2  ;;  %v532_v11 = vadd.f32 %v2981_v10, %v531_v6  ;;  %v1349_v12 = vadd.f32 %v2981_v10, %v1348_v7 }
 0x16b   :  { %1842 = vst.msk [vmem:[%s3524_s4 + $0x268] sm:$0xff] %vm1764_vm2, %v1741_v9  ;;  %v775_v13 = vmax.f32 %v532_v11, 0.0  ;;  %v1592_v14 = vmax.f32 %v1349_v12, 0.0  ;;  %1914 = vmatmul.msk.f32.gmra.mxu0 %vm125_vm1, %v66_v4  ;;  %2015 = vmatmul.msk.f32.gmra.mxu1 %vm125_vm1, %v891_v8  ;;  %v120_v11 = vld [vmem:[%s3521_s0 + $0x310] sm:$0xff] }
 0x16c   :  { %v681_v15 = vpop.f32.mrf.mxu2  ;;  %v1498_v16 = vpop.f32.mrf.mxu3  ;;  %v945_v12 = vld [vmem:[%s3522_s1 + $0x310] sm:$0xff] }
 0x16d   :  { %v682_v17 = vadd.f32 %v2981_v10, %v681_v15  ;;  %v1692_v18 = vmax.f32 %v775_v13, %v1592_v14  ;;  %v1499_v19 = vadd.f32 %v2981_v10, %v1498_v16 }
 0x16f   :  { %v825_v22 = vmax.f32 %v682_v17, 0.0  ;;  %1793 = vst.msk [vmem:[%s3524_s4 + $0xe0] sm:$0xff] %vm1764_vm2, %v1692_v18  ;;  %v1642_v23 = vmax.f32 %v1499_v19, 0.0  ;;  %v70_v17 = vld [vmem:[%s3521_s0 + $0x180] sm:$0xff] }
 0x170   :  { %v534_v24 = vpop.f32.mrf.mxu0  ;;  %v1351_v25 = vpop.f32.mrf.mxu1  ;;  %v895_v18 = vld [vmem:[%s3522_s1 + $0x180] sm:$0xff] }
 0x171   :  { %v1742_v28 = vmax.f32 %v825_v22, %v1642_v23  ;;  %1965 = vmatmul.msk.f32.gmra.mxu2 %vm125_vm1, %v117_v20  ;;  %2066 = vmatmul.msk.f32.gmra.mxu3 %vm125_vm1, %v942_v21  ;;  %v535_v29 = vadd.f32 %v2981_v10, %v534_v24  ;;  %v1352_v30 = vadd.f32 %v2981_v10, %v1351_v25 }
 0x173   :  { %1843 = vst.msk [vmem:[%s3524_s4 + $0x270] sm:$0xff] %vm1764_vm2, %v1742_v28  ;;  %v776_v31 = vmax.f32 %v535_v29, 0.0  ;;  %v1593_v32 = vmax.f32 %v1352_v30, 0.0  ;;  %1915 = vmatmul.msk.f32.gmra.mxu0 %vm125_vm1, %v67_v26  ;;  %2016 = vmatmul.msk.f32.gmra.mxu1 %vm125_vm1, %v892_v27  ;;  %v121_v29 = vld [vmem:[%s3521_s0 + $0x318] sm:$0xff] }
 0x174   :  { %v684_v33 = vpop.f32.mrf.mxu2  ;;  %v1501_v34 = vpop.f32.mrf.mxu3  ;;  %v946_v30 = vld [vmem:[%s3522_s1 + $0x318] sm:$0xff] }
 0x175   :  { %v685_v35 = vadd.f32 %v2981_v10, %v684_v33  ;;  %v1693_v36 = vmax.f32 %v776_v31, %v1593_v32  ;;  %v1502_v37 = vadd.f32 %v2981_v10, %v1501_v34 }
 0x177   :  { %v826_v40 = vmax.f32 %v685_v35, 0.0  ;;  %1794 = vst.msk [vmem:[%s3524_s4 + $0xe8] sm:$0xff] %vm1764_vm2, %v1693_v36  ;;  %v1643_v41 = vmax.f32 %v1502_v37, 0.0  ;;  %v71_v35 = vld [vmem:[%s3521_s0 + $0x188] sm:$0xff] }
 0x178   :  { %v537_v42 = vpop.f32.mrf.mxu0  ;;  %v1354_v43 = vpop.f32.mrf.mxu1  ;;  %v896_v36 = vld [vmem:[%s3522_s1 + $0x188] sm:$0xff] }
 0x179   :  { %v1743_v46 = vmax.f32 %v826_v40, %v1643_v41  ;;  %1966 = vmatmul.msk.f32.gmra.mxu2 %vm125_vm1, %v118_v38  ;;  %2067 = vmatmul.msk.f32.gmra.mxu3 %vm125_vm1, %v943_v39  ;;  %v538_v47 = vadd.f32 %v2981_v10, %v537_v42  ;;  %v1355_v48 = vadd.f32 %v2981_v10, %v1354_v43 }
 0x17b   :  { %1844 = vst.msk [vmem:[%s3524_s4 + $0x278] sm:$0xff] %vm1764_vm2, %v1743_v46  ;;  %v777_v49 = vmax.f32 %v538_v47, 0.0  ;;  %v1594_v50 = vmax.f32 %v1355_v48, 0.0  ;;  %1916 = vmatmul.msk.f32.gmra.mxu0 %vm125_vm1, %v68_v44  ;;  %2017 = vmatmul.msk.f32.gmra.mxu1 %vm125_vm1, %v893_v45 }
 0x17c   :  { %v687_v51 = vpop.f32.mrf.mxu2  ;;  %v1504_v52 = vpop.f32.mrf.mxu3 }
 0x17d   :  { %v688_v53 = vadd.f32 %v2981_v10, %v687_v51  ;;  %v1694_v54 = vmax.f32 %v777_v49, %v1594_v50  ;;  %v1505_v55 = vadd.f32 %v2981_v10, %v1504_v52 }
 0x17f   :  { %v827_v58 = vmax.f32 %v688_v53, 0.0  ;;  %1795 = vst.msk [vmem:[%s3524_s4 + $0xf0] sm:$0xff] %vm1764_vm2, %v1694_v54  ;;  %v1644_v59 = vmax.f32 %v1505_v55, 0.0 }
 0x180   :  { %v540_v60 = vpop.f32.mrf.mxu0  ;;  %v1357_v61 = vpop.f32.mrf.mxu1 }
 0x181   :  { %v1744_v0 = vmax.f32 %v827_v58, %v1644_v59  ;;  %1967 = vmatmul.msk.f32.gmra.mxu2 %vm125_vm1, %v119_v56  ;;  %2068 = vmatmul.msk.f32.gmra.mxu3 %vm125_vm1, %v944_v57  ;;  %v541_v1 = vadd.f32 %v2981_v10, %v540_v60  ;;  %v1358_v2 = vadd.f32 %v2981_v10, %v1357_v61 }
 0x183   :  { %1845 = vst.msk [vmem:[%s3524_s4 + $0x280] sm:$0xff] %vm1764_vm2, %v1744_v0  ;;  %v778_v3 = vmax.f32 %v541_v1, 0.0  ;;  %v1595_v5 = vmax.f32 %v1358_v2, 0.0  ;;  %1917 = vmatmul.msk.f32.gmra.mxu0 %vm125_vm1, %v69_v62  ;;  %2018 = vmatmul.msk.f32.gmra.mxu1 %vm125_vm1, %v894_v63 }
 0x184   :  { %v690_v6 = vpop.f32.mrf.mxu2  ;;  %v1507_v7 = vpop.f32.mrf.mxu3 }
 0x185   :  { %v691_v4 = vadd.f32 %v2981_v10, %v690_v6  ;;  %v1695_v8 = vmax.f32 %v778_v3, %v1595_v5  ;;  %v1508_v9 = vadd.f32 %v2981_v10, %v1507_v7 }
 0x187   :  { %v828_v13 = vmax.f32 %v691_v4, 0.0  ;;  %1796 = vst.msk [vmem:[%s3524_s4 + $0xf8] sm:$0xff] %vm1764_vm2, %v1695_v8  ;;  %v1645_v14 = vmax.f32 %v1508_v9, 0.0 }
 0x188   :  { %v543_v15 = vpop.f32.mrf.mxu0  ;;  %v1360_v16 = vpop.f32.mrf.mxu1 }
 0x189   :  { %v1745_v19 = vmax.f32 %v828_v13, %v1645_v14  ;;  %1968 = vmatmul.msk.f32.gmra.mxu2 %vm125_vm1, %v120_v11  ;;  %2069 = vmatmul.msk.f32.gmra.mxu3 %vm125_vm1, %v945_v12  ;;  %v544_v20 = vadd.f32 %v2981_v10, %v543_v15  ;;  %v1361_v21 = vadd.f32 %v2981_v10, %v1360_v16 }
 0x18b   :  { %1846 = vst.msk [vmem:[%s3524_s4 + $0x288] sm:$0xff] %vm1764_vm2, %v1745_v19  ;;  %v779_v22 = vmax.f32 %v544_v20, 0.0  ;;  %v1596_v23 = vmax.f32 %v1361_v21, 0.0  ;;  %1918 = vmatmul.msk.f32.gmra.mxu0 %vm125_vm1, %v70_v17  ;;  %2019 = vmatmul.msk.f32.gmra.mxu1 %vm125_vm1, %v895_v18 }
 0x18c   :  { %v693_v24 = vpop.f32.mrf.mxu2  ;;  %v1510_v25 = vpop.f32.mrf.mxu3 }
 0x18d   :  { %v694_v26 = vadd.f32 %v2981_v10, %v693_v24  ;;  %v1696_v27 = vmax.f32 %v779_v22, %v1596_v23  ;;  %v1511_v28 = vadd.f32 %v2981_v10, %v1510_v25 }
 0x18f   :  { %v829_v31 = vmax.f32 %v694_v26, 0.0  ;;  %1797 = vst.msk [vmem:[%s3524_s4 + $0x100] sm:$0xff] %vm1764_vm2, %v1696_v27  ;;  %v1646_v32 = vmax.f32 %v1511_v28, 0.0 }
 0x190   :  { %v546_v33 = vpop.f32.mrf.mxu0  ;;  %v1363_v34 = vpop.f32.mrf.mxu1 }
 0x191   :  { %v1746_v37 = vmax.f32 %v829_v31, %v1646_v32  ;;  %1969 = vmatmul.msk.f32.gmra.mxu2 %vm125_vm1, %v121_v29  ;;  %2070 = vmatmul.msk.f32.gmra.mxu3 %vm125_vm1, %v946_v30  ;;  %v547_v38 = vadd.f32 %v2981_v10, %v546_v33  ;;  %v1364_v39 = vadd.f32 %v2981_v10, %v1363_v34 }
 0x193   :  { %1847 = vst.msk [vmem:[%s3524_s4 + $0x290] sm:$0xff] %vm1764_vm2, %v1746_v37  ;;  %v780_v40 = vmax.f32 %v547_v38, 0.0  ;;  %v1597_v41 = vmax.f32 %v1364_v39, 0.0  ;;  %1919 = vmatmul.msk.f32.gmra.mxu0 %vm125_vm1, %v71_v35  ;;  %2020 = vmatmul.msk.f32.gmra.mxu1 %vm125_vm1, %v896_v36 }
 0x194   :  { %v696_v42 = vpop.f32.mrf.mxu2  ;;  %v1513_v43 = vpop.f32.mrf.mxu3 }
 0x195   :  { %v697_v44 = vadd.f32 %v2981_v10, %v696_v42  ;;  %v1697_v45 = vmax.f32 %v780_v40, %v1597_v41  ;;  %v1514_v46 = vadd.f32 %v2981_v10, %v1513_v43 }
 0x197   :  { %v830_v47 = vmax.f32 %v697_v44, 0.0  ;;  %1798 = vst.msk [vmem:[%s3524_s4 + $0x108] sm:$0xff] %vm1764_vm2, %v1697_v45  ;;  %v1647_v48 = vmax.f32 %v1514_v46, 0.0 }
 0x198   :  { %v549_v49 = vpop.f32.mrf.mxu0  ;;  %v1366_v50 = vpop.f32.mrf.mxu1 }
 0x199   :  { %v1747_v51 = vmax.f32 %v830_v47, %v1647_v48  ;;  %v550_v52 = vadd.f32 %v2981_v10, %v549_v49  ;;  %v1367_v53 = vadd.f32 %v2981_v10, %v1366_v50 }
 0x19b   :  { %1848 = vst.msk [vmem:[%s3524_s4 + $0x298] sm:$0xff] %vm1764_vm2, %v1747_v51  ;;  %v781_v54 = vmax.f32 %v550_v52, 0.0  ;;  %v1598_v55 = vmax.f32 %v1367_v53, 0.0 }
 0x19c   :  { %v699_v56 = vpop.f32.mrf.mxu2  ;;  %v1516_v57 = vpop.f32.mrf.mxu3 }
 0x19d   :  { %v700_v58 = vadd.f32 %v2981_v10, %v699_v56  ;;  %v1698_v59 = vmax.f32 %v781_v54, %v1598_v55  ;;  %v1517_v60 = vadd.f32 %v2981_v10, %v1516_v57 }
 0x19f   :  { %v831_v61 = vmax.f32 %v700_v58, 0.0  ;;  %1799 = vst.msk [vmem:[%s3524_s4 + $0x110] sm:$0xff] %vm1764_vm2, %v1698_v59  ;;  %v1648_v62 = vmax.f32 %v1517_v60, 0.0 }
 0x1a0   :  { %v552_v63 = vpop.f32.mrf.mxu0  ;;  %v1369_v0 = vpop.f32.mrf.mxu1 }
 0x1a1   :  { %v1748_v1 = vmax.f32 %v831_v61, %v1648_v62  ;;  %v553_v2 = vadd.f32 %v2981_v10, %v552_v63  ;;  %v1370_v3 = vadd.f32 %v2981_v10, %v1369_v0 }
 0x1a3   :  { %1849 = vst.msk [vmem:[%s3524_s4 + $0x2a0] sm:$0xff] %vm1764_vm2, %v1748_v1  ;;  %v782_v5 = vmax.f32 %v553_v2, 0.0  ;;  %v1599_v6 = vmax.f32 %v1370_v3, 0.0 }
 0x1a4   :  { %v702_v7 = vpop.f32.mrf.mxu2  ;;  %v1519_v4 = vpop.f32.mrf.mxu3 }
 0x1a5   :  { %v703_v8 = vadd.f32 %v2981_v10, %v702_v7  ;;  %v1699_v9 = vmax.f32 %v782_v5, %v1599_v6  ;;  %v1520_v11 = vadd.f32 %v2981_v10, %v1519_v4 }
 0x1a7   :  { %v832_v12 = vmax.f32 %v703_v8, 0.0  ;;  %1800 = vst.msk [vmem:[%s3524_s4 + $0x118] sm:$0xff] %vm1764_vm2, %v1699_v9  ;;  %v1649_v13 = vmax.f32 %v1520_v11, 0.0 }
 0x1a8   :  { %v555_v14 = vpop.f32.mrf.mxu0  ;;  %v1372_v15 = vpop.f32.mrf.mxu1 }
 0x1a9   :  { %v1749_v16 = vmax.f32 %v832_v12, %v1649_v13  ;;  %v556_v17 = vadd.f32 %v2981_v10, %v555_v14  ;;  %v1373_v18 = vadd.f32 %v2981_v10, %v1372_v15 }
 0x1ab   :  { %1850 = vst.msk [vmem:[%s3524_s4 + $0x2a8] sm:$0xff] %vm1764_vm2, %v1749_v16  ;;  %v783_v19 = vmax.f32 %v556_v17, 0.0  ;;  %v1600_v20 = vmax.f32 %v1373_v18, 0.0 }
 0x1ac   :  { %v705_v21 = vpop.f32.mrf.mxu2  ;;  %v1522_v22 = vpop.f32.mrf.mxu3 }
 0x1ad   :  { %v706_v23 = vadd.f32 %v2981_v10, %v705_v21  ;;  %v1700_v24 = vmax.f32 %v783_v19, %v1600_v20  ;;  %v1523_v25 = vadd.f32 %v2981_v10, %v1522_v22 }
 0x1af   :  { %v833_v26 = vmax.f32 %v706_v23, 0.0  ;;  %1801 = vst.msk [vmem:[%s3524_s4 + $0x120] sm:$0xff] %vm1764_vm2, %v1700_v24  ;;  %v1650_v27 = vmax.f32 %v1523_v25, 0.0 }
 0x1b0   :  { %v558_v28 = vpop.f32.mrf.mxu0  ;;  %v1375_v29 = vpop.f32.mrf.mxu1 }
 0x1b1   :  { %v1750_v30 = vmax.f32 %v833_v26, %v1650_v27  ;;  %v559_v31 = vadd.f32 %v2981_v10, %v558_v28  ;;  %v1376_v32 = vadd.f32 %v2981_v10, %v1375_v29 }
 0x1b3   :  { %1851 = vst.msk [vmem:[%s3524_s4 + $0x2b0] sm:$0xff] %vm1764_vm2, %v1750_v30  ;;  %v784_v33 = vmax.f32 %v559_v31, 0.0  ;;  %v1601_v34 = vmax.f32 %v1376_v32, 0.0 }
 0x1b4   :  { %v708_v35 = vpop.f32.mrf.mxu2  ;;  %v1525_v36 = vpop.f32.mrf.mxu3 }
 0x1b5   :  { %v709_v37 = vadd.f32 %v2981_v10, %v708_v35  ;;  %v1701_v38 = vmax.f32 %v784_v33, %v1601_v34  ;;  %v1526_v39 = vadd.f32 %v2981_v10, %v1525_v36 }
 0x1b7   :  { %v834_v40 = vmax.f32 %v709_v37, 0.0  ;;  %1802 = vst.msk [vmem:[%s3524_s4 + $0x128] sm:$0xff] %vm1764_vm2, %v1701_v38  ;;  %v1651_v41 = vmax.f32 %v1526_v39, 0.0 }
 0x1b8   :  { %v561_v42 = vpop.f32.mrf.mxu0  ;;  %v1378_v43 = vpop.f32.mrf.mxu1 }
 0x1b9   :  { %v1751_v44 = vmax.f32 %v834_v40, %v1651_v41  ;;  %v562_v45 = vadd.f32 %v2981_v10, %v561_v42  ;;  %v1379_v46 = vadd.f32 %v2981_v10, %v1378_v43 }
 0x1bb   :  { %1852 = vst.msk [vmem:[%s3524_s4 + $0x2b8] sm:$0xff] %vm1764_vm2, %v1751_v44  ;;  %v785_v47 = vmax.f32 %v562_v45, 0.0  ;;  %v1602_v48 = vmax.f32 %v1379_v46, 0.0 }
 0x1bc   :  { %v711_v49 = vpop.f32.mrf.mxu2  ;;  %v1528_v50 = vpop.f32.mrf.mxu3 }
 0x1bd   :  { %v712_v51 = vadd.f32 %v2981_v10, %v711_v49  ;;  %v1702_v52 = vmax.f32 %v785_v47, %v1602_v48  ;;  %v1529_v53 = vadd.f32 %v2981_v10, %v1528_v50 }
 0x1bf   :  { %v835_v54 = vmax.f32 %v712_v51, 0.0  ;;  %1803 = vst.msk [vmem:[%s3524_s4 + $0x130] sm:$0xff] %vm1764_vm2, %v1702_v52  ;;  %v1652_v55 = vmax.f32 %v1529_v53, 0.0 }
 0x1c0   :  { %v564_v56 = vpop.f32.mrf.mxu0  ;;  %v1381_v57 = vpop.f32.mrf.mxu1 }
 0x1c1   :  { %v1752_v58 = vmax.f32 %v835_v54, %v1652_v55  ;;  %v565_v59 = vadd.f32 %v2981_v10, %v564_v56  ;;  %v1382_v60 = vadd.f32 %v2981_v10, %v1381_v57 }
 0x1c3   :  { %1853 = vst.msk [vmem:[%s3524_s4 + $0x2c0] sm:$0xff] %vm1764_vm2, %v1752_v58  ;;  %v786_v61 = vmax.f32 %v565_v59, 0.0  ;;  %v1603_v62 = vmax.f32 %v1382_v60, 0.0 }
 0x1c4   :  { %v714_v63 = vpop.f32.mrf.mxu2  ;;  %v1531_v0 = vpop.f32.mrf.mxu3 }
 0x1c5   :  { %v715_v1 = vadd.f32 %v2981_v10, %v714_v63  ;;  %v1703_v2 = vmax.f32 %v786_v61, %v1603_v62  ;;  %v1532_v3 = vadd.f32 %v2981_v10, %v1531_v0 }
 0x1c7   :  { %v836_v5 = vmax.f32 %v715_v1, 0.0  ;;  %1804 = vst.msk [vmem:[%s3524_s4 + $0x138] sm:$0xff] %vm1764_vm2, %v1703_v2  ;;  %v1653_v6 = vmax.f32 %v1532_v3, 0.0 }
 0x1c8   :  { %v567_v7 = vpop.f32.mrf.mxu0  ;;  %v1384_v4 = vpop.f32.mrf.mxu1 }
 0x1c9   :  { %v1753_v8 = vmax.f32 %v836_v5, %v1653_v6  ;;  %v568_v9 = vadd.f32 %v2981_v10, %v567_v7  ;;  %v1385_v11 = vadd.f32 %v2981_v10, %v1384_v4 }
 0x1cb   :  { %1854 = vst.msk [vmem:[%s3524_s4 + $0x2c8] sm:$0xff] %vm1764_vm2, %v1753_v8  ;;  %v787_v12 = vmax.f32 %v568_v9, 0.0  ;;  %v1604_v13 = vmax.f32 %v1385_v11, 0.0 }
 0x1cc   :  { %v717_v14 = vpop.f32.mrf.mxu2  ;;  %v1534_v15 = vpop.f32.mrf.mxu3 }
 0x1cd   :  { %v718_v16 = vadd.f32 %v2981_v10, %v717_v14  ;;  %v1704_v17 = vmax.f32 %v787_v12, %v1604_v13  ;;  %v1535_v18 = vadd.f32 %v2981_v10, %v1534_v15 }
 0x1cf   :  { %v837_v19 = vmax.f32 %v718_v16, 0.0  ;;  %1805 = vst.msk [vmem:[%s3524_s4 + $0x140] sm:$0xff] %vm1764_vm2, %v1704_v17  ;;  %v1654_v20 = vmax.f32 %v1535_v18, 0.0 }
 0x1d0   :  { %v570_v21 = vpop.f32.mrf.mxu0  ;;  %v1387_v22 = vpop.f32.mrf.mxu1 }
 0x1d1   :  { %v1754_v23 = vmax.f32 %v837_v19, %v1654_v20  ;;  %v571_v24 = vadd.f32 %v2981_v10, %v570_v21  ;;  %v1388_v25 = vadd.f32 %v2981_v10, %v1387_v22 }
 0x1d3   :  { %1855 = vst.msk [vmem:[%s3524_s4 + $0x2d0] sm:$0xff] %vm1764_vm2, %v1754_v23  ;;  %v788_v26 = vmax.f32 %v571_v24, 0.0  ;;  %v1605_v27 = vmax.f32 %v1388_v25, 0.0 }
 0x1d4   :  { %v720_v28 = vpop.f32.mrf.mxu2  ;;  %v1537_v29 = vpop.f32.mrf.mxu3 }
 0x1d5   :  { %v721_v30 = vadd.f32 %v2981_v10, %v720_v28  ;;  %v1705_v31 = vmax.f32 %v788_v26, %v1605_v27  ;;  %v1538_v32 = vadd.f32 %v2981_v10, %v1537_v29 }
 0x1d7   :  { %v838_v33 = vmax.f32 %v721_v30, 0.0  ;;  %1806 = vst.msk [vmem:[%s3524_s4 + $0x148] sm:$0xff] %vm1764_vm2, %v1705_v31  ;;  %v1655_v34 = vmax.f32 %v1538_v32, 0.0 }
 0x1d8   :  { %v573_v35 = vpop.f32.mrf.mxu0  ;;  %v1390_v36 = vpop.f32.mrf.mxu1 }
 0x1d9   :  { %v1755_v37 = vmax.f32 %v838_v33, %v1655_v34  ;;  %v574_v38 = vadd.f32 %v2981_v10, %v573_v35  ;;  %v1391_v39 = vadd.f32 %v2981_v10, %v1390_v36 }
 0x1db   :  { %1856 = vst.msk [vmem:[%s3524_s4 + $0x2d8] sm:$0xff] %vm1764_vm2, %v1755_v37  ;;  %v789_v40 = vmax.f32 %v574_v38, 0.0  ;;  %v1606_v41 = vmax.f32 %v1391_v39, 0.0 }
 0x1dc   :  { %v723_v42 = vpop.f32.mrf.mxu2  ;;  %v1540_v43 = vpop.f32.mrf.mxu3 }
 0x1dd   :  { %v724_v44 = vadd.f32 %v2981_v10, %v723_v42  ;;  %v1706_v45 = vmax.f32 %v789_v40, %v1606_v41  ;;  %v1541_v46 = vadd.f32 %v2981_v10, %v1540_v43 }
 0x1df   :  { %v839_v47 = vmax.f32 %v724_v44, 0.0  ;;  %1807 = vst.msk [vmem:[%s3524_s4 + $0x150] sm:$0xff] %vm1764_vm2, %v1706_v45  ;;  %v1656_v48 = vmax.f32 %v1541_v46, 0.0  ;;  %v2081_v45 = vld [vmem:[%s3523_s3] ss:$0 sm:$0xff] }
 0x1e0   :  { %v576_v49 = vpop.f32.mrf.mxu0  ;;  %v1393_v50 = vpop.f32.mrf.mxu1 }
 0x1e1   :  { %v1756_v51 = vmax.f32 %v839_v47, %v1656_v48  ;;  %v577_v52 = vadd.f32 %v2981_v10, %v576_v49  ;;  %v1394_v53 = vadd.f32 %v2981_v10, %v1393_v50 }
 0x1e3   :  { %1857 = vst.msk [vmem:[%s3524_s4 + $0x2e0] sm:$0xff] %vm1764_vm2, %v1756_v51  ;;  %v790_v54 = vmax.f32 %v577_v52, 0.0  ;;  %v1607_v55 = vmax.f32 %v1394_v53, 0.0 }
 0x1e4   :  { %v726_v56 = vpop.f32.mrf.mxu2  ;;  %v1543_v57 = vpop.f32.mrf.mxu3 }
 0x1e5   :  { %v727_v58 = vadd.f32 %v2981_v10, %v726_v56  ;;  %v1707_v59 = vmax.f32 %v790_v54, %v1607_v55  ;;  %v1544_v60 = vadd.f32 %v2981_v10, %v1543_v57 }
 0x1e7   :  { %v840_v61 = vmax.f32 %v727_v58, 0.0  ;;  %1808 = vst.msk [vmem:[%s3524_s4 + $0x158] sm:$0xff] %vm1764_vm2, %v1707_v59  ;;  %v1657_v62 = vmax.f32 %v1544_v60, 0.0 }
 0x1e8   :  { %v579_v63 = vpop.f32.mrf.mxu0  ;;  %v1396_v0 = vpop.f32.mrf.mxu1 }
 0x1e9   :  { %v1757_v1 = vmax.f32 %v840_v61, %v1657_v62  ;;  %v580_v2 = vadd.f32 %v2981_v10, %v579_v63  ;;  %v1397_v3 = vadd.f32 %v2981_v10, %v1396_v0 }
 0x1eb   :  { %1858 = vst.msk [vmem:[%s3524_s4 + $0x2e8] sm:$0xff] %vm1764_vm2, %v1757_v1  ;;  %v791_v5 = vmax.f32 %v580_v2, 0.0  ;;  %v1608_v6 = vmax.f32 %v1397_v3, 0.0 }
 0x1ec   :  { %v729_v7 = vpop.f32.mrf.mxu2  ;;  %v1546_v4 = vpop.f32.mrf.mxu3 }
 0x1ed   :  { %v730_v8 = vadd.f32 %v2981_v10, %v729_v7  ;;  %v1708_v9 = vmax.f32 %v791_v5, %v1608_v6  ;;  %v1547_v11 = vadd.f32 %v2981_v10, %v1546_v4 }
 0x1ef   :  { %v841_v12 = vmax.f32 %v730_v8, 0.0  ;;  %1809 = vst.msk [vmem:[%s3524_s4 + $0x160] sm:$0xff] %vm1764_vm2, %v1708_v9  ;;  %v1658_v13 = vmax.f32 %v1547_v11, 0.0 }
 0x1f0   :  { %v582_v14 = vpop.f32.mrf.mxu0  ;;  %v1399_v15 = vpop.f32.mrf.mxu1 }
 0x1f1   :  { %v1758_v16 = vmax.f32 %v841_v12, %v1658_v13  ;;  %v583_v17 = vadd.f32 %v2981_v10, %v582_v14  ;;  %v1400_v18 = vadd.f32 %v2981_v10, %v1399_v15 }
 0x1f3   :  { %1859 = vst.msk [vmem:[%s3524_s4 + $0x2f0] sm:$0xff] %vm1764_vm2, %v1758_v16  ;;  %v792_v19 = vmax.f32 %v583_v17, 0.0  ;;  %v1609_v20 = vmax.f32 %v1400_v18, 0.0 }
 0x1f4   :  { %v732_v21 = vpop.f32.mrf.mxu2  ;;  %v1549_v22 = vpop.f32.mrf.mxu3 }
 0x1f5   :  { %v733_v23 = vadd.f32 %v2981_v10, %v732_v21  ;;  %v1709_v24 = vmax.f32 %v792_v19, %v1609_v20  ;;  %v1550_v25 = vadd.f32 %v2981_v10, %v1549_v22 }
 0x1f7   :  { %v842_v26 = vmax.f32 %v733_v23, 0.0  ;;  %1810 = vst.msk [vmem:[%s3524_s4 + $0x168] sm:$0xff] %vm1764_vm2, %v1709_v24  ;;  %v1659_v27 = vmax.f32 %v1550_v25, 0.0 }
 0x1f8   :  { %v585_v28 = vpop.f32.mrf.mxu0  ;;  %v1402_v29 = vpop.f32.mrf.mxu1 }
 0x1f9   :  { %v1759_v30 = vmax.f32 %v842_v26, %v1659_v27  ;;  %v586_v31 = vadd.f32 %v2981_v10, %v585_v28  ;;  %v1403_v32 = vadd.f32 %v2981_v10, %v1402_v29 }
 0x1fb   :  { %1860 = vst.msk [vmem:[%s3524_s4 + $0x2f8] sm:$0xff] %vm1764_vm2, %v1759_v30  ;;  %v793_v33 = vmax.f32 %v586_v31, 0.0  ;;  %v1610_v34 = vmax.f32 %v1403_v32, 0.0 }
 0x1fc   :  { %v735_v35 = vpop.f32.mrf.mxu2  ;;  %v1552_v36 = vpop.f32.mrf.mxu3 }
 0x1fd   :  { %v736_v37 = vadd.f32 %v2981_v10, %v735_v35  ;;  %v1710_v38 = vmax.f32 %v793_v33, %v1610_v34  ;;  %v1553_v39 = vadd.f32 %v2981_v10, %v1552_v36 }
 0x1ff   :  { %v843_v40 = vmax.f32 %v736_v37, 0.0  ;;  %1811 = vst.msk [vmem:[%s3524_s4 + $0x170] sm:$0xff] %vm1764_vm2, %v1710_v38  ;;  %v1660_v41 = vmax.f32 %v1553_v39, 0.0 }
 0x200   :  { %v588_v42 = vpop.f32.mrf.mxu0  ;;  %v1405_v43 = vpop.f32.mrf.mxu1 }
 0x201   :  { %v1760_v44 = vmax.f32 %v843_v40, %v1660_v41  ;;  %v589_v46 = vadd.f32 %v2081_v45, %v588_v42  ;;  %v1406_v47 = vadd.f32 %v2081_v45, %v1405_v43 }
 0x203   :  { %1861 = vst.msk [vmem:[%s3524_s4 + $0x300] sm:$0xff] %vm1764_vm2, %v1760_v44  ;;  %v794_v10 = vmax.f32 %v589_v46, 0.0  ;;  %v1611_v48 = vmax.f32 %v1406_v47, 0.0 }
 0x204   :  { %v738_v49 = vpop.f32.mrf.mxu2  ;;  %v1555_v50 = vpop.f32.mrf.mxu3 }
 0x205   :  { %v739_v51 = vadd.f32 %v2081_v45, %v738_v49  ;;  %v1711_v52 = vmax.f32 %v794_v10, %v1611_v48  ;;  %v1556_v53 = vadd.f32 %v2081_v45, %v1555_v50 }
 0x207   :  { %v844_v54 = vmax.f32 %v739_v51, 0.0  ;;  %1812 = vst.msk [vmem:[%s3524_s4 + $0x178] sm:$0xff] %vm1764_vm2, %v1711_v52  ;;  %v1661_v55 = vmax.f32 %v1556_v53, 0.0 }
 0x208   :  { %v591_v56 = vpop.f32.mrf.mxu0  ;;  %v1408_v57 = vpop.f32.mrf.mxu1 }
 0x209   :  { %v1761_v58 = vmax.f32 %v844_v54, %v1661_v55  ;;  %v592_v59 = vadd.f32 %v2081_v45, %v591_v56  ;;  %v1409_v60 = vadd.f32 %v2081_v45, %v1408_v57 }
 0x20b   :  { %1862 = vst.msk [vmem:[%s3524_s4 + $0x308] sm:$0xff] %vm1764_vm2, %v1761_v58  ;;  %v795_v61 = vmax.f32 %v592_v59, 0.0  ;;  %v1612_v62 = vmax.f32 %v1409_v60, 0.0 }
 0x20c   :  { %v741_v63 = vpop.f32.mrf.mxu2  ;;  %v1558_v0 = vpop.f32.mrf.mxu3 }
 0x20d   :  { %v742_v1 = vadd.f32 %v2081_v45, %v741_v63  ;;  %v1712_v2 = vmax.f32 %v795_v61, %v1612_v62  ;;  %v1559_v3 = vadd.f32 %v2081_v45, %v1558_v0 }
 0x20f   :  { %v845_v5 = vmax.f32 %v742_v1, 0.0  ;;  %1813 = vst.msk [vmem:[%s3524_s4 + $0x180] sm:$0xff] %vm1764_vm2, %v1712_v2  ;;  %v1662_v6 = vmax.f32 %v1559_v3, 0.0 }
 0x210   :  { %v594_v7 = vpop.f32.mrf.mxu0  ;;  %v1411_v4 = vpop.f32.mrf.mxu1 }
 0x211   :  { %v1762_v8 = vmax.f32 %v845_v5, %v1662_v6  ;;  %v595_v9 = vadd.f32 %v2081_v45, %v594_v7  ;;  %v1412_v11 = vadd.f32 %v2081_v45, %v1411_v4 }
 0x213   :  { %1863 = vst.msk [vmem:[%s3524_s4 + $0x310] sm:$0xff] %vm1764_vm2, %v1762_v8  ;;  %v796_v12 = vmax.f32 %v595_v9, 0.0  ;;  %v1613_v13 = vmax.f32 %v1412_v11, 0.0 }
 0x214   :  { %v744_v14 = vpop.f32.mrf.mxu2  ;;  %v1561_v15 = vpop.f32.mrf.mxu3 }
 0x215   :  { %v745_v16 = vadd.f32 %v2081_v45, %v744_v14  ;;  %v1713_v17 = vmax.f32 %v796_v12, %v1613_v13  ;;  %v1562_v18 = vadd.f32 %v2081_v45, %v1561_v15 }
 0x217   :  { %v846_v19 = vmax.f32 %v745_v16, 0.0  ;;  %1814 = vst.msk [vmem:[%s3524_s4 + $0x188] sm:$0xff] %vm1764_vm2, %v1713_v17  ;;  %v1663_v20 = vmax.f32 %v1562_v18, 0.0 }
 0x219   :  { %v1763_v21 = vmax.f32 %v846_v19, %v1663_v20 }
 0x21b   :  { %1864 = vst.msk [vmem:[%s3524_s4 + $0x318] sm:$0xff] %vm1764_vm2, %v1763_v21 }

// kernel: cnn_lstm_forward.6
= control target key start
LH: loop header
LB: loop body
LE: loop exit
PB: predicated region body
PF: predicated region fallthrough
CT: control target
= control target key end

     0   :  { %vm51_vm0 = vcmask 392192   ;;  %vm470_vm1 = vcmask 261120   ;;  %s944_s2 = inlined_call_operand.vmem [shape: f32[48,32], index: 2, kind: input, shape index: {}]   ;;  %s945_s0 = inlined_call_operand.vmem [shape: f32[192,48], index: 0, kind: input, shape index: {}]   ;;  %s946_s1 = inlined_call_operand.vmem [shape: f32[192,48], index: 1, kind: input, shape index: {}]   ;;  %s947_s3 = inlined_call_operand.vmem [shape: f32[1,32], index: 3, kind: input, shape index: {}]   ;;  %s948_s4 = inlined_call_operand.vmem [shape: f32[192,32], index: 4, kind: output, shape index: {}]  }
   0x1   :  { %v22_v0 = vld [vmem:[%s944_s2 + $0x28] sm:$0xff]  ;;  %v21_v1 = vld [vmem:[%s944_s2 + $0x20] sm:$0xff]  ;;  %v20_v2 = vld [vmem:[%s944_s2 + $0x18] sm:$0xff] }
   0x2   :  { %547 = vmatpush.msra.mxu2 %v22_v0  ;;  %553 = vmatpush.msra.mxu3 %v22_v0  ;;  %v19_v3 = vld [vmem:[%s944_s2 + $0x10] sm:$0xff]  ;;  %v18_v4 = vld [vmem:[%s944_s2 + $0x8] sm:$0xff]  ;;  %v17_v5 = vld [vmem:[%s944_s2] sm:$0xff] }
   0x3   :  { %134 = vmatpush.msra.mxu0 %v22_v0  ;;  %343 = vmatpush.msra.mxu1 %v22_v0  ;;  %v36_v6 = vld [vmem:[%s945_s0 + $0x60] sm:$0xff]  ;;  %v37_v10 = vld [vmem:[%s945_s0 + $0x68] sm:$0xff]  ;;  %v38_v14 = vld [vmem:[%s945_s0 + $0x70] sm:$0xff] }
   0x4   :  { %548 = vmatpush.msra.mxu2 %v21_v1  ;;  %554 = vmatpush.msra.mxu3 %v21_v1  ;;  %v249_v7 = vld [vmem:[%s946_s1 + $0x60] sm:$0xff]  ;;  %v250_v11 = vld [vmem:[%s946_s1 + $0x68] sm:$0xff]  ;;  %v251_v15 = vld [vmem:[%s946_s1 + $0x70] sm:$0xff] }
   0x5   :  { %135 = vmatpush.msra.mxu0 %v21_v1  ;;  %344 = vmatpush.msra.mxu1 %v21_v1  ;;  %v24_v8 = vld [vmem:[%s945_s0] sm:$0xff]  ;;  %v25_v12 = vld [vmem:[%s945_s0 + $0x8] sm:$0xff]  ;;  %v26_v16 = vld [vmem:[%s945_s0 + $0x10] sm:$0xff] }
   0x6   :  { %549 = vmatpush.msra.mxu2 %v20_v2  ;;  %555 = vmatpush.msra.mxu3 %v20_v2  ;;  %v237_v9 = vld [vmem:[%s946_s1] sm:$0xff]  ;;  %v238_v13 = vld [vmem:[%s946_s1 + $0x8] sm:$0xff]  ;;  %v239_v17 = vld [vmem:[%s946_s1 + $0x10] sm:$0xff] }
   0x7   :  { %136 = vmatpush.msra.mxu0 %v20_v2  ;;  %345 = vmatpush.msra.mxu1 %v20_v2  ;;  %v39_v18 = vld [vmem:[%s945_s0 + $0x78] sm:$0xff]  ;;  %v40_v22 = vld [vmem:[%s945_s0 + $0x80] sm:$0xff]  ;;  %v41_v26 = vld [vmem:[%s945_s0 + $0x88] sm:$0xff] }
   0x8   :  { %550 = vmatpush.msra.mxu2 %v19_v3  ;;  %556 = vmatpush.msra.mxu3 %v19_v3  ;;  %v252_v19 = vld [vmem:[%s946_s1 + $0x78] sm:$0xff]  ;;  %v253_v23 = vld [vmem:[%s946_s1 + $0x80] sm:$0xff]  ;;  %v254_v27 = vld [vmem:[%s946_s1 + $0x88] sm:$0xff] }
   0x9   :  { %137 = vmatpush.msra.mxu0 %v19_v3  ;;  %346 = vmatpush.msra.mxu1 %v19_v3  ;;  %v27_v20 = vld [vmem:[%s945_s0 + $0x18] sm:$0xff]  ;;  %v28_v24 = vld [vmem:[%s945_s0 + $0x20] sm:$0xff]  ;;  %v29_v28 = vld [vmem:[%s945_s0 + $0x28] sm:$0xff] }
   0xa   :  { %551 = vmatpush.msra.mxu2 %v18_v4  ;;  %557 = vmatpush.msra.mxu3 %v18_v4  ;;  %v240_v21 = vld [vmem:[%s946_s1 + $0x18] sm:$0xff]  ;;  %v241_v25 = vld [vmem:[%s946_s1 + $0x20] sm:$0xff]  ;;  %v242_v29 = vld [vmem:[%s946_s1 + $0x28] sm:$0xff] }
   0xb   :  { %138 = vmatpush.msra.mxu0 %v18_v4  ;;  %347 = vmatpush.msra.mxu1 %v18_v4  ;;  %v42_v30 = vld [vmem:[%s945_s0 + $0x90] sm:$0xff]  ;;  %v43_v34 = vld [vmem:[%s945_s0 + $0x98] sm:$0xff]  ;;  %v44_v38 = vld [vmem:[%s945_s0 + $0xa0] sm:$0xff] }
   0xc   :  { %552 = vmatpush.msra.mxu2 %v17_v5  ;;  %558 = vmatpush.msra.mxu3 %v17_v5  ;;  %v255_v31 = vld [vmem:[%s946_s1 + $0x90] sm:$0xff]  ;;  %v256_v35 = vld [vmem:[%s946_s1 + $0x98] sm:$0xff]  ;;  %v257_v39 = vld [vmem:[%s946_s1 + $0xa0] sm:$0xff] }
   0xd   :  { %511 = vmatmul.msk.f32.vlgmr.msra.gmra.mxu2 %vm51_vm0, %v36_v6  ;;  %535 = vmatmul.msk.f32.vlgmr.msra.gmra.mxu3 %vm51_vm0, %v249_v7  ;;  %v30_v32 = vld [vmem:[%s945_s0 + $0x30] sm:$0xff]  ;;  %v31_v36 = vld [vmem:[%s945_s0 + $0x38] sm:$0xff]  ;;  %v32_v40 = vld [vmem:[%s945_s0 + $0x40] sm:$0xff] }
   0xe   :  { %139 = vmatpush.msra.mxu0 %v17_v5  ;;  %348 = vmatpush.msra.mxu1 %v17_v5  ;;  %v243_v33 = vld [vmem:[%s946_s1 + $0x30] sm:$0xff]  ;;  %v244_v37 = vld [vmem:[%s946_s1 + $0x38] sm:$0xff]  ;;  %v245_v41 = vld [vmem:[%s946_s1 + $0x40] sm:$0xff] }
   0xf   :  { %499 = vmatmul.msk.f32.vlgmr.msra.gmra.mxu0 %vm51_vm0, %v24_v8  ;;  %523 = vmatmul.msk.f32.vlgmr.msra.gmra.mxu1 %vm51_vm0, %v237_v9  ;;  %v45_v42 = vld [vmem:[%s945_s0 + $0xa8] sm:$0xff]  ;;  %v46_v46 = vld [vmem:[%s945_s0 + $0xb0] sm:$0xff]  ;;  %v47_v50 = vld [vmem:[%s945_s0 + $0xb8] sm:$0xff] }
  0x10   :  { %v258_v43 = vld [vmem:[%s946_s1 + $0xa8] sm:$0xff]  ;;  %v259_v47 = vld [vmem:[%s946_s1 + $0xb0] sm:$0xff]  ;;  %v260_v51 = vld [vmem:[%s946_s1 + $0xb8] sm:$0xff] }
  0x11   :  { %v33_v44 = vld [vmem:[%s945_s0 + $0x48] sm:$0xff]  ;;  %v34_v48 = vld [vmem:[%s945_s0 + $0x50] sm:$0xff]  ;;  %v35_v52 = vld [vmem:[%s945_s0 + $0x58] sm:$0xff] }
  0x12   :  { %v246_v45 = vld [vmem:[%s946_s1 + $0x48] sm:$0xff]  ;;  %v247_v49 = vld [vmem:[%s946_s1 + $0x50] sm:$0xff]  ;;  %v248_v53 = vld [vmem:[%s946_s1 + $0x58] sm:$0xff] }
  0x13   :  { %v798_v54 = vld [vmem:[%s947_s3] ss:$0 sm:$0xff] }
  0x15   :  { %512 = vmatmul.msk.f32.gmra.mxu2 %vm51_vm0, %v37_v10  ;;  %536 = vmatmul.msk.f32.gmra.mxu3 %vm51_vm0, %v250_v11 }
  0x17   :  { %500 = vmatmul.msk.f32.gmra.mxu0 %vm51_vm0, %v25_v12  ;;  %524 = vmatmul.msk.f32.gmra.mxu1 %vm51_vm0, %v238_v13 }
  0x1d   :  { %513 = vmatmul.msk.f32.gmra.mxu2 %vm51_vm0, %v38_v14  ;;  %537 = vmatmul.msk.f32.gmra.mxu3 %vm51_vm0, %v251_v15 }
  0x1f   :  { %501 = vmatmul.msk.f32.gmra.mxu0 %vm51_vm0, %v26_v16  ;;  %525 = vmatmul.msk.f32.gmra.mxu1 %vm51_vm0, %v239_v17 }
  0x25   :  { %514 = vmatmul.msk.f32.gmra.mxu2 %vm51_vm0, %v39_v18  ;;  %538 = vmatmul.msk.f32.gmra.mxu3 %vm51_vm0, %v252_v19 }
  0x27   :  { %502 = vmatmul.msk.f32.gmra.mxu0 %vm51_vm0, %v27_v20  ;;  %526 = vmatmul.msk.f32.gmra.mxu1 %vm51_vm0, %v240_v21 }
  0x2d   :  { %515 = vmatmul.msk.f32.gmra.mxu2 %vm51_vm0, %v40_v22  ;;  %539 = vmatmul.msk.f32.gmra.mxu3 %vm51_vm0, %v253_v23 }
  0x2f   :  { %503 = vmatmul.msk.f32.gmra.mxu0 %vm51_vm0, %v28_v24  ;;  %527 = vmatmul.msk.f32.gmra.mxu1 %vm51_vm0, %v241_v25 }
  0x35   :  { %516 = vmatmul.msk.f32.gmra.mxu2 %vm51_vm0, %v41_v26  ;;  %540 = vmatmul.msk.f32.gmra.mxu3 %vm51_vm0, %v254_v27 }
  0x37   :  { %504 = vmatmul.msk.f32.gmra.mxu0 %vm51_vm0, %v29_v28  ;;  %528 = vmatmul.msk.f32.gmra.mxu1 %vm51_vm0, %v242_v29 }
  0x3d   :  { %517 = vmatmul.msk.f32.gmra.mxu2 %vm51_vm0, %v42_v30  ;;  %541 = vmatmul.msk.f32.gmra.mxu3 %vm51_vm0, %v255_v31 }
  0x3f   :  { %505 = vmatmul.msk.f32.gmra.mxu0 %vm51_vm0, %v30_v32  ;;  %529 = vmatmul.msk.f32.gmra.mxu1 %vm51_vm0, %v243_v33 }
  0x45   :  { %518 = vmatmul.msk.f32.gmra.mxu2 %vm51_vm0, %v43_v34  ;;  %542 = vmatmul.msk.f32.gmra.mxu3 %vm51_vm0, %v256_v35 }
  0x47   :  { %506 = vmatmul.msk.f32.gmra.mxu0 %vm51_vm0, %v31_v36  ;;  %530 = vmatmul.msk.f32.gmra.mxu1 %vm51_vm0, %v244_v37 }
  0x4d   :  { %519 = vmatmul.msk.f32.gmra.mxu2 %vm51_vm0, %v44_v38  ;;  %543 = vmatmul.msk.f32.gmra.mxu3 %vm51_vm0, %v257_v39 }
  0x4f   :  { %507 = vmatmul.msk.f32.gmra.mxu0 %vm51_vm0, %v32_v40  ;;  %531 = vmatmul.msk.f32.gmra.mxu1 %vm51_vm0, %v245_v41 }
  0x55   :  { %520 = vmatmul.msk.f32.gmra.mxu2 %vm51_vm0, %v45_v42  ;;  %544 = vmatmul.msk.f32.gmra.mxu3 %vm51_vm0, %v258_v43 }
  0x57   :  { %508 = vmatmul.msk.f32.gmra.mxu0 %vm51_vm0, %v33_v44  ;;  %532 = vmatmul.msk.f32.gmra.mxu1 %vm51_vm0, %v246_v45 }
  0x5d   :  { %521 = vmatmul.msk.f32.gmra.mxu2 %vm51_vm0, %v46_v46  ;;  %545 = vmatmul.msk.f32.gmra.mxu3 %vm51_vm0, %v259_v47 }
  0x5f   :  { %509 = vmatmul.msk.f32.gmra.mxu0 %vm51_vm0, %v34_v48  ;;  %533 = vmatmul.msk.f32.gmra.mxu1 %vm51_vm0, %v247_v49 }
  0x65   :  { %522 = vmatmul.msk.f32.gmra.mxu2 %vm51_vm0, %v47_v50  ;;  %546 = vmatmul.msk.f32.gmra.mxu3 %vm51_vm0, %v260_v51 }
  0x67   :  { %510 = vmatmul.msk.f32.gmra.mxu0 %vm51_vm0, %v35_v52  ;;  %534 = vmatmul.msk.f32.gmra.mxu1 %vm51_vm0, %v248_v53 }
  0x8c   :  { %v141_v55 = vpop.f32.mrf.mxu0  ;;  %v350_v56 = vpop.f32.mrf.mxu1 }
  0x8d   :  { %v142_v57 = vadd.f32 %v798_v54, %v141_v55  ;;  %v351_v58 = vadd.f32 %v798_v54, %v350_v56 }
  0x8f   :  { %v213_v59 = vmax.f32 %v142_v57, 0.0  ;;  %v422_v60 = vmax.f32 %v351_v58, 0.0 }
  0x90   :  { %v177_v61 = vpop.f32.mrf.mxu2  ;;  %v386_v62 = vpop.f32.mrf.mxu3 }
  0x91   :  { %v178_v63 = vadd.f32 %v798_v54, %v177_v61  ;;  %v446_v0 = vmax.f32 %v213_v59, %v422_v60  ;;  %v387_v1 = vadd.f32 %v798_v54, %v386_v62 }
  0x93   :  { %v225_v2 = vmax.f32 %v178_v63, 0.0  ;;  %471 = vst.msk [vmem:[%s948_s4] sm:$0xff] %vm470_vm1, %v446_v0  ;;  %v434_v3 = vmax.f32 %v387_v1, 0.0 }
  0x94   :  { %v144_v4 = vpop.f32.mrf.mxu0  ;;  %v353_v5 = vpop.f32.mrf.mxu1 }
  0x95   :  { %v458_v6 = vmax.f32 %v225_v2, %v434_v3  ;;  %v145_v7 = vadd.f32 %v798_v54, %v144_v4  ;;  %v354_v8 = vadd.f32 %v798_v54, %v353_v5 }
  0x97   :  { %483 = vst.msk [vmem:[%s948_s4 + $0x60] sm:$0xff] %vm470_vm1, %v458_v6  ;;  %v214_v9 = vmax.f32 %v145_v7, 0.0  ;;  %v423_v10 = vmax.f32 %v354_v8, 0.0 }
  0x98   :  { %v180_v11 = vpop.f32.mrf.mxu2  ;;  %v389_v12 = vpop.f32.mrf.mxu3 }
  0x99   :  { %v181_v13 = vadd.f32 %v798_v54, %v180_v11  ;;  %v447_v14 = vmax.f32 %v214_v9, %v423_v10  ;;  %v390_v15 = vadd.f32 %v798_v54, %v389_v12 }
  0x9b   :  { %v226_v16 = vmax.f32 %v181_v13, 0.0  ;;  %472 = vst.msk [vmem:[%s948_s4 + $0x8] sm:$0xff] %vm470_vm1, %v447_v14  ;;  %v435_v17 = vmax.f32 %v390_v15, 0.0 }
  0x9c   :  { %v147_v18 = vpop.f32.mrf.mxu0  ;;  %v356_v19 = vpop.f32.mrf.mxu1 }
  0x9d   :  { %v459_v20 = vmax.f32 %v226_v16, %v435_v17  ;;  %v148_v21 = vadd.f32 %v798_v54, %v147_v18  ;;  %v357_v22 = vadd.f32 %v798_v54, %v356_v19 }
  0x9f   :  { %484 = vst.msk [vmem:[%s948_s4 + $0x68] sm:$0xff] %vm470_vm1, %v459_v20  ;;  %v215_v23 = vmax.f32 %v148_v21, 0.0  ;;  %v424_v24 = vmax.f32 %v357_v22, 0.0 }
  0xa0   :  { %v183_v25 = vpop.f32.mrf.mxu2  ;;  %v392_v26 = vpop.f32.mrf.mxu3 }
  0xa1   :  { %v184_v27 = vadd.f32 %v798_v54, %v183_v25  ;;  %v448_v28 = vmax.f32 %v215_v23, %v424_v24  ;;  %v393_v29 = vadd.f32 %v798_v54, %v392_v26 }
  0xa3   :  { %v227_v30 = vmax.f32 %v184_v27, 0.0  ;;  %473 = vst.msk [vmem:[%s948_s4 + $0x10] sm:$0xff] %vm470_vm1, %v448_v28  ;;  %v436_v31 = vmax.f32 %v393_v29, 0.0 }
  0xa4   :  { %v150_v32 = vpop.f32.mrf.mxu0  ;;  %v359_v33 = vpop.f32.mrf.mxu1 }
  0xa5   :  { %v460_v34 = vmax.f32 %v227_v30, %v436_v31  ;;  %v151_v35 = vadd.f32 %v798_v54, %v150_v32  ;;  %v360_v36 = vadd.f32 %v798_v54, %v359_v33 }
  0xa7   :  { %485 = vst.msk [vmem:[%s948_s4 + $0x70] sm:$0xff] %vm470_vm1, %v460_v34  ;;  %v216_v37 = vmax.f32 %v151_v35, 0.0  ;;  %v425_v38 = vmax.f32 %v360_v36, 0.0 }
  0xa8   :  { %v186_v39 = vpop.f32.mrf.mxu2  ;;  %v395_v40 = vpop.f32.mrf.mxu3 }
  0xa9   :  { %v187_v41 = vadd.f32 %v798_v54, %v186_v39  ;;  %v449_v42 = vmax.f32 %v216_v37, %v425_v38  ;;  %v396_v43 = vadd.f32 %v798_v54, %v395_v40 }
  0xab   :  { %v228_v44 = vmax.f32 %v187_v41, 0.0  ;;  %474 = vst.msk [vmem:[%s948_s4 + $0x18] sm:$0xff] %vm470_vm1, %v449_v42  ;;  %v437_v45 = vmax.f32 %v396_v43, 0.0 }
  0xac   :  { %v153_v46 = vpop.f32.mrf.mxu0  ;;  %v362_v47 = vpop.f32.mrf.mxu1 }
  0xad   :  { %v461_v48 = vmax.f32 %v228_v44, %v437_v45  ;;  %v154_v49 = vadd.f32 %v798_v54, %v153_v46  ;;  %v363_v50 = vadd.f32 %v798_v54, %v362_v47 }
  0xaf   :  { %486 = vst.msk [vmem:[%s948_s4 + $0x78] sm:$0xff] %vm470_vm1, %v461_v48  ;;  %v217_v51 = vmax.f32 %v154_v49, 0.0  ;;  %v426_v52 = vmax.f32 %v363_v50, 0.0 }
  0xb0   :  { %v189_v53 = vpop.f32.mrf.mxu2  ;;  %v398_v55 = vpop.f32.mrf.mxu3 }
  0xb1   :  { %v190_v56 = vadd.f32 %v798_v54, %v189_v53  ;;  %v450_v57 = vmax.f32 %v217_v51, %v426_v52  ;;  %v399_v58 = vadd.f32 %v798_v54, %v398_v55 }
  0xb3   :  { %v229_v59 = vmax.f32 %v190_v56, 0.0  ;;  %475 = vst.msk [vmem:[%s948_s4 + $0x20] sm:$0xff] %vm470_vm1, %v450_v57  ;;  %v438_v60 = vmax.f32 %v399_v58, 0.0 }
  0xb4   :  { %v156_v61 = vpop.f32.mrf.mxu0  ;;  %v365_v62 = vpop.f32.mrf.mxu1 }
  0xb5   :  { %v462_v63 = vmax.f32 %v229_v59, %v438_v60  ;;  %v157_v0 = vadd.f32 %v798_v54, %v156_v61  ;;  %v366_v1 = vadd.f32 %v798_v54, %v365_v62 }
  0xb7   :  { %487 = vst.msk [vmem:[%s948_s4 + $0x80] sm:$0xff] %vm470_vm1, %v462_v63  ;;  %v218_v2 = vmax.f32 %v157_v0, 0.0  ;;  %v427_v3 = vmax.f32 %v366_v1, 0.0 }
  0xb8   :  { %v192_v4 = vpop.f32.mrf.mxu2  ;;  %v401_v5 = vpop.f32.mrf.mxu3 }
  0xb9   :  { %v193_v6 = vadd.f32 %v798_v54, %v192_v4  ;;  %v451_v7 = vmax.f32 %v218_v2, %v427_v3  ;;  %v402_v8 = vadd.f32 %v798_v54, %v401_v5 }
  0xbb   :  { %v230_v9 = vmax.f32 %v193_v6, 0.0  ;;  %476 = vst.msk [vmem:[%s948_s4 + $0x28] sm:$0xff] %vm470_vm1, %v451_v7  ;;  %v439_v10 = vmax.f32 %v402_v8, 0.0 }
  0xbc   :  { %v159_v11 = vpop.f32.mrf.mxu0  ;;  %v368_v12 = vpop.f32.mrf.mxu1 }
  0xbd   :  { %v463_v13 = vmax.f32 %v230_v9, %v439_v10  ;;  %v160_v14 = vadd.f32 %v798_v54, %v159_v11  ;;  %v369_v15 = vadd.f32 %v798_v54, %v368_v12 }
  0xbf   :  { %488 = vst.msk [vmem:[%s948_s4 + $0x88] sm:$0xff] %vm470_vm1, %v463_v13  ;;  %v219_v16 = vmax.f32 %v160_v14, 0.0  ;;  %v428_v17 = vmax.f32 %v369_v15, 0.0 }
  0xc0   :  { %v195_v18 = vpop.f32.mrf.mxu2  ;;  %v404_v19 = vpop.f32.mrf.mxu3 }
  0xc1   :  { %v196_v20 = vadd.f32 %v798_v54, %v195_v18  ;;  %v452_v21 = vmax.f32 %v219_v16, %v428_v17  ;;  %v405_v22 = vadd.f32 %v798_v54, %v404_v19 }
  0xc3   :  { %v231_v23 = vmax.f32 %v196_v20, 0.0  ;;  %477 = vst.msk [vmem:[%s948_s4 + $0x30] sm:$0xff] %vm470_vm1, %v452_v21  ;;  %v440_v24 = vmax.f32 %v405_v22, 0.0 }
  0xc4   :  { %v162_v25 = vpop.f32.mrf.mxu0  ;;  %v371_v26 = vpop.f32.mrf.mxu1 }
  0xc5   :  { %v464_v27 = vmax.f32 %v231_v23, %v440_v24  ;;  %v163_v28 = vadd.f32 %v798_v54, %v162_v25  ;;  %v372_v29 = vadd.f32 %v798_v54, %v371_v26 }
  0xc7   :  { %489 = vst.msk [vmem:[%s948_s4 + $0x90] sm:$0xff] %vm470_vm1, %v464_v27  ;;  %v220_v30 = vmax.f32 %v163_v28, 0.0  ;;  %v429_v31 = vmax.f32 %v372_v29, 0.0 }
  0xc8   :  { %v198_v32 = vpop.f32.mrf.mxu2  ;;  %v407_v33 = vpop.f32.mrf.mxu3 }
  0xc9   :  { %v199_v34 = vadd.f32 %v798_v54, %v198_v32  ;;  %v453_v35 = vmax.f32 %v220_v30, %v429_v31  ;;  %v408_v36 = vadd.f32 %v798_v54, %v407_v33 }
  0xcb   :  { %v232_v37 = vmax.f32 %v199_v34, 0.0  ;;  %478 = vst.msk [vmem:[%s948_s4 + $0x38] sm:$0xff] %vm470_vm1, %v453_v35  ;;  %v441_v38 = vmax.f32 %v408_v36, 0.0 }
  0xcc   :  { %v165_v39 = vpop.f32.mrf.mxu0  ;;  %v374_v40 = vpop.f32.mrf.mxu1 }
  0xcd   :  { %v465_v41 = vmax.f32 %v232_v37, %v441_v38  ;;  %v166_v42 = vadd.f32 %v798_v54, %v165_v39  ;;  %v375_v43 = vadd.f32 %v798_v54, %v374_v40 }
  0xcf   :  { %490 = vst.msk [vmem:[%s948_s4 + $0x98] sm:$0xff] %vm470_vm1, %v465_v41  ;;  %v221_v44 = vmax.f32 %v166_v42, 0.0  ;;  %v430_v45 = vmax.f32 %v375_v43, 0.0 }
  0xd0   :  { %v201_v46 = vpop.f32.mrf.mxu2  ;;  %v410_v47 = vpop.f32.mrf.mxu3 }
  0xd1   :  { %v202_v48 = vadd.f32 %v798_v54, %v201_v46  ;;  %v454_v49 = vmax.f32 %v221_v44, %v430_v45  ;;  %v411_v50 = vadd.f32 %v798_v54, %v410_v47 }
  0xd3   :  { %v233_v51 = vmax.f32 %v202_v48, 0.0  ;;  %479 = vst.msk [vmem:[%s948_s4 + $0x40] sm:$0xff] %vm470_vm1, %v454_v49  ;;  %v442_v52 = vmax.f32 %v411_v50, 0.0 }
  0xd4   :  { %v168_v53 = vpop.f32.mrf.mxu0  ;;  %v377_v55 = vpop.f32.mrf.mxu1 }
  0xd5   :  { %v466_v56 = vmax.f32 %v233_v51, %v442_v52  ;;  %v169_v57 = vadd.f32 %v798_v54, %v168_v53  ;;  %v378_v58 = vadd.f32 %v798_v54, %v377_v55 }
  0xd7   :  { %491 = vst.msk [vmem:[%s948_s4 + $0xa0] sm:$0xff] %vm470_vm1, %v466_v56  ;;  %v222_v59 = vmax.f32 %v169_v57, 0.0  ;;  %v431_v60 = vmax.f32 %v378_v58, 0.0 }
  0xd8   :  { %v204_v61 = vpop.f32.mrf.mxu2  ;;  %v413_v62 = vpop.f32.mrf.mxu3 }
  0xd9   :  { %v205_v63 = vadd.f32 %v798_v54, %v204_v61  ;;  %v455_v0 = vmax.f32 %v222_v59, %v431_v60  ;;  %v414_v1 = vadd.f32 %v798_v54, %v413_v62 }
  0xdb   :  { %v234_v2 = vmax.f32 %v205_v63, 0.0  ;;  %480 = vst.msk [vmem:[%s948_s4 + $0x48] sm:$0xff] %vm470_vm1, %v455_v0  ;;  %v443_v3 = vmax.f32 %v414_v1, 0.0 }
  0xdc   :  { %v171_v4 = vpop.f32.mrf.mxu0  ;;  %v380_v5 = vpop.f32.mrf.mxu1 }
  0xdd   :  { %v467_v6 = vmax.f32 %v234_v2, %v443_v3  ;;  %v172_v7 = vadd.f32 %v798_v54, %v171_v4  ;;  %v381_v8 = vadd.f32 %v798_v54, %v380_v5 }
  0xdf   :  { %492 = vst.msk [vmem:[%s948_s4 + $0xa8] sm:$0xff] %vm470_vm1, %v467_v6  ;;  %v223_v9 = vmax.f32 %v172_v7, 0.0  ;;  %v432_v10 = vmax.f32 %v381_v8, 0.0 }
  0xe0   :  { %v207_v11 = vpop.f32.mrf.mxu2  ;;  %v416_v12 = vpop.f32.mrf.mxu3 }
  0xe1   :  { %v208_v13 = vadd.f32 %v798_v54, %v207_v11  ;;  %v456_v14 = vmax.f32 %v223_v9, %v432_v10  ;;  %v417_v15 = vadd.f32 %v798_v54, %v416_v12 }
  0xe3   :  { %v235_v16 = vmax.f32 %v208_v13, 0.0  ;;  %481 = vst.msk [vmem:[%s948_s4 + $0x50] sm:$0xff] %vm470_vm1, %v456_v14  ;;  %v444_v17 = vmax.f32 %v417_v15, 0.0 }
  0xe4   :  { %v174_v18 = vpop.f32.mrf.mxu0  ;;  %v383_v19 = vpop.f32.mrf.mxu1 }
  0xe5   :  { %v468_v20 = vmax.f32 %v235_v16, %v444_v17  ;;  %v175_v21 = vadd.f32 %v798_v54, %v174_v18  ;;  %v384_v22 = vadd.f32 %v798_v54, %v383_v19 }
  0xe7   :  { %493 = vst.msk [vmem:[%s948_s4 + $0xb0] sm:$0xff] %vm470_vm1, %v468_v20  ;;  %v224_v23 = vmax.f32 %v175_v21, 0.0  ;;  %v433_v24 = vmax.f32 %v384_v22, 0.0 }
  0xe8   :  { %v210_v25 = vpop.f32.mrf.mxu2  ;;  %v419_v26 = vpop.f32.mrf.mxu3 }
  0xe9   :  { %v211_v27 = vadd.f32 %v798_v54, %v210_v25  ;;  %v457_v28 = vmax.f32 %v224_v23, %v433_v24  ;;  %v420_v29 = vadd.f32 %v798_v54, %v419_v26 }
  0xeb   :  { %v236_v30 = vmax.f32 %v211_v27, 0.0  ;;  %482 = vst.msk [vmem:[%s948_s4 + $0x58] sm:$0xff] %vm470_vm1, %v457_v28  ;;  %v445_v31 = vmax.f32 %v420_v29, 0.0 }
  0xed   :  { %v469_v32 = vmax.f32 %v236_v30, %v445_v31 }
  0xef   :  { %494 = vst.msk [vmem:[%s948_s4 + $0xb8] sm:$0xff] %vm470_vm1, %v469_v32 }

// kernel: cnn_lstm_forward.9
= control target key start
LH: loop header
LB: loop body
LE: loop exit
PB: predicated region body
PF: predicated region fallthrough
CT: control target
= control target key end

     0   :  { %vm47_vm0 = vcmask 523264   ;;  %v202_v30 = vmov 0   ;;  %s203_s23 = smov 1   ;;  %vm141_vm1 = vcmask 7168   ;;  %vm183_vm2 = vcmask 15360   ;;  %s331_s2 = inlined_call_operand.vmem [shape: f32[64,64], index: 2, kind: input, shape index: {}]   ;;  %s332_s4 = inlined_call_operand.vmem [shape: f32[64,1], index: 4, kind: input, shape index: {}]   ;;  %s333_s3 = inlined_call_operand.vmem [shape: f32[1,64], index: 3, kind: input, shape index: {}]   ;;  %s334_s0 = inlined_call_operand.vmem [shape: f32[16,64], index: 0, kind: input, shape index: {}]   ;;  %s335_s1 = inlined_call_operand.vmem [shape: f32[16,64], index: 1, kind: input, shape index: {}]   ;;  %s336_s5 = inlined_call_operand.<no memory space> [shape: f32[1,1], index: 5, kind: input, shape index: {}]   ;;  %s337_s7 = inlined_call_operand.<no memory space> [shape: f32[1,1], index: 7, kind: input, shape index: {}]   ;;  %s338_s6 = inlined_call_operand.vmem [shape: f32[1,8], index: 6, kind: input, shape index: {}]   ;;  %s339_s8 = inlined_call_operand.vmem [shape: f32[9,2], index: 8, kind: output, shape index: {}]  }
   0x1   :  { %v42_v0 = vld [vmem:[%s331_s2 + $0x38] sm:$0xff]  ;;  %v41_v1 = vld [vmem:[%s331_s2 + $0x30] sm:$0xff]  ;;  %v40_v2 = vld [vmem:[%s331_s2 + $0x28] sm:$0xff]  ;;  %v13_v29 = vstv %s336_s5  ;;  %198 = vset.pattern.permute.xlu0 %v202_v30  ;;  %199 = vset.pattern.permute.xlu1 %v202_v30  ;;  %vm159_vm3 = vcmask 64512   ;;  %vm185_vm4 = vcmask 8192  }
   0x2   :  { %62 = vmatpush.msra.mxu0 %v42_v0  ;;  %v90_v3 = vld [vmem:[%s332_s4 + $0x38] sm:$0xff]  ;;  %v89_v4 = vld [vmem:[%s332_s4 + $0x30] sm:$0xff]  ;;  %v39_v5 = vld [vmem:[%s331_s2 + $0x20] sm:$0xff]  ;;  %14 = vst [vmem:[#allocation2] sm:$0x1] %v13_v29  ;;  %v15_v33 = vstv %s337_s7 }
   0x3   :  { %102 = vmatpush.msra.mxu1 %v90_v3  ;;  %125 = vmatpush.msra.mxu2 %v90_v3  ;;  %v88_v6 = vld [vmem:[%s332_s4 + $0x28] sm:$0xff]  ;;  %v38_v7 = vld [vmem:[%s331_s2 + $0x18] sm:$0xff]  ;;  %v87_v8 = vld [vmem:[%s332_s4 + $0x20] sm:$0xff]  ;;  %16 = vst [vmem:[#allocation3] sm:$0x1] %v15_v33 }
   0x4   :  { %63 = vmatpush.msra.mxu0 %v41_v1  ;;  %v37_v9 = vld [vmem:[%s331_s2 + $0x10] sm:$0xff]  ;;  %v36_v10 = vld [vmem:[%s331_s2 + $0x8] sm:$0xff]  ;;  %v35_v11 = vld [vmem:[%s331_s2] sm:$0xff] }
   0x5   :  { %103 = vmatpush.msra.mxu1 %v89_v4  ;;  %126 = vmatpush.msra.mxu2 %v89_v4  ;;  %v33_v12 = vld [vmem:[%s334_s0] sm:$0xff]  ;;  %v34_v13 = vld [vmem:[%s334_s0 + $0x8] sm:$0xff]  ;;  %v86_v14 = vld [vmem:[%s332_s4 + $0x18] sm:$0xff] }
   0x6   :  { %64 = vmatpush.msra.mxu0 %v40_v2  ;;  %v85_v15 = vld [vmem:[%s332_s4 + $0x10] sm:$0xff]  ;;  %v84_v16 = vld [vmem:[%s332_s4 + $0x8] sm:$0xff]  ;;  %v83_v17 = vld [vmem:[%s332_s4] sm:$0xff] }
   0x7   :  { %104 = vmatpush.msra.mxu1 %v88_v6  ;;  %127 = vmatpush.msra.mxu2 %v88_v6  ;;  %v200_v18 = vld [vmem:[%s333_s3] ss:$0 sm:$0xff]  ;;  %v78_v25 = vld [vmem:[%s335_s1 + $0x8] sm:$0xff] }
   0x8   :  { %65 = vmatpush.msra.mxu0 %v39_v5  ;;  %v77_v20 = vld [vmem:[%s335_s1] sm:$0xff] }
   0x9   :  { %105 = vmatpush.msra.mxu1 %v87_v8  ;;  %128 = vmatpush.msra.mxu2 %v87_v8  ;;  %v201_v32 = vld [vmem:[#allocation2] ss:$0 sm:$0xff] }
   0xa   :  { %66 = vmatpush.msra.mxu0 %v38_v7  ;;  %v152_v34 = vld [vmem:[#allocation3] sm:$0x1]  ;;  %v151_v40 = vld [vmem:[%s338_s6] sm:$0x1] }
   0xb   :  { %106 = vmatpush.msra.mxu1 %v86_v14  ;;  %129 = vmatpush.msra.mxu2 %v86_v14 }
   0xc   :  { %67 = vmatpush.msra.mxu0 %v37_v9  ;;  %155 = vperm.xlu1 %199, %v152_v34  }
   0xd   :  { %107 = vmatpush.msra.mxu1 %v85_v15  ;;  %130 = vmatpush.msra.mxu2 %v85_v15 }
   0xe   :  { %68 = vmatpush.msra.mxu0 %v36_v10 }
   0xf   :  { %108 = vmatpush.msra.mxu1 %v84_v16  ;;  %131 = vmatpush.msra.mxu2 %v84_v16 }
  0x10   :  { %69 = vmatpush.msra.mxu0 %v35_v11 }
  0x11   :  { %191 = vmatmul.msk.f32.vlgmr.msra.gmra.mxu0 %vm47_vm0, %v33_v12  ;;  %109 = vmatpush.msra.mxu1 %v83_v17 }
  0x12   :  { %132 = vmatpush.msra.mxu2 %v83_v17 }
  0x19   :  { %192 = vmatmul.msk.f32.gmra.mxu0 %vm47_vm0, %v34_v13 }
  0x7e   :  { %v156_v41 = vpop.permute.xlu1 %155 }
  0x7f   :  { %v158_v42 = vperm.slane %v156_v41, 0 }
  0x8e   :  { %v71_v19 = vpop.f32.mrf.mxu0 }
  0x8f   :  { %v72_v21 = vadd.f32 %v200_v18, %v71_v19 }
  0x91   :  { %v79_v22 = vadd.f32 %v77_v20, %v72_v21 }
  0x93   :  { %v81_v23 = vmax.f32 %v79_v22, 0.0 }
  0x95   :  { %193 = vmatmul.msk.f32.vlgmr.msra.gmra.mxu1 %vm47_vm0, %v81_v23 }
  0x96   :  { %v74_v24 = vpop.f32.mrf.mxu0 }
  0x97   :  { %v75_v26 = vadd.f32 %v200_v18, %v74_v24 }
  0x99   :  { %v80_v27 = vadd.f32 %v78_v25, %v75_v26 }
  0x9b   :  { %v82_v28 = vmax.f32 %v80_v27, 0.0 }
  0x9d   :  { %194 = vmatmul.msk.f32.vlgmr.msra.gmra.mxu2 %vm47_vm0, %v82_v28 }
 0x112   :  { %v111_v36 = vpop.f32.mrf.mxu1 }
 0x120   :  { %v134_v31 = vpop.f32.mrf.mxu2 }
 0x121   :  { %138 = vrot.lane.b32.xlu0 %v134_v31, %s203_s23 }
 0x129   :  { %147 = vperm.xlu0 %198, %v201_v32  }
 0x193   :  { %v139_v35 = vpop.permute.xlu0 %138 }
 0x194   :  { %v142_v38 = vsel %vm141_vm1, %v111_v36, %v139_v35 }
 0x19b   :  { %v148_v37 = vpop.permute.xlu0 %147 }
 0x19c   :  { %v150_v39 = vadd.f32 %v148_v37, %v142_v38 }
 0x19e   :  { %184 = vst.msk [vmem:[%s339_s8] sm:$0xff] %vm183_vm2, %v150_v39  ;;  %178 = vmatpush.msra.mxu3 %v150_v39 }
 0x19f   :  { %195 = vmatmul.msk.f32.vlgmr.msra.gmra.mxu3 %vm159_vm3, %v151_v40 }
 0x222   :  { %v180_v43 = vpop.f32.mrf.mxu3 }
 0x223   :  { %v181_v44 = vadd.f32 %v180_v43, %v158_v42 }
 0x225   :  { %186 = vst.msk [vmem:[%s339_s8 + $0x8] sm:$0x1] %vm185_vm4, %v181_v44 }

// kernel: cnn_lstm_forward.7
= control target key start
LH: loop header
LB: loop body
LE: loop exit
PB: predicated region body
PF: predicated region fallthrough
CT: control target
= control target key end

     0   :  { %vm257_vm0 = vcmask 130048   ;;  %vm63_vm1 = vcmask 785408   ;;  %vm1129_vm2 = vcmask 261120   ;;  %vm1567_vm3 = vcmask 523264   ;;  %s3268_s6 = inlined_call_operand.vmem [shape: f32[16,64], index: 6, kind: input, shape index: {}]   ;;  %s3269_s1 = inlined_call_operand.vmem [shape: f32[800,16], index: 1, kind: input, shape index: {}]   ;;  %s3270_s7 = inlined_call_operand.vmem [shape: f32[1,64], index: 7, kind: input, shape index: {}]   ;;  %s3271_s4 = inlined_call_operand.vmem [shape: f32[96,64], index: 4, kind: input, shape index: {}]   ;;  %s3272_s0 = inlined_call_operand.vmem [shape: f32[96,96], index: 0, kind: input, shape index: {}]   ;;  %s3273_s5 = inlined_call_operand.vmem [shape: f32[1,64], index: 5, kind: input, shape index: {}]   ;;  %s3274_s2 = inlined_call_operand.vmem [shape: f32[96,800], index: 2, kind: input, shape index: {}]   ;;  %s3275_s3 = inlined_call_operand.vmem [shape: f32[96,1], index: 3, kind: input, shape index: {}]   ;;  %s3276_s8 = inlined_call_operand.vmem [shape: f32[192,64], index: 8, kind: input, shape index: {}]   ;;  %s3277_s9 = inlined_call_operand.vmem [shape: f32[1,64], index: 9, kind: input, shape index: {}]   ;;  %s3278_s10 = inlined_call_operand.vmem [shape: f32[16,64], index: 10, kind: output, shape index: {}]  }
   0x1   :  { %v252_v0 = vld [vmem:[%s3268_s6 + $0x8] sm:$0xff]  ;;  %v251_v1 = vld [vmem:[%s3268_s6] sm:$0xff]  ;;  %v153_v6 = vld [vmem:[%s3269_s1 + $0x10] sm:$0xff] }
   0x2   :  { %572 = vmatpush.msra.mxu0 %v252_v0  ;;  %1869 = vmatpush.msra.mxu1 %v252_v0  ;;  %v151_v2 = vld [vmem:[%s3269_s1] sm:$0xff]  ;;  %v152_v4 = vld [vmem:[%s3269_s1 + $0x8] sm:$0xff]  ;;  %v181_v7 = vld [vmem:[%s3269_s1 + $0xf0] sm:$0xff] }
   0x3   :  { %v179_v3 = vld [vmem:[%s3269_s1 + $0xe0] sm:$0xff]  ;;  %1870 = vmatpush.msra.mxu3 %v252_v0  ;;  %v180_v5 = vld [vmem:[%s3269_s1 + $0xe8] sm:$0xff]  ;;  %v154_v8 = vld [vmem:[%s3269_s1 + $0x18] sm:$0xff] }
   0x4   :  { %573 = vmatpush.msra.mxu0 %v251_v1  ;;  %1871 = vmatpush.msra.mxu1 %v251_v1  ;;  %v182_v9 = vld [vmem:[%s3269_s1 + $0xf8] sm:$0xff]  ;;  %v155_v10 = vld [vmem:[%s3269_s1 + $0x20] sm:$0xff]  ;;  %v156_v12 = vld [vmem:[%s3269_s1 + $0x28] sm:$0xff] }
   0x5   :  { %1747 = vmatmul.msk.f32.vlgmr.msra.gmra.mxu0 %vm257_vm0, %v151_v2  ;;  %1775 = vmatmul.msk.f32.vlgmr.msra.gmra.mxu1 %vm257_vm0, %v179_v3  ;;  %v183_v11 = vld [vmem:[%s3269_s1 + $0x100] sm:$0xff]  ;;  %v184_v13 = vld [vmem:[%s3269_s1 + $0x108] sm:$0xff]  ;;  %v157_v14 = vld [vmem:[%s3269_s1 + $0x30] sm:$0xff] }
   0x6   :  { %1872 = vmatpush.msra.mxu3 %v251_v1  ;;  %v185_v15 = vld [vmem:[%s3269_s1 + $0x110] sm:$0xff]  ;;  %v158_v16 = vld [vmem:[%s3269_s1 + $0x38] sm:$0xff]  ;;  %v159_v18 = vld [vmem:[%s3269_s1 + $0x40] sm:$0xff] }
   0x7   :  { %v186_v17 = vld [vmem:[%s3269_s1 + $0x118] sm:$0xff]  ;;  %v187_v19 = vld [vmem:[%s3269_s1 + $0x120] sm:$0xff]  ;;  %v160_v20 = vld [vmem:[%s3269_s1 + $0x48] sm:$0xff] }
   0x8   :  { %v188_v21 = vld [vmem:[%s3269_s1 + $0x128] sm:$0xff]  ;;  %v161_v22 = vld [vmem:[%s3269_s1 + $0x50] sm:$0xff]  ;;  %v162_v24 = vld [vmem:[%s3269_s1 + $0x58] sm:$0xff] }
   0x9   :  { %v189_v23 = vld [vmem:[%s3269_s1 + $0x130] sm:$0xff]  ;;  %v190_v25 = vld [vmem:[%s3269_s1 + $0x138] sm:$0xff]  ;;  %v232_v26 = vld [vmem:[%s3269_s1 + $0x288] sm:$0xff] }
   0xa   :  { %1828 = vmatmul.msk.f32.vlgmr.msra.gmra.mxu3 %vm257_vm0, %v232_v26  ;;  %v163_v27 = vld [vmem:[%s3269_s1 + $0x60] sm:$0xff]  ;;  %v233_v29 = vld [vmem:[%s3269_s1 + $0x290] sm:$0xff]  ;;  %v164_v30 = vld [vmem:[%s3269_s1 + $0x68] sm:$0xff] }
   0xb   :  { %v191_v28 = vld [vmem:[%s3269_s1 + $0x140] sm:$0xff]  ;;  %v192_v31 = vld [vmem:[%s3269_s1 + $0x148] sm:$0xff]  ;;  %v234_v32 = vld [vmem:[%s3269_s1 + $0x298] sm:$0xff] }
   0xc   :  { %v165_v33 = vld [vmem:[%s3269_s1 + $0x70] sm:$0xff]  ;;  %v235_v35 = vld [vmem:[%s3269_s1 + $0x2a0] sm:$0xff]  ;;  %v166_v36 = vld [vmem:[%s3269_s1 + $0x78] sm:$0xff] }
   0xd   :  { %1748 = vmatmul.msk.f32.gmra.mxu0 %vm257_vm0, %v152_v4  ;;  %1776 = vmatmul.msk.f32.gmra.mxu1 %vm257_vm0, %v180_v5  ;;  %v193_v34 = vld [vmem:[%s3269_s1 + $0x150] sm:$0xff]  ;;  %v194_v37 = vld [vmem:[%s3269_s1 + $0x158] sm:$0xff]  ;;  %v236_v38 = vld [vmem:[%s3269_s1 + $0x2a8] sm:$0xff] }
   0xe   :  { %v167_v41 = vld [vmem:[%s3269_s1 + $0x80] sm:$0xff]  ;;  %v237_v43 = vld [vmem:[%s3269_s1 + $0x2b0] sm:$0xff]  ;;  %v168_v46 = vld [vmem:[%s3269_s1 + $0x88] sm:$0xff] }
   0xf   :  { %v195_v42 = vld [vmem:[%s3269_s1 + $0x160] sm:$0xff]  ;;  %v196_v47 = vld [vmem:[%s3269_s1 + $0x168] sm:$0xff]  ;;  %v238_v48 = vld [vmem:[%s3269_s1 + $0x2b8] sm:$0xff] }
  0x10   :  { %v169_v51 = vld [vmem:[%s3269_s1 + $0x90] sm:$0xff]  ;;  %v239_v53 = vld [vmem:[%s3269_s1 + $0x2c0] sm:$0xff]  ;;  %v170_v57 = vld [vmem:[%s3269_s1 + $0x98] sm:$0xff] }
  0x11   :  { %v197_v52 = vld [vmem:[%s3269_s1 + $0x170] sm:$0xff]  ;;  %v2136_v54 = vld [vmem:[%s3270_s7] ss:$0 sm:$0xff]  ;;  %v198_v58 = vld [vmem:[%s3269_s1 + $0x178] sm:$0xff] }
  0x12   :  { %1829 = vmatmul.msk.f32.gmra.mxu3 %vm257_vm0, %v233_v29  ;;  %v240_v63 = vld [vmem:[%s3269_s1 + $0x2c8] sm:$0xff]  ;;  %v171_v5 = vld [vmem:[%s3269_s1 + $0xa0] sm:$0xff]  ;;  %v58_v29 = vld [vmem:[%s3271_s4 + $0x58] sm:$0xff] }
  0x13   :  { %v175_v26 = vld [vmem:[%s3269_s1 + $0xc0] sm:$0xff]  ;;  %104 = vmatpush.msra.mxu2 %v58_v29 }
  0x15   :  { %1749 = vmatmul.msk.f32.gmra.mxu0 %vm257_vm0, %v153_v6  ;;  %1777 = vmatmul.msk.f32.gmra.mxu1 %vm257_vm0, %v181_v7  ;;  %v199_v6 = vld [vmem:[%s3269_s1 + $0x180] sm:$0xff] }
  0x1a   :  { %1830 = vmatmul.msk.f32.gmra.mxu3 %vm257_vm0, %v234_v32 }
  0x1d   :  { %1750 = vmatmul.msk.f32.gmra.mxu0 %vm257_vm0, %v154_v8  ;;  %1778 = vmatmul.msk.f32.gmra.mxu1 %vm257_vm0, %v182_v9  ;;  %v241_v8 = vld [vmem:[%s3269_s1 + $0x2d0] sm:$0xff] }
  0x22   :  { %1831 = vmatmul.msk.f32.gmra.mxu3 %vm257_vm0, %v235_v35  ;;  %v56_v35 = vld [vmem:[%s3271_s4 + $0x48] sm:$0xff] }
  0x25   :  { %1751 = vmatmul.msk.f32.gmra.mxu0 %vm257_vm0, %v155_v10  ;;  %1779 = vmatmul.msk.f32.gmra.mxu1 %vm257_vm0, %v183_v11  ;;  %v172_v11 = vld [vmem:[%s3269_s1 + $0xa8] sm:$0xff] }
  0x2a   :  { %1832 = vmatmul.msk.f32.gmra.mxu3 %vm257_vm0, %v236_v38  ;;  %v54_v38 = vld [vmem:[%s3271_s4 + $0x38] sm:$0xff] }
  0x2d   :  { %1752 = vmatmul.msk.f32.gmra.mxu0 %vm257_vm0, %v156_v12  ;;  %1780 = vmatmul.msk.f32.gmra.mxu1 %vm257_vm0, %v184_v13  ;;  %v200_v12 = vld [vmem:[%s3269_s1 + $0x188] sm:$0xff]  ;;  %v242_v13 = vld [vmem:[%s3269_s1 + $0x2d8] sm:$0xff] }
  0x32   :  { %1833 = vmatmul.msk.f32.gmra.mxu3 %vm257_vm0, %v237_v43  ;;  %v177_v43 = vld [vmem:[%s3269_s1 + $0xd0] sm:$0xff] }
  0x35   :  { %1753 = vmatmul.msk.f32.gmra.mxu0 %vm257_vm0, %v157_v14  ;;  %1781 = vmatmul.msk.f32.gmra.mxu1 %vm257_vm0, %v185_v15 }
  0x3a   :  { %1834 = vmatmul.msk.f32.gmra.mxu3 %vm257_vm0, %v238_v48  ;;  %v50_v48 = vld [vmem:[%s3271_s4 + $0x18] sm:$0xff] }
  0x3d   :  { %1754 = vmatmul.msk.f32.gmra.mxu0 %vm257_vm0, %v158_v16  ;;  %1782 = vmatmul.msk.f32.gmra.mxu1 %vm257_vm0, %v186_v17  ;;  %v173_v16 = vld [vmem:[%s3269_s1 + $0xb0] sm:$0xff] }
  0x3e   :  { %v201_v17 = vld [vmem:[%s3269_s1 + $0x190] sm:$0xff] }
  0x42   :  { %1835 = vmatmul.msk.f32.gmra.mxu3 %vm257_vm0, %v239_v53  ;;  %v178_v53 = vld [vmem:[%s3269_s1 + $0xd8] sm:$0xff] }
  0x45   :  { %1755 = vmatmul.msk.f32.gmra.mxu0 %vm257_vm0, %v159_v18  ;;  %1783 = vmatmul.msk.f32.gmra.mxu1 %vm257_vm0, %v187_v19  ;;  %v243_v18 = vld [vmem:[%s3269_s1 + $0x2e0] sm:$0xff] }
  0x4a   :  { %1836 = vmatmul.msk.f32.gmra.mxu3 %vm257_vm0, %v240_v63 }
  0x4d   :  { %1756 = vmatmul.msk.f32.gmra.mxu0 %vm257_vm0, %v160_v20  ;;  %1784 = vmatmul.msk.f32.gmra.mxu1 %vm257_vm0, %v188_v21  ;;  %v174_v21 = vld [vmem:[%s3269_s1 + $0xb8] sm:$0xff] }
  0x52   :  { %1837 = vmatmul.msk.f32.gmra.mxu3 %vm257_vm0, %v241_v8 }
  0x55   :  { %1757 = vmatmul.msk.f32.gmra.mxu0 %vm257_vm0, %v161_v22  ;;  %1785 = vmatmul.msk.f32.gmra.mxu1 %vm257_vm0, %v189_v23  ;;  %v202_v22 = vld [vmem:[%s3269_s1 + $0x198] sm:$0xff]  ;;  %v244_v23 = vld [vmem:[%s3269_s1 + $0x2e8] sm:$0xff] }
  0x5a   :  { %1838 = vmatmul.msk.f32.gmra.mxu3 %vm257_vm0, %v242_v13 }
  0x5d   :  { %1758 = vmatmul.msk.f32.gmra.mxu0 %vm257_vm0, %v162_v24  ;;  %1786 = vmatmul.msk.f32.gmra.mxu1 %vm257_vm0, %v190_v25 }
  0x62   :  { %1839 = vmatmul.msk.f32.gmra.mxu3 %vm257_vm0, %v243_v18 }
  0x65   :  { %1759 = vmatmul.msk.f32.gmra.mxu0 %vm257_vm0, %v163_v27  ;;  %1787 = vmatmul.msk.f32.gmra.mxu1 %vm257_vm0, %v191_v28  ;;  %v203_v27 = vld [vmem:[%s3269_s1 + $0x1a0] sm:$0xff]  ;;  %v245_v28 = vld [vmem:[%s3269_s1 + $0x2f0] sm:$0xff] }
  0x6a   :  { %1840 = vmatmul.msk.f32.gmra.mxu3 %vm257_vm0, %v244_v23 }
  0x6d   :  { %1760 = vmatmul.msk.f32.gmra.mxu0 %vm257_vm0, %v164_v30  ;;  %1788 = vmatmul.msk.f32.gmra.mxu1 %vm257_vm0, %v192_v31  ;;  %v57_v30 = vld [vmem:[%s3271_s4 + $0x50] sm:$0xff] }
  0x6e   :  { %105 = vmatpush.msra.mxu2 %v57_v30 }
  0x70   :  { %106 = vmatpush.msra.mxu2 %v56_v35 }
  0x72   :  { %1841 = vmatmul.msk.f32.gmra.mxu3 %vm257_vm0, %v245_v28 }
  0x75   :  { %1761 = vmatmul.msk.f32.gmra.mxu0 %vm257_vm0, %v165_v33  ;;  %1789 = vmatmul.msk.f32.gmra.mxu1 %vm257_vm0, %v193_v34  ;;  %v176_v33 = vld [vmem:[%s3269_s1 + $0xc8] sm:$0xff] }
  0x76   :  { %v204_v34 = vld [vmem:[%s3269_s1 + $0x1a8] sm:$0xff] }
  0x7d   :  { %1762 = vmatmul.msk.f32.gmra.mxu0 %vm257_vm0, %v166_v36  ;;  %1790 = vmatmul.msk.f32.gmra.mxu1 %vm257_vm0, %v194_v37  ;;  %v55_v36 = vld [vmem:[%s3271_s4 + $0x40] sm:$0xff]  ;;  %v246_v37 = vld [vmem:[%s3269_s1 + $0x2f8] sm:$0xff] }
  0x7e   :  { %107 = vmatpush.msra.mxu2 %v55_v36  ;;  %1842 = vmatmul.msk.f32.gmra.mxu3 %vm257_vm0, %v246_v37 }
  0x80   :  { %108 = vmatpush.msra.mxu2 %v54_v38 }
  0x82   :  { %v2091_v39 = vpop.f32.mrf.mxu0  ;;  %v659_v40 = vpop.f32.mrf.mxu1 }
  0x83   :  { %v660_v1 = vadd.f32 %v2136_v54, %v659_v40  ;;  %v53_v40 = vld [vmem:[%s3271_s4 + $0x30] sm:$0xff] }
  0x84   :  { %109 = vmatpush.msra.mxu2 %v53_v40 }
  0x85   :  { %1763 = vmatmul.msk.f32.gmra.mxu0 %vm257_vm0, %v167_v41  ;;  %1791 = vmatmul.msk.f32.gmra.mxu1 %vm257_vm0, %v195_v42  ;;  %v903_v7 = vmax.f32 %v660_v1, 0.0 }
  0x8a   :  { %v2105_v44 = vpop.f32.mrf.mxu0  ;;  %v662_v45 = vpop.f32.mrf.mxu1 }
  0x8b   :  { %v663_v61 = vadd.f32 %v2136_v54, %v662_v45  ;;  %v205_v45 = vld [vmem:[%s3269_s1 + $0x1b0] sm:$0xff] }
  0x8d   :  { %1764 = vmatmul.msk.f32.gmra.mxu0 %vm257_vm0, %v168_v46  ;;  %1792 = vmatmul.msk.f32.gmra.mxu1 %vm257_vm0, %v196_v47  ;;  %v904_v2 = vmax.f32 %v663_v61, 0.0  ;;  %v52_v46 = vld [vmem:[%s3271_s4 + $0x28] sm:$0xff]  ;;  %v51_v47 = vld [vmem:[%s3271_s4 + $0x20] sm:$0xff]  ;;  %v2319_v63 = vpop.f32.mrf.mxu3 }
  0x8e   :  { %110 = vmatpush.msra.mxu2 %v52_v46 }
  0x90   :  { %111 = vmatpush.msra.mxu2 %v51_v47 }
  0x92   :  { %v2119_v49 = vpop.f32.mrf.mxu0  ;;  %v665_v50 = vpop.f32.mrf.mxu1  ;;  %112 = vmatpush.msra.mxu2 %v50_v48 }
  0x93   :  { %v666_v59 = vadd.f32 %v2136_v54, %v665_v50  ;;  %v49_v50 = vld [vmem:[%s3271_s4 + $0x10] sm:$0xff] }
  0x94   :  { %113 = vmatpush.msra.mxu2 %v49_v50  ;;  %v40_v50 = vld [vmem:[%s3272_s0 + $0x28] sm:$0xff] }
  0x95   :  { %1765 = vmatmul.msk.f32.gmra.mxu0 %vm257_vm0, %v169_v51  ;;  %1793 = vmatmul.msk.f32.gmra.mxu1 %vm257_vm0, %v197_v52  ;;  %v905_v0 = vmax.f32 %v666_v59, 0.0  ;;  %v35_v59 = vld [vmem:[%s3272_s0] sm:$0xff] }
  0x9a   :  { %v2138_v55 = vpop.f32.mrf.mxu0  ;;  %v668_v56 = vpop.f32.mrf.mxu1 }
  0x9b   :  { %v669_v60 = vadd.f32 %v2136_v54, %v668_v56  ;;  %v206_v56 = vld [vmem:[%s3269_s1 + $0x1b8] sm:$0xff] }
  0x9d   :  { %1766 = vmatmul.msk.f32.gmra.mxu0 %vm257_vm0, %v170_v57  ;;  %1794 = vmatmul.msk.f32.gmra.mxu1 %vm257_vm0, %v198_v58  ;;  %v906_v62 = vmax.f32 %v669_v60, 0.0  ;;  %v48_v57 = vld [vmem:[%s3271_s4 + $0x8] sm:$0xff]  ;;  %v47_v58 = vld [vmem:[%s3271_s4] sm:$0xff] }
  0x9e   :  { %114 = vmatpush.msra.mxu2 %v48_v57 }
  0x9f   :  { %1217 = vmatpush.msrb.mxu3 %v906_v62  ;;  %v207_v62 = vld [vmem:[%s3269_s1 + $0x1c0] sm:$0xff] }
  0xa0   :  { %115 = vmatpush.msra.mxu2 %v47_v58  ;;  %v212_v58 = vld [vmem:[%s3269_s1 + $0x1e8] sm:$0xff] }
  0xa1   :  { %1218 = vmatpush.msrb.mxu3 %v905_v0  ;;  %1735 = vmatmul.msk.f32.vlgmr.msra.gmra.mxu2 %vm63_vm1, %v35_v59  ;;  %v36_v0 = vld [vmem:[%s3272_s0 + $0x8] sm:$0xff] }
  0xa2   :  { %v2156_v3 = vpop.f32.mrf.mxu0  ;;  %v2158_v4 = vpop.f32.mrf.mxu1 }
  0xa3   :  { %1219 = vmatpush.msrb.mxu3 %v904_v2 }
  0xa5   :  { %1767 = vmatmul.msk.f32.gmra.mxu0 %vm257_vm0, %v171_v5  ;;  %1795 = vmatmul.msk.f32.gmra.mxu1 %vm257_vm0, %v199_v6  ;;  %v208_v5 = vld [vmem:[%s3269_s1 + $0x1c8] sm:$0xff]  ;;  %v2331_v6 = vpop.f32.mrf.mxu3 }
  0xa6   :  { %1220 = vmatpush.msrb.mxu3 %v903_v7  ;;  %v37_v7 = vld [vmem:[%s3272_s0 + $0x10] sm:$0xff] }
  0xa9   :  { %1736 = vmatmul.msk.f32.gmra.mxu2 %vm63_vm1, %v36_v0  ;;  %v588_v0 = vadd.f32 %v2136_v54, %v2156_v3 }
  0xaa   :  { %v2172_v9 = vpop.f32.mrf.mxu0  ;;  %v2174_v10 = vpop.f32.mrf.mxu1 }
  0xab   :  { %v591_v59 = vadd.f32 %v2136_v54, %v2172_v9  ;;  %v585_v9 = vadd.f32 %v2136_v54, %v2138_v55  ;;  %v879_v3 = vmax.f32 %v588_v0, 0.0 }
  0xad   :  { %1768 = vmatmul.msk.f32.gmra.mxu0 %vm257_vm0, %v172_v11  ;;  %1796 = vmatmul.msk.f32.gmra.mxu1 %vm257_vm0, %v200_v12  ;;  %v209_v12 = vld [vmem:[%s3269_s1 + $0x1d0] sm:$0xff]  ;;  %v2343_v13 = vpop.f32.mrf.mxu3  ;;  %v878_v55 = vmax.f32 %v585_v9, 0.0 }
  0xae   :  { %v45_v9 = vld [vmem:[%s3272_s0 + $0x50] sm:$0xff] }
  0xb1   :  { %1737 = vmatmul.msk.f32.gmra.mxu2 %vm63_vm1, %v37_v7 }
  0xb2   :  { %v2188_v14 = vpop.f32.mrf.mxu0  ;;  %v2190_v15 = vpop.f32.mrf.mxu1 }
  0xb5   :  { %1769 = vmatmul.msk.f32.gmra.mxu0 %vm257_vm0, %v173_v16  ;;  %1797 = vmatmul.msk.f32.gmra.mxu1 %vm257_vm0, %v201_v17  ;;  %v38_v16 = vld [vmem:[%s3272_s0 + $0x18] sm:$0xff] }
  0xb9   :  { %1738 = vmatmul.msk.f32.gmra.mxu2 %vm63_vm1, %v38_v16  ;;  %v579_v16 = vadd.f32 %v2136_v54, %v2105_v44 }
  0xba   :  { %v2204_v19 = vpop.f32.mrf.mxu0  ;;  %v2206_v20 = vpop.f32.mrf.mxu1 }
  0xbd   :  { %1770 = vmatmul.msk.f32.gmra.mxu0 %vm257_vm0, %v174_v21  ;;  %1798 = vmatmul.msk.f32.gmra.mxu1 %vm257_vm0, %v202_v22  ;;  %v210_v22 = vld [vmem:[%s3269_s1 + $0x1d8] sm:$0xff] }
  0xc2   :  { %v2220_v24 = vpop.f32.mrf.mxu0  ;;  %v2222_v25 = vpop.f32.mrf.mxu1 }
  0xc3   :  { %v600_v47 = vadd.f32 %v2136_v54, %v2220_v24  ;;  %v594_v24 = vadd.f32 %v2136_v54, %v2188_v14  ;;  %v41_v14 = vld [vmem:[%s3272_s0 + $0x30] sm:$0xff] }
  0xc5   :  { %1771 = vmatmul.msk.f32.gmra.mxu0 %vm257_vm0, %v175_v26  ;;  %1799 = vmatmul.msk.f32.gmra.mxu1 %vm257_vm0, %v203_v27  ;;  %v2358_v27 = vpop.f32.mrf.mxu3 }
  0xca   :  { %v2242_v31 = vpop.f32.mrf.mxu0  ;;  %v2244_v32 = vpop.f32.mrf.mxu1 }
  0xcb   :  { %v687_v0 = vadd.f32 %v2136_v54, %v2244_v32  ;;  %v681_v32 = vadd.f32 %v2136_v54, %v2206_v20 }
  0xcd   :  { %1772 = vmatmul.msk.f32.gmra.mxu0 %vm257_vm0, %v176_v33  ;;  %1800 = vmatmul.msk.f32.gmra.mxu1 %vm257_vm0, %v204_v34  ;;  %v39_v33 = vld [vmem:[%s3272_s0 + $0x20] sm:$0xff]  ;;  %v2381_v48 = vpop.f32.mrf.mxu3  ;;  %v910_v20 = vmax.f32 %v681_v32, 0.0 }
  0xce   :  { %1739 = vmatmul.msk.f32.gmra.mxu2 %vm63_vm1, %v39_v33 }
  0xd2   :  { %v2270_v41 = vpop.f32.mrf.mxu0  ;;  %v2272_v42 = vpop.f32.mrf.mxu1 }
  0xd3   :  { %v606_v36 = vadd.f32 %v2136_v54, %v2270_v41 }
  0xd5   :  { %1773 = vmatmul.msk.f32.gmra.mxu0 %vm257_vm0, %v177_v43  ;;  %1801 = vmatmul.msk.f32.gmra.mxu1 %vm257_vm0, %v205_v45  ;;  %v211_v43 = vld [vmem:[%s3269_s1 + $0x1e0] sm:$0xff]  ;;  %v603_v45 = vadd.f32 %v2136_v54, %v2242_v31  ;;  %v885_v41 = vmax.f32 %v606_v36, 0.0 }
  0xd6   :  { %1740 = vmatmul.msk.f32.gmra.mxu2 %vm63_vm1, %v40_v50  ;;  %v43_v36 = vld [vmem:[%s3272_s0 + $0x40] sm:$0xff] }
  0xd7   :  { %v884_v31 = vmax.f32 %v603_v45, 0.0  ;;  %v215_v50 = vld [vmem:[%s3269_s1 + $0x200] sm:$0xff] }
  0xda   :  { %v608_v51 = vpop.f32.mrf.mxu0  ;;  %v2294_v52 = vpop.f32.mrf.mxu1 }
  0xdb   :  { %v609_v34 = vadd.f32 %v2136_v54, %v608_v51  ;;  %v597_v51 = vadd.f32 %v2136_v54, %v2204_v19 }
  0xdd   :  { %1774 = vmatmul.msk.f32.gmra.mxu0 %vm257_vm0, %v178_v53  ;;  %1802 = vmatmul.msk.f32.gmra.mxu1 %vm257_vm0, %v206_v56  ;;  %v886_v46 = vmax.f32 %v609_v34, 0.0  ;;  %v883_v53 = vmax.f32 %v600_v47, 0.0  ;;  %v882_v19 = vmax.f32 %v597_v51, 0.0 }
  0xde   :  { %1741 = vmatmul.msk.f32.gmra.mxu2 %vm63_vm1, %v41_v14 }
  0xe2   :  { %v611_v60 = vpop.f32.mrf.mxu0  ;;  %v2314_v61 = vpop.f32.mrf.mxu1 }
  0xe3   :  { %v612_v28 = vadd.f32 %v2136_v54, %v611_v60  ;;  %v881_v60 = vmax.f32 %v594_v24, 0.0 }
  0xe5   :  { %1803 = vmatmul.msk.f32.gmra.mxu1 %vm257_vm0, %v207_v62  ;;  %v887_v37 = vmax.f32 %v612_v28, 0.0  ;;  %v2399_v62 = vpop.f32.mrf.mxu3  ;;  %v214_v28 = vld [vmem:[%s3269_s1 + $0x1f8] sm:$0xff] }
  0xea   :  { %v614_v1 = vpop.f32.mrf.mxu0  ;;  %v2326_v2 = vpop.f32.mrf.mxu1 }
  0xeb   :  { %v615_v23 = vadd.f32 %v2136_v54, %v614_v1  ;;  %v880_v1 = vmax.f32 %v591_v59, 0.0 }
  0xed   :  { %1804 = vmatmul.msk.f32.gmra.mxu1 %vm257_vm0, %v208_v5  ;;  %v888_v35 = vmax.f32 %v615_v23, 0.0  ;;  %v876_v23 = vmax.f32 %v579_v16, 0.0  ;;  %v217_v16 = vld [vmem:[%s3269_s1 + $0x210] sm:$0xff] }
  0xf2   :  { %v617_v8 = vpop.f32.mrf.mxu0  ;;  %v2338_v11 = vpop.f32.mrf.mxu1 }
  0xf3   :  { %v618_v17 = vadd.f32 %v2136_v54, %v617_v8  ;;  %v213_v8 = vld [vmem:[%s3269_s1 + $0x1f0] sm:$0xff] }
  0xf5   :  { %1805 = vmatmul.msk.f32.gmra.mxu1 %vm257_vm0, %v209_v12  ;;  %v889_v30 = vmax.f32 %v618_v17, 0.0  ;;  %v582_v12 = vadd.f32 %v2136_v54, %v2119_v49  ;;  %v2419_v17 = vpop.f32.mrf.mxu3 }
  0xf7   :  { %v877_v49 = vmax.f32 %v582_v12, 0.0 }
  0xfa   :  { %v620_v18 = vpop.f32.mrf.mxu0  ;;  %v2351_v21 = vpop.f32.mrf.mxu1 }
  0xfb   :  { %v621_v26 = vadd.f32 %v2136_v54, %v620_v18  ;;  %v42_v18 = vld [vmem:[%s3272_s0 + $0x38] sm:$0xff]  ;;  %v705_v45 = vadd.f32 %v2136_v54, %v2351_v21 }
  0xfc   :  { %1742 = vmatmul.msk.f32.gmra.mxu2 %vm63_vm1, %v42_v18  ;;  %v675_v18 = vadd.f32 %v2136_v54, %v2174_v10 }
  0xfd   :  { %1806 = vmatmul.msk.f32.gmra.mxu1 %vm257_vm0, %v210_v22  ;;  %v890_v29 = vmax.f32 %v621_v26, 0.0  ;;  %v576_v22 = vadd.f32 %v2136_v54, %v2091_v39  ;;  %v918_v21 = vmax.f32 %v705_v45, 0.0  ;;  %v982_v45 = vld [vmem:[%s3274_s2 + $0x38] sm:$0xff] }
  0xff   :  { %1166 = vmatpush.msrb.mxu2 %v890_v29  ;;  %v875_v33 = vmax.f32 %v576_v22, 0.0 }
 0x101   :  { %1167 = vmatpush.msrb.mxu2 %v889_v30 }
 0x102   :  { %v2369_v38 = vpop.f32.mrf.mxu0  ;;  %v2371_v40 = vpop.f32.mrf.mxu1 }
 0x103   :  { %1168 = vmatpush.msrb.mxu2 %v888_v35  ;;  %v2436_v35 = vpop.f32.mrf.mxu3 }
 0x104   :  { %1743 = vmatmul.msk.f32.gmra.mxu2 %vm63_vm1, %v43_v36  ;;  %v219_v36 = vld [vmem:[%s3269_s1 + $0x220] sm:$0xff] }
 0x105   :  { %1807 = vmatmul.msk.f32.gmra.mxu1 %vm257_vm0, %v211_v43  ;;  %1169 = vmatpush.msrb.mxu2 %v887_v37  ;;  %v708_v37 = vadd.f32 %v2136_v54, %v2371_v40  ;;  %v702_v40 = vadd.f32 %v2136_v54, %v2338_v11 }
 0x107   :  { %1170 = vmatpush.msrb.mxu2 %v886_v46  ;;  %v919_v51 = vmax.f32 %v708_v37, 0.0  ;;  %v917_v11 = vmax.f32 %v702_v40, 0.0  ;;  %v247_v37 = vld [vmem:[%s3269_s1 + $0x300] sm:$0xff]  ;;  %v220_v40 = vld [vmem:[%s3269_s1 + $0x228] sm:$0xff] }
 0x108   :  { %1843 = vmatmul.msk.f32.gmra.mxu3 %vm257_vm0, %v247_v37 }
 0x109   :  { %1171 = vmatpush.msrb.mxu2 %v885_v41 }
 0x10a   :  { %v2391_v56 = vpop.f32.mrf.mxu0  ;;  %v710_v57 = vpop.f32.mrf.mxu1 }
 0x10b   :  { %1172 = vmatpush.msrb.mxu2 %v884_v31  ;;  %v711_v39 = vadd.f32 %v2136_v54, %v710_v57  ;;  %v699_v31 = vadd.f32 %v2136_v54, %v2326_v2  ;;  %v2458_v24 = vpop.f32.mrf.mxu3  ;;  %v696_v57 = vadd.f32 %v2136_v54, %v2314_v61  ;;  %v693_v2 = vadd.f32 %v2136_v54, %v2294_v52 }
 0x10c   :  { %v690_v61 = vadd.f32 %v2136_v54, %v2272_v42 }
 0x10d   :  { %1808 = vmatmul.msk.f32.gmra.mxu1 %vm257_vm0, %v212_v58  ;;  %1173 = vmatpush.msrb.mxu2 %v883_v53  ;;  %v920_v46 = vmax.f32 %v711_v39, 0.0  ;;  %v44_v53 = vld [vmem:[%s3272_s0 + $0x48] sm:$0xff]  ;;  %v916_v58 = vmax.f32 %v699_v31, 0.0  ;;  %v915_v14 = vmax.f32 %v696_v57, 0.0  ;;  %v914_v52 = vmax.f32 %v693_v2, 0.0 }
 0x10e   :  { %1744 = vmatmul.msk.f32.gmra.mxu2 %vm63_vm1, %v44_v53  ;;  %v913_v42 = vmax.f32 %v690_v61, 0.0 }
 0x10f   :  { %1174 = vmatpush.msrb.mxu2 %v882_v19 }
 0x111   :  { %1175 = vmatpush.msrb.mxu2 %v881_v60  ;;  %v216_v60 = vld [vmem:[%s3269_s1 + $0x208] sm:$0xff] }
 0x112   :  { %v2409_v5 = vpop.f32.mrf.mxu0  ;;  %v713_v7 = vpop.f32.mrf.mxu1 }
 0x113   :  { %1176 = vmatpush.msrb.mxu2 %v880_v1  ;;  %v714_v29 = vadd.f32 %v2136_v54, %v713_v7  ;;  %v2480_v1 = vpop.f32.mrf.mxu3  ;;  %v684_v7 = vadd.f32 %v2136_v54, %v2222_v25  ;;  %v678_v25 = vadd.f32 %v2136_v54, %v2190_v15  ;;  %v908_v15 = vmax.f32 %v675_v18, 0.0 }
 0x115   :  { %1809 = vmatmul.msk.f32.gmra.mxu1 %vm257_vm0, %v213_v8  ;;  %1177 = vmatpush.msrb.mxu2 %v879_v3  ;;  %v921_v43 = vmax.f32 %v714_v29, 0.0  ;;  %v912_v8 = vmax.f32 %v687_v0, 0.0  ;;  %v218_v29 = vld [vmem:[%s3269_s1 + $0x218] sm:$0xff]  ;;  %v996_v0 = vld [vmem:[%s3274_s2 + $0xa8] sm:$0xff] }
 0x116   :  { %1745 = vmatmul.msk.f32.gmra.mxu2 %vm63_vm1, %v45_v9 }
 0x117   :  { %1178 = vmatpush.msrb.mxu2 %v878_v55  ;;  %v911_v55 = vmax.f32 %v684_v7, 0.0 }
 0x119   :  { %1179 = vmatpush.msrb.mxu2 %v877_v49  ;;  %v46_v49 = vld [vmem:[%s3272_s0 + $0x58] sm:$0xff] }
 0x11a   :  { %v2427_v44 = vpop.f32.mrf.mxu0  ;;  %v716_v26 = vpop.f32.mrf.mxu1 }
 0x11b   :  { %v717_v30 = vadd.f32 %v2136_v54, %v716_v26  ;;  %1180 = vmatpush.msrb.mxu2 %v876_v23  ;;  %v848_v22 = vpop.f32.mrf.mxu3  ;;  %v672_v23 = vadd.f32 %v2136_v54, %v2158_v4  ;;  %v909_v26 = vmax.f32 %v678_v25, 0.0  ;;  %v222_v25 = vld [vmem:[%s3269_s1 + $0x238] sm:$0xff] }
 0x11c   :  { %v849_v32 = vadd.f32 %v2136_v54, %v848_v22  ;;  %v250_v22 = vld [vmem:[%s3269_s1 + $0x318] sm:$0xff] }
 0x11d   :  { %1810 = vmatmul.msk.f32.gmra.mxu1 %vm257_vm0, %v214_v28  ;;  %1181 = vmatpush.msrb.mxu2 %v875_v33  ;;  %v922_v34 = vmax.f32 %v717_v30, 0.0  ;;  %v907_v30 = vmax.f32 %v672_v23, 0.0  ;;  %v975_v33 = vld [vmem:[%s3274_s2] sm:$0xff] }
 0x11e   :  { %1746 = vmatmul.msk.f32.gmra.mxu2 %vm63_vm1, %v46_v49  ;;  %v846_v49 = vadd.f32 %v2136_v54, %v2480_v1  ;;  %v1003_v1 = vld [vmem:[%s3274_s2 + $0xe0] sm:$0xff] }
 0x11f   :  { %1268 = vmatpush.msrb.mxu0 %v922_v34 }
 0x120   :  { %v965_v37 = vmax.f32 %v846_v49, 0.0 }
 0x121   :  { %1269 = vmatpush.msrb.mxu0 %v921_v43 }
 0x122   :  { %v2446_v47 = vpop.f32.mrf.mxu0  ;;  %v2448_v41 = vpop.f32.mrf.mxu1 }
 0x123   :  { %1270 = vmatpush.msrb.mxu0 %v920_v46  ;;  %v851_v4 = vpop.f32.mrf.mxu3 }
 0x125   :  { %1811 = vmatmul.msk.f32.gmra.mxu1 %vm257_vm0, %v215_v50  ;;  %1271 = vmatpush.msrb.mxu0 %v919_v51  ;;  %v248_v51 = vld [vmem:[%s3269_s1 + $0x308] sm:$0xff] }
 0x126   :  { %1182 = vmatmul.f32.vlgmr.msrb.gmra.mxu2 %v975_v33  ;;  %1844 = vmatmul.msk.f32.gmra.mxu3 %vm257_vm0, %v248_v51 }
 0x127   :  { %1272 = vmatpush.msrb.mxu0 %v918_v21  ;;  %v989_v21 = vld [vmem:[%s3274_s2 + $0x70] sm:$0xff] }
 0x129   :  { %1273 = vmatpush.msrb.mxu0 %v917_v11  ;;  %v221_v11 = vld [vmem:[%s3269_s1 + $0x230] sm:$0xff] }
 0x12a   :  { %v2468_v59 = vpop.f32.mrf.mxu0  ;;  %v2470_v19 = vpop.f32.mrf.mxu1 }
 0x12b   :  { %1274 = vmatpush.msrb.mxu0 %v916_v58  ;;  %v854_v43 = vpop.f32.mrf.mxu3  ;;  %v249_v58 = vld [vmem:[%s3269_s1 + $0x310] sm:$0xff]  ;;  %v639_v51 = vadd.f32 %v2136_v54, %v2468_v59  ;;  %v1010_v59 = vld [vmem:[%s3274_s2 + $0x118] sm:$0xff] }
 0x12c   :  { %v855_v61 = vadd.f32 %v2136_v54, %v854_v43 }
 0x12d   :  { %1812 = vmatmul.msk.f32.gmra.mxu1 %vm257_vm0, %v216_v60  ;;  %1275 = vmatpush.msrb.mxu0 %v915_v14 }
 0x12e   :  { %1185 = vmatmul.f32.gmra.mxu2 %v982_v45  ;;  %1845 = vmatmul.msk.f32.gmra.mxu3 %vm257_vm0, %v249_v58  ;;  %v837_v45 = vadd.f32 %v2136_v54, %v2419_v17  ;;  %v636_v17 = vadd.f32 %v2136_v54, %v2446_v47  ;;  %v896_v58 = vmax.f32 %v639_v51, 0.0  ;;  %v828_v47 = vadd.f32 %v2136_v54, %v2358_v27  ;;  %v1061_v51 = vld [vmem:[%s3275_s3 + $0x10] sm:$0xff] }
 0x12f   :  { %1276 = vmatpush.msrb.mxu0 %v914_v52  ;;  %v852_v52 = vadd.f32 %v2136_v54, %v851_v4  ;;  %v966_v4 = vmax.f32 %v849_v32, 0.0 }
 0x131   :  { %1277 = vmatpush.msrb.mxu0 %v913_v42  ;;  %v967_v23 = vmax.f32 %v852_v52, 0.0 }
 0x132   :  { %v2490_v12 = vpop.f32.mrf.mxu0  ;;  %v2492_v3 = vpop.f32.mrf.mxu1 }
 0x133   :  { %1278 = vmatpush.msrb.mxu0 %v912_v8  ;;  %v857_v31 = vpop.f32.mrf.mxu3 }
 0x134   :  { %v858_v2 = vadd.f32 %v2136_v54, %v857_v31  ;;  %v834_v31 = vadd.f32 %v2136_v54, %v2399_v62  ;;  %v633_v62 = vadd.f32 %v2136_v54, %v2427_v44  ;;  %v224_v44 = vld [vmem:[%s3269_s1 + $0x248] sm:$0xff] }
 0x135   :  { %1813 = vmatmul.msk.f32.gmra.mxu1 %vm257_vm0, %v217_v16  ;;  %1279 = vmatpush.msrb.mxu0 %v911_v55  ;;  %v968_v55 = vmax.f32 %v855_v61, 0.0  ;;  %v895_v61 = vmax.f32 %v636_v17, 0.0  ;;  %v228_v17 = vld [vmem:[%s3269_s1 + $0x268] sm:$0xff] }
 0x136   :  { %1188 = vmatmul.f32.gmra.mxu2 %v989_v21  ;;  %v969_v9 = vmax.f32 %v858_v2, 0.0  ;;  %1846 = vmatmul.msk.f32.gmra.mxu3 %vm257_vm0, %v250_v22  ;;  %v962_v2 = vmax.f32 %v837_v45, 0.0  ;;  %v227_v45 = vld [vmem:[%s3269_s1 + $0x260] sm:$0xff] }
 0x137   :  { %1280 = vmatpush.msrb.mxu0 %v910_v20 }
 0x139   :  { %1281 = vmatpush.msrb.mxu0 %v909_v26 }
 0x13a   :  { %v2508_v28 = vpop.f32.mrf.mxu0  ;;  %v2510_v10 = vpop.f32.mrf.mxu1 }
 0x13b   :  { %1282 = vmatpush.msrb.mxu0 %v908_v15  ;;  %v860_v60 = vpop.f32.mrf.mxu3  ;;  %v645_v33 = vadd.f32 %v2136_v54, %v2508_v28  ;;  %v223_v28 = vld [vmem:[%s3269_s1 + $0x240] sm:$0xff] }
 0x13c   :  { %v861_v14 = vadd.f32 %v2136_v54, %v860_v60  ;;  %v961_v60 = vmax.f32 %v834_v31, 0.0  ;;  %v1038_v31 = vld [vmem:[%s3274_s2 + $0x1f8] sm:$0xff] }
 0x13d   :  { %1814 = vmatmul.msk.f32.gmra.mxu1 %vm257_vm0, %v218_v29  ;;  %1283 = vmatpush.msrb.mxu0 %v907_v30  ;;  %v843_v30 = vadd.f32 %v2136_v54, %v2458_v24  ;;  %v642_v24 = vadd.f32 %v2136_v54, %v2490_v12  ;;  %v898_v12 = vmax.f32 %v645_v33, 0.0 }
 0x13e   :  { %v970_v7 = vmax.f32 %v861_v14, 0.0  ;;  %1191 = vmatmul.f32.gmra.mxu2 %v996_v0  ;;  %v825_v14 = vadd.f32 %v2136_v54, %v2343_v13  ;;  %v977_v13 = vld [vmem:[%s3274_s2 + $0x10] sm:$0xff] }
 0x13f   :  { %1284 = vmatmul.f32.vlgmr.msrb.gmra.mxu0 %v977_v13  ;;  %v1011_v13 = vld [vmem:[%s3274_s2 + $0x120] sm:$0xff] }
 0x140   :  { %1421 = vmatpush.msra.mxu0 %v970_v7  ;;  %v822_v7 = vadd.f32 %v2136_v54, %v2331_v6  ;;  %v624_v6 = vadd.f32 %v2136_v54, %v2369_v38  ;;  %v976_v38 = vld [vmem:[%s3274_s2 + $0x8] sm:$0xff] }
 0x142   :  { %v647_v39 = vpop.f32.mrf.mxu0  ;;  %v2519_v34 = vpop.f32.mrf.mxu1  ;;  %1422 = vmatpush.msra.mxu0 %v969_v9  ;;  %v627_v9 = vadd.f32 %v2136_v54, %v2391_v56  ;;  %v1017_v56 = vld [vmem:[%s3274_s2 + $0x150] sm:$0xff]  ;;  %v891_v22 = vmax.f32 %v624_v6, 0.0 }
 0x143   :  { %v648_v26 = vadd.f32 %v2136_v54, %v647_v39 }
 0x144   :  { %1423 = vmatpush.msra.mxu0 %v968_v55  ;;  %v892_v55 = vmax.f32 %v627_v9, 0.0  ;;  %v230_v9 = vld [vmem:[%s3269_s1 + $0x278] sm:$0xff] }
 0x145   :  { %1815 = vmatmul.msk.f32.gmra.mxu1 %vm257_vm0, %v219_v36  ;;  %v840_v36 = vadd.f32 %v2136_v54, %v2436_v35  ;;  %v899_v43 = vmax.f32 %v648_v26, 0.0  ;;  %v2597_v35 = vpop.f32.mrf.mxu2  ;;  %v1881_v26 = vmov 0  }
 0x146   :  { %1424 = vmatpush.msra.mxu0 %v967_v23  ;;  %1194 = vmatmul.f32.gmra.mxu2 %v1003_v1  ;;  %v226_v1 = vld [vmem:[%s3269_s1 + $0x258] sm:$0xff] }
 0x147   :  { %v963_v21 = vmax.f32 %v840_v36, 0.0  ;;  %1875 = vset.pattern.permute.xlu1 %v1881_v26  ;;  %1874 = vset.pattern.permute.xlu0 %v1881_v26  ;;  %v1060_v36 = vld [vmem:[%s3275_s3 + $0x8] sm:$0xff] }
 0x148   :  { %1425 = vmatpush.msra.mxu0 %v966_v4  ;;  %1876 = vset.pattern.permute.xlu2 %v1881_v26  ;;  %v231_v26 = vld [vmem:[%s3269_s1 + $0x280] sm:$0xff] }
 0x149   :  { %1083 = vperm.xlu0 %1874, %v1061_v51  }
 0x14a   :  { %v650_v46 = vpop.f32.mrf.mxu0  ;;  %v2532_v50 = vpop.f32.mrf.mxu1  ;;  %1426 = vmatpush.msra.mxu0 %v965_v37  ;;  %v991_v37 = vld [vmem:[%s3274_s2 + $0x80] sm:$0xff] }
 0x14b   :  { %v651_v18 = vadd.f32 %v2136_v54, %v650_v46  ;;  %v964_v46 = vmax.f32 %v843_v30, 0.0  ;;  %v1024_v30 = vld [vmem:[%s3274_s2 + $0x188] sm:$0xff] }
 0x14d   :  { %1816 = vmatmul.msk.f32.gmra.mxu1 %vm257_vm0, %v220_v40  ;;  %v900_v39 = vmax.f32 %v651_v18, 0.0  ;;  %1427 = vmatpush.msra.mxu0 %v964_v46  ;;  %v2624_v27 = vpop.f32.mrf.mxu2  ;;  %v957_v18 = vmax.f32 %v822_v7, 0.0 }
 0x14e   :  { %1197 = vmatmul.f32.gmra.mxu2 %v1010_v59  ;;  %v1005_v59 = vld [vmem:[%s3274_s2 + $0xf0] sm:$0xff] }
 0x14f   :  { %1428 = vmatpush.msra.mxu0 %v963_v21 }
 0x151   :  { %1429 = vmatpush.msra.mxu0 %v962_v2  ;;  %v1062_v2 = vld [vmem:[%s3275_s3 + $0x18] sm:$0xff] }
 0x152   :  { %v653_v53 = vpop.f32.mrf.mxu0  ;;  %v2545_v57 = vpop.f32.mrf.mxu1  ;;  %1088 = vperm.xlu0 %1874, %v1062_v2  }
 0x153   :  { %v654_v42 = vadd.f32 %v2136_v54, %v653_v53  ;;  %v897_v53 = vmax.f32 %v642_v24, 0.0  ;;  %1430 = vmatpush.msra.mxu0 %v961_v60  ;;  %v1031_v24 = vld [vmem:[%s3274_s2 + $0x1c0] sm:$0xff] }
 0x155   :  { %1817 = vmatmul.msk.f32.gmra.mxu1 %vm257_vm0, %v221_v11  ;;  %v901_v29 = vmax.f32 %v654_v42, 0.0  ;;  %v831_v11 = vadd.f32 %v2136_v54, %v2381_v48  ;;  %v630_v48 = vadd.f32 %v2136_v54, %v2409_v5  ;;  %v894_v5 = vmax.f32 %v633_v62, 0.0  ;;  %v2646_v23 = vpop.f32.mrf.mxu2  ;;  %v1045_v62 = vld [vmem:[%s3274_s2 + $0x230] sm:$0xff] }
 0x156   :  { %v959_v42 = vmax.f32 %v828_v47, 0.0  ;;  %1200 = vmatmul.f32.gmra.mxu2 %v1017_v56  ;;  %v229_v47 = vld [vmem:[%s3269_s1 + $0x270] sm:$0xff] }
 0x157   :  { %v960_v0 = vmax.f32 %v831_v11, 0.0  ;;  %v893_v32 = vmax.f32 %v630_v48, 0.0  ;;  %v997_v11 = vld [vmem:[%s3274_s2 + $0xb0] sm:$0xff]  ;;  %v1004_v48 = vld [vmem:[%s3274_s2 + $0xe8] sm:$0xff] }
 0x159   :  { %1431 = vmatpush.msra.mxu0 %v960_v0  ;;  %v1052_v0 = vld [vmem:[%s3274_s2 + $0x268] sm:$0xff] }
 0x15a   :  { %v656_v8 = vpop.f32.mrf.mxu0  ;;  %v2564_v16 = vpop.f32.mrf.mxu1 }
 0x15b   :  { %v657_v20 = vadd.f32 %v2136_v54, %v656_v8  ;;  %v819_v8 = vadd.f32 %v2136_v54, %v2319_v63  ;;  %1432 = vmatpush.msra.mxu0 %v959_v42  ;;  %v225_v63 = vld [vmem:[%s3269_s1 + $0x250] sm:$0xff] }
 0x15d   :  { %1818 = vmatmul.msk.f32.gmra.mxu1 %vm257_vm0, %v222_v25  ;;  %v902_v15 = vmax.f32 %v657_v20, 0.0  ;;  %v958_v25 = vmax.f32 %v825_v14, 0.0  ;;  %v956_v20 = vmax.f32 %v819_v8, 0.0  ;;  %v2666_v33 = vpop.f32.mrf.mxu2  ;;  %v1012_v14 = vld [vmem:[%s3274_s2 + $0x128] sm:$0xff]  ;;  %v1019_v8 = vld [vmem:[%s3274_s2 + $0x160] sm:$0xff] }
 0x15e   :  { %1203 = vmatmul.f32.gmra.mxu2 %v1024_v30  ;;  %v1026_v30 = vld [vmem:[%s3274_s2 + $0x198] sm:$0xff] }
 0x15f   :  { %1221 = vmatpush.msrb.mxu3 %v902_v15  ;;  %1433 = vmatpush.msra.mxu0 %v958_v25  ;;  %v1059_v15 = vld [vmem:[%s3275_s3] sm:$0xff] }
 0x160   :  { %1073 = vperm.xlu1 %1875, %v1059_v15  }
 0x161   :  { %1222 = vmatpush.msrb.mxu3 %v901_v29  ;;  %1434 = vmatpush.msra.mxu0 %v957_v18  ;;  %v984_v29 = vld [vmem:[%s3274_s2 + $0x48] sm:$0xff] }
 0x162   :  { %v2592_v40 = vpop.f32.mrf.mxu1  ;;  %1287 = vmatmul.f32.gmra.mxu0 %v984_v29  ;;  %v1018_v29 = vld [vmem:[%s3274_s2 + $0x158] sm:$0xff] }
 0x163   :  { %1223 = vmatpush.msrb.mxu3 %v900_v39  ;;  %1435 = vmatpush.msra.mxu0 %v956_v20  ;;  %v983_v39 = vld [vmem:[%s3274_s2 + $0x40] sm:$0xff] }
 0x165   :  { %1819 = vmatmul.msk.f32.gmra.mxu1 %vm257_vm0, %v223_v28  ;;  %1224 = vmatpush.msrb.mxu3 %v899_v43  ;;  %v2684_v46 = vpop.f32.mrf.mxu2  ;;  %v990_v28 = vld [vmem:[%s3274_s2 + $0x78] sm:$0xff] }
 0x166   :  { %1206 = vmatmul.f32.gmra.mxu2 %v1031_v24 }
 0x167   :  { %1225 = vmatpush.msrb.mxu3 %v898_v12  ;;  %v998_v12 = vld [vmem:[%s3274_s2 + $0xb8] sm:$0xff] }
 0x168   :  { %1078 = vperm.xlu1 %1875, %v1060_v36  }
 0x169   :  { %1226 = vmatpush.msrb.mxu3 %v897_v53 }
 0x16a   :  { %v2619_v52 = vpop.f32.mrf.mxu1  ;;  %1290 = vmatmul.f32.gmra.mxu0 %v991_v37 }
 0x16b   :  { %1227 = vmatpush.msrb.mxu3 %v896_v58 }
 0x16d   :  { %1820 = vmatmul.msk.f32.gmra.mxu1 %vm257_vm0, %v224_v44  ;;  %1228 = vmatpush.msrb.mxu3 %v895_v61  ;;  %v2702_v53 = vpop.f32.mrf.mxu2  ;;  %v1063_v61 = vld [vmem:[%s3275_s3 + $0x20] sm:$0xff] }
 0x16e   :  { %1209 = vmatmul.f32.gmra.mxu2 %v1038_v31  ;;  %1093 = vperm.xlu0 %1874, %v1063_v61   ;;  %v978_v61 = vld [vmem:[%s3274_s2 + $0x18] sm:$0xff] }
 0x16f   :  { %1229 = vmatpush.msrb.mxu3 %v894_v5 }
 0x171   :  { %1230 = vmatpush.msrb.mxu3 %v893_v32  ;;  %v1064_v32 = vld [vmem:[%s3275_s3 + $0x28] sm:$0xff] }
 0x172   :  { %v2641_v49 = vpop.f32.mrf.mxu1  ;;  %1293 = vmatmul.f32.gmra.mxu0 %v998_v12  ;;  %1098 = vperm.xlu1 %1875, %v1064_v32  }
 0x173   :  { %1231 = vmatpush.msrb.mxu3 %v892_v55 }
 0x175   :  { %1821 = vmatmul.msk.f32.gmra.mxu1 %vm257_vm0, %v225_v63  ;;  %1232 = vmatpush.msrb.mxu3 %v891_v22  ;;  %v2720_v60 = vpop.f32.mrf.mxu2  ;;  %v750_v22 = vadd.f32 %v2136_v54, %v2641_v49 }
 0x176   :  { %1233 = vmatmul.f32.vlgmr.msrb.gmra.mxu3 %v976_v38  ;;  %1212 = vmatmul.f32.gmra.mxu2 %v1045_v62 }
 0x17a   :  { %v2661_v4 = vpop.f32.mrf.mxu1  ;;  %1296 = vmatmul.f32.gmra.mxu0 %v1005_v59  ;;  %v1040_v59 = vld [vmem:[%s3274_s2 + $0x208] sm:$0xff] }
 0x17b   :  { %v753_v18 = vadd.f32 %v2136_v54, %v2661_v4 }
 0x17d   :  { %1822 = vmatmul.msk.f32.gmra.mxu1 %vm257_vm0, %v226_v1  ;;  %v934_v4 = vmax.f32 %v753_v18, 0.0 }
 0x17e   :  { %1236 = vmatmul.f32.gmra.mxu3 %v983_v39  ;;  %1214 = vmatmul.f32.gmra.mxu2 %v1052_v0  ;;  %v933_v39 = vmax.f32 %v750_v22, 0.0  ;;  %v1039_v0 = vld [vmem:[%s3274_s2 + $0x200] sm:$0xff] }
 0x17f   :  { %v2740_v42 = vpop.f32.mrf.mxu2 }
 0x182   :  { %v755_v43 = vpop.f32.mrf.mxu1  ;;  %1299 = vmatmul.f32.gmra.mxu0 %v1012_v14 }
 0x183   :  { %v756_v6 = vadd.f32 %v2136_v54, %v755_v43 }
 0x185   :  { %1823 = vmatmul.msk.f32.gmra.mxu1 %vm257_vm0, %v227_v45  ;;  %v935_v38 = vmax.f32 %v756_v6, 0.0  ;;  %v1067_v6 = vld [vmem:[%s3275_s3 + $0x40] sm:$0xff] }
 0x186   :  { %1239 = vmatmul.f32.gmra.mxu3 %v990_v28  ;;  %v1033_v28 = vld [vmem:[%s3274_s2 + $0x1d0] sm:$0xff] }
 0x187   :  { %v2763_v15 = vpop.f32.mrf.mxu2 }
 0x18a   :  { %v758_v21 = vpop.f32.mrf.mxu1  ;;  %1302 = vmatmul.f32.gmra.mxu0 %v1019_v8 }
 0x18b   :  { %v759_v25 = vadd.f32 %v2136_v54, %v758_v21  ;;  %v863_v32 = vpop.f32.mrf.mxu3 }
 0x18d   :  { %1824 = vmatmul.msk.f32.gmra.mxu1 %vm257_vm0, %v228_v17  ;;  %v936_v20 = vmax.f32 %v759_v25, 0.0  ;;  %v992_v25 = vld [vmem:[%s3274_s2 + $0x88] sm:$0xff] }
 0x18e   :  { %1242 = vmatmul.f32.gmra.mxu3 %v997_v11 }
 0x191   :  { %v2787_v45 = vpop.f32.mrf.mxu2 }
 0x192   :  { %v761_v58 = vpop.f32.mrf.mxu1  ;;  %1305 = vmatmul.f32.gmra.mxu0 %v1026_v30 }
 0x193   :  { %v762_v5 = vadd.f32 %v2136_v54, %v761_v58 }
 0x195   :  { %1825 = vmatmul.msk.f32.gmra.mxu1 %vm257_vm0, %v229_v47  ;;  %v937_v55 = vmax.f32 %v762_v5, 0.0  ;;  %v985_v5 = vld [vmem:[%s3274_s2 + $0x50] sm:$0xff] }
 0x196   :  { %1245 = vmatmul.f32.gmra.mxu3 %v1004_v48 }
 0x199   :  { %v147_v2 = vpop.f32.mrf.mxu2 }
 0x19a   :  { %v764_v44 = vpop.f32.mrf.mxu1  ;;  %1308 = vmatmul.f32.gmra.mxu0 %v1033_v28 }
 0x19b   :  { %v765_v7 = vadd.f32 %v2136_v54, %v764_v44  ;;  %v2774_v54 = vld [vmem:[%s3270_s7] ss:$0 sm:$0xff]  ;;  %v1068_v44 = vld [vmem:[%s3275_s3 + $0x48] sm:$0xff] }
 0x19c   :  { %v747_v49 = vadd.f32 %v2774_v54, %v2619_v52  ;;  %v744_v1 = vadd.f32 %v2774_v54, %v2592_v40  ;;  %v741_v36 = vadd.f32 %v2774_v54, %v2564_v16  ;;  %v738_v52 = vadd.f32 %v2774_v54, %v2545_v57  ;;  %v1025_v40 = vld [vmem:[%s3274_s2 + $0x190] sm:$0xff]  ;;  %1118 = vperm.xlu0 %1874, %v1068_v44   ;;  %v1047_v44 = vld [vmem:[%s3274_s2 + $0x240] sm:$0xff] }
 0x19d   :  { %v938_v56 = vmax.f32 %v765_v7, 0.0  ;;  %1826 = vmatmul.msk.f32.gmra.mxu1 %vm257_vm0, %v230_v9  ;;  %v735_v16 = vadd.f32 %v2774_v54, %v2532_v50  ;;  %v732_v57 = vadd.f32 %v2774_v54, %v2519_v34  ;;  %v729_v31 = vadd.f32 %v2774_v54, %v2510_v10  ;;  %v1032_v34 = vld [vmem:[%s3274_s2 + $0x1c8] sm:$0xff] }
 0x19e   :  { %1248 = vmatmul.f32.gmra.mxu3 %v1011_v13  ;;  %v932_v37 = vmax.f32 %v747_v49, 0.0  ;;  %v931_v43 = vmax.f32 %v744_v1, 0.0  ;;  %v930_v51 = vmax.f32 %v741_v36, 0.0  ;;  %v929_v12 = vmax.f32 %v738_v52, 0.0  ;;  %v1066_v13 = vld [vmem:[%s3275_s3 + $0x38] sm:$0xff]  ;;  %v1013_v52 = vld [vmem:[%s3274_s2 + $0x130] sm:$0xff] }
 0x19f   :  { %1319 = vmatpush.msra.mxu2 %v938_v56  ;;  %v928_v21 = vmax.f32 %v735_v16, 0.0  ;;  %v726_v11 = vadd.f32 %v2774_v54, %v2492_v3  ;;  %v927_v50 = vmax.f32 %v732_v57, 0.0  ;;  %v723_v10 = vadd.f32 %v2774_v54, %v2470_v19 }
 0x1a0   :  { %v926_v62 = vmax.f32 %v729_v31, 0.0  ;;  %v720_v3 = vadd.f32 %v2774_v54, %v2448_v41  ;;  %v1065_v41 = vld [vmem:[%s3275_s3 + $0x30] sm:$0xff] }
 0x1a1   :  { %1320 = vmatpush.msra.mxu2 %v937_v55  ;;  %v925_v58 = vmax.f32 %v726_v11, 0.0  ;;  %v924_v47 = vmax.f32 %v723_v10, 0.0  ;;  %v149_v19 = vpop.f32.mrf.mxu2  ;;  %1103 = vperm.xlu2 %1876, %v1065_v41   ;;  %v1027_v11 = vld [vmem:[%s3274_s2 + $0x1a0] sm:$0xff]  ;;  %v1053_v41 = vld [vmem:[%s3274_s2 + $0x270] sm:$0xff] }
 0x1a2   :  { %v2756_v63 = vpop.f32.mrf.mxu1  ;;  %1311 = vmatmul.f32.gmra.mxu0 %v1040_v59  ;;  %v923_v14 = vmax.f32 %v720_v3, 0.0 }
 0x1a3   :  { %1321 = vmatpush.msra.mxu2 %v936_v20  ;;  %v999_v20 = vld [vmem:[%s3274_s2 + $0xc0] sm:$0xff] }
 0x1a5   :  { %1322 = vmatpush.msra.mxu2 %v935_v38  ;;  %1827 = vmatmul.msk.f32.gmra.mxu1 %vm257_vm0, %v231_v26 }
 0x1a6   :  { %1251 = vmatmul.f32.gmra.mxu3 %v1018_v29  ;;  %v1006_v29 = vld [vmem:[%s3274_s2 + $0xf8] sm:$0xff] }
 0x1a7   :  { %1323 = vmatpush.msra.mxu2 %v934_v4 }
 0x1a9   :  { %1324 = vmatpush.msra.mxu2 %v933_v39  ;;  %v2834_v7 = vpop.f32.mrf.mxu2  ;;  %1108 = vperm.xlu2 %1876, %v1066_v13   ;;  %v866_v55 = vpop.f32.mrf.mxu3 }
 0x1aa   :  { %v2783_v24 = vpop.f32.mrf.mxu1  ;;  %v867_v1 = vadd.f32 %v2774_v54, %v866_v55  ;;  %1314 = vmatmul.f32.gmra.mxu0 %v1047_v44 }
 0x1ab   :  { %1325 = vmatpush.msra.mxu2 %v932_v37  ;;  %v864_v37 = vadd.f32 %v2774_v54, %v863_v32 }
 0x1ac   :  { %v972_v16 = vmax.f32 %v867_v1, 0.0 }
 0x1ad   :  { %1326 = vmatpush.msra.mxu2 %v931_v43 }
 0x1ae   :  { %1254 = vmatmul.f32.gmra.mxu3 %v1025_v40 }
 0x1af   :  { %1327 = vmatpush.msra.mxu2 %v930_v51  ;;  %v971_v51 = vmax.f32 %v864_v37, 0.0 }
 0x1b1   :  { %1328 = vmatpush.msra.mxu2 %v929_v12  ;;  %v2844_v56 = vpop.f32.mrf.mxu2  ;;  %1113 = vperm.xlu2 %1876, %v1067_v6   ;;  %v869_v38 = vpop.f32.mrf.mxu3  ;;  %v1020_v12 = vld [vmem:[%s3274_s2 + $0x168] sm:$0xff] }
 0x1b2   :  { %v2801_v17 = vpop.f32.mrf.mxu1  ;;  %v870_v49 = vadd.f32 %v2774_v54, %v869_v38  ;;  %v1054_v38 = vld [vmem:[%s3274_s2 + $0x278] sm:$0xff] }
 0x1b3   :  { %1329 = vmatpush.msra.mxu2 %v928_v21  ;;  %1316 = vmatmul.f32.gmra.mxu0 %v1054_v38 }
 0x1b4   :  { %v973_v43 = vmax.f32 %v870_v49, 0.0 }
 0x1b5   :  { %1330 = vmatpush.msra.mxu2 %v927_v50 }
 0x1b6   :  { %1257 = vmatmul.f32.gmra.mxu3 %v1032_v34  ;;  %v1034_v34 = vld [vmem:[%s3274_s2 + $0x1d8] sm:$0xff] }
 0x1b7   :  { %1331 = vmatpush.msra.mxu2 %v926_v62  ;;  %v1041_v62 = vld [vmem:[%s3274_s2 + $0x210] sm:$0xff] }
 0x1b9   :  { %1332 = vmatpush.msra.mxu2 %v925_v58  ;;  %v2854_v22 = vpop.f32.mrf.mxu2  ;;  %v872_v4 = vpop.f32.mrf.mxu3 }
 0x1ba   :  { %v2815_v48 = vpop.f32.mrf.mxu1  ;;  %v873_v39 = vadd.f32 %v2774_v54, %v872_v4  ;;  %v981_v4 = vld [vmem:[%s3274_s2 + $0x30] sm:$0xff] }
 0x1bb   :  { %1333 = vmatpush.msra.mxu2 %v924_v47 }
 0x1bc   :  { %v974_v40 = vmax.f32 %v873_v39, 0.0 }
 0x1bd   :  { %1334 = vmatpush.msra.mxu2 %v923_v14  ;;  %v1048_v14 = vld [vmem:[%s3274_s2 + $0x248] sm:$0xff] }
 0x1be   :  { %1335 = vmatmul.f32.vlgmr.msra.gmra.mxu2 %v978_v61  ;;  %1260 = vmatmul.f32.gmra.mxu3 %v1039_v0  ;;  %v1046_v61 = vld [vmem:[%s3274_s2 + $0x238] sm:$0xff] }
 0x1bf   :  { %1484 = vmatpush.msrb.mxu2 %v974_v40 }
 0x1c1   :  { %v2861_v30 = vpop.f32.mrf.mxu2  ;;  %1485 = vmatpush.msrb.mxu2 %v973_v43 }
 0x1c2   :  { %v2829_v9 = vpop.f32.mrf.mxu1 }
 0x1c3   :  { %1486 = vmatpush.msrb.mxu2 %v972_v16 }
 0x1c5   :  { %1487 = vmatpush.msrb.mxu2 %v971_v51 }
 0x1c6   :  { %1338 = vmatmul.f32.gmra.mxu2 %v985_v5  ;;  %1263 = vmatmul.f32.gmra.mxu3 %v1046_v61  ;;  %v1055_v5 = vld [vmem:[%s3274_s2 + $0x280] sm:$0xff] }
 0x1c9   :  { %v2872_v28 = vpop.f32.mrf.mxu2 }
 0x1ca   :  { %v2839_v8 = vpop.f32.mrf.mxu1 }
 0x1cb   :  { %v783_v61 = vadd.f32 %v2774_v54, %v2839_v8  ;;  %v777_v8 = vadd.f32 %v2774_v54, %v2815_v48  ;;  %v994_v48 = vld [vmem:[%s3274_s2 + $0x98] sm:$0xff] }
 0x1cd   :  { %v944_v44 = vmax.f32 %v783_v61, 0.0 }
 0x1ce   :  { %1341 = vmatmul.f32.gmra.mxu2 %v992_v25  ;;  %1265 = vmatmul.f32.gmra.mxu3 %v1053_v41 }
 0x1d1   :  { %v2877_v31 = vpop.f32.mrf.mxu2 }
 0x1d2   :  { %v2849_v18 = vpop.f32.mrf.mxu1 }
 0x1d6   :  { %1344 = vmatmul.f32.gmra.mxu2 %v999_v20 }
 0x1d9   :  { %v2882_v50 = vpop.f32.mrf.mxu2 }
 0x1da   :  { %v2856_v26 = vpop.f32.mrf.mxu1 }
 0x1de   :  { %1347 = vmatmul.f32.gmra.mxu2 %v1006_v29 }
 0x1e1   :  { %v2887_v59 = vpop.f32.mrf.mxu2 }
 0x1e2   :  { %v2866_v36 = vpop.f32.mrf.mxu1 }
 0x1e6   :  { %1350 = vmatmul.f32.gmra.mxu2 %v1013_v52 }
 0x1e9   :  { %v2892_v3 = vpop.f32.mrf.mxu2 }
 0x1ea   :  { %v794_v57 = vpop.f32.mrf.mxu1 }
 0x1eb   :  { %v795_v16 = vadd.f32 %v2774_v54, %v794_v57  ;;  %v789_v57 = vadd.f32 %v2774_v54, %v2856_v26  ;;  %v987_v26 = vld [vmem:[%s3274_s2 + $0x60] sm:$0xff] }
 0x1ee   :  { %1353 = vmatmul.f32.gmra.mxu2 %v1020_v12 }
 0x1f1   :  { %v2894_v47 = vpop.f32.mrf.mxu2 }
 0x1f2   :  { %v797_v21 = vpop.f32.mrf.mxu1 }
 0x1f3   :  { %v798_v52 = vadd.f32 %v2774_v54, %v797_v21  ;;  %v988_v21 = vld [vmem:[%s3274_s2 + $0x68] sm:$0xff] }
 0x1f6   :  { %1356 = vmatmul.f32.gmra.mxu2 %v1027_v11  ;;  %v980_v11 = vld [vmem:[%s3274_s2 + $0x28] sm:$0xff] }
 0x1f9   :  { %v1213_v0 = vpop.f32.mrf.mxu2 }
 0x1fa   :  { %v800_v2 = vpop.f32.mrf.mxu1  ;;  %v780_v0 = vadd.f32 %v2774_v54, %v2829_v9  ;;  %v1074_v9 = vpop.permute.xlu1 %1073 }
 0x1fb   :  { %v801_v1 = vadd.f32 %v2774_v54, %v800_v2  ;;  %v792_v2 = vadd.f32 %v2774_v54, %v2866_v36 }
 0x1fd   :  { %v950_v51 = vmax.f32 %v801_v1, 0.0  ;;  %v947_v36 = vmax.f32 %v792_v2, 0.0  ;;  %v1008_v2 = vld [vmem:[%s3274_s2 + $0x108] sm:$0xff] }
 0x1fe   :  { %1359 = vmatmul.f32.gmra.mxu2 %v1034_v34  ;;  %v949_v34 = vmax.f32 %v798_v52, 0.0 }
 0x201   :  { %v1215_v6 = vpop.f32.mrf.mxu2 }
 0x202   :  { %v803_v10 = vpop.f32.mrf.mxu1  ;;  %v942_v6 = vmax.f32 %v777_v8, 0.0 }
 0x203   :  { %v804_v29 = vadd.f32 %v2774_v54, %v803_v10  ;;  %v948_v10 = vmax.f32 %v795_v16, 0.0 }
 0x205   :  { %v951_v43 = vmax.f32 %v804_v29, 0.0  ;;  %v1184_v29 = vadd.f32 %v2834_v7, %v1074_v9  ;;  %v1001_v7 = vld [vmem:[%s3274_s2 + $0xd0] sm:$0xff] }
 0x206   :  { %1362 = vmatmul.f32.gmra.mxu2 %v1041_v62  ;;  %v1234_v62 = vpop.f32.mrf.mxu3 }
 0x20a   :  { %v806_v58 = vpop.f32.mrf.mxu1 }
 0x20b   :  { %v807_v55 = vadd.f32 %v2774_v54, %v806_v58  ;;  %v786_v58 = vadd.f32 %v2774_v54, %v2849_v18  ;;  %v995_v18 = vld [vmem:[%s3274_s2 + $0xa0] sm:$0xff] }
 0x20d   :  { %v952_v39 = vmax.f32 %v807_v55, 0.0  ;;  %v945_v41 = vmax.f32 %v786_v58, 0.0  ;;  %v768_v55 = vadd.f32 %v2774_v54, %v2756_v63  ;;  %v979_v63 = vld [vmem:[%s3274_s2 + $0x20] sm:$0xff]  ;;  %v993_v58 = vld [vmem:[%s3274_s2 + $0x90] sm:$0xff] }
 0x20e   :  { %1365 = vmatmul.f32.gmra.mxu2 %v1048_v14  ;;  %v946_v14 = vmax.f32 %v789_v57, 0.0 }
 0x212   :  { %v809_v19 = vpop.f32.mrf.mxu1 }
 0x213   :  { %v810_v32 = vadd.f32 %v2774_v54, %v809_v19  ;;  %v1285_v19 = vpop.f32.mrf.mxu0 }
 0x215   :  { %v953_v49 = vmax.f32 %v810_v32, 0.0  ;;  %v1237_v32 = vpop.f32.mrf.mxu3 }
 0x216   :  { %1367 = vmatmul.f32.gmra.mxu2 %v1055_v5  ;;  %v774_v5 = vadd.f32 %v2774_v54, %v2801_v17  ;;  %v1002_v17 = vld [vmem:[%s3274_s2 + $0xd8] sm:$0xff] }
 0x21a   :  { %v812_v13 = vpop.f32.mrf.mxu1 }
 0x21b   :  { %v813_v25 = vadd.f32 %v2774_v54, %v812_v13  ;;  %v943_v13 = vmax.f32 %v780_v0, 0.0  ;;  %v1288_v38 = vpop.f32.mrf.mxu0 }
 0x21d   :  { %v954_v20 = vmax.f32 %v813_v25, 0.0  ;;  %v771_v25 = vadd.f32 %v2774_v54, %v2783_v24  ;;  %v1240_v1 = vpop.f32.mrf.mxu3 }
 0x21e   :  { %1847 = vmatmul.msk.f32.vlgmr.msrb.gmra.mxu2 %vm1129_vm2, %v981_v4  ;;  %v1079_v4 = vpop.permute.xlu1 %1078 }
 0x21f   :  { %1370 = vmatpush.msra.mxu3 %v954_v20  ;;  %v941_v20 = vmax.f32 %v774_v5, 0.0  ;;  %v940_v24 = vmax.f32 %v771_v25, 0.0  ;;  %v1187_v52 = vadd.f32 %v2844_v56, %v1079_v4  ;;  %v1016_v56 = vld [vmem:[%s3274_s2 + $0x148] sm:$0xff] }
 0x221   :  { %1371 = vmatpush.msra.mxu3 %v953_v49  ;;  %v939_v49 = vmax.f32 %v768_v55, 0.0 }
 0x222   :  { %v815_v37 = vpop.f32.mrf.mxu1 }
 0x223   :  { %1372 = vmatpush.msra.mxu3 %v952_v39  ;;  %v816_v40 = vadd.f32 %v2774_v54, %v815_v37  ;;  %v1235_v54 = vadd.f32 %v1234_v62, %v1184_v29  ;;  %v1009_v39 = vld [vmem:[%s3274_s2 + $0x110] sm:$0xff]  ;;  %v1291_v16 = vpop.f32.mrf.mxu0 }
 0x225   :  { %1373 = vmatpush.msra.mxu3 %v951_v43  ;;  %v955_v12 = vmax.f32 %v816_v40, 0.0  ;;  %v1286_v37 = vadd.f32 %v1285_v19, %v1235_v54  ;;  %v1084_v43 = vpop.permute.xlu0 %1083  ;;  %v1015_v19 = vld [vmem:[%s3274_s2 + $0x140] sm:$0xff] }
 0x226   :  { %1848 = vmatmul.msk.f32.gmra.mxu2 %vm1129_vm2, %v988_v21  ;;  %v1190_v57 = vadd.f32 %v2854_v22, %v1084_v43  ;;  %v1023_v22 = vld [vmem:[%s3274_s2 + $0x180] sm:$0xff]  ;;  %v1099_v29 = vpop.permute.xlu1 %1098  ;;  %v1036_v43 = vld [vmem:[%s3274_s2 + $0x1e8] sm:$0xff] }
 0x227   :  { %1374 = vmatpush.msra.mxu3 %v950_v51  ;;  %1436 = vmatpush.msra.mxu0 %v955_v12  ;;  %v986_v12 = vld [vmem:[%s3274_s2 + $0x58] sm:$0xff]  ;;  %v1199_v54 = vadd.f32 %v2877_v31, %v1099_v29  ;;  %v1044_v31 = vld [vmem:[%s3274_s2 + $0x228] sm:$0xff] }
 0x228   :  { %1437 = vmatmul.f32.vlgmr.msra.gmra.mxu0 %v980_v11  ;;  %v1238_v11 = vadd.f32 %v1237_v32, %v1187_v52  ;;  %v1022_v32 = vld [vmem:[%s3274_s2 + $0x178] sm:$0xff] }
 0x229   :  { %1375 = vmatpush.msra.mxu3 %v949_v34  ;;  %v1243_v34 = vpop.f32.mrf.mxu3 }
 0x22a   :  { %v1289_v21 = vadd.f32 %v1288_v38, %v1238_v11 }
 0x22b   :  { %1376 = vmatpush.msra.mxu3 %v948_v10  ;;  %v1294_v61 = vpop.f32.mrf.mxu0 }
 0x22d   :  { %1377 = vmatpush.msra.mxu3 %v947_v36  ;;  %v1089_v36 = vpop.permute.xlu0 %1088 }
 0x22e   :  { %1849 = vmatmul.msk.f32.gmra.mxu2 %vm1129_vm2, %v995_v18  ;;  %v1193_v0 = vadd.f32 %v2861_v30, %v1089_v36  ;;  %v1030_v30 = vld [vmem:[%s3274_s2 + $0x1b8] sm:$0xff] }
 0x22f   :  { %1378 = vmatpush.msra.mxu3 %v946_v14  ;;  %v1241_v14 = vadd.f32 %v1240_v1, %v1190_v57  ;;  %v1104_v1 = vpop.permute.xlu2 %1103  ;;  %v1043_v57 = vld [vmem:[%s3274_s2 + $0x220] sm:$0xff] }
 0x230   :  { %1440 = vmatmul.f32.gmra.mxu0 %v987_v26  ;;  %v1244_v5 = vadd.f32 %v1243_v34, %v1193_v0  ;;  %v1021_v34 = vld [vmem:[%s3274_s2 + $0x170] sm:$0xff] }
 0x231   :  { %1379 = vmatpush.msra.mxu3 %v945_v41  ;;  %v1292_v26 = vadd.f32 %v1291_v16, %v1241_v14  ;;  %v1246_v18 = vpop.f32.mrf.mxu3  ;;  %v1202_v16 = vadd.f32 %v2882_v50, %v1104_v1  ;;  %v1028_v14 = vld [vmem:[%s3274_s2 + $0x1a8] sm:$0xff] }
 0x232   :  { %v1295_v25 = vadd.f32 %v1294_v61, %v1244_v5  ;;  %v3091_v1 = vld [vmem:[%s3276_s8 + $0xa8] sm:$0xff] }
 0x233   :  { %1380 = vmatpush.msra.mxu3 %v944_v44  ;;  %v1000_v44 = vld [vmem:[%s3274_s2 + $0xc8] sm:$0xff]  ;;  %v1297_v9 = vpop.f32.mrf.mxu0 }
 0x235   :  { %1381 = vmatpush.msra.mxu3 %v943_v13  ;;  %v1094_v13 = vpop.permute.xlu0 %1093 }
 0x236   :  { %1850 = vmatmul.msk.f32.gmra.mxu2 %vm1129_vm2, %v1002_v17 }
 0x237   :  { %1382 = vmatpush.msra.mxu3 %v942_v6  ;;  %v1196_v6 = vadd.f32 %v2872_v28, %v1094_v13  ;;  %v1037_v28 = vld [vmem:[%s3274_s2 + $0x1f0] sm:$0xff] }
 0x238   :  { %1443 = vmatmul.f32.gmra.mxu0 %v994_v48 }
 0x239   :  { %1383 = vmatpush.msra.mxu3 %v941_v20  ;;  %v1007_v20 = vld [vmem:[%s3274_s2 + $0x100] sm:$0xff]  ;;  %v1249_v38 = vpop.f32.mrf.mxu3  ;;  %v1247_v17 = vadd.f32 %v1246_v18, %v1196_v6  ;;  %v1042_v6 = vld [vmem:[%s3274_s2 + $0x218] sm:$0xff] }
 0x23b   :  { %1384 = vmatpush.msra.mxu3 %v940_v24  ;;  %v1029_v24 = vld [vmem:[%s3274_s2 + $0x1b0] sm:$0xff] }
 0x23d   :  { %1385 = vmatpush.msra.mxu3 %v939_v49  ;;  %v1300_v49 = vpop.f32.mrf.mxu0 }
 0x23e   :  { %1386 = vmatmul.f32.vlgmr.msra.gmra.mxu3 %v979_v63  ;;  %1851 = vmatmul.msk.f32.gmra.mxu2 %vm1129_vm2, %v1009_v39  ;;  %v1298_v63 = vadd.f32 %v1297_v9, %v1247_v17  ;;  %v1014_v39 = vld [vmem:[%s3274_s2 + $0x138] sm:$0xff] }
 0x240   :  { %1446 = vmatmul.f32.gmra.mxu0 %v1001_v7 }
 0x241   :  { %v1336_v40 = vpop.f32.mrf.mxu2  ;;  %v1252_v52 = vpop.f32.mrf.mxu3 }
 0x242   :  { %v2976_v51 = vadd.f32 %v1336_v40, %v1286_v37  ;;  %v1250_v37 = vadd.f32 %v1249_v38, %v1199_v54  ;;  %v3082_v54 = vld [vmem:[%s3276_s8 + $0xb0] sm:$0xff] }
 0x244   :  { %v1301_v40 = vadd.f32 %v1300_v49, %v1250_v37  ;;  %v3097_v37 = vld [vmem:[%s3276_s8 + $0xa0] sm:$0xff] }
 0x245   :  { %v1303_v11 = vpop.f32.mrf.mxu0 }
 0x246   :  { %1389 = vmatmul.f32.gmra.mxu3 %v986_v12  ;;  %1852 = vmatmul.msk.f32.gmra.mxu2 %vm1129_vm2, %v1016_v56  ;;  %v1109_v56 = vpop.permute.xlu2 %1108 }
 0x248   :  { %1449 = vmatmul.f32.gmra.mxu0 %v1008_v2 }
 0x249   :  { %v1339_v10 = vpop.f32.mrf.mxu2 }
 0x24a   :  { %v2989_v62 = vadd.f32 %v1339_v10, %v1289_v21  ;;  %v1253_v21 = vadd.f32 %v1252_v52, %v1202_v16  ;;  %v1255_v10 = vpop.f32.mrf.mxu3  ;;  %v1056_v52 = vld [vmem:[%s3274_s2 + $0x288] sm:$0xff] }
 0x24b   :  { %v3118_v16 = vld [vmem:[%s3276_s8 + $0x88] sm:$0xff] }
 0x24c   :  { %v1304_v50 = vadd.f32 %v1303_v11, %v1253_v21  ;;  %v1557_v21 = vld [vmem:[%s3276_s8 + $0x70] sm:$0xff] }
 0x24e   :  { %1392 = vmatmul.f32.gmra.mxu3 %v993_v58  ;;  %1853 = vmatmul.msk.f32.gmra.mxu2 %vm1129_vm2, %v1023_v22  ;;  %v1205_v58 = vadd.f32 %v2887_v59, %v1109_v56  ;;  %v1035_v59 = vld [vmem:[%s3274_s2 + $0x1e0] sm:$0xff] }
 0x250   :  { %1452 = vmatmul.f32.gmra.mxu0 %v1015_v19  ;;  %v1306_v19 = vpop.f32.mrf.mxu0  ;;  %v1256_v22 = vadd.f32 %v1255_v10, %v1205_v58  ;;  %v1556_v10 = vld [vmem:[%s3276_s8 + $0x68] sm:$0xff]  ;;  %v1554_v58 = vld [vmem:[%s3276_s8 + $0x58] sm:$0xff] }
 0x251   :  { %v1342_v41 = vpop.f32.mrf.mxu2 }
 0x252   :  { %v3002_v8 = vadd.f32 %v1342_v41, %v1292_v26  ;;  %v1114_v26 = vpop.permute.xlu2 %1113  ;;  %v1307_v0 = vadd.f32 %v1306_v19, %v1256_v22 }
 0x253   :  { %v1208_v41 = vadd.f32 %v2892_v3, %v1114_v26  ;;  %v1552_v26 = vld [vmem:[%s3276_s8 + $0x48] sm:$0xff] }
 0x256   :  { %1395 = vmatmul.f32.gmra.mxu3 %v1000_v44  ;;  %1854 = vmatmul.msk.f32.gmra.mxu2 %vm1129_vm2, %v1030_v30  ;;  %v1258_v44 = vpop.f32.mrf.mxu3 }
 0x257   :  { %v1259_v13 = vadd.f32 %v1258_v44, %v1208_v41 }
 0x258   :  { %1455 = vmatmul.f32.gmra.mxu0 %v1022_v32  ;;  %v1309_v9 = vpop.f32.mrf.mxu0  ;;  %v3065_v32 = vld [vmem:[%s3276_s8 + $0xb8] sm:$0xff] }
 0x259   :  { %v1345_v48 = vpop.f32.mrf.mxu2  ;;  %1582 = vmatpush.msrb.mxu3 %v3065_v32  ;;  %v1310_v30 = vadd.f32 %v1309_v9, %v1259_v13  ;;  %v3155_v13 = vld [vmem:[%s3273_s5] ss:$0 sm:$0xff] }
 0x25a   :  { %v3015_v55 = vadd.f32 %v1345_v48, %v1295_v25 }
 0x25b   :  { %1583 = vmatpush.msrb.mxu3 %v3082_v54 }
 0x25d   :  { %1584 = vmatpush.msrb.mxu3 %v3091_v1 }
 0x25e   :  { %1398 = vmatmul.f32.gmra.mxu3 %v1007_v20  ;;  %1855 = vmatmul.msk.f32.gmra.mxu2 %vm1129_vm2, %v1037_v28  ;;  %v3073_v48 = vpop.f32.mrf.mxu3 }
 0x25f   :  { %1585 = vmatpush.msrb.mxu3 %v3097_v37 }
 0x260   :  { %1458 = vmatmul.f32.gmra.mxu0 %v1029_v24  ;;  %v3075_v20 = vpop.f32.mrf.mxu0 }
 0x261   :  { %v1348_v4 = vpop.f32.mrf.mxu2 }
 0x262   :  { %v3028_v7 = vadd.f32 %v1348_v4, %v1298_v63  ;;  %v1049_v4 = vld [vmem:[%s3274_s2 + $0x250] sm:$0xff] }
 0x266   :  { %1401 = vmatmul.f32.gmra.mxu3 %v1014_v39  ;;  %1856 = vmatmul.msk.f32.gmra.mxu2 %vm1129_vm2, %v1044_v31  ;;  %v1264_v17 = vpop.f32.mrf.mxu3  ;;  %v3106_v31 = vld [vmem:[%s3276_s8 + $0x98] sm:$0xff] }
 0x267   :  { %1586 = vmatpush.msrb.mxu3 %v3106_v31 }
 0x268   :  { %1461 = vmatmul.f32.gmra.mxu0 %v1036_v43  ;;  %v1315_v29 = vpop.f32.mrf.mxu0 }
 0x269   :  { %v1351_v12 = vpop.f32.mrf.mxu2 }
 0x26a   :  { %v3041_v2 = vadd.f32 %v1351_v12, %v1301_v40  ;;  %v3112_v40 = vld [vmem:[%s3276_s8 + $0x90] sm:$0xff]  ;;  %v3124_v12 = vld [vmem:[%s3276_s8 + $0x80] sm:$0xff] }
 0x26b   :  { %1587 = vmatpush.msrb.mxu3 %v3112_v40 }
 0x26d   :  { %1588 = vmatpush.msrb.mxu3 %v3118_v16 }
 0x26e   :  { %1404 = vmatmul.f32.gmra.mxu3 %v1021_v34  ;;  %v1266_v49 = vpop.f32.mrf.mxu3  ;;  %v1558_v34 = vld [vmem:[%s3276_s8 + $0x78] sm:$0xff] }
 0x26f   :  { %1589 = vmatpush.msrb.mxu3 %v3124_v12 }
 0x270   :  { %1464 = vmatmul.f32.gmra.mxu0 %v1043_v57  ;;  %v1317_v28 = vpop.f32.mrf.mxu0 }
 0x271   :  { %v1354_v36 = vpop.f32.mrf.mxu2  ;;  %1611 = vmatpush.msra.mxu3 %v1558_v34 }
 0x272   :  { %v3051_v61 = vadd.f32 %v1354_v36, %v1304_v50  ;;  %v1555_v50 = vld [vmem:[%s3276_s8 + $0x60] sm:$0xff] }
 0x273   :  { %1612 = vmatpush.msra.mxu3 %v1557_v21 }
 0x275   :  { %1613 = vmatpush.msra.mxu3 %v1556_v10 }
 0x276   :  { %1407 = vmatmul.f32.gmra.mxu3 %v1028_v14  ;;  %v1553_v14 = vld [vmem:[%s3276_s8 + $0x50] sm:$0xff] }
 0x277   :  { %1614 = vmatpush.msra.mxu3 %v1555_v50 }
 0x279   :  { %v1357_v18 = vpop.f32.mrf.mxu2  ;;  %1615 = vmatpush.msra.mxu3 %v1554_v58 }
 0x27a   :  { %v3057_v5 = vadd.f32 %v1357_v18, %v1307_v0  ;;  %v1551_v0 = vld [vmem:[%s3276_s8 + $0x40] sm:$0xff] }
 0x27b   :  { %1616 = vmatpush.msra.mxu3 %v1553_v14 }
 0x27d   :  { %1617 = vmatpush.msra.mxu3 %v1552_v26 }
 0x27e   :  { %1410 = vmatmul.f32.gmra.mxu3 %v1035_v59 }
 0x27f   :  { %1618 = vmatpush.msra.mxu3 %v1551_v0 }
 0x281   :  { %v1360_v3 = vpop.f32.mrf.mxu2 }
 0x282   :  { %v3068_v25 = vadd.f32 %v1360_v3, %v1310_v30  ;;  %v124_v30 = vadd.f32 %v3155_v13, %v2646_v23  ;;  %v127_v23 = vadd.f32 %v3155_v13, %v2666_v33 }
 0x286   :  { %1413 = vmatmul.f32.gmra.mxu3 %v1042_v6 }
 0x289   :  { %v3077_v38 = vpop.f32.mrf.mxu2 }
 0x28e   :  { %1416 = vmatmul.f32.gmra.mxu3 %v1049_v4 }
 0x291   :  { %v1366_v24 = vpop.f32.mrf.mxu2 }
 0x296   :  { %1418 = vmatmul.f32.gmra.mxu3 %v1056_v52 }
 0x299   :  { %v1368_v63 = vpop.f32.mrf.mxu2 }
 0x2a1   :  { %v1489_v43 = vpop.f32.mrf.mxu2 }
 0x2a5   :  { %v1438_v39 = vpop.f32.mrf.mxu0 }
 0x2a9   :  { %v1492_v56 = vpop.f32.mrf.mxu2 }
 0x2ad   :  { %v1441_v11 = vpop.f32.mrf.mxu0 }
 0x2b1   :  { %v1495_v22 = vpop.f32.mrf.mxu2 }
 0x2b5   :  { %v1444_v36 = vpop.f32.mrf.mxu0 }
 0x2b9   :  { %v1498_v59 = vpop.f32.mrf.mxu2 }
 0x2bd   :  { %v1447_v18 = vpop.f32.mrf.mxu0 }
 0x2c1   :  { %v1387_v57 = vpop.f32.mrf.mxu3  ;;  %v3164_v63 = vpop.f32.mrf.mxu2 }
 0x2c2   :  { %v1388_v29 = vadd.f32 %v1387_v57, %v2976_v51 }
 0x2c4   :  { %v1439_v4 = vadd.f32 %v1438_v39, %v1388_v29 }
 0x2c6   :  { %v1490_v51 = vadd.f32 %v1489_v43, %v1439_v4 }
 0x2c9   :  { %v1390_v19 = vpop.f32.mrf.mxu3 }
 0x2d1   :  { %v1393_v41 = vpop.f32.mrf.mxu3 }
 0x2d2   :  { %v1394_v44 = vadd.f32 %v1393_v41, %v3002_v8  ;;  %v3161_v8 = vpop.f32.mrf.mxu0  ;;  %v118_v41 = vadd.f32 %v3155_v13, %v2597_v35  ;;  %v121_v35 = vadd.f32 %v3155_v13, %v2624_v27 }
 0x2d4   :  { %v1445_v9 = vadd.f32 %v1444_v36, %v1394_v44  ;;  %v1523_v33 = vadd.f32 %v1490_v51, %v118_v41  ;;  %v1546_v44 = vld [vmem:[%s3276_s8 + $0x18] sm:$0xff] }
 0x2d6   :  { %v1496_v3 = vadd.f32 %v1495_v22, %v1445_v9  ;;  %v1533_v43 = vmax.f32 %v1523_v33, 0.0  ;;  %v1545_v9 = vld [vmem:[%s3276_s8 + $0x10] sm:$0xff] }
 0x2d8   :  { %v1525_v6 = vadd.f32 %v1496_v3, %v124_v30  ;;  %v136_v30 = vadd.f32 %v3155_v13, %v2720_v60 }
 0x2d9   :  { %v1396_v17 = vpop.f32.mrf.mxu3 }
 0x2da   :  { %v1535_v24 = vmax.f32 %v1525_v6, 0.0  ;;  %v1397_v49 = vadd.f32 %v1396_v17, %v3015_v55  ;;  %v1391_v55 = vadd.f32 %v1390_v19, %v2989_v62  ;;  %v1550_v62 = vld [vmem:[%s3276_s8 + $0x38] sm:$0xff]  ;;  %v1543_v17 = vld [vmem:[%s3276_s8] sm:$0xff] }
 0x2dc   :  { %v1448_v28 = vadd.f32 %v1447_v18, %v1397_v49  ;;  %1859 = vmatmul.msk.f32.vlgmr.msrb.gmra.mxu3 %vm1567_vm3, %v1535_v24  ;;  %v1442_v39 = vadd.f32 %v1441_v11, %v1391_v55  ;;  %v3174_v18 = vpop.f32.mrf.mxu2  ;;  %v1549_v11 = vld [vmem:[%s3276_s8 + $0x30] sm:$0xff] }
 0x2dd   :  { %1646 = vmatpush.msrb.mxu3 %v1558_v34  ;;  %v3172_v34 = vpop.f32.mrf.mxu0 }
 0x2de   :  { %v1499_v52 = vadd.f32 %v1498_v59, %v1448_v28 }
 0x2df   :  { %1647 = vmatpush.msrb.mxu3 %v1557_v21 }
 0x2e0   :  { %v1526_v36 = vadd.f32 %v1499_v52, %v127_v23  ;;  %v139_v52 = vadd.f32 %v3155_v13, %v2740_v42 }
 0x2e1   :  { %v1399_v22 = vpop.f32.mrf.mxu3  ;;  %1648 = vmatpush.msrb.mxu3 %v1556_v10  ;;  %v1493_v10 = vadd.f32 %v1492_v56, %v1442_v39  ;;  %v1548_v56 = vld [vmem:[%s3276_s8 + $0x28] sm:$0xff] }
 0x2e2   :  { %v1536_v57 = vmax.f32 %v1526_v36, 0.0  ;;  %v1400_v49 = vadd.f32 %v1399_v22, %v3028_v7 }
 0x2e3   :  { %1649 = vmatpush.msrb.mxu3 %v1555_v50  ;;  %v1524_v50 = vadd.f32 %v1493_v10, %v121_v35  ;;  %v1057_v10 = vld [vmem:[%s3274_s2 + $0x290] sm:$0xff] }
 0x2e4   :  { %1860 = vmatmul.msk.f32.gmra.mxu3 %vm1567_vm3, %v1536_v57  ;;  %v1507_v27 = vpop.f32.mrf.mxu2  ;;  %v1451_v36 = vadd.f32 %v3161_v8, %v1400_v49  ;;  %v1119_v57 = vpop.permute.xlu0 %1118 }
 0x2e5   :  { %1650 = vmatpush.msrb.mxu3 %v1554_v58  ;;  %v1456_v58 = vpop.f32.mrf.mxu0 }
 0x2e6   :  { %v1502_v7 = vadd.f32 %v3164_v63, %v1451_v36 }
 0x2e7   :  { %1651 = vmatpush.msrb.mxu3 %v1553_v14  ;;  %v1547_v14 = vld [vmem:[%s3276_s8 + $0x20] sm:$0xff] }
 0x2e9   :  { %v1402_v21 = vpop.f32.mrf.mxu3  ;;  %1652 = vmatpush.msrb.mxu3 %v1552_v26  ;;  %v1534_v26 = vmax.f32 %v1524_v50, 0.0 }
 0x2eb   :  { %1653 = vmatpush.msrb.mxu3 %v1551_v0 }
 0x2ec   :  { %1861 = vmatmul.msk.f32.vlgmr.msra.gmra.mxu3 %vm1567_vm3, %v1533_v43  ;;  %v1510_v60 = vpop.f32.mrf.mxu2 }
 0x2ed   :  { %1675 = vmatpush.msra.mxu3 %v1550_v62  ;;  %v1459_v24 = vpop.f32.mrf.mxu0  ;;  %v142_v62 = vadd.f32 %v3155_v13, %v2763_v15 }
 0x2ef   :  { %1676 = vmatpush.msra.mxu3 %v1549_v11 }
 0x2f1   :  { %v1405_v19 = vpop.f32.mrf.mxu3  ;;  %1677 = vmatpush.msra.mxu3 %v1548_v56 }
 0x2f2   :  { %v1406_v0 = vadd.f32 %v1405_v19, %v3051_v61  ;;  %v1544_v61 = vld [vmem:[%s3276_s8 + $0x8] sm:$0xff] }
 0x2f3   :  { %1678 = vmatpush.msra.mxu3 %v1547_v14 }
 0x2f4   :  { %v1457_v59 = vadd.f32 %v1456_v58, %v1406_v0  ;;  %1862 = vmatmul.msk.f32.gmra.mxu3 %vm1567_vm3, %v1534_v26 }
 0x2f5   :  { %1679 = vmatpush.msra.mxu3 %v1546_v44 }
 0x2f6   :  { %v1508_v3 = vadd.f32 %v1507_v27, %v1457_v59 }
 0x2f7   :  { %1680 = vmatpush.msra.mxu3 %v1545_v9 }
 0x2f8   :  { %v1529_v6 = vadd.f32 %v1508_v3, %v136_v30 }
 0x2f9   :  { %v1408_v29 = vpop.f32.mrf.mxu3  ;;  %1681 = vmatpush.msra.mxu3 %v1544_v61 }
 0x2fa   :  { %v1539_v28 = vmax.f32 %v1529_v6, 0.0  ;;  %v1409_v23 = vadd.f32 %v1408_v29, %v3057_v5  ;;  %v1403_v5 = vadd.f32 %v1402_v21, %v3041_v2  ;;  %v1879_v29 = vld [vmem:[%s3277_s9] ss:$0 sm:$0xff] }
 0x2fb   :  { %1682 = vmatpush.msra.mxu3 %v1543_v17 }
 0x2fc   :  { %v1460_v4 = vadd.f32 %v1459_v24, %v1409_v23  ;;  %1863 = vmatmul.msk.f32.vlgmr.msrb.gmra.mxu3 %vm1567_vm3, %v1539_v28  ;;  %v1454_v2 = vadd.f32 %v3172_v34, %v1403_v5  ;;  %v133_v34 = vadd.f32 %v3155_v13, %v2702_v53 }
 0x2fd   :  { %1704 = vmatpush.msrb.mxu3 %v3065_v32  ;;  %v130_v32 = vadd.f32 %v3155_v13, %v2684_v46 }
 0x2fe   :  { %v1511_v51 = vadd.f32 %v1510_v60, %v1460_v4 }
 0x2ff   :  { %1705 = vmatpush.msrb.mxu3 %v3082_v54  ;;  %v1051_v54 = vld [vmem:[%s3274_s2 + $0x260] sm:$0xff]  ;;  %v1527_v8 = vadd.f32 %v1502_v7, %v130_v32 }
 0x300   :  { %v1530_v55 = vadd.f32 %v1511_v51, %v139_v52  ;;  %1857 = vmatmul.msk.f32.gmra.mxu2 %vm1129_vm2, %v1051_v54 }
 0x301   :  { %1706 = vmatpush.msrb.mxu3 %v3091_v1  ;;  %v1411_v42 = vpop.f32.mrf.mxu3  ;;  %v1211_v1 = vadd.f32 %v2894_v47, %v1119_v57  ;;  %v1537_v63 = vmax.f32 %v1527_v8, 0.0  ;;  %v1050_v47 = vld [vmem:[%s3274_s2 + $0x258] sm:$0xff] }
 0x302   :  { %v1540_v22 = vmax.f32 %v1530_v55, 0.0  ;;  %v1412_v41 = vadd.f32 %v1411_v42, %v3068_v25  ;;  %1467 = vmatmul.f32.gmra.mxu0 %v1050_v47 }
 0x303   :  { %1707 = vmatpush.msrb.mxu3 %v3097_v37  ;;  %v1462_v37 = vpop.f32.mrf.mxu0  ;;  %v1262_v46 = vadd.f32 %v3073_v48, %v1211_v1  ;;  %v1058_v48 = vld [vmem:[%s3274_s2 + $0x298] sm:$0xff] }
 0x304   :  { %1864 = vmatmul.msk.f32.gmra.mxu3 %vm1567_vm3, %v1540_v22  ;;  %v1463_v33 = vadd.f32 %v1462_v37, %v1412_v41 }
 0x305   :  { %1708 = vmatpush.msrb.mxu3 %v3106_v31  ;;  %v1505_v31 = vadd.f32 %v3174_v18, %v1454_v2 }
 0x307   :  { %1709 = vmatpush.msrb.mxu3 %v3112_v40  ;;  %v1513_v40 = vpop.f32.mrf.mxu2  ;;  %v1528_v25 = vadd.f32 %v1505_v31, %v133_v34 }
 0x308   :  { %1858 = vmatmul.msk.f32.gmra.mxu2 %vm1129_vm2, %v1058_v48  ;;  %v1514_v21 = vadd.f32 %v1513_v40, %v1463_v33 }
 0x309   :  { %1710 = vmatpush.msrb.mxu3 %v3118_v16  ;;  %v1313_v16 = vadd.f32 %v3075_v20, %v1262_v46  ;;  %v1538_v18 = vmax.f32 %v1528_v25, 0.0 }
 0x30a   :  { %1469 = vmatmul.f32.gmra.mxu0 %v1057_v10  ;;  %v1531_v20 = vadd.f32 %v1514_v21, %v142_v62 }
 0x30b   :  { %1711 = vmatpush.msrb.mxu3 %v3124_v12  ;;  %v1414_v12 = vpop.f32.mrf.mxu3  ;;  %v1364_v39 = vadd.f32 %v3077_v38, %v1313_v16  ;;  %v1465_v43 = vpop.f32.mrf.mxu0  ;;  %v145_v38 = vadd.f32 %v3155_v13, %v2787_v45 }
 0x30c   :  { %1865 = vmatmul.msk.f32.vlgmr.msra.gmra.mxu3 %vm1567_vm3, %v1537_v63  ;;  %v1541_v50 = vmax.f32 %v1531_v20, 0.0 }
 0x30d   :  { %v1415_v53 = vadd.f32 %v1414_v12, %v1364_v39 }
 0x30f   :  { %v1466_v35 = vadd.f32 %v1465_v43, %v1415_v53  ;;  %v1516_v11 = vpop.f32.mrf.mxu2 }
 0x311   :  { %v1517_v56 = vadd.f32 %v1516_v11, %v1466_v35 }
 0x313   :  { %v1532_v58 = vadd.f32 %v1517_v56, %v145_v38  ;;  %v1417_v19 = vpop.f32.mrf.mxu3 }
 0x314   :  { %1866 = vmatmul.msk.f32.gmra.mxu3 %vm1567_vm3, %v1538_v18 }
 0x315   :  { %v1542_v14 = vmax.f32 %v1532_v58, 0.0 }
 0x31b   :  { %v1419_v27 = vpop.f32.mrf.mxu3 }
 0x31c   :  { %1867 = vmatmul.msk.f32.vlgmr.msrb.gmra.mxu3 %vm1567_vm3, %v1541_v50 }
 0x324   :  { %1868 = vmatmul.msk.f32.gmra.mxu3 %vm1567_vm3, %v1542_v14 }
 0x35f   :  { %v1591_v15 = vpop.f32.mrf.mxu3 }
 0x367   :  { %v1594_v26 = vpop.f32.mrf.mxu3 }
 0x36f   :  { %v1620_v0 = vpop.f32.mrf.mxu3 }
 0x370   :  { %v1621_v13 = vadd.f32 %v1620_v0, %v1591_v15 }
 0x372   :  { %v1630_v28 = vadd.f32 %v1879_v29, %v1621_v13 }
 0x374   :  { %v1723_v4 = vmax.f32 %v1630_v28, 0.0 }
 0x377   :  { %v1623_v44 = vpop.f32.mrf.mxu3 }
 0x378   :  { %v1624_v52 = vadd.f32 %v1623_v44, %v1594_v26 }
 0x37a   :  { %v1631_v5 = vadd.f32 %v1879_v29, %v1624_v52 }
 0x37c   :  { %v1724_v32 = vmax.f32 %v1631_v5, 0.0 }
 0x37f   :  { %v1655_v59 = vpop.f32.mrf.mxu3  ;;  %v1468_v30 = vpop.f32.mrf.mxu0 }
 0x383   :  { %v1519_v3 = vpop.f32.mrf.mxu2 }
 0x387   :  { %v1658_v9 = vpop.f32.mrf.mxu3  ;;  %v1470_v6 = vpop.f32.mrf.mxu0 }
 0x38b   :  { %v1521_v17 = vpop.f32.mrf.mxu2 }
 0x38f   :  { %v1684_v61 = vpop.f32.mrf.mxu3 }
 0x390   :  { %v1685_v24 = vadd.f32 %v1684_v61, %v1655_v59 }
 0x397   :  { %v1687_v45 = vpop.f32.mrf.mxu3 }
 0x398   :  { %v1688_v51 = vadd.f32 %v1687_v45, %v1658_v9 }
 0x39f   :  { %v1713_v49 = vpop.f32.mrf.mxu3 }
 0x3a0   :  { %v1719_v23 = vadd.f32 %v1713_v49, %v1685_v24 }
 0x3a2   :  { %v1721_v60 = vadd.f32 %v1879_v29, %v1719_v23 }
 0x3a4   :  { %v1725_v36 = vmax.f32 %v1721_v60, 0.0 }
 0x3a6   :  { %v1727_v55 = vmax.f32 %v1723_v4, %v1725_v36 }
 0x3a7   :  { %v1716_v7 = vpop.f32.mrf.mxu3 }
 0x3a8   :  { %1729 = vst.msk [vmem:[%s3278_s10] sm:$0xff] %vm1567_vm3, %v1727_v55  ;;  %v1720_v22 = vadd.f32 %v1716_v7, %v1688_v51 }
 0x3aa   :  { %v1722_v57 = vadd.f32 %v1879_v29, %v1720_v22 }
 0x3ac   :  { %v1726_v42 = vmax.f32 %v1722_v57, 0.0 }
 0x3ae   :  { %v1728_v54 = vmax.f32 %v1724_v32, %v1726_v42 }
 0x3b0   :  { %1730 = vst.msk [vmem:[%s3278_s10 + $0x8] sm:$0xff] %vm1567_vm3, %v1728_v54 }

// kernel: cnn_lstm_forward.8
= control target key start
LH: loop header
LB: loop body
LE: loop exit
PB: predicated region body
PF: predicated region fallthrough
CT: control target
= control target key end

     0   :  { %v1183_v16 = vmov 0.0   ;;  %vm41_vm0 = vcmask 523264   ;;  %vm104_vm1 = vcmask 261120   ;;  %vm993_vm2 = vcmask 1041408   ;;  %s1620_s1 = inlined_call_operand.vmem [shape: f32[64,256], index: 1, kind: input, shape index: {}]   ;;  %s1621_s3 = inlined_call_operand.vmem [shape: f32[32,128], index: 3, kind: input, shape index: {}]   ;;  %s1622_s2 = inlined_call_operand.vmem [shape: f32[32,128], index: 2, kind: input, shape index: {}]   ;;  %s1623_s0 = inlined_call_operand.vmem [shape: f32[16,64], index: 0, kind: input, shape index: {}]   ;;  %s1624_s5 = inlined_call_operand.vmem [shape: f32[1,128], index: 5, kind: input, shape index: {}]   ;;  %s1625_s4 = inlined_call_operand.vmem [shape: f32[1,128], index: 4, kind: input, shape index: {}]   ;;  %s1626_s6 = inlined_call_operand.vmem [shape: f32[16,64], index: 6, kind: output, shape index: {}]  }
   0x1   :  { %v40_v0 = vld [vmem:[%s1620_s1 + $0x78] sm:$0xff]  ;;  %v38_v1 = vld [vmem:[%s1620_s1 + $0x68] sm:$0xff]  ;;  %v1239_v4 = vld [vmem:[%s1621_s3 + $0x10] sm:$0xff]  ;;  %vm995_vm3 = vcmask 1043456   ;;  %vm997_vm4 = vcmask 1045504  }
   0x2   :  { %79 = vmatpush.msra.mxu1 %v40_v0  ;;  %v1230_v2 = vld [vmem:[%s1621_s3 + $0x18] sm:$0xff]  ;;  %v1244_v5 = vld [vmem:[%s1621_s3 + $0x8] sm:$0xff]  ;;  %v39_v7 = vld [vmem:[%s1620_s1 + $0x70] sm:$0xff] }
   0x3   :  { %v36_v3 = vld [vmem:[%s1620_s1 + $0x58] sm:$0xff]  ;;  %145 = vmatpush.msra.mxu3 %v1230_v2  ;;  %v34_v6 = vld [vmem:[%s1620_s1 + $0x48] sm:$0xff]  ;;  %v37_v8 = vld [vmem:[%s1620_s1 + $0x60] sm:$0xff]  ;;  %56 = vmatpush.msra.mxu0 %v39_v7 }
   0x4   :  { %80 = vmatpush.msra.mxu1 %v38_v1  ;;  %v1259_v9 = vld [vmem:[%s1621_s3] sm:$0xff]  ;;  %v1264_v10 = vld [vmem:[%s1622_s2 + $0x18] sm:$0xff]  ;;  %v1269_v11 = vld [vmem:[%s1622_s2 + $0x10] sm:$0xff] }
   0x5   :  { %146 = vmatpush.msra.mxu3 %v1239_v4  ;;  %v32_v12 = vld [vmem:[%s1620_s1 + $0x38] sm:$0xff]  ;;  %120 = vmatpush.msra.mxu2 %v1264_v10  ;;  %v35_v13 = vld [vmem:[%s1620_s1 + $0x50] sm:$0xff]  ;;  %v1282_v14 = vld [vmem:[%s1622_s2 + $0x8] sm:$0xff] }
   0x6   :  { %81 = vmatpush.msra.mxu1 %v36_v3  ;;  %57 = vmatpush.msra.mxu0 %v37_v8  ;;  %v30_v15 = vld [vmem:[%s1620_s1 + $0x28] sm:$0xff]  ;;  %v33_v17 = vld [vmem:[%s1620_s1 + $0x40] sm:$0xff]  ;;  %v28_v19 = vld [vmem:[%s1620_s1 + $0x18] sm:$0xff] }
   0x7   :  { %147 = vmatpush.msra.mxu3 %v1244_v5  ;;  %121 = vmatpush.msra.mxu2 %v1269_v11  ;;  %v1295_v18 = vld [vmem:[%s1622_s2] sm:$0xff]  ;;  %v31_v20 = vld [vmem:[%s1620_s1 + $0x30] sm:$0xff]  ;;  %v26_v21 = vld [vmem:[%s1620_s1 + $0x8] sm:$0xff] }
   0x8   :  { %82 = vmatpush.msra.mxu1 %v34_v6  ;;  %58 = vmatpush.msra.mxu0 %v35_v13  ;;  %v23_v22 = vld [vmem:[%s1623_s0] sm:$0xff]  ;;  %v27_v24 = vld [vmem:[%s1620_s1 + $0x10] sm:$0xff]  ;;  %v24_v26 = vld [vmem:[%s1623_s0 + $0x8] sm:$0xff] }
   0x9   :  { %148 = vmatpush.msra.mxu3 %v1259_v9  ;;  %122 = vmatpush.msra.mxu2 %v1282_v14  ;;  %v29_v23 = vld [vmem:[%s1620_s1 + $0x20] sm:$0xff] }
   0xa   :  { %83 = vmatpush.msra.mxu1 %v32_v12  ;;  %149 = vmatmul.f32.vlgmr.msra.gmra.mxu3 %v1183_v16  ;;  %v25_v25 = vld [vmem:[%s1620_s1] sm:$0xff] }
   0xb   :  { %255 = vmatpush.msrb.mxu3 %v1230_v2  ;;  %59 = vmatpush.msra.mxu0 %v33_v17  ;;  %v1364_v30 = vld [vmem:[%s1624_s5] ss:$0 sm:$0xff]  ;;  %s1184_s5 = smov 64  }
   0xc   :  { %84 = vmatpush.msra.mxu1 %v30_v15  ;;  %123 = vmatpush.msra.mxu2 %v1295_v18  ;;  %v1376_v37 = vld [vmem:[%s1625_s4] ss:$0 sm:$0xff]  ;;  %s1185_s4 = smov 32  }
   0xd   :  { %124 = vmatmul.f32.vlgmr.msra.gmra.mxu2 %v1183_v16  ;;  %60 = vmatpush.msra.mxu0 %v31_v20 }
   0xe   :  { %85 = vmatpush.msra.mxu1 %v28_v19  ;;  %256 = vmatpush.msrb.mxu3 %v1239_v4 }
   0xf   :  { %224 = vmatpush.msrb.mxu2 %v1264_v10  ;;  %61 = vmatpush.msra.mxu0 %v29_v23 }
  0x10   :  { %86 = vmatpush.msra.mxu1 %v26_v21  ;;  %257 = vmatpush.msrb.mxu3 %v1244_v5 }
  0x11   :  { %1034 = vmatmul.msk.f32.vlgmr.msra.gmra.mxu1 %vm41_vm0, %v23_v22  ;;  %225 = vmatpush.msrb.mxu2 %v1269_v11 }
  0x12   :  { %62 = vmatpush.msra.mxu0 %v27_v24  ;;  %483 = vmatpush.msrb.mxu1 %v1230_v2 }
  0x13   :  { %258 = vmatpush.msrb.mxu3 %v1259_v9  ;;  %226 = vmatpush.msrb.mxu2 %v1282_v14 }
  0x14   :  { %63 = vmatpush.msra.mxu0 %v25_v25  ;;  %484 = vmatpush.msrb.mxu1 %v1239_v4 }
  0x15   :  { %369 = vmatpush.msra.mxu3 %v1230_v2  ;;  %1032 = vmatmul.msk.f32.vlgmr.msra.gmra.mxu0 %vm41_vm0, %v23_v22 }
  0x16   :  { %227 = vmatpush.msrb.mxu2 %v1295_v18  ;;  %452 = vmatpush.msrb.mxu0 %v1264_v10 }
  0x17   :  { %370 = vmatpush.msra.mxu3 %v1239_v4  ;;  %485 = vmatpush.msrb.mxu1 %v1244_v5 }
  0x18   :  { %338 = vmatpush.msra.mxu2 %v1264_v10  ;;  %453 = vmatpush.msrb.mxu0 %v1269_v11 }
  0x19   :  { %1035 = vmatmul.msk.f32.gmra.mxu1 %vm41_vm0, %v24_v26  ;;  %371 = vmatpush.msra.mxu3 %v1244_v5 }
  0x1a   :  { %339 = vmatpush.msra.mxu2 %v1269_v11  ;;  %454 = vmatpush.msrb.mxu0 %v1282_v14 }
  0x1b   :  { %372 = vmatpush.msra.mxu3 %v1259_v9  ;;  %486 = vmatpush.msrb.mxu1 %v1259_v9 }
  0x1c   :  { %340 = vmatpush.msra.mxu2 %v1282_v14  ;;  %455 = vmatpush.msrb.mxu0 %v1295_v18 }
  0x1d   :  { %1033 = vmatmul.msk.f32.gmra.mxu0 %vm41_vm0, %v24_v26  ;;  %703 = vmatpush.msra.mxu1 %v1230_v2 }
  0x1e   :  { %341 = vmatpush.msra.mxu2 %v1295_v18  ;;  %672 = vmatpush.msra.mxu0 %v1264_v10 }
  0x1f   :  { %704 = vmatpush.msra.mxu1 %v1239_v4 }
  0x20   :  { %673 = vmatpush.msra.mxu0 %v1269_v11 }
  0x21   :  { %705 = vmatpush.msra.mxu1 %v1244_v5 }
  0x22   :  { %674 = vmatpush.msra.mxu0 %v1282_v14 }
  0x23   :  { %706 = vmatpush.msra.mxu1 %v1259_v9 }
  0x24   :  { %675 = vmatpush.msra.mxu0 %v1295_v18 }
  0x8d   :  { %v150_v28 = vpop.f32.mrf.mxu3 }
  0x8e   :  { %v1359_v27 = vpop.f32.mrf.mxu1  ;;  %v154_v29 = vrot.slane %v150_v28, 2 }
  0x90   :  { %v125_v31 = vpop.f32.mrf.mxu2 }
  0x92   :  { %v1368_v33 = vpop.f32.mrf.mxu0 }
  0x93   :  { %v128_v36 = vadd.f32 %v125_v31, %v1368_v33 }
  0x95   :  { %v132_v38 = vadd.f32 %v1376_v37, %v128_v36 }
  0x96   :  { %v1366_v32 = vpop.f32.mrf.mxu1 }
  0x97   :  { %v156_v34 = vadd.f32 %v154_v29, %v1366_v32  ;;  %v161_v43 = vsub.f32 0.0, %v132_v38 }
  0x99   :  { %v160_v35 = vadd.f32 %v1364_v30, %v156_v34  ;;  %v162_v44 = vmul.f32 1.442695, %v161_v43 }
  0x9b   :  { %1055 = vtanh.f32 %v160_v35  ;;  %v167_v41 = vsub.f32 0.0, %v160_v35 }
  0x9c   :  { %1057 = vtanh.f32 %v132_v38 }
  0x9d   :  { %v168_v42 = vmul.f32 1.442695, %v167_v41 }
  0x9f   :  { %1059 = vpow2.f32 %v168_v42 }
  0xa0   :  { %1061 = vpow2.f32 %v162_v44 }
  0xa1   :  { %v1056_v39 = vpop.eup %1055 }
  0xa2   :  { %192 = vrot.lane.b32.xlu0 %v1056_v39, %s1184_s5  ;;  %v1058_v40 = vpop.eup %1057 }
  0xa5   :  { %v1060_v45 = vpop.eup %1059 }
  0xa6   :  { %v170_v46 = vadd.f32 1.0, %v1060_v45  ;;  %v1062_v47 = vpop.eup %1061 }
  0xa7   :  { %v164_v48 = vadd.f32 1.0, %v1062_v47 }
  0xa8   :  { %1063 = vrcp.f32 %v170_v46 }
  0xa9   :  { %1065 = vrcp.f32 %v164_v48 }
  0xaa   :  { %175 = vrot.lane.b32.xlu0 %v1058_v40, %s1184_s5 }
  0xae   :  { %v1064_v49 = vpop.eup %1063 }
  0xaf   :  { %v1066_v52 = vpop.eup %1065  ;;  %v190_v55 = vmul.f32 0.0, %v1064_v49 }
  0xb0   :  { %v173_v58 = vmul.f32 0.0, %v1066_v52 }
 0x114   :  { %v193_v50 = vpop.permute.xlu0 %192 }
 0x115   :  { %v195_v51 = vmul.f32 %v1064_v49, %v193_v50 }
 0x117   :  { %197 = vrot.lane.b32.xlu1 %v195_v51, %s1185_s4 }
 0x11c   :  { %v176_v53 = vpop.permute.xlu0 %175 }
 0x11d   :  { %v178_v54 = vmul.f32 %v1066_v52, %v176_v53 }
 0x11f   :  { %180 = vrot.lane.b32.xlu1 %v178_v54, %s1185_s4 }
 0x189   :  { %v198_v56 = vpop.permute.xlu1 %197 }
 0x18a   :  { %v1383_v57 = vadd.f32 %v198_v56, %v190_v55 }
 0x18c   :  { %1067 = vtanh.f32 %v1383_v57  ;;  %v301_v43 = vrot.slane %v1383_v57, 2 }
 0x191   :  { %v181_v59 = vpop.permute.xlu1 %180 }
 0x192   :  { %v1068_v60 = vpop.eup %1067  ;;  %v1386_v61 = vadd.f32 %v181_v59, %v173_v58 }
 0x193   :  { %203 = vrot.lane.b32.xlu2 %v1068_v60, %s1184_s5 }
 0x194   :  { %1069 = vtanh.f32 %v1386_v61  ;;  %v281_v47 = vrot.slane %v1386_v61, 6 }
 0x19a   :  { %v1070_v62 = vpop.eup %1069 }
 0x19b   :  { %186 = vrot.lane.b32.xlu2 %v1070_v62, %s1184_s5 }
 0x1ed   :  { %v204_v63 = vpop.permute.xlu2 %203 }
 0x1ee   :  { %v1391_v0 = vmul.f32 %v1064_v49, %v204_v63 }
 0x1f0   :  { %v238_v1 = vrot.slane %v1391_v0, 6 }
 0x1f2   :  { %239 = vrot.lane.b32.xlu1 %v238_v1, %s1185_s4 }
 0x1f5   :  { %v187_v3 = vpop.permute.xlu2 %186 }
 0x1f6   :  { %v1395_v6 = vmul.f32 %v1066_v52, %v187_v3 }
 0x1f8   :  { %208 = vrot.lane.b32.xlu0 %v1395_v6, %s1185_s4 }
 0x264   :  { %v240_v7 = vpop.permute.xlu1 %239 }
 0x265   :  { %1037 = vmatmul.msk.f32.vlgmr.msrb.gmra.mxu3 %vm104_vm1, %v240_v7 }
 0x266   :  { %590 = vmatpush.msrb.mxu3 %v1230_v2 }
 0x268   :  { %591 = vmatpush.msrb.mxu3 %v1239_v4 }
 0x26a   :  { %v209_v8 = vpop.permute.xlu0 %208  ;;  %592 = vmatpush.msrb.mxu3 %v1244_v5 }
 0x26b   :  { %1036 = vmatmul.msk.f32.vlgmr.msrb.gmra.mxu2 %vm104_vm1, %v209_v8 }
 0x26c   :  { %593 = vmatpush.msrb.mxu3 %v1259_v9  ;;  %563 = vmatpush.msrb.mxu2 %v1264_v10 }
 0x26e   :  { %564 = vmatpush.msrb.mxu2 %v1269_v11 }
 0x270   :  { %565 = vmatpush.msrb.mxu2 %v1282_v14 }
 0x272   :  { %566 = vmatpush.msrb.mxu2 %v1295_v18 }
 0x2e8   :  { %v260_v12 = vpop.f32.mrf.mxu3 }
 0x2e9   :  { %v264_v13 = vrot.slane %v260_v12, 4 }
 0x2eb   :  { %v266_v15 = vadd.f32 %v264_v13, %v1366_v32 }
 0x2ed   :  { %v267_v16 = vadd.f32 %v1364_v30, %v266_v15 }
 0x2ee   :  { %v229_v17 = vpop.f32.mrf.mxu2 }
 0x2ef   :  { %1071 = vtanh.f32 %v267_v16  ;;  %v233_v19 = vrot.slane %v229_v17, 6  ;;  %v274_v29 = vsub.f32 0.0, %v267_v16 }
 0x2f1   :  { %v235_v20 = vadd.f32 %v233_v19, %v1368_v33  ;;  %v275_v31 = vmul.f32 1.442695, %v274_v29 }
 0x2f3   :  { %v236_v21 = vadd.f32 %v1376_v37, %v235_v20 }
 0x2f5   :  { %v1072_v22 = vpop.eup %1071  ;;  %1073 = vtanh.f32 %v236_v21  ;;  %v268_v24 = vsub.f32 0.0, %v236_v21 }
 0x2f6   :  { %305 = vrot.lane.b32.xlu0 %v1072_v22, %s1184_s5 }
 0x2f7   :  { %v269_v25 = vmul.f32 1.442695, %v268_v24 }
 0x2f9   :  { %1075 = vpow2.f32 %v269_v25 }
 0x2fb   :  { %v1074_v23 = vpop.eup %1073 }
 0x2fc   :  { %285 = vrot.lane.b32.xlu2 %v1074_v23, %s1184_s5 }
 0x2ff   :  { %v1076_v26 = vpop.eup %1075 }
 0x300   :  { %v271_v28 = vadd.f32 1.0, %v1076_v26 }
 0x302   :  { %1077 = vrcp.f32 %v271_v28 }
 0x303   :  { %1079 = vpow2.f32 %v275_v31 }
 0x308   :  { %v1078_v34 = vpop.eup %1077 }
 0x309   :  { %v1080_v38 = vpop.eup %1079  ;;  %v283_v48 = vmul.f32 %v1078_v34, %v281_v47 }
 0x30a   :  { %v277_v39 = vadd.f32 1.0, %v1080_v38 }
 0x30c   :  { %1081 = vrcp.f32 %v277_v39 }
 0x312   :  { %v1082_v40 = vpop.eup %1081 }
 0x313   :  { %v303_v44 = vmul.f32 %v1082_v40, %v301_v43 }
 0x356   :  { %v286_v35 = vpop.permute.xlu2 %285 }
 0x357   :  { %v288_v36 = vmul.f32 %v1078_v34, %v286_v35 }
 0x359   :  { %290 = vrot.lane.b32.xlu1 %v288_v36, %s1185_s4 }
 0x368   :  { %v306_v41 = vpop.permute.xlu0 %305 }
 0x369   :  { %v308_v42 = vmul.f32 %v1082_v40, %v306_v41 }
 0x36b   :  { %310 = vrot.lane.b32.xlu2 %v308_v42, %s1185_s4 }
 0x3c5   :  { %v311_v45 = vpop.permute.xlu2 %310 }
 0x3c6   :  { %v1418_v46 = vadd.f32 %v311_v45, %v303_v44 }
 0x3c8   :  { %1083 = vtanh.f32 %v1418_v46  ;;  %v415_v35 = vrot.slane %v1418_v46, 2 }
 0x3cb   :  { %v291_v49 = vpop.permute.xlu1 %290 }
 0x3cc   :  { %v1422_v50 = vadd.f32 %v291_v49, %v283_v48 }
 0x3ce   :  { %v1084_v51 = vpop.eup %1083  ;;  %1085 = vtanh.f32 %v1422_v50 }
 0x3cf   :  { %316 = vrot.lane.b32.xlu1 %v1084_v51, %s1184_s5 }
 0x3d4   :  { %v1086_v52 = vpop.eup %1085 }
 0x3d5   :  { %296 = vrot.lane.b32.xlu0 %v1086_v52, %s1184_s5 }
 0x441   :  { %v317_v53 = vpop.permute.xlu1 %316 }
 0x442   :  { %v1427_v54 = vmul.f32 %v1082_v40, %v317_v53  ;;  %v395_v40 = vrot.slane %v1422_v50, 6 }
 0x444   :  { %v352_v55 = vrot.slane %v1427_v54, 4 }
 0x446   :  { %353 = vrot.lane.b32.xlu0 %v352_v55, %s1185_s4 }
 0x447   :  { %v297_v56 = vpop.permute.xlu0 %296 }
 0x448   :  { %v1431_v57 = vmul.f32 %v1078_v34, %v297_v56  ;;  %v1484_v56 = vpop.f32.mrf.mxu0 }
 0x44a   :  { %v321_v58 = vrot.slane %v1431_v57, 2  ;;  %v994_v48 = vsel %vm993_vm2, %v1395_v6, %v1431_v57 }
 0x44c   :  { %322 = vrot.lane.b32.xlu2 %v321_v58, %s1185_s4 }
 0x4a6   :  { %v323_v59 = vpop.permute.xlu2 %322 }
 0x4a7   :  { %1038 = vmatmul.msk.f32.vlgmr.msra.gmra.mxu2 %vm104_vm1, %v323_v59 }
 0x4a8   :  { %786 = vmatpush.msra.mxu2 %v1264_v10 }
 0x4aa   :  { %787 = vmatpush.msra.mxu2 %v1269_v11 }
 0x4ac   :  { %788 = vmatpush.msra.mxu2 %v1282_v14 }
 0x4ae   :  { %789 = vmatpush.msra.mxu2 %v1295_v18 }
 0x4b8   :  { %v354_v60 = vpop.permute.xlu0 %353 }
 0x4b9   :  { %1039 = vmatmul.msk.f32.vlgmr.msra.gmra.mxu3 %vm104_vm1, %v354_v60 }
 0x4ba   :  { %817 = vmatpush.msra.mxu3 %v1230_v2 }
 0x4bc   :  { %818 = vmatpush.msra.mxu3 %v1239_v4 }
 0x4be   :  { %819 = vmatpush.msra.mxu3 %v1244_v5 }
 0x4c0   :  { %820 = vmatpush.msra.mxu3 %v1259_v9 }
 0x52a   :  { %v343_v61 = vpop.f32.mrf.mxu2 }
 0x52b   :  { %v347_v62 = vrot.slane %v343_v61, 4 }
 0x52d   :  { %v349_v63 = vadd.f32 %v347_v62, %v1368_v33 }
 0x52f   :  { %v350_v1 = vadd.f32 %v1376_v37, %v349_v63 }
 0x531   :  { %1087 = vtanh.f32 %v350_v1  ;;  %v382_v19 = vsub.f32 0.0, %v350_v1 }
 0x533   :  { %v383_v20 = vmul.f32 1.442695, %v382_v19 }
 0x537   :  { %v1088_v3 = vpop.eup %1087 }
 0x538   :  { %399 = vrot.lane.b32.xlu1 %v1088_v3, %s1184_s5 }
 0x53c   :  { %v374_v7 = vpop.f32.mrf.mxu3 }
 0x53d   :  { %v378_v8 = vrot.slane %v374_v7, 6 }
 0x53f   :  { %v380_v12 = vadd.f32 %v378_v8, %v1366_v32 }
 0x541   :  { %v381_v13 = vadd.f32 %v1364_v30, %v380_v12 }
 0x543   :  { %1089 = vtanh.f32 %v381_v13  ;;  %v388_v16 = vsub.f32 0.0, %v381_v13 }
 0x545   :  { %v389_v17 = vmul.f32 1.442695, %v388_v16 }
 0x547   :  { %1091 = vpow2.f32 %v389_v17 }
 0x548   :  { %1093 = vpow2.f32 %v383_v20 }
 0x549   :  { %v1090_v15 = vpop.eup %1089 }
 0x54a   :  { %419 = vrot.lane.b32.xlu2 %v1090_v15, %s1184_s5 }
 0x54d   :  { %v1092_v21 = vpop.eup %1091 }
 0x54e   :  { %v391_v22 = vadd.f32 1.0, %v1092_v21  ;;  %v1094_v23 = vpop.eup %1093 }
 0x54f   :  { %v385_v24 = vadd.f32 1.0, %v1094_v23 }
 0x550   :  { %1095 = vrcp.f32 %v391_v22 }
 0x551   :  { %1097 = vrcp.f32 %v385_v24 }
 0x556   :  { %v1096_v25 = vpop.eup %1095 }
 0x557   :  { %v1098_v29 = vpop.eup %1097  ;;  %v417_v36 = vmul.f32 %v1096_v25, %v415_v35 }
 0x558   :  { %v397_v41 = vmul.f32 %v1098_v29, %v395_v40 }
 0x5a4   :  { %v420_v26 = vpop.permute.xlu2 %419 }
 0x5a5   :  { %v422_v28 = vmul.f32 %v1096_v25, %v420_v26 }
 0x5a7   :  { %424 = vrot.lane.b32.xlu1 %v422_v28, %s1185_s4 }
 0x5aa   :  { %v400_v31 = vpop.permute.xlu1 %399 }
 0x5ab   :  { %v402_v34 = vmul.f32 %v1098_v29, %v400_v31 }
 0x5ad   :  { %404 = vrot.lane.b32.xlu0 %v402_v34, %s1185_s4 }
 0x619   :  { %v425_v38 = vpop.permute.xlu1 %424 }
 0x61a   :  { %v1454_v39 = vadd.f32 %v425_v38, %v417_v36 }
 0x61c   :  { %1099 = vtanh.f32 %v1454_v39  ;;  %v526_v15 = vrot.slane %v1454_v39, 2 }
 0x61f   :  { %v405_v42 = vpop.permute.xlu0 %404 }
 0x620   :  { %v1458_v43 = vadd.f32 %v405_v42, %v397_v41 }
 0x622   :  { %v1100_v44 = vpop.eup %1099  ;;  %1101 = vtanh.f32 %v1458_v43  ;;  %v506_v21 = vrot.slane %v1458_v43, 6 }
 0x623   :  { %430 = vrot.lane.b32.xlu0 %v1100_v44, %s1184_s5 }
 0x628   :  { %v1102_v45 = vpop.eup %1101 }
 0x629   :  { %410 = vrot.lane.b32.xlu2 %v1102_v45, %s1184_s5 }
 0x683   :  { %v411_v46 = vpop.permute.xlu2 %410 }
 0x684   :  { %v413_v47 = vmul.f32 %v1098_v29, %v411_v46 }
 0x686   :  { %v435_v49 = vrot.slane %v413_v47, 4  ;;  %v1467_v50 = vsel %vm995_vm3, %v994_v48, %v413_v47 }
 0x688   :  { %436 = vrot.lane.b32.xlu1 %v435_v49, %s1185_s4 }
 0x695   :  { %v431_v51 = vpop.permute.xlu0 %430 }
 0x696   :  { %v1470_v52 = vmul.f32 %v1096_v25, %v431_v51 }
 0x698   :  { %v466_v53 = vrot.slane %v1470_v52, 2 }
 0x69a   :  { %467 = vrot.lane.b32.xlu2 %v466_v53, %s1185_s4 }
 0x6f4   :  { %v468_v55 = vpop.permute.xlu2 %467 }
 0x6f5   :  { %1041 = vmatmul.msk.f32.vlgmr.msrb.gmra.mxu1 %vm104_vm1, %v468_v55 }
 0x6f6   :  { %931 = vmatpush.msrb.mxu1 %v1230_v2 }
 0x6f8   :  { %932 = vmatpush.msrb.mxu1 %v1239_v4 }
 0x6fa   :  { %v437_v6 = vpop.permute.xlu1 %436  ;;  %933 = vmatpush.msrb.mxu1 %v1244_v5 }
 0x6fb   :  { %1040 = vmatmul.msk.f32.vlgmr.msrb.gmra.mxu0 %vm104_vm1, %v437_v6 }
 0x6fc   :  { %900 = vmatpush.msrb.mxu0 %v1264_v10  ;;  %934 = vmatpush.msrb.mxu1 %v1259_v9 }
 0x6fe   :  { %901 = vmatpush.msrb.mxu0 %v1269_v11 }
 0x700   :  { %902 = vmatpush.msrb.mxu0 %v1282_v14 }
 0x702   :  { %903 = vmatpush.msrb.mxu0 %v1295_v18 }
 0x772   :  { %v488_v2 = vpop.f32.mrf.mxu1 }
 0x773   :  { %v491_v4 = vadd.f32 %v488_v2, %v1366_v32 }
 0x775   :  { %v492_v57 = vadd.f32 %v1364_v30, %v491_v4 }
 0x777   :  { %1103 = vtanh.f32 %v492_v57  ;;  %v499_v14 = vsub.f32 0.0, %v492_v57 }
 0x778   :  { %v457_v5 = vpop.f32.mrf.mxu0 }
 0x779   :  { %v461_v58 = vrot.slane %v457_v5, 2  ;;  %v500_v18 = vmul.f32 1.442695, %v499_v14 }
 0x77b   :  { %v463_v10 = vadd.f32 %v461_v58, %v1368_v33 }
 0x77d   :  { %v1104_v59 = vpop.eup %1103  ;;  %v464_v9 = vadd.f32 %v1376_v37, %v463_v10 }
 0x77e   :  { %530 = vrot.lane.b32.xlu0 %v1104_v59, %s1184_s5 }
 0x77f   :  { %1105 = vtanh.f32 %v464_v9  ;;  %v493_v32 = vsub.f32 0.0, %v464_v9 }
 0x780   :  { %1107 = vpow2.f32 %v500_v18 }
 0x781   :  { %v494_v60 = vmul.f32 1.442695, %v493_v32 }
 0x783   :  { %1109 = vpow2.f32 %v494_v60 }
 0x785   :  { %v1106_v11 = vpop.eup %1105 }
 0x786   :  { %510 = vrot.lane.b32.xlu1 %v1106_v11, %s1184_s5  ;;  %v1108_v61 = vpop.eup %1107 }
 0x787   :  { %v502_v62 = vadd.f32 1.0, %v1108_v61 }
 0x789   :  { %1111 = vrcp.f32 %v502_v62  ;;  %v1110_v63 = vpop.eup %1109 }
 0x78a   :  { %v496_v33 = vadd.f32 1.0, %v1110_v63 }
 0x78c   :  { %1113 = vrcp.f32 %v496_v33 }
 0x78f   :  { %v1112_v1 = vpop.eup %1111 }
 0x790   :  { %v528_v16 = vmul.f32 %v1112_v1, %v526_v15 }
 0x792   :  { %v1114_v8 = vpop.eup %1113 }
 0x793   :  { %v508_v22 = vmul.f32 %v1114_v8, %v506_v21 }
 0x7f0   :  { %v531_v3 = vpop.permute.xlu0 %530 }
 0x7f1   :  { %v533_v7 = vmul.f32 %v1112_v1, %v531_v3 }
 0x7f3   :  { %535 = vrot.lane.b32.xlu2 %v533_v7, %s1185_s4 }
 0x7f8   :  { %v511_v12 = vpop.permute.xlu1 %510 }
 0x7f9   :  { %v513_v13 = vmul.f32 %v1114_v8, %v511_v12 }
 0x7fb   :  { %515 = vrot.lane.b32.xlu0 %v513_v13, %s1185_s4 }
 0x84d   :  { %v536_v17 = vpop.permute.xlu2 %535 }
 0x84e   :  { %v538_v19 = vadd.f32 %v536_v17, %v528_v16 }
 0x850   :  { %1115 = vtanh.f32 %v538_v19  ;;  %v636_v9 = vrot.slane %v538_v19, 2 }
 0x856   :  { %v1116_v20 = vpop.eup %1115 }
 0x857   :  { %541 = vrot.lane.b32.xlu1 %v1116_v20, %s1184_s5 }
 0x86d   :  { %v516_v23 = vpop.permute.xlu0 %515 }
 0x86e   :  { %v518_v24 = vadd.f32 %v516_v23, %v508_v22 }
 0x870   :  { %1117 = vtanh.f32 %v518_v24  ;;  %v616_v32 = vrot.slane %v518_v24, 6 }
 0x876   :  { %v1118_v25 = vpop.eup %1117 }
 0x877   :  { %521 = vrot.lane.b32.xlu2 %v1118_v25, %s1184_s5 }
 0x8c9   :  { %v542_v26 = vpop.permute.xlu1 %541 }
 0x8ca   :  { %v1498_v28 = vmul.f32 %v1112_v1, %v542_v26 }
 0x8cc   :  { %574 = vrot.lane.b32.xlu0 %v1498_v28, %s1185_s4 }
 0x8d1   :  { %v522_v29 = vpop.permute.xlu2 %521 }
 0x8d2   :  { %v524_v31 = vmul.f32 %v1114_v8, %v522_v29 }
 0x8d4   :  { %v546_v34 = vrot.slane %v524_v31, 6  ;;  %v1504_v35 = vsel %vm997_vm4, %v1467_v50, %v524_v31 }
 0x8d6   :  { %547 = vrot.lane.b32.xlu1 %v546_v34, %s1185_s4 }
 0x93e   :  { %v575_v36 = vpop.permute.xlu0 %574 }
 0x93f   :  { %1043 = vmatmul.msk.f32.vlgmr.msrb.gmra.mxu3 %vm104_vm1, %v575_v36 }
 0x948   :  { %v548_v38 = vpop.permute.xlu1 %547 }
 0x949   :  { %1042 = vmatmul.msk.f32.vlgmr.msrb.gmra.mxu2 %vm104_vm1, %v548_v38 }
 0x9c2   :  { %v595_v39 = vpop.f32.mrf.mxu3 }
 0x9c3   :  { %v599_v40 = vrot.slane %v595_v39, 2 }
 0x9c5   :  { %v601_v41 = vadd.f32 %v599_v40, %v1359_v27 }
 0x9c7   :  { %v602_v42 = vadd.f32 %v1364_v30, %v601_v41 }
 0x9c9   :  { %1119 = vtanh.f32 %v602_v42  ;;  %v609_v48 = vsub.f32 0.0, %v602_v42 }
 0x9cb   :  { %v610_v49 = vmul.f32 1.442695, %v609_v48 }
 0x9cc   :  { %v568_v43 = vpop.f32.mrf.mxu2 }
 0x9cd   :  { %v571_v44 = vadd.f32 %v568_v43, %v1484_v56 }
 0x9cf   :  { %v1120_v45 = vpop.eup %1119  ;;  %v572_v46 = vadd.f32 %v1376_v37, %v571_v44 }
 0x9d0   :  { %640 = vrot.lane.b32.xlu2 %v1120_v45, %s1184_s5 }
 0x9d1   :  { %1121 = vtanh.f32 %v572_v46  ;;  %v603_v2 = vsub.f32 0.0, %v572_v46 }
 0x9d2   :  { %1123 = vpow2.f32 %v610_v49 }
 0x9d3   :  { %v604_v4 = vmul.f32 1.442695, %v603_v2 }
 0x9d7   :  { %v1122_v47 = vpop.eup %1121 }
 0x9d8   :  { %620 = vrot.lane.b32.xlu0 %v1122_v47, %s1184_s5  ;;  %v1124_v50 = vpop.eup %1123 }
 0x9d9   :  { %v612_v51 = vadd.f32 1.0, %v1124_v50 }
 0x9db   :  { %1125 = vrcp.f32 %v612_v51 }
 0x9dc   :  { %1127 = vpow2.f32 %v604_v4 }
 0x9e1   :  { %v1126_v53 = vpop.eup %1125 }
 0x9e2   :  { %v1128_v57 = vpop.eup %1127  ;;  %v638_v11 = vmul.f32 %v1126_v53, %v636_v9 }
 0x9e3   :  { %v606_v5 = vadd.f32 1.0, %v1128_v57 }
 0x9e5   :  { %1129 = vrcp.f32 %v606_v5 }
 0x9eb   :  { %v1130_v58 = vpop.eup %1129 }
 0x9ec   :  { %v618_v60 = vmul.f32 %v1130_v58, %v616_v32 }
 0xa2a   :  { %v641_v55 = vpop.permute.xlu2 %640 }
 0xa2b   :  { %v643_v6 = vmul.f32 %v1126_v53, %v641_v55 }
 0xa2d   :  { %645 = vrot.lane.b32.xlu1 %v643_v6, %s1185_s4 }
 0xa4a   :  { %v621_v10 = vpop.permute.xlu0 %620 }
 0xa4b   :  { %v623_v59 = vmul.f32 %v1130_v58, %v621_v10 }
 0xa4d   :  { %625 = vrot.lane.b32.xlu2 %v623_v59, %s1185_s4 }
 0xa9f   :  { %v646_v14 = vpop.permute.xlu1 %645 }
 0xaa0   :  { %v648_v18 = vadd.f32 %v646_v14, %v638_v11 }
 0xaa2   :  { %1131 = vtanh.f32 %v648_v18  ;;  %v749_v48 = vrot.slane %v648_v18, 2 }
 0xaa7   :  { %v626_v61 = vpop.permute.xlu2 %625 }
 0xaa8   :  { %v1132_v62 = vpop.eup %1131  ;;  %v628_v63 = vadd.f32 %v626_v61, %v618_v60 }
 0xaa9   :  { %651 = vrot.lane.b32.xlu0 %v1132_v62, %s1184_s5 }
 0xaaa   :  { %1133 = vtanh.f32 %v628_v63 }
 0xab0   :  { %v1134_v33 = vpop.eup %1133 }
 0xab1   :  { %631 = vrot.lane.b32.xlu1 %v1134_v33, %s1184_s5 }
 0xb1b   :  { %v652_v1 = vpop.permute.xlu0 %651 }
 0xb1c   :  { %v1519_v3 = vmul.f32 %v1126_v53, %v652_v1  ;;  %v729_v53 = vrot.slane %v628_v63, 6 }
 0xb1e   :  { %v686_v7 = vrot.slane %v1519_v3, 6 }
 0xb20   :  { %687 = vrot.lane.b32.xlu0 %v686_v7, %s1185_s4 }
 0xb23   :  { %v632_v8 = vpop.permute.xlu1 %631 }
 0xb24   :  { %v1523_v12 = vmul.f32 %v1130_v58, %v632_v8 }
 0xb26   :  { %656 = vrot.lane.b32.xlu2 %v1523_v12, %s1185_s4 }
 0xb80   :  { %v657_v13 = vpop.permute.xlu2 %656 }
 0xb81   :  { %1044 = vmatmul.msk.f32.vlgmr.msra.gmra.mxu0 %vm104_vm1, %v657_v13 }
 0xb92   :  { %v688_v15 = vpop.permute.xlu0 %687 }
 0xb93   :  { %1045 = vmatmul.msk.f32.vlgmr.msra.gmra.mxu1 %vm104_vm1, %v688_v15 }
 0xbfe   :  { %v677_v16 = vpop.f32.mrf.mxu0 }
 0xbff   :  { %v681_v17 = vrot.slane %v677_v16, 6 }
 0xc01   :  { %v683_v19 = vadd.f32 %v681_v17, %v1484_v56 }
 0xc03   :  { %v684_v20 = vadd.f32 %v1376_v37, %v683_v19 }
 0xc05   :  { %1135 = vtanh.f32 %v684_v20  ;;  %v716_v34 = vsub.f32 0.0, %v684_v20 }
 0xc07   :  { %v717_v36 = vmul.f32 1.442695, %v716_v34 }
 0xc0b   :  { %v1136_v21 = vpop.eup %1135 }
 0xc0c   :  { %733 = vrot.lane.b32.xlu1 %v1136_v21, %s1184_s5 }
 0xc10   :  { %v708_v22 = vpop.f32.mrf.mxu1 }
 0xc11   :  { %v712_v23 = vrot.slane %v708_v22, 4 }
 0xc13   :  { %v714_v24 = vadd.f32 %v712_v23, %v1359_v27 }
 0xc15   :  { %v715_v25 = vadd.f32 %v1364_v30, %v714_v24 }
 0xc17   :  { %1137 = vtanh.f32 %v715_v25  ;;  %v722_v29 = vsub.f32 0.0, %v715_v25 }
 0xc19   :  { %v723_v31 = vmul.f32 1.442695, %v722_v29 }
 0xc1b   :  { %1139 = vpow2.f32 %v723_v31 }
 0xc1c   :  { %1141 = vpow2.f32 %v717_v36 }
 0xc1d   :  { %v1138_v26 = vpop.eup %1137 }
 0xc1e   :  { %753 = vrot.lane.b32.xlu2 %v1138_v26, %s1184_s5 }
 0xc21   :  { %v1140_v38 = vpop.eup %1139 }
 0xc22   :  { %v725_v39 = vadd.f32 1.0, %v1140_v38  ;;  %v1142_v40 = vpop.eup %1141 }
 0xc23   :  { %v719_v41 = vadd.f32 1.0, %v1142_v40 }
 0xc24   :  { %1143 = vrcp.f32 %v725_v39 }
 0xc25   :  { %1145 = vrcp.f32 %v719_v41 }
 0xc2a   :  { %v1144_v42 = vpop.eup %1143 }
 0xc2b   :  { %v1146_v45 = vpop.eup %1145  ;;  %v751_v49 = vmul.f32 %v1144_v42, %v749_v48 }
 0xc2c   :  { %v731_v55 = vmul.f32 %v1146_v45, %v729_v53 }
 0xc78   :  { %v754_v43 = vpop.permute.xlu2 %753 }
 0xc79   :  { %v756_v44 = vmul.f32 %v1144_v42, %v754_v43 }
 0xc7b   :  { %758 = vrot.lane.b32.xlu1 %v756_v44, %s1185_s4 }
 0xc7e   :  { %v734_v46 = vpop.permute.xlu1 %733 }
 0xc7f   :  { %v736_v47 = vmul.f32 %v1146_v45, %v734_v46 }
 0xc81   :  { %738 = vrot.lane.b32.xlu0 %v736_v47, %s1185_s4 }
 0xced   :  { %v759_v50 = vpop.permute.xlu1 %758 }
 0xcee   :  { %v1537_v51 = vadd.f32 %v759_v50, %v751_v49 }
 0xcf0   :  { %1147 = vtanh.f32 %v1537_v51 }
 0xcf3   :  { %v739_v6 = vpop.permute.xlu0 %738 }
 0xcf4   :  { %v741_v2 = vadd.f32 %v739_v6, %v731_v55 }
 0xcf6   :  { %v1148_v4 = vpop.eup %1147  ;;  %1149 = vtanh.f32 %v741_v2  ;;  %v843_v36 = vrot.slane %v741_v2, 6 }
 0xcf7   :  { %764 = vrot.lane.b32.xlu0 %v1148_v4, %s1184_s5 }
 0xcfc   :  { %v1150_v57 = vpop.eup %1149 }
 0xcfd   :  { %744 = vrot.lane.b32.xlu2 %v1150_v57, %s1184_s5 }
 0xd57   :  { %v745_v5 = vpop.permute.xlu2 %744 }
 0xd58   :  { %v1542_v58 = vmul.f32 %v1146_v45, %v745_v5 }
 0xd5a   :  { %v769_v10 = vrot.slane %v1542_v58, 2 }
 0xd5c   :  { %770 = vrot.lane.b32.xlu1 %v769_v10, %s1185_s4 }
 0xd69   :  { %v765_v59 = vpop.permute.xlu0 %764 }
 0xd6a   :  { %v1546_v9 = vmul.f32 %v1144_v42, %v765_v59  ;;  %v863_v42 = vrot.slane %v1537_v51, 2  ;;  %v999_v51 = vsel %vm993_vm2, %v1523_v12, %v1542_v58 }
 0xd6c   :  { %v800_v11 = vrot.slane %v1546_v9, 4 }
 0xd6e   :  { %801 = vrot.lane.b32.xlu2 %v800_v11, %s1185_s4 }
 0xdc8   :  { %v802_v14 = vpop.permute.xlu2 %801 }
 0xdc9   :  { %1047 = vmatmul.msk.f32.vlgmr.msra.gmra.mxu3 %vm104_vm1, %v802_v14 }
 0xdce   :  { %v771_v18 = vpop.permute.xlu1 %770 }
 0xdcf   :  { %1046 = vmatmul.msk.f32.vlgmr.msra.gmra.mxu2 %vm104_vm1, %v771_v18 }
 0xe4c   :  { %v822_v32 = vpop.f32.mrf.mxu3 }
 0xe4d   :  { %v826_v60 = vrot.slane %v822_v32, 6 }
 0xe4f   :  { %v828_v61 = vadd.f32 %v826_v60, %v1359_v27 }
 0xe51   :  { %v829_v62 = vadd.f32 %v1364_v30, %v828_v61 }
 0xe52   :  { %v791_v63 = vpop.f32.mrf.mxu2 }
 0xe53   :  { %1151 = vtanh.f32 %v829_v62  ;;  %v795_v33 = vrot.slane %v791_v63, 4  ;;  %v836_v15 = vsub.f32 0.0, %v829_v62 }
 0xe55   :  { %v797_v1 = vadd.f32 %v795_v33, %v1484_v56  ;;  %v837_v16 = vmul.f32 1.442695, %v836_v15  ;;  %v1005_v15 = vsel %vm993_vm2, %v1498_v28, %v1470_v52 }
 0xe57   :  { %v798_v7 = vadd.f32 %v1376_v37, %v797_v1 }
 0xe59   :  { %v1152_v8 = vpop.eup %1151  ;;  %1153 = vtanh.f32 %v798_v7  ;;  %v830_v17 = vsub.f32 0.0, %v798_v7 }
 0xe5a   :  { %867 = vrot.lane.b32.xlu1 %v1152_v8, %s1184_s5  ;;  %1155 = vpow2.f32 %v837_v16  ;;  %v1006_v16 = vsel %vm995_vm3, %v1005_v15, %v1427_v54 }
 0xe5b   :  { %v831_v19 = vmul.f32 1.442695, %v830_v17  ;;  %v1007_v17 = vsel %vm997_vm4, %v1006_v16, %v1391_v0 }
 0xe5d   :  { %1157 = vpow2.f32 %v831_v19 }
 0xe5f   :  { %v1154_v13 = vpop.eup %1153 }
 0xe60   :  { %847 = vrot.lane.b32.xlu0 %v1154_v13, %s1184_s5  ;;  %v1156_v20 = vpop.eup %1155 }
 0xe61   :  { %v839_v21 = vadd.f32 1.0, %v1156_v20 }
 0xe63   :  { %v1158_v22 = vpop.eup %1157  ;;  %1159 = vrcp.f32 %v839_v21 }
 0xe64   :  { %v833_v23 = vadd.f32 1.0, %v1158_v22 }
 0xe66   :  { %1161 = vrcp.f32 %v833_v23 }
 0xe69   :  { %v1160_v24 = vpop.eup %1159 }
 0xe6a   :  { %v865_v43 = vmul.f32 %v1160_v24, %v863_v42 }
 0xe6c   :  { %v1162_v29 = vpop.eup %1161 }
 0xe6d   :  { %v845_v38 = vmul.f32 %v1162_v29, %v843_v36 }
 0xecc   :  { %v868_v25 = vpop.permute.xlu1 %867 }
 0xecd   :  { %v870_v26 = vmul.f32 %v1160_v24, %v868_v25 }
 0xecf   :  { %872 = vrot.lane.b32.xlu0 %v870_v26, %s1185_s4 }
 0xed2   :  { %v848_v31 = vpop.permute.xlu0 %847 }
 0xed3   :  { %v850_v34 = vmul.f32 %v1162_v29, %v848_v31 }
 0xed5   :  { %852 = vrot.lane.b32.xlu2 %v850_v34, %s1185_s4 }
 0xf2f   :  { %v853_v39 = vpop.permute.xlu2 %852 }
 0xf30   :  { %v1560_v40 = vadd.f32 %v853_v39, %v845_v38 }
 0xf32   :  { %1163 = vtanh.f32 %v1560_v40  ;;  %v954_v23 = vrot.slane %v1560_v40, 6 }
 0xf38   :  { %v1164_v41 = vpop.eup %1163 }
 0xf39   :  { %858 = vrot.lane.b32.xlu1 %v1164_v41, %s1184_s5 }
 0xf41   :  { %v873_v44 = vpop.permute.xlu0 %872 }
 0xf42   :  { %v875_v45 = vadd.f32 %v873_v44, %v865_v43 }
 0xf44   :  { %1165 = vtanh.f32 %v875_v45  ;;  %v974_v19 = vrot.slane %v875_v45, 2 }
 0xf4a   :  { %v1166_v46 = vpop.eup %1165 }
 0xf4b   :  { %878 = vrot.lane.b32.xlu2 %v1166_v46, %s1184_s5 }
 0xfa5   :  { %v879_v47 = vpop.permute.xlu2 %878 }
 0xfa6   :  { %v1566_v48 = vmul.f32 %v1160_v24, %v879_v47 }
 0xfa8   :  { %v914_v49 = vrot.slane %v1566_v48, 2 }
 0xfaa   :  { %915 = vrot.lane.b32.xlu1 %v914_v49, %s1185_s4 }
 0xfab   :  { %v859_v50 = vpop.permute.xlu1 %858 }
 0xfac   :  { %v861_v53 = vmul.f32 %v1162_v29, %v859_v50 }
 0xfae   :  { %v883_v55 = vrot.slane %v861_v53, 4  ;;  %v1574_v6 = vsel %vm995_vm3, %v999_v51, %v861_v53 }
 0xfb0   :  { %884 = vrot.lane.b32.xlu0 %v883_v55, %s1185_s4 }
0x101c   :  { %v916_v2 = vpop.permute.xlu1 %915 }
0x101d   :  { %1049 = vmatmul.msk.f32.vlgmr.msrb.gmra.mxu1 %vm104_vm1, %v916_v2 }
0x1022   :  { %v885_v4 = vpop.permute.xlu0 %884 }
0x1023   :  { %1048 = vmatmul.msk.f32.vlgmr.msrb.gmra.mxu0 %vm104_vm1, %v885_v4 }
0x109a   :  { %v936_v57 = vpop.f32.mrf.mxu1 }
0x109b   :  { %v939_v5 = vadd.f32 %v936_v57, %v1359_v27 }
0x109d   :  { %v940_v10 = vadd.f32 %v1364_v30, %v939_v5 }
0x109f   :  { %1167 = vtanh.f32 %v940_v10  ;;  %v947_v32 = vsub.f32 0.0, %v940_v10 }
0x10a0   :  { %v905_v59 = vpop.f32.mrf.mxu0 }
0x10a1   :  { %v909_v12 = vrot.slane %v905_v59, 2  ;;  %v948_v60 = vmul.f32 1.442695, %v947_v32 }
0x10a3   :  { %v911_v58 = vadd.f32 %v909_v12, %v1484_v56 }
0x10a5   :  { %v1168_v11 = vpop.eup %1167  ;;  %v912_v14 = vadd.f32 %v1376_v37, %v911_v58 }
0x10a6   :  { %978 = vrot.lane.b32.xlu2 %v1168_v11, %s1184_s5 }
0x10a7   :  { %1169 = vtanh.f32 %v912_v14  ;;  %v941_v56 = vsub.f32 0.0, %v912_v14 }
0x10a8   :  { %1171 = vpow2.f32 %v948_v60 }
0x10a9   :  { %v942_v33 = vmul.f32 1.442695, %v941_v56 }
0x10ad   :  { %v1170_v18 = vpop.eup %1169 }
0x10ae   :  { %958 = vrot.lane.b32.xlu0 %v1170_v18, %s1184_s5  ;;  %v1172_v27 = vpop.eup %1171 }
0x10af   :  { %v950_v61 = vadd.f32 1.0, %v1172_v27 }
0x10b1   :  { %1173 = vrcp.f32 %v950_v61 }
0x10b2   :  { %1175 = vpow2.f32 %v942_v33 }
0x10b7   :  { %v1174_v30 = vpop.eup %1173 }
0x10b8   :  { %v1176_v37 = vpop.eup %1175  ;;  %v976_v20 = vmul.f32 %v1174_v30, %v974_v19 }
0x10b9   :  { %v944_v1 = vadd.f32 1.0, %v1176_v37 }
0x10bb   :  { %1177 = vrcp.f32 %v944_v1 }
0x10c1   :  { %v1178_v7 = vpop.eup %1177 }
0x1100   :  { %v979_v62 = vpop.permute.xlu2 %978 }
0x1101   :  { %v981_v63 = vmul.f32 %v1174_v30, %v979_v62 }
0x1103   :  { %983 = vrot.lane.b32.xlu1 %v981_v63, %s1185_s4 }
0x1120   :  { %v959_v8 = vpop.permute.xlu0 %958 }
0x1121   :  { %v961_v13 = vmul.f32 %v1178_v7, %v959_v8 }
0x1123   :  { %963 = vrot.lane.b32.xlu2 %v961_v13, %s1185_s4 }
0x112b   :  { %1010 = vrot.lane.b32.xlu2 %v1504_v35, %s1185_s4  ;;  %v956_v35 = vmul.f32 %v1178_v7, %v954_v23 }
0x1133   :  { %1020 = vrot.lane.b32.xlu2 %v1007_v17, %s1184_s5 }
0x1175   :  { %v984_v21 = vpop.permute.xlu1 %983 }
0x1176   :  { %v986_v22 = vadd.f32 %v984_v21, %v976_v20 }
0x1178   :  { %1179 = vtanh.f32 %v986_v22 }
0x117d   :  { %v964_v24 = vpop.permute.xlu2 %963 }
0x117e   :  { %v1180_v25 = vpop.eup %1179  ;;  %v966_v26 = vadd.f32 %v964_v24, %v956_v35 }
0x117f   :  { %989 = vrot.lane.b32.xlu0 %v1180_v25, %s1184_s5 }
0x1180   :  { %1181 = vtanh.f32 %v966_v26 }
0x1185   :  { %v1011_v39 = vpop.permute.xlu2 %1010 }
0x1186   :  { %v1182_v54 = vpop.eup %1181 }
0x1187   :  { %969 = vrot.lane.b32.xlu1 %v1182_v54, %s1184_s5 }
0x11f1   :  { %v990_v0 = vpop.permute.xlu0 %989 }
0x11f2   :  { %v992_v52 = vmul.f32 %v1174_v30, %v990_v0 }
0x11f4   :  { %v1002_v28 = vsel %vm993_vm2, %v992_v52, %v1566_v48 }
0x11f5   :  { %v1003_v29 = vsel %vm995_vm3, %v1002_v28, %v1546_v9  ;;  %v1021_v9 = vpop.permute.xlu2 %1020 }
0x11f6   :  { %v1004_v31 = vsel %vm997_vm4, %v1003_v29, %v1519_v3 }
0x11f7   :  { %1018 = vrot.lane.b32.xlu1 %v1004_v31, %s1184_s5 }
0x11f9   :  { %v970_v34 = vpop.permute.xlu1 %969 }
0x11fa   :  { %v972_v36 = vmul.f32 %v1178_v7, %v970_v34 }
0x11fc   :  { %v1001_v38 = vsel %vm997_vm4, %v1574_v6, %v972_v36 }
0x11fd   :  { %1012 = vrot.lane.b32.xlu0 %v1001_v38, %s1185_s4 }
0x1269   :  { %v1019_v40 = vpop.permute.xlu1 %1018 }
0x126a   :  { %v1024_v41 = vsel %vm104_vm1, %v1011_v39, %v1019_v40 }
0x126b   :  { %1026 = vst.msk [vmem:[%s1626_s6] sm:$0xff] %vm41_vm0, %v1024_v41 }
0x126f   :  { %v1013_v3 = vpop.permute.xlu0 %1012 }
0x1270   :  { %v1025_v42 = vsel %vm104_vm1, %v1013_v3, %v1021_v9 }
0x1271   :  { %1027 = vst.msk [vmem:[%s1626_s6 + $0x8] sm:$0xff] %vm41_vm0, %v1025_v42 }

</bundles_post_ra>
